<compile_context>
chip_gen: v6e
topology: v6e:2x2x1
jax: 0.10.0
libtpu: 0.0.40
codegen_flags: <defaults>
</compile_context>

<pallas_src>
import jax
import jax.numpy as jnp
from jax.experimental import pallas as pl
from jax.experimental.pallas import tpu as pltpu

EPS = 1e-5  # PyTorch BatchNorm default eps

# Lane-padded sizes (all multiples of 128).
XK = 896     # 28*28 = 784 input pixels          -> 7 * 128
H1L = 1280   # 6*14*14 = 1176 conv1+pool outputs -> 10 * 128
H2L = 512    # 16*5*5 = 400 conv2+pool outputs   -> 4 * 128
FCL = 128    # fc lanes (120 / 84 / 10 -> 128)


# --------------------------- in-kernel helpers --------------------------------

def _sigmoid(y):
    # Numerically stable sigmoid that lowers to a single EUP tanh.
    return 0.5 * (jnp.tanh(0.5 * y) + 1.0)


def _bn_sigmoid_grouped(z, psum_ref, pbc_ref, gamma, beta, count):
    """Training-mode BatchNorm2d over (batch, H, W) per channel + Sigmoid.

    z: (N, L) f32 with lanes = channel*HW + spatial (padded lanes are exactly 0).
    Channel stats for all channels at once: sublane row-sum, then two tiny
    block-diagonal segment matmuls (L,128) / (128,L) broadcast the per-channel
    mean / variance back over the lanes.  Everything stays lane-dense f32.
    """
    f32 = jnp.float32
    inv = 1.0 / float(count)
    col = jnp.sum(z, axis=0, keepdims=True)                                # (1, L)
    mean = jnp.dot(col, psum_ref[...], preferred_element_type=f32) * inv   # (1, 128)
    mean_bc = jnp.dot(mean, pbc_ref[...], preferred_element_type=f32)      # (1, L)
    cz = z - mean_bc
    col2 = jnp.sum(cz * cz, axis=0, keepdims=True)
    var = jnp.dot(col2, psum_ref[...], preferred_element_type=f32) * inv
    var_bc = jnp.dot(var, pbc_ref[...], preferred_element_type=f32)
    y = cz * jax.lax.rsqrt(var_bc + EPS) * gamma + beta
    return _sigmoid(y)


def _bn_sigmoid_1d(z, gamma, beta):
    """Training-mode BatchNorm1d over the batch + Sigmoid (lane-dense)."""
    mu = jnp.mean(z, axis=0, keepdims=True)
    cz = z - mu
    var = jnp.mean(cz * cz, axis=0, keepdims=True)
    return _sigmoid(cz * jax.lax.rsqrt(var + EPS) * gamma + beta)


# --------------------------- the fused kernel ----------------------------------

def lenet_kernel(x_ref,
                 w1_ref, cb1_ref, g1_ref, be1_ref, p1s_ref, p1b_ref,
                 w2_ref, cb2_ref, g2_ref, be2_ref, p2s_ref, p2b_ref,
                 wf1_ref, bf1_ref, g3_ref, be3_ref,
                 wf2_ref, bf2_ref, g4_ref, be4_ref,
                 wf3_ref, bf3_ref,
                 out_ref):
    f32 = jnp.float32
    n = x_ref.shape[0]
    mm = w1_ref.dtype   # MXU feed dtype (bf16 on v6e/v7x, f32 on v5e)

    # Conv2d(1,6,k=5,pad=2) + AvgPool2d(2,2), fully folded into one weight:
    # one (N, 896) x (896, 1280) matmul, M = batch.
    h1 = jnp.dot(x_ref[...], w1_ref[...], preferred_element_type=f32) + cb1_ref[...]
    # BatchNorm2d(6) + Sigmoid, all channels at once, lane-dense.
    h1 = _bn_sigmoid_grouped(h1, p1s_ref, p1b_ref, g1_ref[...], be1_ref[...],
                             n * 14 * 14)

    # Conv2d(6,16,k=5) + AvgPool2d(2,2): one (N, 1280) x (1280, 512) matmul.
    h2 = jnp.dot(h1.astype(mm), w2_ref[...], preferred_element_type=f32) + cb2_ref[...]
    # BatchNorm2d(16) + Sigmoid.
    h2 = _bn_sigmoid_grouped(h2, p2s_ref, p2b_ref, g2_ref[...], be2_ref[...],
                             n * 5 * 5)

    # nn.Flatten is the identity in this layout (lane = c*25 + i*5 + j).
    z1 = jnp.dot(h2.astype(mm), wf1_ref[...], preferred_element_type=f32) + bf1_ref[...]
    a1 = _bn_sigmoid_1d(z1, g3_ref[...], be3_ref[...])

    z2 = jnp.dot(a1.astype(mm), wf2_ref[...], preferred_element_type=f32) + bf2_ref[...]
    a2 = _bn_sigmoid_1d(z2, g4_ref[...], be4_ref[...])

    logits = jnp.dot(a2.astype(mm), wf3_ref[...], preferred_element_type=f32) + bf3_ref[...]
    # Softmax over the 10 real classes only (lanes >= 10 are padding -> prob 0).
    lane = jax.lax.broadcasted_iota(jnp.int32, logits.shape, 1)
    logits = jnp.where(lane < 10, logits, -jnp.inf)
    m = jnp.max(logits, axis=-1, keepdims=True)
    e = jnp.exp(logits - m)
    out_ref[...] = e / jnp.sum(e, axis=-1, keepdims=True)   # lane-dense (N, 128) store


# --------------------------- host-side weight folding --------------------------

def _pad_to(a, shape):
    return jnp.pad(a, [(0, t - s) for s, t in zip(a.shape, shape)])


def _fold_conv_pool(w, in_hw, out_hw, pad):
    """Dense (in_c*ih*iw, out_c*oh*ow) matrix implementing
    Conv2d(k=5, stride=1, padding=pad) followed by AvgPool2d(2,2)."""
    out_c, in_c, kh, kw = w.shape
    ih, iw = in_hw
    oh, ow = out_hw
    a = jnp.arange(2)
    di = (jnp.arange(ih)[:, None, None] + pad
          - (2 * jnp.arange(oh)[None, :, None] + a[None, None, :]))      # (ih, oh, 2)
    dj = (jnp.arange(iw)[:, None, None] + pad
          - (2 * jnp.arange(ow)[None, :, None] + a[None, None, :]))      # (iw, ow, 2)
    vi = (di >= 0) & (di < kh)
    vj = (dj >= 0) & (dj < kw)
    dic = jnp.clip(di, 0, kh - 1)[:, :, :, None, None, None]
    djc = jnp.clip(dj, 0, kw - 1)[None, None, None, :, :, :]
    term = w[:, :, dic, djc]                         # (out_c,in_c, ih,oh,2, iw,ow,2)
    mask = vi[:, :, :, None, None, None] & vj[None, None, None, :, :, :]
    term = jnp.where(mask[None, None], term, 0.0)
    m = 0.25 * term.sum(axis=(4, 7))                 # (out_c,in_c, ih,oh, iw,ow)
    m = m.transpose(1, 2, 4, 0, 3, 5)                # (in_c, ih, iw, out_c, oh, ow)
    return m.reshape(in_c * ih * iw, out_c * oh * ow)


def _seg_matrix(nch, group, lanes):
    """(lanes, 128) f32 indicator: lane l belongs to channel l // group."""
    l = jnp.arange(lanes)[:, None]
    c = jnp.arange(128)[None, :]
    return (((l // group) == c) & (l < nch * group)).astype(jnp.float32)


def _prepare_inputs(x, p, mm_dtype):
    f32 = jnp.float32
    n = x.shape[0]

    xf = _pad_to(x.astype(f32).reshape(n, 28 * 28), (n, XK)).astype(mm_dtype)

    # conv1 + pool folded into (896, 1280); lane = ch*196 + r*14 + c.
    w1 = _fold_conv_pool(p["conv1_w"].astype(f32), (28, 28), (14, 14), pad=2)
    w1 = _pad_to(w1, (XK, H1L)).astype(mm_dtype)
    cb1 = _pad_to(jnp.repeat(p["conv1_b"].astype(f32), 196)[None, :], (1, H1L))
    g1 = _pad_to(jnp.repeat(p["bn1_g"].astype(f32), 196)[None, :], (1, H1L))
    be1 = _pad_to(jnp.repeat(p["bn1_b"].astype(f32), 196)[None, :], (1, H1L))
    p1s = _seg_matrix(6, 196, H1L)     # (1280, 128) f32
    p1b = p1s.T                        # (128, 1280)

    # conv2 + pool folded into (1280, 512); lane = ch*25 + r*5 + c (= flatten order).
    w2 = _fold_conv_pool(p["conv2_w"].astype(f32), (14, 14), (5, 5), pad=0)
    w2 = _pad_to(w2, (H1L, H2L)).astype(mm_dtype)
    cb2 = _pad_to(jnp.repeat(p["conv2_b"].astype(f32), 25)[None, :], (1, H2L))
    g2 = _pad_to(jnp.repeat(p["bn2_g"].astype(f32), 25)[None, :], (1, H2L))
    be2 = _pad_to(jnp.repeat(p["bn2_b"].astype(f32), 25)[None, :], (1, H2L))
    p2s = _seg_matrix(16, 25, H2L)
    p2b = p2s.T

    wf1 = _pad_to(p["fc1_w"].astype(f32), (H2L, FCL)).astype(mm_dtype)
    bf1 = _pad_to(p["fc1_b"].astype(f32)[None, :], (1, FCL))
    g3 = _pad_to(p["bn3_g"].astype(f32)[None, :], (1, FCL))
    be3 = _pad_to(p["bn3_b"].astype(f32)[None, :], (1, FCL))

    wf2 = _pad_to(p["fc2_w"].astype(f32), (FCL, FCL)).astype(mm_dtype)
    bf2 = _pad_to(p["fc2_b"].astype(f32)[None, :], (1, FCL))
    g4 = _pad_to(p["bn4_g"].astype(f32)[None, :], (1, FCL))
    be4 = _pad_to(p["bn4_b"].astype(f32)[None, :], (1, FCL))

    wf3 = _pad_to(p["fc3_w"].astype(f32), (FCL, FCL)).astype(mm_dtype)
    bf3 = _pad_to(p["fc3_b"].astype(f32)[None, :], (1, FCL))

    return (xf, w1, cb1, g1, be1, p1s, p1b,
            w2, cb2, g2, be2, p2s, p2b,
            wf1, bf1, g3, be3,
            wf2, bf2, g4, be4,
            wf3, bf3)


# --------------------------- pallas_call wrapper --------------------------------

def _lenet_pallas(x, p, mm_dtype=jnp.bfloat16):
    n = x.shape[0]
    args = _prepare_inputs(x, p, mm_dtype)
    vmem = pltpu.MemorySpace.VMEM
    probs = pl.pallas_call(
        lenet_kernel,
        out_shape=jax.ShapeDtypeStruct((n, FCL), jnp.float32),
        in_specs=[pl.BlockSpec(memory_space=vmem) for _ in args],
        out_specs=pl.BlockSpec(memory_space=vmem),
        compiler_params=pltpu.CompilerParams(
            # Explicit (modest) VMEM budget; total resident footprint ~6 MB,
            # well under v7x's 64 MiB physical VMEM.
            vmem_limit_bytes=32 * 1024 * 1024),
    )(*args)
    return probs[:, :10]   # drop the lane padding outside the kernel


def lenet_forward(x, p, mm_dtype=jnp.bfloat16):
    return _lenet_pallas(x, p, mm_dtype)


# --------------------------- plain-JAX reference (self-check) ------------------

def _ref_forward(x, p):
    hp = jax.lax.Precision.HIGHEST

    def conv(h, w, b, pad):
        y = jax.lax.conv_general_dilated(
            h, w, window_strides=(1, 1), padding=((pad, pad), (pad, pad)),
            dimension_numbers=("NCHW", "OIHW", "NCHW"), precision=hp)
        return y + b[None, :, None, None]

    def pool(h):
        n, c, hh, ww = h.shape
        return h.reshape(n, c, hh // 2, 2, ww // 2, 2).mean(axis=(3, 5))

    def bn(h, g, b, axes, shape):
        mu = jnp.mean(h, axis=axes, keepdims=True)
        var = jnp.mean((h - mu) ** 2, axis=axes, keepdims=True)
        return (h - mu) * jax.lax.rsqrt(var + EPS) * g.reshape(shape) + b.reshape(shape)

    h = pool(conv(x, p["conv1_w"], p["conv1_b"], 2))
    h = jax.nn.sigmoid(bn(h, p["bn1_g"], p["bn1_b"], (0, 2, 3), (1, 6, 1, 1)))
    h = pool(conv(h, p["conv2_w"], p["conv2_b"], 0))
    h = jax.nn.sigmoid(bn(h, p["bn2_g"], p["bn2_b"], (0, 2, 3), (1, 16, 1, 1)))
    h = h.reshape(h.shape[0], -1)
    h = jnp.dot(h, p["fc1_w"], precision=hp) + p["fc1_b"]
    h = jax.nn.sigmoid(bn(h, p["bn3_g"], p["bn3_b"], (0,), (1, 120)))
    h = jnp.dot(h, p["fc2_w"], precision=hp) + p["fc2_b"]
    h = jax.nn.sigmoid(bn(h, p["bn4_g"], p["bn4_b"], (0,), (1, 84)))
    h = jnp.dot(h, p["fc3_w"], precision=hp) + p["fc3_b"]
    return jax.nn.softmax(h, axis=1)


# --------------------------- params --------------------------------------------

def init_params(key):
    """Deterministic synthetic parameters (shapes match the PyTorch module).
    Linear weights are stored pre-transposed as (in, out)."""
    ks = jax.random.split(key, 10)

    def nrm(k, shape, fan_in):
        return (jax.random.normal(k, shape, dtype=jnp.float32)
                / jnp.sqrt(jnp.float32(fan_in)))

    p = {}
    p["conv1_w"] = nrm(ks[0], (6, 1, 5, 5), 1 * 5 * 5)
    p["conv1_b"] = nrm(ks[1], (6,), 1 * 5 * 5)
    p["conv2_w"] = nrm(ks[2], (16, 6, 5, 5), 6 * 5 * 5)
    p["conv2_b"] = nrm(ks[3], (16,), 6 * 5 * 5)
    p["fc1_w"] = nrm(ks[4], (400, 120), 400)
    p["fc1_b"] = nrm(ks[5], (120,), 400)
    p["fc2_w"] = nrm(ks[6], (120, 84), 120)
    p["fc2_b"] = nrm(ks[7], (84,), 120)
    p["fc3_w"] = nrm(ks[8], (84, 10), 84)
    p["fc3_b"] = nrm(ks[9], (10,), 84)
    # BatchNorm affine params: PyTorch default init (gamma=1, beta=0)
    p["bn1_g"], p["bn1_b"] = jnp.ones((6,), jnp.float32), jnp.zeros((6,), jnp.float32)
    p["bn2_g"], p["bn2_b"] = jnp.ones((16,), jnp.float32), jnp.zeros((16,), jnp.float32)
    p["bn3_g"], p["bn3_b"] = jnp.ones((120,), jnp.float32), jnp.zeros((120,), jnp.float32)
    p["bn4_g"], p["bn4_b"] = jnp.ones((84,), jnp.float32), jnp.zeros((84,), jnp.float32)
    return p


if __name__ == "__main__":
    key = jax.random.PRNGKey(0)
    params = init_params(key)
    # LeNet-5 geometry requires 28x28 single-channel input.  Batch 8 keeps the
    # training-mode BatchNorm1d batch statistics well-conditioned and the
    # sublane (M) dimension tile-aligned.
    x = jax.random.normal(jax.random.fold_in(key, 123), (8, 1, 28, 28),
                          dtype=jnp.float32)

    fwd_bf16 = jax.jit(lambda xx, pp: _lenet_pallas(xx, pp, jnp.bfloat16))
    fwd_f32 = jax.jit(lambda xx, pp: _lenet_pallas(xx, pp, jnp.float32))

    out_bf16 = jax.block_until_ready(fwd_bf16(x, params))   # v6e/v7x MXU feed
    out_f32 = jax.block_until_ready(fwd_f32(x, params))     # v5e-style f32 feed
    ref = jax.block_until_ready(jax.jit(_ref_forward)(x, params))

    assert out_bf16.shape == (8, 10) and out_f32.shape == (8, 10)
    assert bool(jnp.all(jnp.isfinite(out_bf16))) and bool(jnp.all(jnp.isfinite(out_f32)))
    assert bool(jnp.allclose(jnp.sum(out_f32, axis=1), 1.0, atol=1e-5))
    assert bool(jnp.allclose(jnp.sum(out_bf16, axis=1), 1.0, atol=1e-5))
    # f32-fed kernel vs f32 reference: differences are accumulation-order only,
    # so this is a tight structural check of the folded conv/pool/BN/fc math.
    assert float(jnp.max(jnp.abs(out_f32 - ref))) < 5e-3
    # bf16 MXU feed: training-mode BN1d over the batch amplifies the ~0.4% bf16
    # rounding, so the end-to-end bound is deliberately looser (typ. error ~1e-3).
    assert float(jnp.max(jnp.abs(out_bf16 - ref))) < 1e-1
    print("KERNEL_OK")
</pallas_src>

<mosaic_0001>
module attributes {stable_mosaic.version = 11 : i64} {
  func.func @lenet_kernel(%arg0: memref<8x896xbf16, #tpu.memory_space<vmem>>, %arg1: memref<896x1280xbf16, #tpu.memory_space<vmem>>, %arg2: memref<1x1280xf32, #tpu.memory_space<vmem>>, %arg3: memref<1x1280xf32, #tpu.memory_space<vmem>>, %arg4: memref<1x1280xf32, #tpu.memory_space<vmem>>, %arg5: memref<1280x128xf32, #tpu.memory_space<vmem>>, %arg6: memref<128x1280xf32, #tpu.memory_space<vmem>>, %arg7: memref<1280x512xbf16, #tpu.memory_space<vmem>>, %arg8: memref<1x512xf32, #tpu.memory_space<vmem>>, %arg9: memref<1x512xf32, #tpu.memory_space<vmem>>, %arg10: memref<1x512xf32, #tpu.memory_space<vmem>>, %arg11: memref<512x128xf32, #tpu.memory_space<vmem>>, %arg12: memref<128x512xf32, #tpu.memory_space<vmem>>, %arg13: memref<512x128xbf16, #tpu.memory_space<vmem>>, %arg14: memref<1x128xf32, #tpu.memory_space<vmem>>, %arg15: memref<1x128xf32, #tpu.memory_space<vmem>>, %arg16: memref<1x128xf32, #tpu.memory_space<vmem>>, %arg17: memref<128x128xbf16, #tpu.memory_space<vmem>>, %arg18: memref<1x128xf32, #tpu.memory_space<vmem>>, %arg19: memref<1x128xf32, #tpu.memory_space<vmem>>, %arg20: memref<1x128xf32, #tpu.memory_space<vmem>>, %arg21: memref<128x128xbf16, #tpu.memory_space<vmem>>, %arg22: memref<1x128xf32, #tpu.memory_space<vmem>>, %arg23: memref<8x128xf32, #tpu.memory_space<vmem>>) attributes {dimension_semantics = [], scalar_prefetch = 0 : i64, scratch_operands = 0 : i64, tpu.core_type = #tpu.core_type<tc>} {
    %c0 = arith.constant 0 : index
    %c0_0 = arith.constant 0 : index
    %0 = vector.load %arg0[%c0, %c0_0] : memref<8x896xbf16, #tpu.memory_space<vmem>>, vector<8x896xbf16>
    %c0_1 = arith.constant 0 : index
    %c0_2 = arith.constant 0 : index
    %1 = vector.load %arg1[%c0_1, %c0_2] : memref<896x1280xbf16, #tpu.memory_space<vmem>>, vector<896x1280xbf16>
    %cst = arith.constant dense<0.000000e+00> : vector<8x1280xf32>
    %2 = tpu.matmul %0, %1, %cst {dimension_numbers = #tpu.dot_dimension_numbers<[1], [0], [0], [1], [0, 0, 1, 1], [], []>} : vector<8x896xbf16>, vector<896x1280xbf16>, vector<8x1280xf32> -> vector<8x1280xf32>
    %c0_3 = arith.constant 0 : index
    %c0_4 = arith.constant 0 : index
    %3 = vector.load %arg2[%c0_3, %c0_4] : memref<1x1280xf32, #tpu.memory_space<vmem>>, vector<1x1280xf32>
    %4 = vector.broadcast %3 : vector<1x1280xf32> to vector<8x1280xf32>
    %5 = arith.addf %2, %4 : vector<8x1280xf32>
    %c0_5 = arith.constant 0 : index
    %c0_6 = arith.constant 0 : index
    %6 = vector.load %arg3[%c0_5, %c0_6] : memref<1x1280xf32, #tpu.memory_space<vmem>>, vector<1x1280xf32>
    %c0_7 = arith.constant 0 : index
    %c0_8 = arith.constant 0 : index
    %7 = vector.load %arg4[%c0_7, %c0_8] : memref<1x1280xf32, #tpu.memory_space<vmem>>, vector<1x1280xf32>
    %cst_9 = arith.constant dense<0.000000e+00> : vector<1280xf32>
    %8 = vector.multi_reduction <add>, %5, %cst_9 [0] : vector<8x1280xf32> to vector<1280xf32>
    %9 = vector.shape_cast %8 : vector<1280xf32> to vector<1x1280xf32>
    %c0_10 = arith.constant 0 : index
    %c0_11 = arith.constant 0 : index
    %10 = vector.load %arg5[%c0_10, %c0_11] : memref<1280x128xf32, #tpu.memory_space<vmem>>, vector<1280x128xf32>
    %cst_12 = arith.constant dense<0.000000e+00> : vector<1x128xf32>
    %11 = tpu.matmul %9, %10, %cst_12 {dimension_numbers = #tpu.dot_dimension_numbers<[1], [0], [0], [1], [0, 0, 1, 1], [], []>} : vector<1x1280xf32>, vector<1280x128xf32>, vector<1x128xf32> -> vector<1x128xf32>
    %cst_13 = arith.constant 6.37755089E-4 : f32
    %12 = vector.broadcast %cst_13 : f32 to vector<1x128xf32>
    %13 = arith.mulf %11, %12 : vector<1x128xf32>
    %c0_14 = arith.constant 0 : index
    %c0_15 = arith.constant 0 : index
    %14 = vector.load %arg6[%c0_14, %c0_15] : memref<128x1280xf32, #tpu.memory_space<vmem>>, vector<128x1280xf32>
    %cst_16 = arith.constant dense<0.000000e+00> : vector<1x1280xf32>
    %15 = tpu.matmul %13, %14, %cst_16 {dimension_numbers = #tpu.dot_dimension_numbers<[1], [0], [0], [1], [0, 0, 1, 1], [], []>} : vector<1x128xf32>, vector<128x1280xf32>, vector<1x1280xf32> -> vector<1x1280xf32>
    %16 = vector.broadcast %15 : vector<1x1280xf32> to vector<8x1280xf32>
    %17 = arith.subf %5, %16 : vector<8x1280xf32>
    %18 = arith.mulf %17, %17 : vector<8x1280xf32>
    %cst_17 = arith.constant dense<0.000000e+00> : vector<1280xf32>
    %19 = vector.multi_reduction <add>, %18, %cst_17 [0] : vector<8x1280xf32> to vector<1280xf32>
    %20 = vector.shape_cast %19 : vector<1280xf32> to vector<1x1280xf32>
    %c0_18 = arith.constant 0 : index
    %c0_19 = arith.constant 0 : index
    %21 = vector.load %arg5[%c0_18, %c0_19] : memref<1280x128xf32, #tpu.memory_space<vmem>>, vector<1280x128xf32>
    %cst_20 = arith.constant dense<0.000000e+00> : vector<1x128xf32>
    %22 = tpu.matmul %20, %21, %cst_20 {dimension_numbers = #tpu.dot_dimension_numbers<[1], [0], [0], [1], [0, 0, 1, 1], [], []>} : vector<1x1280xf32>, vector<1280x128xf32>, vector<1x128xf32> -> vector<1x128xf32>
    %cst_21 = arith.constant 6.37755089E-4 : f32
    %23 = vector.broadcast %cst_21 : f32 to vector<1x128xf32>
    %24 = arith.mulf %22, %23 : vector<1x128xf32>
    %c0_22 = arith.constant 0 : index
    %c0_23 = arith.constant 0 : index
    %25 = vector.load %arg6[%c0_22, %c0_23] : memref<128x1280xf32, #tpu.memory_space<vmem>>, vector<128x1280xf32>
    %cst_24 = arith.constant dense<0.000000e+00> : vector<1x1280xf32>
    %26 = tpu.matmul %24, %25, %cst_24 {dimension_numbers = #tpu.dot_dimension_numbers<[1], [0], [0], [1], [0, 0, 1, 1], [], []>} : vector<1x128xf32>, vector<128x1280xf32>, vector<1x1280xf32> -> vector<1x1280xf32>
    %cst_25 = arith.constant 9.99999974E-6 : f32
    %27 = vector.broadcast %cst_25 : f32 to vector<1x1280xf32>
    %28 = arith.addf %26, %27 : vector<1x1280xf32>
    %29 = math.rsqrt %28 : vector<1x1280xf32>
    %30 = vector.broadcast %29 : vector<1x1280xf32> to vector<8x1280xf32>
    %31 = arith.mulf %17, %30 : vector<8x1280xf32>
    %32 = vector.broadcast %6 : vector<1x1280xf32> to vector<8x1280xf32>
    %33 = arith.mulf %31, %32 : vector<8x1280xf32>
    %34 = vector.broadcast %7 : vector<1x1280xf32> to vector<8x1280xf32>
    %35 = arith.addf %33, %34 : vector<8x1280xf32>
    %cst_26 = arith.constant 5.000000e-01 : f32
    %36 = vector.broadcast %cst_26 : f32 to vector<8x1280xf32>
    %37 = arith.mulf %36, %35 : vector<8x1280xf32>
    %38 = math.tanh %37 : vector<8x1280xf32>
    %cst_27 = arith.constant 1.000000e+00 : f32
    %39 = vector.broadcast %cst_27 : f32 to vector<8x1280xf32>
    %40 = arith.addf %38, %39 : vector<8x1280xf32>
    %cst_28 = arith.constant 5.000000e-01 : f32
    %41 = vector.broadcast %cst_28 : f32 to vector<8x1280xf32>
    %42 = arith.mulf %41, %40 : vector<8x1280xf32>
    %43 = arith.truncf %42 : vector<8x1280xf32> to vector<8x1280xbf16>
    %c0_29 = arith.constant 0 : index
    %c0_30 = arith.constant 0 : index
    %44 = vector.load %arg7[%c0_29, %c0_30] : memref<1280x512xbf16, #tpu.memory_space<vmem>>, vector<1280x512xbf16>
    %cst_31 = arith.constant dense<0.000000e+00> : vector<8x512xf32>
    %45 = tpu.matmul %43, %44, %cst_31 {dimension_numbers = #tpu.dot_dimension_numbers<[1], [0], [0], [1], [0, 0, 1, 1], [], []>} : vector<8x1280xbf16>, vector<1280x512xbf16>, vector<8x512xf32> -> vector<8x512xf32>
    %c0_32 = arith.constant 0 : index
    %c0_33 = arith.constant 0 : index
    %46 = vector.load %arg8[%c0_32, %c0_33] : memref<1x512xf32, #tpu.memory_space<vmem>>, vector<1x512xf32>
    %47 = vector.broadcast %46 : vector<1x512xf32> to vector<8x512xf32>
    %48 = arith.addf %45, %47 : vector<8x512xf32>
    %c0_34 = arith.constant 0 : index
    %c0_35 = arith.constant 0 : index
    %49 = vector.load %arg9[%c0_34, %c0_35] : memref<1x512xf32, #tpu.memory_space<vmem>>, vector<1x512xf32>
    %c0_36 = arith.constant 0 : index
    %c0_37 = arith.constant 0 : index
    %50 = vector.load %arg10[%c0_36, %c0_37] : memref<1x512xf32, #tpu.memory_space<vmem>>, vector<1x512xf32>
    %cst_38 = arith.constant dense<0.000000e+00> : vector<512xf32>
    %51 = vector.multi_reduction <add>, %48, %cst_38 [0] : vector<8x512xf32> to vector<512xf32>
    %52 = vector.shape_cast %51 : vector<512xf32> to vector<1x512xf32>
    %c0_39 = arith.constant 0 : index
    %c0_40 = arith.constant 0 : index
    %53 = vector.load %arg11[%c0_39, %c0_40] : memref<512x128xf32, #tpu.memory_space<vmem>>, vector<512x128xf32>
    %cst_41 = arith.constant dense<0.000000e+00> : vector<1x128xf32>
    %54 = tpu.matmul %52, %53, %cst_41 {dimension_numbers = #tpu.dot_dimension_numbers<[1], [0], [0], [1], [0, 0, 1, 1], [], []>} : vector<1x512xf32>, vector<512x128xf32>, vector<1x128xf32> -> vector<1x128xf32>
    %cst_42 = arith.constant 5.000000e-03 : f32
    %55 = vector.broadcast %cst_42 : f32 to vector<1x128xf32>
    %56 = arith.mulf %54, %55 : vector<1x128xf32>
    %c0_43 = arith.constant 0 : index
    %c0_44 = arith.constant 0 : index
    %57 = vector.load %arg12[%c0_43, %c0_44] : memref<128x512xf32, #tpu.memory_space<vmem>>, vector<128x512xf32>
    %cst_45 = arith.constant dense<0.000000e+00> : vector<1x512xf32>
    %58 = tpu.matmul %56, %57, %cst_45 {dimension_numbers = #tpu.dot_dimension_numbers<[1], [0], [0], [1], [0, 0, 1, 1], [], []>} : vector<1x128xf32>, vector<128x512xf32>, vector<1x512xf32> -> vector<1x512xf32>
    %59 = vector.broadcast %58 : vector<1x512xf32> to vector<8x512xf32>
    %60 = arith.subf %48, %59 : vector<8x512xf32>
    %61 = arith.mulf %60, %60 : vector<8x512xf32>
    %cst_46 = arith.constant dense<0.000000e+00> : vector<512xf32>
    %62 = vector.multi_reduction <add>, %61, %cst_46 [0] : vector<8x512xf32> to vector<512xf32>
    %63 = vector.shape_cast %62 : vector<512xf32> to vector<1x512xf32>
    %c0_47 = arith.constant 0 : index
    %c0_48 = arith.constant 0 : index
    %64 = vector.load %arg11[%c0_47, %c0_48] : memref<512x128xf32, #tpu.memory_space<vmem>>, vector<512x128xf32>
    %cst_49 = arith.constant dense<0.000000e+00> : vector<1x128xf32>
    %65 = tpu.matmul %63, %64, %cst_49 {dimension_numbers = #tpu.dot_dimension_numbers<[1], [0], [0], [1], [0, 0, 1, 1], [], []>} : vector<1x512xf32>, vector<512x128xf32>, vector<1x128xf32> -> vector<1x128xf32>
    %cst_50 = arith.constant 5.000000e-03 : f32
    %66 = vector.broadcast %cst_50 : f32 to vector<1x128xf32>
    %67 = arith.mulf %65, %66 : vector<1x128xf32>
    %c0_51 = arith.constant 0 : index
    %c0_52 = arith.constant 0 : index
    %68 = vector.load %arg12[%c0_51, %c0_52] : memref<128x512xf32, #tpu.memory_space<vmem>>, vector<128x512xf32>
    %cst_53 = arith.constant dense<0.000000e+00> : vector<1x512xf32>
    %69 = tpu.matmul %67, %68, %cst_53 {dimension_numbers = #tpu.dot_dimension_numbers<[1], [0], [0], [1], [0, 0, 1, 1], [], []>} : vector<1x128xf32>, vector<128x512xf32>, vector<1x512xf32> -> vector<1x512xf32>
    %cst_54 = arith.constant 9.99999974E-6 : f32
    %70 = vector.broadcast %cst_54 : f32 to vector<1x512xf32>
    %71 = arith.addf %69, %70 : vector<1x512xf32>
    %72 = math.rsqrt %71 : vector<1x512xf32>
    %73 = vector.broadcast %72 : vector<1x512xf32> to vector<8x512xf32>
    %74 = arith.mulf %60, %73 : vector<8x512xf32>
    %75 = vector.broadcast %49 : vector<1x512xf32> to vector<8x512xf32>
    %76 = arith.mulf %74, %75 : vector<8x512xf32>
    %77 = vector.broadcast %50 : vector<1x512xf32> to vector<8x512xf32>
    %78 = arith.addf %76, %77 : vector<8x512xf32>
    %cst_55 = arith.constant 5.000000e-01 : f32
    %79 = vector.broadcast %cst_55 : f32 to vector<8x512xf32>
    %80 = arith.mulf %79, %78 : vector<8x512xf32>
    %81 = math.tanh %80 : vector<8x512xf32>
    %cst_56 = arith.constant 1.000000e+00 : f32
    %82 = vector.broadcast %cst_56 : f32 to vector<8x512xf32>
    %83 = arith.addf %81, %82 : vector<8x512xf32>
    %cst_57 = arith.constant 5.000000e-01 : f32
    %84 = vector.broadcast %cst_57 : f32 to vector<8x512xf32>
    %85 = arith.mulf %84, %83 : vector<8x512xf32>
    %86 = arith.truncf %85 : vector<8x512xf32> to vector<8x512xbf16>
    %c0_58 = arith.constant 0 : index
    %c0_59 = arith.constant 0 : index
    %87 = vector.load %arg13[%c0_58, %c0_59] : memref<512x128xbf16, #tpu.memory_space<vmem>>, vector<512x128xbf16>
    %cst_60 = arith.constant dense<0.000000e+00> : vector<8x128xf32>
    %88 = tpu.matmul %86, %87, %cst_60 {dimension_numbers = #tpu.dot_dimension_numbers<[1], [0], [0], [1], [0, 0, 1, 1], [], []>} : vector<8x512xbf16>, vector<512x128xbf16>, vector<8x128xf32> -> vector<8x128xf32>
    %c0_61 = arith.constant 0 : index
    %c0_62 = arith.constant 0 : index
    %89 = vector.load %arg14[%c0_61, %c0_62] : memref<1x128xf32, #tpu.memory_space<vmem>>, vector<1x128xf32>
    %90 = vector.broadcast %89 : vector<1x128xf32> to vector<8x128xf32>
    %91 = arith.addf %88, %90 : vector<8x128xf32>
    %c0_63 = arith.constant 0 : index
    %c0_64 = arith.constant 0 : index
    %92 = vector.load %arg15[%c0_63, %c0_64] : memref<1x128xf32, #tpu.memory_space<vmem>>, vector<1x128xf32>
    %c0_65 = arith.constant 0 : index
    %c0_66 = arith.constant 0 : index
    %93 = vector.load %arg16[%c0_65, %c0_66] : memref<1x128xf32, #tpu.memory_space<vmem>>, vector<1x128xf32>
    %cst_67 = arith.constant dense<0.000000e+00> : vector<128xf32>
    %94 = vector.multi_reduction <add>, %91, %cst_67 [0] : vector<8x128xf32> to vector<128xf32>
    %95 = vector.shape_cast %94 : vector<128xf32> to vector<1x128xf32>
    %cst_68 = arith.constant 8.000000e+00 : f32
    %96 = vector.broadcast %cst_68 : f32 to vector<1x128xf32>
    %97 = arith.divf %95, %96 : vector<1x128xf32>
    %98 = vector.broadcast %97 : vector<1x128xf32> to vector<8x128xf32>
    %99 = arith.subf %91, %98 : vector<8x128xf32>
    %100 = arith.mulf %99, %99 : vector<8x128xf32>
    %cst_69 = arith.constant dense<0.000000e+00> : vector<128xf32>
    %101 = vector.multi_reduction <add>, %100, %cst_69 [0] : vector<8x128xf32> to vector<128xf32>
    %102 = vector.shape_cast %101 : vector<128xf32> to vector<1x128xf32>
    %cst_70 = arith.constant 8.000000e+00 : f32
    %103 = vector.broadcast %cst_70 : f32 to vector<1x128xf32>
    %104 = arith.divf %102, %103 : vector<1x128xf32>
    %cst_71 = arith.constant 9.99999974E-6 : f32
    %105 = vector.broadcast %cst_71 : f32 to vector<1x128xf32>
    %106 = arith.addf %104, %105 : vector<1x128xf32>
    %107 = math.rsqrt %106 : vector<1x128xf32>
    %108 = vector.broadcast %107 : vector<1x128xf32> to vector<8x128xf32>
    %109 = arith.mulf %99, %108 : vector<8x128xf32>
    %110 = vector.broadcast %92 : vector<1x128xf32> to vector<8x128xf32>
    %111 = arith.mulf %109, %110 : vector<8x128xf32>
    %112 = vector.broadcast %93 : vector<1x128xf32> to vector<8x128xf32>
    %113 = arith.addf %111, %112 : vector<8x128xf32>
    %cst_72 = arith.constant 5.000000e-01 : f32
    %114 = vector.broadcast %cst_72 : f32 to vector<8x128xf32>
    %115 = arith.mulf %114, %113 : vector<8x128xf32>
    %116 = math.tanh %115 : vector<8x128xf32>
    %cst_73 = arith.constant 1.000000e+00 : f32
    %117 = vector.broadcast %cst_73 : f32 to vector<8x128xf32>
    %118 = arith.addf %116, %117 : vector<8x128xf32>
    %cst_74 = arith.constant 5.000000e-01 : f32
    %119 = vector.broadcast %cst_74 : f32 to vector<8x128xf32>
    %120 = arith.mulf %119, %118 : vector<8x128xf32>
    %121 = arith.truncf %120 : vector<8x128xf32> to vector<8x128xbf16>
    %c0_75 = arith.constant 0 : index
    %c0_76 = arith.constant 0 : index
    %122 = vector.load %arg17[%c0_75, %c0_76] : memref<128x128xbf16, #tpu.memory_space<vmem>>, vector<128x128xbf16>
    %cst_77 = arith.constant dense<0.000000e+00> : vector<8x128xf32>
    %123 = tpu.matmul %121, %122, %cst_77 {dimension_numbers = #tpu.dot_dimension_numbers<[1], [0], [0], [1], [0, 0, 1, 1], [], []>} : vector<8x128xbf16>, vector<128x128xbf16>, vector<8x128xf32> -> vector<8x128xf32>
    %c0_78 = arith.constant 0 : index
    %c0_79 = arith.constant 0 : index
    %124 = vector.load %arg18[%c0_78, %c0_79] : memref<1x128xf32, #tpu.memory_space<vmem>>, vector<1x128xf32>
    %125 = vector.broadcast %124 : vector<1x128xf32> to vector<8x128xf32>
    %126 = arith.addf %123, %125 : vector<8x128xf32>
    %c0_80 = arith.constant 0 : index
    %c0_81 = arith.constant 0 : index
    %127 = vector.load %arg19[%c0_80, %c0_81] : memref<1x128xf32, #tpu.memory_space<vmem>>, vector<1x128xf32>
    %c0_82 = arith.constant 0 : index
    %c0_83 = arith.constant 0 : index
    %128 = vector.load %arg20[%c0_82, %c0_83] : memref<1x128xf32, #tpu.memory_space<vmem>>, vector<1x128xf32>
    %cst_84 = arith.constant dense<0.000000e+00> : vector<128xf32>
    %129 = vector.multi_reduction <add>, %126, %cst_84 [0] : vector<8x128xf32> to vector<128xf32>
    %130 = vector.shape_cast %129 : vector<128xf32> to vector<1x128xf32>
    %cst_85 = arith.constant 8.000000e+00 : f32
    %131 = vector.broadcast %cst_85 : f32 to vector<1x128xf32>
    %132 = arith.divf %130, %131 : vector<1x128xf32>
    %133 = vector.broadcast %132 : vector<1x128xf32> to vector<8x128xf32>
    %134 = arith.subf %126, %133 : vector<8x128xf32>
    %135 = arith.mulf %134, %134 : vector<8x128xf32>
    %cst_86 = arith.constant dense<0.000000e+00> : vector<128xf32>
    %136 = vector.multi_reduction <add>, %135, %cst_86 [0] : vector<8x128xf32> to vector<128xf32>
    %137 = vector.shape_cast %136 : vector<128xf32> to vector<1x128xf32>
    %cst_87 = arith.constant 8.000000e+00 : f32
    %138 = vector.broadcast %cst_87 : f32 to vector<1x128xf32>
    %139 = arith.divf %137, %138 : vector<1x128xf32>
    %cst_88 = arith.constant 9.99999974E-6 : f32
    %140 = vector.broadcast %cst_88 : f32 to vector<1x128xf32>
    %141 = arith.addf %139, %140 : vector<1x128xf32>
    %142 = math.rsqrt %141 : vector<1x128xf32>
    %143 = vector.broadcast %142 : vector<1x128xf32> to vector<8x128xf32>
    %144 = arith.mulf %134, %143 : vector<8x128xf32>
    %145 = vector.broadcast %127 : vector<1x128xf32> to vector<8x128xf32>
    %146 = arith.mulf %144, %145 : vector<8x128xf32>
    %147 = vector.broadcast %128 : vector<1x128xf32> to vector<8x128xf32>
    %148 = arith.addf %146, %147 : vector<8x128xf32>
    %cst_89 = arith.constant 5.000000e-01 : f32
    %149 = vector.broadcast %cst_89 : f32 to vector<8x128xf32>
    %150 = arith.mulf %149, %148 : vector<8x128xf32>
    %151 = math.tanh %150 : vector<8x128xf32>
    %cst_90 = arith.constant 1.000000e+00 : f32
    %152 = vector.broadcast %cst_90 : f32 to vector<8x128xf32>
    %153 = arith.addf %151, %152 : vector<8x128xf32>
    %cst_91 = arith.constant 5.000000e-01 : f32
    %154 = vector.broadcast %cst_91 : f32 to vector<8x128xf32>
    %155 = arith.mulf %154, %153 : vector<8x128xf32>
    %156 = arith.truncf %155 : vector<8x128xf32> to vector<8x128xbf16>
    %c0_92 = arith.constant 0 : index
    %c0_93 = arith.constant 0 : index
    %157 = vector.load %arg21[%c0_92, %c0_93] : memref<128x128xbf16, #tpu.memory_space<vmem>>, vector<128x128xbf16>
    %cst_94 = arith.constant dense<0.000000e+00> : vector<8x128xf32>
    %158 = tpu.matmul %156, %157, %cst_94 {dimension_numbers = #tpu.dot_dimension_numbers<[1], [0], [0], [1], [0, 0, 1, 1], [], []>} : vector<8x128xbf16>, vector<128x128xbf16>, vector<8x128xf32> -> vector<8x128xf32>
    %c0_95 = arith.constant 0 : index
    %c0_96 = arith.constant 0 : index
    %159 = vector.load %arg22[%c0_95, %c0_96] : memref<1x128xf32, #tpu.memory_space<vmem>>, vector<1x128xf32>
    %160 = vector.broadcast %159 : vector<1x128xf32> to vector<8x128xf32>
    %161 = arith.addf %158, %160 : vector<8x128xf32>
    %162 = tpu.iota {dimensions = array<i32: 1>} : vector<8x128xi32>
    %c10_i32 = arith.constant 10 : i32
    %163 = vector.broadcast %c10_i32 : i32 to vector<8x128xi32>
    %164 = arith.cmpi slt, %162, %163 : vector<8x128xi32>
    %cst_97 = arith.constant 0xFF800000 : f32
    %165 = vector.broadcast %cst_97 : f32 to vector<8x128xf32>
    %166 = arith.select %164, %161, %165 : vector<8x128xi1>, vector<8x128xf32>
    %cst_98 = arith.constant dense<0xFF800000> : vector<8xf32>
    %167 = vector.multi_reduction <maximumf>, %166, %cst_98 [1] : vector<8x128xf32> to vector<8xf32>
    %168 = vector.shape_cast %167 : vector<8xf32> to vector<8x1xf32>
    %169 = vector.broadcast %168 : vector<8x1xf32> to vector<8x128xf32>
    %170 = arith.subf %166, %169 : vector<8x128xf32>
    %171 = math.exp %170 : vector<8x128xf32>
    %cst_99 = arith.constant dense<0.000000e+00> : vector<8xf32>
    %172 = vector.multi_reduction <add>, %171, %cst_99 [1] : vector<8x128xf32> to vector<8xf32>
    %173 = vector.shape_cast %172 : vector<8xf32> to vector<8x1xf32>
    %174 = vector.broadcast %173 : vector<8x1xf32> to vector<8x128xf32>
    %175 = arith.divf %171, %174 : vector<8x128xf32>
    %c0_100 = arith.constant 0 : index
    %c0_101 = arith.constant 0 : index
    %176 = vector.load %arg23[%c0_100, %c0_101] : memref<8x128xf32, #tpu.memory_space<vmem>>, vector<8x128xf32>
    tpu.vector_store %arg23[%c0_100, %c0_101], %175 {strides = array<i32>} : memref<8x128xf32, #tpu.memory_space<vmem>>, vector<8x128xf32>,
    return
  }
}

</mosaic_0001>

<bundles_post_ra>
// kernel: _lambda_.1
= control target key start
LH: loop header
LB: loop body
LE: loop exit
PB: predicated region body
PF: predicated region fallthrough
CT: control target
= control target key end

     0   :  { %s20012_s0 = inlined_call_operand.vmem [shape: bf16[8,896], index: 0, kind: input, shape index: {}]   ;;  %s20013_s1 = inlined_call_operand.vmem [shape: bf16[896,1280], index: 1, kind: input, shape index: {}]   ;;  %s20014_s2 = inlined_call_operand.vmem [shape: f32[1,1280], index: 2, kind: input, shape index: {}]   ;;  %s20015_s3 = inlined_call_operand.vmem [shape: f32[1,1280], index: 3, kind: input, shape index: {}]   ;;  %s20016_s4 = inlined_call_operand.vmem [shape: f32[1,1280], index: 4, kind: input, shape index: {}]   ;;  %s20017_s5 = inlined_call_operand.vmem [shape: f32[1280,128], index: 5, kind: input, shape index: {}]   ;;  %s20018_s6 = inlined_call_operand.vmem [shape: f32[128,1280], index: 6, kind: input, shape index: {}]   ;;  %s20019_s7 = inlined_call_operand.vmem [shape: bf16[1280,512], index: 7, kind: input, shape index: {}]   ;;  %s20020_s8 = inlined_call_operand.vmem [shape: f32[1,512], index: 8, kind: input, shape index: {}]   ;;  %s20021_s9 = inlined_call_operand.vmem [shape: f32[1,512], index: 9, kind: input, shape index: {}]   ;;  %s20022_s10 = inlined_call_operand.vmem [shape: f32[1,512], index: 10, kind: input, shape index: {}]   ;;  %s20023_s11 = inlined_call_operand.vmem [shape: f32[512,128], index: 11, kind: input, shape index: {}]   ;;  %s20024_s12 = inlined_call_operand.vmem [shape: f32[128,512], index: 12, kind: input, shape index: {}]   ;;  %s20025_s13 = inlined_call_operand.vmem [shape: bf16[512,128], index: 13, kind: input, shape index: {}]   ;;  %s20026_s14 = inlined_call_operand.vmem [shape: f32[1,128], index: 14, kind: input, shape index: {}]   ;;  %s20027_s15 = inlined_call_operand.vmem [shape: f32[1,128], index: 15, kind: input, shape index: {}]   ;;  %s20028_s16 = inlined_call_operand.vmem [shape: f32[1,128], index: 16, kind: input, shape index: {}]   ;;  %s20029_s17 = inlined_call_operand.vmem [shape: bf16[128,128], index: 17, kind: input, shape index: {}]   ;;  %s20030_s18 = inlined_call_operand.vmem [shape: f32[1,128], index: 18, kind: input, shape index: {}]   ;;  %s20031_s19 = inlined_call_operand.vmem [shape: f32[1,128], index: 19, kind: input, shape index: {}]   ;;  %s20032_s20 = inlined_call_operand.vmem [shape: f32[1,128], index: 20, kind: input, shape index: {}]   ;;  %s20033_s21 = inlined_call_operand.vmem [shape: bf16[128,128], index: 21, kind: input, shape index: {}]   ;;  %s20034_s22 = inlined_call_operand.vmem [shape: f32[1,128], index: 22, kind: input, shape index: {}]   ;;  %s20035_s23 = inlined_call_operand.hbm [shape: f32[8,128], index: 23, kind: output, shape index: {}]  }
   0x1   :  { %20162 = sst [smem:[#allocation85_spill]] %s20012_s0 }
   0x2   :  { %20163 = sst [smem:[#allocation86_spill]] %s20013_s1 }
   0x3   :  { %20164 = sst [smem:[#allocation87_spill]] %s20014_s2 }
   0x4   :  { %20165 = sst [smem:[#allocation88_spill]] %s20015_s3 }
   0x5   :  { %20166 = sst [smem:[#allocation89_spill]] %s20016_s4 }
   0x6   :  { %20167 = sst [smem:[#allocation90_spill]] %s20017_s5 }
   0x7   :  { %20168 = sst [smem:[#allocation91_spill]] %s20018_s6 }
   0x8   :  { %20169 = sst [smem:[#allocation92_spill]] %s20019_s7 }
   0x9   :  { %s20170_s24 = sld [smem:[#allocation86_spill]] }
   0xa   :  { %s20171_s28 = sld [smem:[#allocation85_spill]] }
   0xb   :  { %s20172_s7 = sld [smem:[#allocation87_spill]] }
   0xc   :  { %s20179_s26 = sld [smem:[#allocation90_spill]] }
   0xf   :  { %v11915_v0 = vld [vmem:[%s20170_s24 + $0x234] ss:$40 sps:$4 sm:$0xff]   ;;  %v11919_v2 = vld [vmem:[%s20170_s24 + $0x230] ss:$40 sps:$4 sm:$0xff]   ;;  %v11921_v4 = vld [vmem:[%s20170_s24 + $0x1e4] ss:$40 sps:$4 sm:$0xff]  }
  0x10   :  { %v11917_v1 = vld [vmem:[%s20170_s24 + $0x734] ss:$40 sps:$4 sm:$0xff]   ;;  %3519 = vmatprep.subr.bf16.mxu0 %v11915_v0  ;;  %v11920_v3 = vld [vmem:[%s20170_s24 + $0x730] ss:$40 sps:$4 sm:$0xff]   ;;  %v11923_v5 = vld [vmem:[%s20170_s24 + $0x6e4] ss:$40 sps:$4 sm:$0xff]  }
  0x11   :  { %3560 = vmatprep.subr.bf16.mxu1 %v11917_v1  ;;  %3520 = vmatpush1.bf16.msra.mxu0 %v11919_v2  ;;  %v11925_v6 = vld [vmem:[%s20170_s24 + $0x1e0] ss:$40 sps:$4 sm:$0xff]   ;;  %v11927_v8 = vld [vmem:[%s20170_s24 + $0x194] ss:$40 sps:$4 sm:$0xff]   ;;  %v11931_v10 = vld [vmem:[%s20170_s24 + $0x190] ss:$40 sps:$4 sm:$0xff]  }
  0x12   :  { %3561 = vmatpush1.bf16.msra.mxu1 %v11920_v3  ;;  %3521 = vmatprep.subr.bf16.mxu0 %v11921_v4  ;;  %v11926_v7 = vld [vmem:[%s20170_s24 + $0x6e0] ss:$40 sps:$4 sm:$0xff]   ;;  %v11929_v9 = vld [vmem:[%s20170_s24 + $0x694] ss:$40 sps:$4 sm:$0xff]   ;;  %v11932_v11 = vld [vmem:[%s20170_s24 + $0x690] ss:$40 sps:$4 sm:$0xff]  }
  0x13   :  { %3562 = vmatprep.subr.bf16.mxu1 %v11923_v5  ;;  %v11933_v12 = vld [vmem:[%s20170_s24 + $0x144] ss:$40 sps:$4 sm:$0xff]   ;;  %v11937_v14 = vld [vmem:[%s20170_s24 + $0x140] ss:$40 sps:$4 sm:$0xff]   ;;  %v11939_v16 = vld [vmem:[%s20170_s24 + $0xf4] ss:$40 sps:$4 sm:$0xff]  }
  0x14   :  { %v11935_v13 = vld [vmem:[%s20170_s24 + $0x644] ss:$40 sps:$4 sm:$0xff]   ;;  %v11938_v15 = vld [vmem:[%s20170_s24 + $0x640] ss:$40 sps:$4 sm:$0xff]   ;;  %v11941_v17 = vld [vmem:[%s20170_s24 + $0x5f4] ss:$40 sps:$4 sm:$0xff]  }
  0x15   :  { %3522 = vmatpush1.bf16.msra.mxu0 %v11925_v6  ;;  %v11943_v18 = vld [vmem:[%s20170_s24 + $0xf0] ss:$40 sps:$4 sm:$0xff]   ;;  %v11945_v20 = vld [vmem:[%s20170_s24 + $0xa4] ss:$40 sps:$4 sm:$0xff]   ;;  %v11949_v22 = vld [vmem:[%s20170_s24 + $0xa0] ss:$40 sps:$4 sm:$0xff]  }
  0x16   :  { %3563 = vmatpush1.bf16.msra.mxu1 %v11926_v7  ;;  %3523 = vmatprep.subr.bf16.mxu0 %v11927_v8  ;;  %v11944_v19 = vld [vmem:[%s20170_s24 + $0x5f0] ss:$40 sps:$4 sm:$0xff]   ;;  %v11947_v21 = vld [vmem:[%s20170_s24 + $0x5a4] ss:$40 sps:$4 sm:$0xff]   ;;  %v11950_v23 = vld [vmem:[%s20170_s24 + $0x5a0] ss:$40 sps:$4 sm:$0xff]  }
  0x17   :  { %3564 = vmatprep.subr.bf16.mxu1 %v11929_v9  ;;  %v11951_v24 = vld [vmem:[%s20170_s24 + $0x54] ss:$40 sps:$4 sm:$0xff]   ;;  %v11955_v26 = vld [vmem:[%s20170_s24 + $0x50] ss:$40 sps:$4 sm:$0xff]   ;;  %v11957_v28 = vld [vmem:[%s20170_s24 + $0x4] ss:$40 sps:$4 sm:$0xff]  }
  0x18   :  { %v11953_v25 = vld [vmem:[%s20170_s24 + $0x554] ss:$40 sps:$4 sm:$0xff]   ;;  %v11956_v27 = vld [vmem:[%s20170_s24 + $0x550] ss:$40 sps:$4 sm:$0xff]   ;;  %v11959_v29 = vld [vmem:[%s20170_s24 + $0x504] ss:$40 sps:$4 sm:$0xff]  }
  0x19   :  { %3524 = vmatpush1.bf16.msra.mxu0 %v11931_v10  ;;  %v11961_v30 = vld [vmem:[%s20170_s24] ss:$40 sps:$4 sm:$0xff]   ;;  %v11963_v32 = vld [vmem:[%s20170_s24 + $0x4b4] ss:$40 sps:$4 sm:$0xff]   ;;  %v11967_v34 = vld [vmem:[%s20170_s24 + $0x4b0] ss:$40 sps:$4 sm:$0xff]  }
  0x1a   :  { %3565 = vmatpush1.bf16.msra.mxu1 %v11932_v11  ;;  %3525 = vmatprep.subr.bf16.mxu0 %v11933_v12  ;;  %v11962_v31 = vld [vmem:[%s20170_s24 + $0x500] ss:$40 sps:$4 sm:$0xff]   ;;  %v11965_v33 = vld [vmem:[%s20170_s24 + $0x9b4] ss:$40 sps:$4 sm:$0xff]   ;;  %v11968_v35 = vld [vmem:[%s20170_s24 + $0x9b0] ss:$40 sps:$4 sm:$0xff]  }
  0x1b   :  { %3566 = vmatprep.subr.bf16.mxu1 %v11935_v13  ;;  %v11969_v36 = vld [vmem:[%s20170_s24 + $0x464] ss:$40 sps:$4 sm:$0xff]   ;;  %v11973_v38 = vld [vmem:[%s20170_s24 + $0x460] ss:$40 sps:$4 sm:$0xff]   ;;  %v11975_v40 = vld [vmem:[%s20170_s24 + $0x414] ss:$40 sps:$4 sm:$0xff]  }
  0x1c   :  { %v11971_v37 = vld [vmem:[%s20170_s24 + $0x964] ss:$40 sps:$4 sm:$0xff]   ;;  %v11974_v39 = vld [vmem:[%s20170_s24 + $0x960] ss:$40 sps:$4 sm:$0xff]   ;;  %v11977_v41 = vld [vmem:[%s20170_s24 + $0x914] ss:$40 sps:$4 sm:$0xff]  }
  0x1d   :  { %3526 = vmatpush1.bf16.msra.mxu0 %v11937_v14  ;;  %v11979_v42 = vld [vmem:[%s20170_s24 + $0x410] ss:$40 sps:$4 sm:$0xff]   ;;  %v11981_v44 = vld [vmem:[%s20170_s24 + $0x3c4] ss:$40 sps:$4 sm:$0xff]   ;;  %v11985_v49 = vld [vmem:[%s20170_s24 + $0x3c0] ss:$40 sps:$4 sm:$0xff]  }
  0x1e   :  { %3567 = vmatpush1.bf16.msra.mxu1 %v11938_v15  ;;  %3527 = vmatprep.subr.bf16.mxu0 %v11939_v16  ;;  %v11980_v43 = vld [vmem:[%s20170_s24 + $0x910] ss:$40 sps:$4 sm:$0xff]   ;;  %v11983_v45 = vld [vmem:[%s20170_s24 + $0x8c4] ss:$40 sps:$4 sm:$0xff]   ;;  %v11986_v50 = vld [vmem:[%s20170_s24 + $0x8c0] ss:$40 sps:$4 sm:$0xff]  }
  0x1f   :  { %3568 = vmatprep.subr.bf16.mxu1 %v11941_v17  ;;  %v76_v46 = vld [vmem:[%s20171_s28] sm:$0xff]  ;;  %v77_v48 = vld [vmem:[%s20171_s28 + $0x8] sm:$0xff]  ;;  %v11987_v52 = vld [vmem:[%s20170_s24 + $0x374] ss:$40 sps:$4 sm:$0xff]   ;;  %v13658_v16 = vmov 0  }
  0x20   :  { %v13923_v47 = vcombine.high %v76_v46, %v76_v46  ;;  %v13934_v51 = vcombine.high %v77_v48, %v77_v48  ;;  %v11989_v53 = vld [vmem:[%s20170_s24 + $0x874] ss:$40 sps:$4 sm:$0xff]   ;;  %v11991_v54 = vld [vmem:[%s20170_s24 + $0x370] ss:$40 sps:$4 sm:$0xff]   ;;  %v11993_v56 = vld [vmem:[%s20170_s24 + $0x324] ss:$40 sps:$4 sm:$0xff]   ;;  %v13992_v6 = vcombine.low %v76_v46, %v76_v46  ;;  %v13994_v7 = vcombine.low %v77_v48, %v77_v48 }
  0x21   :  { %3528 = vmatpush1.bf16.msra.mxu0 %v11943_v18  ;;  %v11992_v55 = vld [vmem:[%s20170_s24 + $0x870] ss:$40 sps:$4 sm:$0xff]   ;;  %v11995_v57 = vld [vmem:[%s20170_s24 + $0x824] ss:$40 sps:$4 sm:$0xff]   ;;  %v11997_v58 = vld [vmem:[%s20170_s24 + $0x320] ss:$40 sps:$4 sm:$0xff]  }
  0x22   :  { %3569 = vmatpush1.bf16.msra.mxu1 %v11944_v19  ;;  %3529 = vmatprep.subr.bf16.mxu0 %v11945_v20  ;;  %v11998_v59 = vld [vmem:[%s20170_s24 + $0x820] ss:$40 sps:$4 sm:$0xff]   ;;  %v11999_v60 = vld [vmem:[%s20170_s24 + $0x2d4] ss:$40 sps:$4 sm:$0xff]   ;;  %v12003_v62 = vld [vmem:[%s20170_s24 + $0x2d0] ss:$40 sps:$4 sm:$0xff]  }
  0x23   :  { %3570 = vmatprep.subr.bf16.mxu1 %v11947_v21  ;;  %3551 = vmatprep.mubr.bf16.mxu0 %v13923_v47  ;;  %v12001_v61 = vld [vmem:[%s20170_s24 + $0x7d4] ss:$40 sps:$4 sm:$0xff]   ;;  %v12004_v63 = vld [vmem:[%s20170_s24 + $0x7d0] ss:$40 sps:$4 sm:$0xff]   ;;  %v12005_v0 = vld [vmem:[%s20170_s24 + $0x284] ss:$40 sps:$4 sm:$0xff]  }
  0x24   :  { %3592 = vmatprep.mubr.bf16.mxu1 %v13934_v51  ;;  %v12007_v1 = vld [vmem:[%s20170_s24 + $0x784] ss:$40 sps:$4 sm:$0xff]   ;;  %v12009_v2 = vld [vmem:[%s20170_s24 + $0x280] ss:$40 sps:$4 sm:$0xff]   ;;  %v12016_v4 = vld [vmem:[%s20170_s24 + $0xc34] ss:$40 sps:$4 sm:$0xff]  }
  0x25   :  { %3530 = vmatpush1.bf16.msra.mxu0 %v11949_v22  ;;  %v12010_v3 = vld [vmem:[%s20170_s24 + $0x780] ss:$40 sps:$4 sm:$0xff]   ;;  %v12019_v5 = vld [vmem:[%s20170_s24 + $0x1134] ss:$40 sps:$4 sm:$0xff]   ;;  %v12014_v8 = vld [vmem:[%s20170_s24 + $0xc30] ss:$40 sps:$4 sm:$0xff]  }
  0x26   :  { %3571 = vmatpush1.bf16.msra.mxu1 %v11950_v23  ;;  %3531 = vmatprep.subr.bf16.mxu0 %v11951_v24  ;;  %v12017_v9 = vld [vmem:[%s20170_s24 + $0x1130] ss:$40 sps:$4 sm:$0xff]   ;;  %v12023_v10 = vld [vmem:[%s20170_s24 + $0xbe4] ss:$40 sps:$4 sm:$0xff]   ;;  %v12021_v12 = vld [vmem:[%s20170_s24 + $0xbe0] ss:$40 sps:$4 sm:$0xff]  }
  0x27   :  { %3572 = vmatprep.subr.bf16.mxu1 %v11953_v25  ;;  %v12026_v11 = vld [vmem:[%s20170_s24 + $0x10e4] ss:$40 sps:$4 sm:$0xff]   ;;  %v12024_v13 = vld [vmem:[%s20170_s24 + $0x10e0] ss:$40 sps:$4 sm:$0xff]   ;;  %v12029_v14 = vld [vmem:[%s20170_s24 + $0xb94] ss:$40 sps:$4 sm:$0xff]  }
  0x28   :  { %v12032_v15 = vld [vmem:[%s20170_s24 + $0x1094] ss:$40 sps:$4 sm:$0xff]   ;;  %v12027_v17 = vld [vmem:[%s20170_s24 + $0xb90] ss:$40 sps:$4 sm:$0xff]   ;;  %v12035_v19 = vld [vmem:[%s20170_s24 + $0xb44] ss:$40 sps:$4 sm:$0xff]  }
  0x29   :  { %3532 = vmatpush1.bf16.msra.mxu0 %v11955_v26  ;;  %v12030_v18 = vld [vmem:[%s20170_s24 + $0x1090] ss:$40 sps:$4 sm:$0xff]   ;;  %v12038_v20 = vld [vmem:[%s20170_s24 + $0x1044] ss:$40 sps:$4 sm:$0xff]   ;;  %v12033_v21 = vld [vmem:[%s20170_s24 + $0xb40] ss:$40 sps:$4 sm:$0xff]  }
  0x2a   :  { %3573 = vmatpush1.bf16.msra.mxu1 %v11956_v27  ;;  %3533 = vmatprep.subr.bf16.mxu0 %v11957_v28  ;;  %v12036_v22 = vld [vmem:[%s20170_s24 + $0x1040] ss:$40 sps:$4 sm:$0xff]   ;;  %v12041_v23 = vld [vmem:[%s20170_s24 + $0xaf4] ss:$40 sps:$4 sm:$0xff]   ;;  %v12039_v25 = vld [vmem:[%s20170_s24 + $0xaf0] ss:$40 sps:$4 sm:$0xff]  }
  0x2b   :  { %3574 = vmatprep.subr.bf16.mxu1 %v11959_v29  ;;  %v12044_v24 = vld [vmem:[%s20170_s24 + $0xff4] ss:$40 sps:$4 sm:$0xff]   ;;  %v12042_v26 = vld [vmem:[%s20170_s24 + $0xff0] ss:$40 sps:$4 sm:$0xff]   ;;  %v12047_v27 = vld [vmem:[%s20170_s24 + $0xaa4] ss:$40 sps:$4 sm:$0xff]  }
  0x2c   :  { %v12050_v28 = vld [vmem:[%s20170_s24 + $0xfa4] ss:$40 sps:$4 sm:$0xff]   ;;  %v12045_v29 = vld [vmem:[%s20170_s24 + $0xaa0] ss:$40 sps:$4 sm:$0xff]  }
  0x2d   :  { %3534 = vmatpush1.bf16.msra.mxu0 %v11961_v30  ;;  %v12048_v30 = vld [vmem:[%s20170_s24 + $0xfa0] ss:$40 sps:$4 sm:$0xff]   ;;  %v12072_v46 = vld [vmem:[%s20170_s24 + $0xe64] ss:$40 sps:$4 sm:$0xff]  }
  0x2e   :  { %3575 = vmatpush1.bf16.msra.mxu1 %v11962_v31  ;;  %3535 = vmatprep.subr.bf16.mxu0 %v11963_v32  ;;  %v12053_v31 = vld [vmem:[%s20170_s24 + $0xa54] ss:$40 sps:$4 sm:$0xff]  }
  0x2f   :  { %3576 = vmatprep.subr.bf16.mxu1 %v11965_v33  ;;  %v12056_v32 = vld [vmem:[%s20170_s24 + $0xf54] ss:$40 sps:$4 sm:$0xff]  }
  0x30   :  { %v14074_v33 = vld [vmem:[%s20171_s28 + $0x10] sm:$0xff] }
  0x31   :  { %3536 = vmatpush2.bf16.msra.mxu0 %v11967_v34  ;;  %v12051_v34 = vld [vmem:[%s20170_s24 + $0xa50] ss:$40 sps:$4 sm:$0xff]   ;;  %v12075_v48 = vld [vmem:[%s20170_s24 + $0x1ec] ss:$40 sps:$4 sm:$0xff]  }
  0x32   :  { %3577 = vmatpush2.bf16.msra.mxu1 %v11968_v35  ;;  %3537 = vmatprep.subr.bf16.mxu0 %v11969_v36  ;;  %v14081_v35 = vcombine.high %v14074_v33, %v14074_v33  ;;  %v12054_v36 = vld [vmem:[%s20170_s24 + $0xf50] ss:$40 sps:$4 sm:$0xff]  }
  0x33   :  { %3578 = vmatprep.subr.bf16.mxu1 %v11971_v37  ;;  %v12059_v37 = vld [vmem:[%s20170_s24 + $0xa04] ss:$40 sps:$4 sm:$0xff]  }
  0x35   :  { %3538 = vmatpush2.bf16.msra.mxu0 %v11973_v38  ;;  %v12062_v38 = vld [vmem:[%s20170_s24 + $0xf04] ss:$40 sps:$4 sm:$0xff]  }
  0x36   :  { %3579 = vmatpush2.bf16.msra.mxu1 %v11974_v39  ;;  %3539 = vmatprep.subr.bf16.mxu0 %v11975_v40  ;;  %v12057_v39 = vld [vmem:[%s20170_s24 + $0xa00] ss:$40 sps:$4 sm:$0xff]  }
  0x37   :  { %3580 = vmatprep.subr.bf16.mxu1 %v11977_v41  ;;  %v12060_v40 = vld [vmem:[%s20170_s24 + $0xf00] ss:$40 sps:$4 sm:$0xff]   ;;  %v12065_v41 = vld [vmem:[%s20170_s24 + $0xeb4] ss:$40 sps:$4 sm:$0xff]  }
  0x39   :  { %3540 = vmatpush2.bf16.msra.mxu0 %v11979_v42  ;;  %v12068_v42 = vld [vmem:[%s20170_s24 + $0x23c] ss:$40 sps:$4 sm:$0xff]  }
  0x3a   :  { %3581 = vmatpush2.bf16.msra.mxu1 %v11980_v43  ;;  %3541 = vmatprep.subr.bf16.mxu0 %v11981_v44  ;;  %v12063_v43 = vld [vmem:[%s20170_s24 + $0xeb0] ss:$40 sps:$4 sm:$0xff]  }
  0x3b   :  { %3582 = vmatprep.subr.bf16.mxu1 %v11983_v45  ;;  %v14111_v44 = vld [vmem:[%s20171_s28 + $0x18] ss:$0 sps:$4 sm:$0xff]  }
  0x3c   :  { %v12066_v45 = vld [vmem:[%s20170_s24 + $0x238] ss:$40 sps:$4 sm:$0xff]  }
  0x3d   :  { %3542 = vmatpush2.bf16.msra.mxu0 %v11985_v49  ;;  %v12070_v49 = vld [vmem:[%s20170_s24 + $0xe60] ss:$40 sps:$4 sm:$0xff]  }
  0x3e   :  { %3583 = vmatpush2.bf16.msra.mxu1 %v11986_v50  ;;  %3543 = vmatprep.subr.bf16.mxu0 %v11987_v52  ;;  %v12073_v50 = vld [vmem:[%s20170_s24 + $0x1e8] ss:$40 sps:$4 sm:$0xff]   ;;  %v12078_v52 = vld [vmem:[%s20170_s24 + $0xe14] ss:$40 sps:$4 sm:$0xff]  }
  0x3f   :  { %3584 = vmatprep.subr.bf16.mxu1 %v11989_v53  ;;  %v12081_v53 = vld [vmem:[%s20170_s24 + $0x19c] ss:$40 sps:$4 sm:$0xff]  }
  0x41   :  { %3544 = vmatpush2.bf16.msra.mxu0 %v11991_v54  ;;  %v12076_v54 = vld [vmem:[%s20170_s24 + $0xe10] ss:$40 sps:$4 sm:$0xff]  }
  0x42   :  { %3585 = vmatpush2.bf16.msra.mxu1 %v11992_v55  ;;  %3545 = vmatprep.subr.bf16.mxu0 %v11993_v56  ;;  %v12079_v55 = vld [vmem:[%s20170_s24 + $0x198] ss:$40 sps:$4 sm:$0xff]   ;;  %v12084_v56 = vld [vmem:[%s20170_s24 + $0xdc4] ss:$40 sps:$4 sm:$0xff]  }
  0x43   :  { %3586 = vmatprep.subr.bf16.mxu1 %v11995_v57  ;;  %v12087_v57 = vld [vmem:[%s20170_s24 + $0x14c] ss:$40 sps:$4 sm:$0xff]  }
  0x45   :  { %3546 = vmatpush2.bf16.msra.mxu0 %v11997_v58  ;;  %v12082_v58 = vld [vmem:[%s20170_s24 + $0xdc0] ss:$40 sps:$4 sm:$0xff]  }
  0x46   :  { %3587 = vmatpush2.bf16.msra.mxu1 %v11998_v59  ;;  %3547 = vmatprep.subr.bf16.mxu0 %v11999_v60  ;;  %v12085_v59 = vld [vmem:[%s20170_s24 + $0x148] ss:$40 sps:$4 sm:$0xff]   ;;  %v12090_v60 = vld [vmem:[%s20170_s24 + $0xd74] ss:$40 sps:$4 sm:$0xff]  }
  0x47   :  { %3588 = vmatprep.subr.bf16.mxu1 %v12001_v61  ;;  %v12093_v61 = vld [vmem:[%s20170_s24 + $0xfc] ss:$40 sps:$4 sm:$0xff]  }
  0x49   :  { %3548 = vmatpush2.bf16.msra.mxu0 %v12003_v62  ;;  %v12088_v62 = vld [vmem:[%s20170_s24 + $0xd70] ss:$40 sps:$4 sm:$0xff]  }
  0x4a   :  { %3589 = vmatpush2.bf16.msra.mxu1 %v12004_v63  ;;  %3549 = vmatprep.subr.bf16.mxu0 %v12005_v0  ;;  %v12091_v63 = vld [vmem:[%s20170_s24 + $0xf8] ss:$40 sps:$4 sm:$0xff]   ;;  %v12096_v0 = vld [vmem:[%s20170_s24 + $0xd24] ss:$40 sps:$4 sm:$0xff]  }
  0x4b   :  { %3590 = vmatprep.subr.bf16.mxu1 %v12007_v1  ;;  %v12099_v1 = vld [vmem:[%s20170_s24 + $0xac] ss:$40 sps:$4 sm:$0xff]  }
  0x4d   :  { %3550 = vmatpush2.bf16.msra.mxu0 %v12009_v2  ;;  %v12094_v2 = vld [vmem:[%s20170_s24 + $0xd20] ss:$40 sps:$4 sm:$0xff]  }
  0x4e   :  { %3591 = vmatpush2.bf16.msra.mxu1 %v12010_v3  ;;  %3601 = vmatprep.subr.bf16.mxu0 %v12016_v4  ;;  %v12097_v3 = vld [vmem:[%s20170_s24 + $0xa8] ss:$40 sps:$4 sm:$0xff]   ;;  %v12102_v4 = vld [vmem:[%s20170_s24 + $0xcd4] ss:$40 sps:$4 sm:$0xff]  }
  0x4f   :  { %3642 = vmatprep.subr.bf16.mxu1 %v12019_v5  ;;  %v12105_v5 = vld [vmem:[%s20170_s24 + $0x5c] ss:$40 sps:$4 sm:$0xff]  }
  0x50   :  { %3552 = vmatmul.mubr.bf16.vlgmr.msra.gmra.mxu0 %v13992_v6 }
  0x51   :  { %3593 = vmatmul.mubr.bf16.vlgmr.msra.gmra.mxu1 %v13994_v7  ;;  %3602 = vmatpush1.bf16.msra.mxu0 %v12014_v8  ;;  %v12100_v8 = vld [vmem:[%s20170_s24 + $0xcd0] ss:$40 sps:$4 sm:$0xff]  }
  0x52   :  { %3643 = vmatpush1.bf16.msra.mxu1 %v12017_v9  ;;  %3603 = vmatprep.subr.bf16.mxu0 %v12023_v10  ;;  %v12103_v9 = vld [vmem:[%s20170_s24 + $0x58] ss:$40 sps:$4 sm:$0xff]   ;;  %v12108_v10 = vld [vmem:[%s20170_s24 + $0xc84] ss:$40 sps:$4 sm:$0xff]  }
  0x53   :  { %3644 = vmatprep.subr.bf16.mxu1 %v12026_v11  ;;  %3674 = vmatprep.mubr.bf16.mxu1 %v13658_v16  ;;  %v12111_v11 = vld [vmem:[%s20170_s24 + $0xc] ss:$40 sps:$4 sm:$0xff]  }
  0x54   :  { %3633 = vmatprep.mubr.bf16.mxu0 %v14081_v35 }
  0x55   :  { %3604 = vmatpush1.bf16.msra.mxu0 %v12021_v12  ;;  %v12106_v12 = vld [vmem:[%s20170_s24 + $0xc80] ss:$40 sps:$4 sm:$0xff]  }
  0x56   :  { %3645 = vmatpush1.bf16.msra.mxu1 %v12024_v13  ;;  %3605 = vmatprep.subr.bf16.mxu0 %v12029_v14  ;;  %v12109_v13 = vld [vmem:[%s20170_s24 + $0x8] ss:$40 sps:$4 sm:$0xff]   ;;  %v12116_v14 = vld [vmem:[%s20170_s24 + $0x4bc] ss:$40 sps:$4 sm:$0xff]  }
  0x57   :  { %3646 = vmatprep.subr.bf16.mxu1 %v12032_v15  ;;  %v12119_v15 = vld [vmem:[%s20170_s24 + $0x73c] ss:$40 sps:$4 sm:$0xff]  }
  0x59   :  { %3606 = vmatpush1.bf16.msra.mxu0 %v12027_v17  ;;  %v14210_v17 = vcombine.low %v14074_v33, %v14074_v33  ;;  %v12143_v33 = vld [vmem:[%s20170_s24 + $0x5fc] ss:$40 sps:$4 sm:$0xff]  }
  0x5a   :  { %3647 = vmatpush1.bf16.msra.mxu1 %v12030_v18  ;;  %3607 = vmatprep.subr.bf16.mxu0 %v12035_v19  ;;  %v12114_v18 = vld [vmem:[%s20170_s24 + $0x4b8] ss:$40 sps:$4 sm:$0xff]  }
  0x5b   :  { %3648 = vmatprep.subr.bf16.mxu1 %v12038_v20  ;;  %v12117_v19 = vld [vmem:[%s20170_s24 + $0x738] ss:$40 sps:$4 sm:$0xff]   ;;  %v12122_v20 = vld [vmem:[%s20170_s24 + $0x46c] ss:$40 sps:$4 sm:$0xff]  }
  0x5d   :  { %3608 = vmatpush1.bf16.msra.mxu0 %v12033_v21  ;;  %v12125_v21 = vld [vmem:[%s20170_s24 + $0x6ec] ss:$40 sps:$4 sm:$0xff]  }
  0x5e   :  { %3649 = vmatpush1.bf16.msra.mxu1 %v12036_v22  ;;  %3609 = vmatprep.subr.bf16.mxu0 %v12041_v23  ;;  %v12120_v22 = vld [vmem:[%s20170_s24 + $0x468] ss:$40 sps:$4 sm:$0xff]  }
  0x5f   :  { %3650 = vmatprep.subr.bf16.mxu1 %v12044_v24  ;;  %v12123_v23 = vld [vmem:[%s20170_s24 + $0x6e8] ss:$40 sps:$4 sm:$0xff]   ;;  %v12128_v24 = vld [vmem:[%s20170_s24 + $0x41c] ss:$40 sps:$4 sm:$0xff]  }
  0x61   :  { %3610 = vmatpush1.bf16.msra.mxu0 %v12039_v25  ;;  %v12131_v25 = vld [vmem:[%s20170_s24 + $0x69c] ss:$40 sps:$4 sm:$0xff]  }
  0x62   :  { %3651 = vmatpush1.bf16.msra.mxu1 %v12042_v26  ;;  %3611 = vmatprep.subr.bf16.mxu0 %v12047_v27  ;;  %v12126_v26 = vld [vmem:[%s20170_s24 + $0x418] ss:$40 sps:$4 sm:$0xff]  }
  0x63   :  { %3652 = vmatprep.subr.bf16.mxu1 %v12050_v28  ;;  %v12129_v27 = vld [vmem:[%s20170_s24 + $0x698] ss:$40 sps:$4 sm:$0xff]   ;;  %v12134_v28 = vld [vmem:[%s20170_s24 + $0x3cc] ss:$40 sps:$4 sm:$0xff]  }
  0x65   :  { %3612 = vmatpush1.bf16.msra.mxu0 %v12045_v29  ;;  %v12137_v29 = vld [vmem:[%s20170_s24 + $0x64c] ss:$40 sps:$4 sm:$0xff]  }
  0x66   :  { %3653 = vmatpush1.bf16.msra.mxu1 %v12048_v30  ;;  %3613 = vmatprep.subr.bf16.mxu0 %v12053_v31  ;;  %v12132_v30 = vld [vmem:[%s20170_s24 + $0x3c8] ss:$40 sps:$4 sm:$0xff]  }
  0x67   :  { %3654 = vmatprep.subr.bf16.mxu1 %v12056_v32  ;;  %v12135_v31 = vld [vmem:[%s20170_s24 + $0x648] ss:$40 sps:$4 sm:$0xff]   ;;  %v12140_v32 = vld [vmem:[%s20170_s24 + $0x37c] ss:$40 sps:$4 sm:$0xff]  }
  0x69   :  { %3614 = vmatpush1.bf16.msra.mxu0 %v12051_v34  ;;  %v12138_v34 = vld [vmem:[%s20170_s24 + $0x378] ss:$40 sps:$4 sm:$0xff]  }
  0x6a   :  { %3655 = vmatpush1.bf16.msra.mxu1 %v12054_v36  ;;  %3615 = vmatprep.subr.bf16.mxu0 %v12059_v37  ;;  %v12141_v36 = vld [vmem:[%s20170_s24 + $0x5f8] ss:$40 sps:$4 sm:$0xff]   ;;  %v12146_v37 = vld [vmem:[%s20170_s24 + $0x32c] ss:$40 sps:$4 sm:$0xff]  }
  0x6b   :  { %3656 = vmatprep.subr.bf16.mxu1 %v12062_v38  ;;  %v12149_v38 = vld [vmem:[%s20170_s24 + $0x5ac] ss:$40 sps:$4 sm:$0xff]  }
  0x6d   :  { %3616 = vmatpush1.bf16.msra.mxu0 %v12057_v39  ;;  %v12144_v39 = vld [vmem:[%s20170_s24 + $0x328] ss:$40 sps:$4 sm:$0xff]  }
  0x6e   :  { %3657 = vmatpush1.bf16.msra.mxu1 %v12060_v40  ;;  %3617 = vmatprep.subr.bf16.mxu0 %v12065_v41  ;;  %v12147_v40 = vld [vmem:[%s20170_s24 + $0x5a8] ss:$40 sps:$4 sm:$0xff]   ;;  %v12152_v41 = vld [vmem:[%s20170_s24 + $0x2dc] ss:$40 sps:$4 sm:$0xff]  }
  0x6f   :  { %3683 = vmatprep.subr.bf16.mxu1 %v12068_v42  ;;  %v12155_v42 = vld [vmem:[%s20170_s24 + $0x55c] ss:$40 sps:$4 sm:$0xff]  }
  0x71   :  { %3675 = vmatmul.mubr.bf16.vlgmr.msra.gmra.mxu1 %v14111_v44  ;;  %3618 = vmatpush2.bf16.msra.mxu0 %v12063_v43  ;;  %v12150_v43 = vld [vmem:[%s20170_s24 + $0x2d8] ss:$40 sps:$4 sm:$0xff]  }
  0x72   :  { %3684 = vmatpush1.bf16.msra.mxu1 %v12066_v45  ;;  %3619 = vmatprep.subr.bf16.mxu0 %v12072_v46  ;;  %v12153_v45 = vld [vmem:[%s20170_s24 + $0x558] ss:$40 sps:$4 sm:$0xff]   ;;  %v12158_v46 = vld [vmem:[%s20170_s24 + $0x28c] ss:$40 sps:$4 sm:$0xff]  }
  0x73   :  { %3685 = vmatprep.subr.bf16.mxu1 %v12075_v48  ;;  %3715 = vmatprep.mubr.bf16.mxu1 %v13923_v47  ;;  %v12161_v48 = vld [vmem:[%s20170_s24 + $0x50c] ss:$40 sps:$4 sm:$0xff]  }
  0x75   :  { %3620 = vmatpush2.bf16.msra.mxu0 %v12070_v49  ;;  %v12156_v49 = vld [vmem:[%s20170_s24 + $0x288] ss:$40 sps:$4 sm:$0xff]  }
  0x76   :  { %3686 = vmatpush1.bf16.msra.mxu1 %v12073_v50  ;;  %3621 = vmatprep.subr.bf16.mxu0 %v12078_v52  ;;  %v12159_v50 = vld [vmem:[%s20170_s24 + $0x508] ss:$40 sps:$4 sm:$0xff]   ;;  %v12164_v52 = vld [vmem:[%s20170_s24 + $0x9bc] ss:$40 sps:$4 sm:$0xff]  }
  0x77   :  { %3687 = vmatprep.subr.bf16.mxu1 %v12081_v53  ;;  %v12167_v53 = vld [vmem:[%s20170_s24 + $0xc3c] ss:$40 sps:$4 sm:$0xff]  }
  0x79   :  { %3622 = vmatpush2.bf16.msra.mxu0 %v12076_v54  ;;  %v12162_v54 = vld [vmem:[%s20170_s24 + $0x9b8] ss:$40 sps:$4 sm:$0xff]  }
  0x7a   :  { %3688 = vmatpush1.bf16.msra.mxu1 %v12079_v55  ;;  %3623 = vmatprep.subr.bf16.mxu0 %v12084_v56  ;;  %v12165_v55 = vld [vmem:[%s20170_s24 + $0xc38] ss:$40 sps:$4 sm:$0xff]   ;;  %v12170_v56 = vld [vmem:[%s20170_s24 + $0x96c] ss:$40 sps:$4 sm:$0xff]  }
  0x7b   :  { %3689 = vmatprep.subr.bf16.mxu1 %v12087_v57  ;;  %v12173_v57 = vld [vmem:[%s20170_s24 + $0xbec] ss:$40 sps:$4 sm:$0xff]  }
  0x7d   :  { %3624 = vmatpush2.bf16.msra.mxu0 %v12082_v58  ;;  %v12168_v58 = vld [vmem:[%s20170_s24 + $0x968] ss:$40 sps:$4 sm:$0xff]  }
  0x7e   :  { %3690 = vmatpush1.bf16.msra.mxu1 %v12085_v59  ;;  %3625 = vmatprep.subr.bf16.mxu0 %v12090_v60  ;;  %v12171_v59 = vld [vmem:[%s20170_s24 + $0xbe8] ss:$40 sps:$4 sm:$0xff]   ;;  %v12176_v60 = vld [vmem:[%s20170_s24 + $0x91c] ss:$40 sps:$4 sm:$0xff]  }
  0x7f   :  { %3691 = vmatprep.subr.bf16.mxu1 %v12093_v61  ;;  %v12179_v61 = vld [vmem:[%s20170_s24 + $0xb9c] ss:$40 sps:$4 sm:$0xff]  }
  0x81   :  { %3626 = vmatpush2.bf16.msra.mxu0 %v12088_v62  ;;  %v12174_v62 = vld [vmem:[%s20170_s24 + $0x918] ss:$40 sps:$4 sm:$0xff]  }
  0x82   :  { %3692 = vmatpush1.bf16.msra.mxu1 %v12091_v63  ;;  %3627 = vmatprep.subr.bf16.mxu0 %v12096_v0  ;;  %v12177_v63 = vld [vmem:[%s20170_s24 + $0xb98] ss:$40 sps:$4 sm:$0xff]   ;;  %v12182_v0 = vld [vmem:[%s20170_s24 + $0x8cc] ss:$40 sps:$4 sm:$0xff]  }
  0x83   :  { %3693 = vmatprep.subr.bf16.mxu1 %v12099_v1  ;;  %v12185_v1 = vld [vmem:[%s20170_s24 + $0xb4c] ss:$40 sps:$4 sm:$0xff]  }
  0x85   :  { %3628 = vmatpush2.bf16.msra.mxu0 %v12094_v2  ;;  %v12180_v2 = vld [vmem:[%s20170_s24 + $0x8c8] ss:$40 sps:$4 sm:$0xff]  }
  0x86   :  { %3694 = vmatpush1.bf16.msra.mxu1 %v12097_v3  ;;  %3629 = vmatprep.subr.bf16.mxu0 %v12102_v4  ;;  %v12183_v3 = vld [vmem:[%s20170_s24 + $0xb48] ss:$40 sps:$4 sm:$0xff]   ;;  %v12188_v4 = vld [vmem:[%s20170_s24 + $0x87c] ss:$40 sps:$4 sm:$0xff]  }
  0x87   :  { %3695 = vmatprep.subr.bf16.mxu1 %v12105_v5  ;;  %v12191_v5 = vld [vmem:[%s20170_s24 + $0xafc] ss:$40 sps:$4 sm:$0xff]  }
  0x89   :  { %3630 = vmatpush2.bf16.msra.mxu0 %v12100_v8  ;;  %v12186_v8 = vld [vmem:[%s20170_s24 + $0x878] ss:$40 sps:$4 sm:$0xff]  }
  0x8a   :  { %3696 = vmatpush1.bf16.msra.mxu1 %v12103_v9  ;;  %3631 = vmatprep.subr.bf16.mxu0 %v12108_v10  ;;  %v12189_v9 = vld [vmem:[%s20170_s24 + $0xaf8] ss:$40 sps:$4 sm:$0xff]   ;;  %v12194_v10 = vld [vmem:[%s20170_s24 + $0x82c] ss:$40 sps:$4 sm:$0xff]  }
  0x8b   :  { %3697 = vmatprep.subr.bf16.mxu1 %v12111_v11  ;;  %v12197_v11 = vld [vmem:[%s20170_s24 + $0xaac] ss:$40 sps:$4 sm:$0xff]  }
  0x8d   :  { %3632 = vmatpush2.bf16.msra.mxu0 %v12106_v12  ;;  %v12192_v12 = vld [vmem:[%s20170_s24 + $0x828] ss:$40 sps:$4 sm:$0xff]  }
  0x8e   :  { %3698 = vmatpush1.bf16.msra.mxu1 %v12109_v13  ;;  %3724 = vmatprep.subr.bf16.mxu0 %v12119_v15  ;;  %v12195_v13 = vld [vmem:[%s20170_s24 + $0xaa8] ss:$40 sps:$4 sm:$0xff]   ;;  %v12203_v15 = vld [vmem:[%s20170_s24 + $0xa5c] ss:$40 sps:$4 sm:$0xff]  }
  0x8f   :  { %3699 = vmatprep.subr.bf16.mxu1 %v12116_v14  ;;  %v12200_v14 = vld [vmem:[%s20170_s24 + $0x7dc] ss:$40 sps:$4 sm:$0xff]  }
  0x90   :  { %3634 = vmatmul.mubr.bf16.vlgmr.msra.gmra.mxu0 %v14210_v17 }
  0x91   :  { %3725 = vmatpush1.bf16.msra.mxu0 %v12117_v19  ;;  %3756 = vmatprep.mubr.bf16.mxu0 %v13934_v51  ;;  %v12201_v19 = vld [vmem:[%s20170_s24 + $0xa58] ss:$40 sps:$4 sm:$0xff]  }
  0x92   :  { %3700 = vmatpush2.bf16.msra.mxu1 %v12114_v18  ;;  %3726 = vmatprep.subr.bf16.mxu0 %v12125_v21  ;;  %v12198_v18 = vld [vmem:[%s20170_s24 + $0x7d8] ss:$40 sps:$4 sm:$0xff]   ;;  %v12209_v21 = vld [vmem:[%s20170_s24 + $0xa0c] ss:$40 sps:$4 sm:$0xff]  }
  0x93   :  { %3701 = vmatprep.subr.bf16.mxu1 %v12122_v20  ;;  %v12206_v20 = vld [vmem:[%s20170_s24 + $0x78c] ss:$40 sps:$4 sm:$0xff]  }
  0x95   :  { %3727 = vmatpush1.bf16.msra.mxu0 %v12123_v23  ;;  %v12207_v23 = vld [vmem:[%s20170_s24 + $0xa08] ss:$40 sps:$4 sm:$0xff]  }
  0x96   :  { %3702 = vmatpush2.bf16.msra.mxu1 %v12120_v22  ;;  %3728 = vmatprep.subr.bf16.mxu0 %v12131_v25  ;;  %v12204_v22 = vld [vmem:[%s20170_s24 + $0x788] ss:$40 sps:$4 sm:$0xff]   ;;  %v12215_v25 = vld [vmem:[%s20170_s24 + $0x113c] ss:$40 sps:$4 sm:$0xff]  }
  0x97   :  { %3703 = vmatprep.subr.bf16.mxu1 %v12128_v24  ;;  %v12212_v24 = vld [vmem:[%s20170_s24 + $0xebc] ss:$40 sps:$4 sm:$0xff]  }
  0x99   :  { %3729 = vmatpush1.bf16.msra.mxu0 %v12129_v27  ;;  %v12213_v27 = vld [vmem:[%s20170_s24 + $0x1138] ss:$40 sps:$4 sm:$0xff]  }
  0x9a   :  { %3704 = vmatpush2.bf16.msra.mxu1 %v12126_v26  ;;  %3730 = vmatprep.subr.bf16.mxu0 %v12137_v29  ;;  %v12210_v26 = vld [vmem:[%s20170_s24 + $0xeb8] ss:$40 sps:$4 sm:$0xff]   ;;  %v12221_v29 = vld [vmem:[%s20170_s24 + $0x10ec] ss:$40 sps:$4 sm:$0xff]  }
  0x9b   :  { %3705 = vmatprep.subr.bf16.mxu1 %v12134_v28  ;;  %v12218_v28 = vld [vmem:[%s20170_s24 + $0xe6c] ss:$40 sps:$4 sm:$0xff]  }
  0x9d   :  { %3731 = vmatpush1.bf16.msra.mxu0 %v12135_v31  ;;  %v12219_v31 = vld [vmem:[%s20170_s24 + $0x10e8] ss:$40 sps:$4 sm:$0xff]  }
  0x9e   :  { %3706 = vmatpush2.bf16.msra.mxu1 %v12132_v30  ;;  %3732 = vmatprep.subr.bf16.mxu0 %v12143_v33  ;;  %v12216_v30 = vld [vmem:[%s20170_s24 + $0xe68] ss:$40 sps:$4 sm:$0xff]   ;;  %v12227_v33 = vld [vmem:[%s20170_s24 + $0x109c] ss:$40 sps:$4 sm:$0xff]  }
  0x9f   :  { %3707 = vmatprep.subr.bf16.mxu1 %v12140_v32  ;;  %v12224_v32 = vld [vmem:[%s20170_s24 + $0xe1c] ss:$40 sps:$4 sm:$0xff]  }
  0xa1   :  { %3733 = vmatpush1.bf16.msra.mxu0 %v12141_v36  ;;  %v12225_v36 = vld [vmem:[%s20170_s24 + $0x1098] ss:$40 sps:$4 sm:$0xff]  }
  0xa2   :  { %3708 = vmatpush2.bf16.msra.mxu1 %v12138_v34  ;;  %3734 = vmatprep.subr.bf16.mxu0 %v12149_v38  ;;  %v12222_v34 = vld [vmem:[%s20170_s24 + $0xe18] ss:$40 sps:$4 sm:$0xff]   ;;  %v12233_v38 = vld [vmem:[%s20170_s24 + $0x104c] ss:$40 sps:$4 sm:$0xff]  }
  0xa3   :  { %3709 = vmatprep.subr.bf16.mxu1 %v12146_v37  ;;  %v12230_v37 = vld [vmem:[%s20170_s24 + $0xdcc] ss:$40 sps:$4 sm:$0xff]  }
  0xa5   :  { %3735 = vmatpush1.bf16.msra.mxu0 %v12147_v40  ;;  %v12231_v40 = vld [vmem:[%s20170_s24 + $0x1048] ss:$40 sps:$4 sm:$0xff]  }
  0xa6   :  { %3710 = vmatpush2.bf16.msra.mxu1 %v12144_v39  ;;  %3736 = vmatprep.subr.bf16.mxu0 %v12155_v42  ;;  %v12228_v39 = vld [vmem:[%s20170_s24 + $0xdc8] ss:$40 sps:$4 sm:$0xff]   ;;  %v12239_v42 = vld [vmem:[%s20170_s24 + $0xffc] ss:$40 sps:$4 sm:$0xff]  }
  0xa7   :  { %3711 = vmatprep.subr.bf16.mxu1 %v12152_v41  ;;  %v12236_v41 = vld [vmem:[%s20170_s24 + $0xd7c] ss:$40 sps:$4 sm:$0xff]  }
  0xa9   :  { %3737 = vmatpush1.bf16.msra.mxu0 %v12153_v45  ;;  %v12237_v45 = vld [vmem:[%s20170_s24 + $0xff8] ss:$40 sps:$4 sm:$0xff]  }
  0xaa   :  { %3712 = vmatpush2.bf16.msra.mxu1 %v12150_v43  ;;  %3738 = vmatprep.subr.bf16.mxu0 %v12161_v48  ;;  %v12234_v43 = vld [vmem:[%s20170_s24 + $0xd78] ss:$40 sps:$4 sm:$0xff]   ;;  %v12245_v48 = vld [vmem:[%s20170_s24 + $0xfac] ss:$40 sps:$4 sm:$0xff]  }
  0xab   :  { %3713 = vmatprep.subr.bf16.mxu1 %v12158_v46  ;;  %v12242_v46 = vld [vmem:[%s20170_s24 + $0xd2c] ss:$40 sps:$4 sm:$0xff]  }
  0xad   :  { %3739 = vmatpush1.bf16.msra.mxu0 %v12159_v50  ;;  %v12243_v50 = vld [vmem:[%s20170_s24 + $0xfa8] ss:$40 sps:$4 sm:$0xff]  }
  0xae   :  { %3714 = vmatpush2.bf16.msra.mxu1 %v12156_v49  ;;  %3740 = vmatprep.subr.bf16.mxu0 %v12164_v52  ;;  %v12240_v49 = vld [vmem:[%s20170_s24 + $0xd28] ss:$40 sps:$4 sm:$0xff]   ;;  %v12248_v52 = vld [vmem:[%s20170_s24 + $0xcdc] ss:$40 sps:$4 sm:$0xff]  }
  0xaf   :  { %3765 = vmatprep.subr.bf16.mxu1 %v12167_v53  ;;  %v12251_v53 = vld [vmem:[%s20170_s24 + $0xf5c] ss:$40 sps:$4 sm:$0xff]  }
  0xb1   :  { %3716 = vmatmul.mubr.bf16.vlgmr.msra.gmra.mxu1 %v13992_v6  ;;  %3741 = vmatpush2.bf16.msra.mxu0 %v12162_v54  ;;  %v12246_v54 = vld [vmem:[%s20170_s24 + $0xcd8] ss:$40 sps:$4 sm:$0xff]  }
  0xb2   :  { %3766 = vmatpush1.bf16.msra.mxu1 %v12165_v55  ;;  %3742 = vmatprep.subr.bf16.mxu0 %v12170_v56  ;;  %v12249_v55 = vld [vmem:[%s20170_s24 + $0xf58] ss:$40 sps:$4 sm:$0xff]   ;;  %v12254_v56 = vld [vmem:[%s20170_s24 + $0xc8c] ss:$40 sps:$4 sm:$0xff]  }
  0xb3   :  { %3767 = vmatprep.subr.bf16.mxu1 %v12173_v57  ;;  %3797 = vmatprep.mubr.bf16.mxu1 %v14081_v35  ;;  %v12257_v57 = vld [vmem:[%s20170_s24 + $0xf0c] ss:$40 sps:$4 sm:$0xff]  }
  0xb5   :  { %3743 = vmatpush2.bf16.msra.mxu0 %v12168_v58  ;;  %v12252_v58 = vld [vmem:[%s20170_s24 + $0xc88] ss:$40 sps:$4 sm:$0xff]  }
  0xb6   :  { %3768 = vmatpush1.bf16.msra.mxu1 %v12171_v59  ;;  %3744 = vmatprep.subr.bf16.mxu0 %v12176_v60  ;;  %v12255_v59 = vld [vmem:[%s20170_s24 + $0xf08] ss:$40 sps:$4 sm:$0xff]   ;;  %v12260_v60 = vld [vmem:[%s20170_s24 + $0x244] ss:$40 sps:$4 sm:$0xff]  }
  0xb7   :  { %3769 = vmatprep.subr.bf16.mxu1 %v12179_v61  ;;  %v12263_v61 = vld [vmem:[%s20170_s24 + $0x744] ss:$40 sps:$4 sm:$0xff]  }
  0xb9   :  { %3745 = vmatpush2.bf16.msra.mxu0 %v12174_v62  ;;  %v12258_v62 = vld [vmem:[%s20170_s24 + $0x240] ss:$40 sps:$4 sm:$0xff]  }
  0xba   :  { %3770 = vmatpush1.bf16.msra.mxu1 %v12177_v63  ;;  %3746 = vmatprep.subr.bf16.mxu0 %v12182_v0  ;;  %v12261_v63 = vld [vmem:[%s20170_s24 + $0x740] ss:$40 sps:$4 sm:$0xff]   ;;  %v12266_v0 = vld [vmem:[%s20170_s24 + $0x1f4] ss:$40 sps:$4 sm:$0xff]  }
  0xbb   :  { %3771 = vmatprep.subr.bf16.mxu1 %v12185_v1  ;;  %v12269_v1 = vld [vmem:[%s20170_s24 + $0x6f4] ss:$40 sps:$4 sm:$0xff]  }
  0xbd   :  { %3747 = vmatpush2.bf16.msra.mxu0 %v12180_v2  ;;  %v12264_v2 = vld [vmem:[%s20170_s24 + $0x1f0] ss:$40 sps:$4 sm:$0xff]  }
  0xbe   :  { %3772 = vmatpush1.bf16.msra.mxu1 %v12183_v3  ;;  %3748 = vmatprep.subr.bf16.mxu0 %v12188_v4  ;;  %v12267_v3 = vld [vmem:[%s20170_s24 + $0x6f0] ss:$40 sps:$4 sm:$0xff]   ;;  %v12272_v4 = vld [vmem:[%s20170_s24 + $0x1a4] ss:$40 sps:$4 sm:$0xff]  }
  0xbf   :  { %3773 = vmatprep.subr.bf16.mxu1 %v12191_v5  ;;  %v12270_v5 = vld [vmem:[%s20170_s24 + $0x1a0] ss:$40 sps:$4 sm:$0xff]  }
  0xc1   :  { %3749 = vmatpush2.bf16.msra.mxu0 %v12186_v8  ;;  %v12273_v8 = vld [vmem:[%s20170_s24 + $0x6a0] ss:$40 sps:$4 sm:$0xff]  }
  0xc2   :  { %3774 = vmatpush1.bf16.msra.mxu1 %v12189_v9  ;;  %3750 = vmatprep.subr.bf16.mxu0 %v12194_v10  ;;  %v12278_v9 = vld [vmem:[%s20170_s24 + $0x154] ss:$40 sps:$4 sm:$0xff]  }
  0xc3   :  { %3775 = vmatprep.subr.bf16.mxu1 %v12197_v11  ;;  %v12281_v10 = vld [vmem:[%s20170_s24 + $0x654] ss:$40 sps:$4 sm:$0xff]   ;;  %v12276_v11 = vld [vmem:[%s20170_s24 + $0x150] ss:$40 sps:$4 sm:$0xff]  }
  0xc5   :  { %3751 = vmatpush2.bf16.msra.mxu0 %v12192_v12  ;;  %v12279_v12 = vld [vmem:[%s20170_s24 + $0x650] ss:$40 sps:$4 sm:$0xff]  }
  0xc6   :  { %3776 = vmatpush1.bf16.msra.mxu1 %v12195_v13  ;;  %3752 = vmatprep.subr.bf16.mxu0 %v12200_v14  ;;  %v12284_v13 = vld [vmem:[%s20170_s24 + $0x104] ss:$40 sps:$4 sm:$0xff]  }
  0xc7   :  { %3777 = vmatprep.subr.bf16.mxu1 %v12203_v15  ;;  %v12287_v14 = vld [vmem:[%s20170_s24 + $0x604] ss:$40 sps:$4 sm:$0xff]   ;;  %v12282_v15 = vld [vmem:[%s20170_s24 + $0x100] ss:$40 sps:$4 sm:$0xff]  }
  0xc9   :  { %3753 = vmatpush2.bf16.msra.mxu0 %v12198_v18  ;;  %v12285_v18 = vld [vmem:[%s20170_s24 + $0x600] ss:$40 sps:$4 sm:$0xff]  }
  0xca   :  { %3778 = vmatpush1.bf16.msra.mxu1 %v12201_v19  ;;  %3754 = vmatprep.subr.bf16.mxu0 %v12206_v20  ;;  %v12290_v19 = vld [vmem:[%s20170_s24 + $0xb4] ss:$40 sps:$4 sm:$0xff]  }
  0xcb   :  { %3779 = vmatprep.subr.bf16.mxu1 %v12209_v21  ;;  %v12293_v20 = vld [vmem:[%s20170_s24 + $0x5b4] ss:$40 sps:$4 sm:$0xff]   ;;  %v12288_v21 = vld [vmem:[%s20170_s24 + $0xb0] ss:$40 sps:$4 sm:$0xff]  }
  0xcd   :  { %3755 = vmatpush2.bf16.msra.mxu0 %v12204_v22  ;;  %v12291_v22 = vld [vmem:[%s20170_s24 + $0x5b0] ss:$40 sps:$4 sm:$0xff]  }
  0xce   :  { %3780 = vmatpush1.bf16.msra.mxu1 %v12207_v23  ;;  %3806 = vmatprep.subr.bf16.mxu0 %v12215_v25  ;;  %v20044_v23 = vlaneseq  ;;  %v12299_v25 = vld [vmem:[%s20170_s24 + $0x564] ss:$40 sps:$4 sm:$0xff]  }
  0xcf   :  { %3781 = vmatprep.subr.bf16.mxu1 %v12212_v24  ;;  %v12296_v24 = vld [vmem:[%s20170_s24 + $0x64] ss:$40 sps:$4 sm:$0xff]  }
  0xd0   :  { %3757 = vmatmul.mubr.bf16.vlgmr.msra.gmra.mxu0 %v13994_v7 }
  0xd1   :  { %3807 = vmatpush1.bf16.msra.mxu0 %v12213_v27  ;;  %3838 = vmatprep.mubr.bf16.mxu0 %v13658_v16  ;;  %v12297_v27 = vld [vmem:[%s20170_s24 + $0x560] ss:$40 sps:$4 sm:$0xff]  }
  0xd2   :  { %3782 = vmatpush2.bf16.msra.mxu1 %v12210_v26  ;;  %3808 = vmatprep.subr.bf16.mxu0 %v12221_v29  ;;  %v12294_v26 = vld [vmem:[%s20170_s24 + $0x60] ss:$40 sps:$4 sm:$0xff]   ;;  %v12302_v29 = vld [vmem:[%s20170_s24 + $0x14] ss:$40 sps:$4 sm:$0xff]  }
  0xd3   :  { %3783 = vmatprep.subr.bf16.mxu1 %v12218_v28  ;;  %v14589_v28 = vshrl.u32 %v20044_v23, 7 }
  0xd5   :  { %3809 = vmatpush1.bf16.msra.mxu0 %v12219_v31  ;;  %v12300_v31 = vld [vmem:[%s20170_s24 + $0x10] ss:$40 sps:$4 sm:$0xff]  }
  0xd6   :  { %3784 = vmatpush2.bf16.msra.mxu1 %v12216_v30  ;;  %3810 = vmatprep.subr.bf16.mxu0 %v12227_v33  ;;  %v12305_v30 = vld [vmem:[%s20170_s24 + $0x514] ss:$40 sps:$4 sm:$0xff]   ;;  %v640_v33 = vld [vmem:[%s20172_s7] sm:$0xff] }
  0xd7   :  { %3785 = vmatprep.subr.bf16.mxu1 %v12224_v32  ;;  %v12303_v32 = vld [vmem:[%s20170_s24 + $0x510] ss:$40 sps:$4 sm:$0xff]  }
  0xd9   :  { %3811 = vmatpush1.bf16.msra.mxu0 %v12225_v36  ;;  %v12308_v36 = vld [vmem:[%s20170_s24 + $0x4c4] ss:$40 sps:$4 sm:$0xff]  }
  0xda   :  { %3786 = vmatpush2.bf16.msra.mxu1 %v12222_v34  ;;  %3812 = vmatprep.subr.bf16.mxu0 %v12233_v38  ;;  %v14607_v34 = vsub.s32 0, %v14589_v28  ;;  %v14616_v38 = vsub.s32 1, %v14589_v28 }
  0xdb   :  { %3787 = vmatprep.subr.bf16.mxu1 %v12230_v37  ;;  %v12311_v37 = vld [vmem:[%s20170_s24 + $0x9c4] ss:$40 sps:$4 sm:$0xff]  }
  0xdc   :  { %20173 = vst [vmem:[#allocation5_spill] sm:$0xff] %v14607_v34  ;;  %20174 = vst [vmem:[#allocation6_spill] sm:$0xff] %v14616_v38 }
  0xdd   :  { %3813 = vmatpush1.bf16.msra.mxu0 %v12231_v40  ;;  %v12306_v40 = vld [vmem:[%s20170_s24 + $0x4c0] ss:$40 sps:$4 sm:$0xff]  }
  0xde   :  { %3788 = vmatpush2.bf16.msra.mxu1 %v12228_v39  ;;  %3814 = vmatprep.subr.bf16.mxu0 %v12239_v42  ;;  %v647_v39 = vrot.slane %v640_v33, %v14607_v34  ;;  %v12314_v42 = vld [vmem:[%s20170_s24 + $0x474] ss:$40 sps:$4 sm:$0xff]  }
  0xdf   :  { %3789 = vmatprep.subr.bf16.mxu1 %v12236_v41  ;;  %v12309_v41 = vld [vmem:[%s20170_s24 + $0x9c0] ss:$40 sps:$4 sm:$0xff]  }
  0xe1   :  { %3815 = vmatpush1.bf16.msra.mxu0 %v12237_v45  ;;  %v651_v45 = vrot.slane %v640_v33, %v14616_v38  ;;  %v12360_v33 = vld [vmem:[%s20170_s24 + $0xbf0] ss:$40 sps:$4 sm:$0xff]  }
  0xe2   :  { %3790 = vmatpush2.bf16.msra.mxu1 %v12234_v43  ;;  %3816 = vmatprep.subr.bf16.mxu0 %v12245_v48  ;;  %v12317_v43 = vld [vmem:[%s20170_s24 + $0x974] ss:$40 sps:$4 sm:$0xff]  }
  0xe3   :  { %3791 = vmatprep.subr.bf16.mxu1 %v12242_v46 }
  0xe5   :  { %3817 = vmatpush1.bf16.msra.mxu0 %v12243_v50 }
  0xe6   :  { %3792 = vmatpush2.bf16.msra.mxu1 %v12240_v49  ;;  %3818 = vmatprep.subr.bf16.mxu0 %v12251_v53  ;;  %v12312_v49 = vld [vmem:[%s20170_s24 + $0x470] ss:$40 sps:$4 sm:$0xff]   ;;  %v12320_v53 = vld [vmem:[%s20170_s24 + $0x424] ss:$40 sps:$4 sm:$0xff]  }
  0xe7   :  { %3793 = vmatprep.subr.bf16.mxu1 %v12248_v52  ;;  %v12315_v52 = vld [vmem:[%s20170_s24 + $0x970] ss:$40 sps:$4 sm:$0xff]  }
  0xe9   :  { %3819 = vmatpush1.bf16.msra.mxu0 %v12249_v55 }
  0xea   :  { %3794 = vmatpush2.bf16.msra.mxu1 %v12246_v54  ;;  %3820 = vmatprep.subr.bf16.mxu0 %v12257_v57 }
  0xeb   :  { %3795 = vmatprep.subr.bf16.mxu1 %v12254_v56  ;;  %v12323_v56 = vld [vmem:[%s20170_s24 + $0x924] ss:$40 sps:$4 sm:$0xff]  }
  0xed   :  { %3821 = vmatpush1.bf16.msra.mxu0 %v12255_v59  ;;  %v12318_v59 = vld [vmem:[%s20170_s24 + $0x420] ss:$40 sps:$4 sm:$0xff]  }
  0xee   :  { %3796 = vmatpush2.bf16.msra.mxu1 %v12252_v58  ;;  %3847 = vmatprep.subr.bf16.mxu0 %v12260_v60 }
  0xef   :  { %3888 = vmatprep.subr.bf16.mxu1 %v12263_v61  ;;  %v12321_v61 = vld [vmem:[%s20170_s24 + $0x920] ss:$40 sps:$4 sm:$0xff]  }
  0xf0   :  { %3839 = vmatmul.mubr.bf16.vlgmr.msra.gmra.mxu0 %v14111_v44  ;;  %v12275_v44 = vld [vmem:[%s20170_s24 + $0x6a4] ss:$40 sps:$4 sm:$0xff]  }
  0xf1   :  { %3798 = vmatmul.mubr.bf16.vlgmr.msra.gmra.mxu1 %v14210_v17  ;;  %3848 = vmatpush1.bf16.msra.mxu0 %v12258_v62 }
  0xf2   :  { %3889 = vmatpush1.bf16.msra.mxu1 %v12261_v63  ;;  %3849 = vmatprep.subr.bf16.mxu0 %v12266_v0 }
  0xf3   :  { %3890 = vmatprep.subr.bf16.mxu1 %v12269_v1  ;;  %3879 = vmatprep.mubr.bf16.mxu0 %v13923_v47  ;;  %v12326_v1 = vld [vmem:[%s20170_s24 + $0x3d4] ss:$40 sps:$4 sm:$0xff]  }
  0xf4   :  { %3920 = vmatprep.mubr.bf16.mxu1 %v13934_v51 }
  0xf5   :  { %3850 = vmatpush1.bf16.msra.mxu0 %v12264_v2  ;;  %v12329_v2 = vld [vmem:[%s20170_s24 + $0x8d4] ss:$40 sps:$4 sm:$0xff]  }
  0xf6   :  { %3891 = vmatpush1.bf16.msra.mxu1 %v12267_v3  ;;  %3851 = vmatprep.subr.bf16.mxu0 %v12272_v4  ;;  %v12324_v4 = vld [vmem:[%s20170_s24 + $0x3d0] ss:$40 sps:$4 sm:$0xff]  }
  0xf7   :  { %3892 = vmatprep.subr.bf16.mxu1 %v12275_v44  ;;  %v12327_v44 = vld [vmem:[%s20170_s24 + $0x8d0] ss:$40 sps:$4 sm:$0xff]  }
  0xf9   :  { %3852 = vmatpush1.bf16.msra.mxu0 %v12270_v5  ;;  %v12332_v5 = vld [vmem:[%s20170_s24 + $0x384] ss:$40 sps:$4 sm:$0xff]  }
  0xfa   :  { %3893 = vmatpush1.bf16.msra.mxu1 %v12273_v8  ;;  %3853 = vmatprep.subr.bf16.mxu0 %v12278_v9  ;;  %v12335_v8 = vld [vmem:[%s20170_s24 + $0x884] ss:$40 sps:$4 sm:$0xff]   ;;  %v12330_v9 = vld [vmem:[%s20170_s24 + $0x380] ss:$40 sps:$4 sm:$0xff]  }
  0xfb   :  { %3894 = vmatprep.subr.bf16.mxu1 %v12281_v10  ;;  %v12333_v10 = vld [vmem:[%s20170_s24 + $0x880] ss:$40 sps:$4 sm:$0xff]  }
  0xfd   :  { %3854 = vmatpush1.bf16.msra.mxu0 %v12276_v11  ;;  %v12338_v11 = vld [vmem:[%s20170_s24 + $0x334] ss:$40 sps:$4 sm:$0xff]  }
  0xfe   :  { %3895 = vmatpush1.bf16.msra.mxu1 %v12279_v12  ;;  %3855 = vmatprep.subr.bf16.mxu0 %v12284_v13  ;;  %v12341_v12 = vld [vmem:[%s20170_s24 + $0x834] ss:$40 sps:$4 sm:$0xff]   ;;  %v12336_v13 = vld [vmem:[%s20170_s24 + $0x330] ss:$40 sps:$4 sm:$0xff]  }
  0xff   :  { %3896 = vmatprep.subr.bf16.mxu1 %v12287_v14  ;;  %v12339_v14 = vld [vmem:[%s20170_s24 + $0x830] ss:$40 sps:$4 sm:$0xff]  }
 0x101   :  { %3856 = vmatpush1.bf16.msra.mxu0 %v12282_v15  ;;  %v12344_v15 = vld [vmem:[%s20170_s24 + $0x2e4] ss:$40 sps:$4 sm:$0xff]  }
 0x102   :  { %3897 = vmatpush1.bf16.msra.mxu1 %v12285_v18  ;;  %3857 = vmatprep.subr.bf16.mxu0 %v12290_v19  ;;  %v12347_v18 = vld [vmem:[%s20170_s24 + $0x7e4] ss:$40 sps:$4 sm:$0xff]   ;;  %v12342_v19 = vld [vmem:[%s20170_s24 + $0x2e0] ss:$40 sps:$4 sm:$0xff]  }
 0x103   :  { %3898 = vmatprep.subr.bf16.mxu1 %v12293_v20  ;;  %v12345_v20 = vld [vmem:[%s20170_s24 + $0x7e0] ss:$40 sps:$4 sm:$0xff]  }
 0x105   :  { %3858 = vmatpush1.bf16.msra.mxu0 %v12288_v21  ;;  %v12350_v21 = vld [vmem:[%s20170_s24 + $0x294] ss:$40 sps:$4 sm:$0xff]  }
 0x106   :  { %3899 = vmatpush1.bf16.msra.mxu1 %v12291_v22  ;;  %3859 = vmatprep.subr.bf16.mxu0 %v12296_v24  ;;  %v12353_v22 = vld [vmem:[%s20170_s24 + $0x794] ss:$40 sps:$4 sm:$0xff]   ;;  %v12348_v24 = vld [vmem:[%s20170_s24 + $0x290] ss:$40 sps:$4 sm:$0xff]  }
 0x107   :  { %3900 = vmatprep.subr.bf16.mxu1 %v12299_v25  ;;  %v12351_v25 = vld [vmem:[%s20170_s24 + $0x790] ss:$40 sps:$4 sm:$0xff]  }
 0x109   :  { %3860 = vmatpush1.bf16.msra.mxu0 %v12294_v26  ;;  %v12356_v26 = vld [vmem:[%s20170_s24 + $0xc44] ss:$40 sps:$4 sm:$0xff]  }
 0x10a   :  { %3901 = vmatpush1.bf16.msra.mxu1 %v12297_v27  ;;  %3861 = vmatprep.subr.bf16.mxu0 %v12302_v29  ;;  %v12359_v27 = vld [vmem:[%s20170_s24 + $0x1144] ss:$40 sps:$4 sm:$0xff]   ;;  %v12354_v29 = vld [vmem:[%s20170_s24 + $0xc40] ss:$40 sps:$4 sm:$0xff]  }
 0x10b   :  { %3902 = vmatprep.subr.bf16.mxu1 %v12305_v30  ;;  %v12357_v30 = vld [vmem:[%s20170_s24 + $0x1140] ss:$40 sps:$4 sm:$0xff]  }
 0x10d   :  { %3862 = vmatpush1.bf16.msra.mxu0 %v12300_v31  ;;  %v12362_v31 = vld [vmem:[%s20170_s24 + $0xbf4] ss:$40 sps:$4 sm:$0xff]  }
 0x10e   :  { %3903 = vmatpush1.bf16.msra.mxu1 %v12303_v32  ;;  %3863 = vmatprep.subr.bf16.mxu0 %v12308_v36  ;;  %v12365_v32 = vld [vmem:[%s20170_s24 + $0x10f4] ss:$40 sps:$4 sm:$0xff]   ;;  %v12363_v36 = vld [vmem:[%s20170_s24 + $0x10f0] ss:$40 sps:$4 sm:$0xff]  }
 0x10f   :  { %3904 = vmatprep.subr.bf16.mxu1 %v12311_v37 }
 0x110   :  { %v3553_v46 = vpop.f32.mrf.mxu0 }
 0x111   :  { %v3594_v48 = vpop.f32.mrf.mxu1  ;;  %v3554_v50 = vadd.f32 %v3553_v46, %v647_v39  ;;  %3864 = vmatpush2.bf16.msra.mxu0 %v12306_v40  ;;  %v12368_v39 = vld [vmem:[%s20170_s24 + $0xba4] ss:$40 sps:$4 sm:$0xff]   ;;  %v12374_v46 = vld [vmem:[%s20170_s24 + $0xb54] ss:$40 sps:$4 sm:$0xff]  }
 0x112   :  { %3905 = vmatpush2.bf16.msra.mxu1 %v12309_v41  ;;  %v3555_v54 = vpop.f32.mrf.mxu0  ;;  %3865 = vmatprep.subr.bf16.mxu0 %v12314_v42  ;;  %v12371_v40 = vld [vmem:[%s20170_s24 + $0x10a4] ss:$40 sps:$4 sm:$0xff]   ;;  %v12366_v42 = vld [vmem:[%s20170_s24 + $0xba0] ss:$40 sps:$4 sm:$0xff]  }
 0x113   :  { %v3596_v55 = vpop.f32.mrf.mxu1  ;;  %3906 = vmatprep.subr.bf16.mxu1 %v12317_v43  ;;  %v3556_v57 = vadd.f32 %v3555_v54, %v651_v45  ;;  %v14644_v58 = vadd.f32 %v3594_v48, %v3554_v50  ;;  %v12369_v43 = vld [vmem:[%s20170_s24 + $0x10a0] ss:$40 sps:$4 sm:$0xff]   ;;  %v12377_v48 = vld [vmem:[%s20170_s24 + $0x1054] ss:$40 sps:$4 sm:$0xff]   ;;  %v12372_v50 = vld [vmem:[%s20170_s24 + $0xb50] ss:$40 sps:$4 sm:$0xff]  }
 0x114   :  { %v3557_v60 = vpop.f32.mrf.mxu0  ;;  %v12383_v54 = vld [vmem:[%s20170_s24 + $0x1004] ss:$40 sps:$4 sm:$0xff]  }
 0x115   :  { %v3598_v62 = vpop.f32.mrf.mxu1  ;;  %v14652_v63 = vadd.f32 %v3596_v55, %v3556_v57  ;;  %3866 = vmatpush2.bf16.msra.mxu0 %v12312_v49  ;;  %v12378_v55 = vld [vmem:[%s20170_s24 + $0xb00] ss:$40 sps:$4 sm:$0xff]   ;;  %v12386_v57 = vld [vmem:[%s20170_s24 + $0xab4] ss:$40 sps:$4 sm:$0xff]   ;;  %v12384_v60 = vld [vmem:[%s20170_s24 + $0xab0] ss:$40 sps:$4 sm:$0xff]  }
 0x116   :  { %3907 = vmatpush2.bf16.msra.mxu1 %v12315_v52  ;;  %v3558_v0 = vpop.f32.mrf.mxu0  ;;  %3867 = vmatprep.subr.bf16.mxu0 %v12320_v53  ;;  %v12375_v52 = vld [vmem:[%s20170_s24 + $0x1050] ss:$40 sps:$4 sm:$0xff]   ;;  %v12380_v53 = vld [vmem:[%s20170_s24 + $0xb04] ss:$40 sps:$4 sm:$0xff]  }
 0x117   :  { %3908 = vmatprep.subr.bf16.mxu1 %v12323_v56  ;;  %v3599_v3 = vpop.f32.mrf.mxu1  ;;  %v12381_v56 = vld [vmem:[%s20170_s24 + $0x1000] ss:$40 sps:$4 sm:$0xff]   ;;  %v12392_v62 = vld [vmem:[%s20170_s24 + $0xa64] ss:$40 sps:$4 sm:$0xff]  }
 0x118   :  { %v12395_v0 = vld [vmem:[%s20170_s24 + $0xf64] ss:$40 sps:$4 sm:$0xff]   ;;  %v12398_v3 = vld [vmem:[%s20170_s24 + $0xa14] ss:$40 sps:$4 sm:$0xff]  }
 0x119   :  { %3868 = vmatpush2.bf16.msra.mxu0 %v12318_v59  ;;  %v12389_v59 = vld [vmem:[%s20170_s24 + $0xfb4] ss:$40 sps:$4 sm:$0xff]  }
 0x11a   :  { %3909 = vmatpush2.bf16.msra.mxu1 %v12321_v61  ;;  %3869 = vmatprep.subr.bf16.mxu0 %v12326_v1  ;;  %v12387_v61 = vld [vmem:[%s20170_s24 + $0xfb0] ss:$40 sps:$4 sm:$0xff]   ;;  %v12390_v1 = vld [vmem:[%s20170_s24 + $0xa60] ss:$40 sps:$4 sm:$0xff]  }
 0x11b   :  { %3910 = vmatprep.subr.bf16.mxu1 %v12329_v2  ;;  %v12393_v2 = vld [vmem:[%s20170_s24 + $0xf60] ss:$40 sps:$4 sm:$0xff]  }
 0x11d   :  { %3870 = vmatpush2.bf16.msra.mxu0 %v12324_v4  ;;  %v12401_v4 = vld [vmem:[%s20170_s24 + $0xf14] ss:$40 sps:$4 sm:$0xff]  }
 0x11e   :  { %3911 = vmatpush2.bf16.msra.mxu1 %v12327_v44  ;;  %3871 = vmatprep.subr.bf16.mxu0 %v12332_v5  ;;  %v12396_v44 = vld [vmem:[%s20170_s24 + $0xa10] ss:$40 sps:$4 sm:$0xff]  }
 0x11f   :  { %3912 = vmatprep.subr.bf16.mxu1 %v12335_v8  ;;  %v12399_v5 = vld [vmem:[%s20170_s24 + $0xf10] ss:$40 sps:$4 sm:$0xff]   ;;  %v12404_v8 = vld [vmem:[%s20170_s24 + $0xec4] ss:$40 sps:$4 sm:$0xff]  }
 0x121   :  { %3872 = vmatpush2.bf16.msra.mxu0 %v12330_v9  ;;  %v12407_v9 = vld [vmem:[%s20170_s24 + $0x24c] ss:$40 sps:$4 sm:$0xff]  }
 0x122   :  { %3913 = vmatpush2.bf16.msra.mxu1 %v12333_v10  ;;  %3873 = vmatprep.subr.bf16.mxu0 %v12338_v11  ;;  %v12402_v10 = vld [vmem:[%s20170_s24 + $0xec0] ss:$40 sps:$4 sm:$0xff]  }
 0x123   :  { %3914 = vmatprep.subr.bf16.mxu1 %v12341_v12  ;;  %v12405_v11 = vld [vmem:[%s20170_s24 + $0x248] ss:$40 sps:$4 sm:$0xff]   ;;  %v12410_v12 = vld [vmem:[%s20170_s24 + $0xe74] ss:$40 sps:$4 sm:$0xff]  }
 0x125   :  { %3874 = vmatpush2.bf16.msra.mxu0 %v12336_v13  ;;  %v12413_v13 = vld [vmem:[%s20170_s24 + $0x1fc] ss:$40 sps:$4 sm:$0xff]  }
 0x126   :  { %3915 = vmatpush2.bf16.msra.mxu1 %v12339_v14  ;;  %3875 = vmatprep.subr.bf16.mxu0 %v12344_v15  ;;  %v13358_v15 = vld [vmem:[%s20171_s28 + $0x18] ss:$0 sps:$4 sm:$0xff]  }
 0x127   :  { %3916 = vmatprep.subr.bf16.mxu1 %v12347_v18 }
 0x129   :  { %3876 = vmatpush2.bf16.msra.mxu0 %v12342_v19  ;;  %v12408_v19 = vld [vmem:[%s20170_s24 + $0xe70] ss:$40 sps:$4 sm:$0xff]  }
 0x12a   :  { %3917 = vmatpush2.bf16.msra.mxu1 %v12345_v20  ;;  %3877 = vmatprep.subr.bf16.mxu0 %v12350_v21  ;;  %v12411_v20 = vld [vmem:[%s20170_s24 + $0x1f8] ss:$40 sps:$4 sm:$0xff]  }
 0x12b   :  { %3918 = vmatprep.subr.bf16.mxu1 %v12353_v22  ;;  %v12416_v22 = vld [vmem:[%s20170_s24 + $0xe24] ss:$40 sps:$4 sm:$0xff]  }
 0x12d   :  { %3878 = vmatpush2.bf16.msra.mxu0 %v12348_v24 }
 0x12e   :  { %3919 = vmatpush2.bf16.msra.mxu1 %v12351_v25  ;;  %3929 = vmatprep.subr.bf16.mxu0 %v12356_v26 }
 0x12f   :  { %3970 = vmatprep.subr.bf16.mxu1 %v12359_v27 }
 0x130   :  { %3880 = vmatmul.mubr.bf16.vlgmr.msra.gmra.mxu0 %v13992_v6 }
 0x131   :  { %3921 = vmatmul.mubr.bf16.vlgmr.msra.gmra.mxu1 %v13994_v7  ;;  %v14740_v37 = vpop.f32.mrf.mxu1  ;;  %3930 = vmatpush1.bf16.msra.mxu0 %v12354_v29  ;;  %v12414_v29 = vld [vmem:[%s20170_s24 + $0xe20] ss:$40 sps:$4 sm:$0xff]  }
 0x132   :  { %3971 = vmatpush1.bf16.msra.mxu1 %v12357_v30  ;;  %3931 = vmatprep.subr.bf16.mxu0 %v12362_v31  ;;  %v12417_v30 = vld [vmem:[%s20170_s24 + $0x1a8] ss:$40 sps:$4 sm:$0xff]  }
 0x133   :  { %3972 = vmatprep.subr.bf16.mxu1 %v12365_v32  ;;  %v14748_v41 = vpop.f32.mrf.mxu1  ;;  %4002 = vmatprep.mubr.bf16.mxu1 %v13658_v16  ;;  %v12425_v32 = vld [vmem:[%s20170_s24 + $0x15c] ss:$40 sps:$4 sm:$0xff]  }
 0x134   :  { %3961 = vmatprep.mubr.bf16.mxu0 %v14081_v35 }
 0x135   :  { %v3680_v45 = vpop.f32.mrf.mxu1  ;;  %3932 = vmatpush1.bf16.msra.mxu0 %v12360_v33  ;;  %v12420_v33 = vld [vmem:[%s20170_s24 + $0xdd0] ss:$40 sps:$4 sm:$0xff]  }
 0x136   :  { %3973 = vmatpush1.bf16.msra.mxu1 %v12363_v36  ;;  %3933 = vmatprep.subr.bf16.mxu0 %v12368_v39  ;;  %v12423_v36 = vld [vmem:[%s20170_s24 + $0x158] ss:$40 sps:$4 sm:$0xff]   ;;  %v12431_v39 = vld [vmem:[%s20170_s24 + $0x10c] ss:$40 sps:$4 sm:$0xff]  }
 0x137   :  { %3974 = vmatprep.subr.bf16.mxu1 %v12371_v40  ;;  %v3681_v49 = vpop.f32.mrf.mxu1  ;;  %v12426_v40 = vld [vmem:[%s20170_s24 + $0xd80] ss:$40 sps:$4 sm:$0xff]   ;;  %v12432_v45 = vld [vmem:[%s20170_s24 + $0xd30] ss:$40 sps:$4 sm:$0xff]  }
 0x138   :  { %v12443_v49 = vld [vmem:[%s20170_s24 + $0x6c] ss:$40 sps:$4 sm:$0xff]  }
 0x139   :  { %3934 = vmatpush1.bf16.msra.mxu0 %v12366_v42  ;;  %v12434_v42 = vld [vmem:[%s20170_s24 + $0xd34] ss:$40 sps:$4 sm:$0xff]  }
 0x13a   :  { %3975 = vmatpush1.bf16.msra.mxu1 %v12369_v43  ;;  %3935 = vmatprep.subr.bf16.mxu0 %v12374_v46  ;;  %v12437_v43 = vld [vmem:[%s20170_s24 + $0xbc] ss:$40 sps:$4 sm:$0xff]   ;;  %v12435_v46 = vld [vmem:[%s20170_s24 + $0xb8] ss:$40 sps:$4 sm:$0xff]  }
 0x13b   :  { %3976 = vmatprep.subr.bf16.mxu1 %v12377_v48  ;;  %v12440_v48 = vld [vmem:[%s20170_s24 + $0xce4] ss:$40 sps:$4 sm:$0xff]  }
 0x13d   :  { %3936 = vmatpush1.bf16.msra.mxu0 %v12372_v50  ;;  %v12438_v50 = vld [vmem:[%s20170_s24 + $0xce0] ss:$40 sps:$4 sm:$0xff]  }
 0x13e   :  { %3977 = vmatpush1.bf16.msra.mxu1 %v12375_v52  ;;  %3937 = vmatprep.subr.bf16.mxu0 %v12380_v53  ;;  %v12441_v52 = vld [vmem:[%s20170_s24 + $0x68] ss:$40 sps:$4 sm:$0xff]   ;;  %v12446_v53 = vld [vmem:[%s20170_s24 + $0xc94] ss:$40 sps:$4 sm:$0xff]  }
 0x13f   :  { %3978 = vmatprep.subr.bf16.mxu1 %v12383_v54  ;;  %v12449_v54 = vld [vmem:[%s20170_s24 + $0x1c] ss:$40 sps:$4 sm:$0xff]  }
 0x141   :  { %3938 = vmatpush1.bf16.msra.mxu0 %v12378_v55  ;;  %v12444_v55 = vld [vmem:[%s20170_s24 + $0xc90] ss:$40 sps:$4 sm:$0xff]  }
 0x142   :  { %3979 = vmatpush1.bf16.msra.mxu1 %v12381_v56  ;;  %3939 = vmatprep.subr.bf16.mxu0 %v12386_v57  ;;  %v12447_v56 = vld [vmem:[%s20170_s24 + $0x18] ss:$40 sps:$4 sm:$0xff]   ;;  %v12452_v57 = vld [vmem:[%s20170_s24 + $0x4cc] ss:$40 sps:$4 sm:$0xff]  }
 0x143   :  { %3980 = vmatprep.subr.bf16.mxu1 %v12389_v59  ;;  %v12455_v59 = vld [vmem:[%s20170_s24 + $0x74c] ss:$40 sps:$4 sm:$0xff]  }
 0x145   :  { %3940 = vmatpush1.bf16.msra.mxu0 %v12384_v60  ;;  %v12450_v60 = vld [vmem:[%s20170_s24 + $0x4c8] ss:$40 sps:$4 sm:$0xff]  }
 0x146   :  { %3981 = vmatpush1.bf16.msra.mxu1 %v12387_v61  ;;  %3941 = vmatprep.subr.bf16.mxu0 %v12392_v62  ;;  %v12453_v61 = vld [vmem:[%s20170_s24 + $0x748] ss:$40 sps:$4 sm:$0xff]   ;;  %v12458_v62 = vld [vmem:[%s20170_s24 + $0x47c] ss:$40 sps:$4 sm:$0xff]  }
 0x147   :  { %3982 = vmatprep.subr.bf16.mxu1 %v12395_v0  ;;  %v12461_v0 = vld [vmem:[%s20170_s24 + $0x6fc] ss:$40 sps:$4 sm:$0xff]  }
 0x149   :  { %3942 = vmatpush1.bf16.msra.mxu0 %v12390_v1 }
 0x14a   :  { %3983 = vmatpush1.bf16.msra.mxu1 %v12393_v2  ;;  %3943 = vmatprep.subr.bf16.mxu0 %v12398_v3  ;;  %v12456_v2 = vld [vmem:[%s20170_s24 + $0x478] ss:$40 sps:$4 sm:$0xff]  }
 0x14b   :  { %3984 = vmatprep.subr.bf16.mxu1 %v12401_v4  ;;  %v12459_v3 = vld [vmem:[%s20170_s24 + $0x6f8] ss:$40 sps:$4 sm:$0xff]   ;;  %v12464_v4 = vld [vmem:[%s20170_s24 + $0x42c] ss:$40 sps:$4 sm:$0xff]  }
 0x14d   :  { %3944 = vmatpush1.bf16.msra.mxu0 %v12396_v44  ;;  %v12467_v44 = vld [vmem:[%s20170_s24 + $0x6ac] ss:$40 sps:$4 sm:$0xff]  }
 0x14e   :  { %3985 = vmatpush1.bf16.msra.mxu1 %v12399_v5  ;;  %3945 = vmatprep.subr.bf16.mxu0 %v12404_v8  ;;  %v12462_v8 = vld [vmem:[%s20170_s24 + $0x428] ss:$40 sps:$4 sm:$0xff]  }
 0x14f   :  { %4011 = vmatprep.subr.bf16.mxu1 %v12407_v9  ;;  %v12465_v9 = vld [vmem:[%s20170_s24 + $0x6a8] ss:$40 sps:$4 sm:$0xff]  }
 0x150   :  { %v3635_v14 = vpop.f32.mrf.mxu0 }
 0x151   :  { %4003 = vmatmul.mubr.bf16.vlgmr.msra.gmra.mxu1 %v13358_v15  ;;  %v3636_v18 = vadd.f32 %v3635_v14, %v14644_v58  ;;  %3946 = vmatpush2.bf16.msra.mxu0 %v12402_v10  ;;  %v12419_v58 = vld [vmem:[%s20170_s24 + $0x1ac] ss:$40 sps:$4 sm:$0xff]   ;;  %v12468_v14 = vld [vmem:[%s20170_s24 + $0x3d8] ss:$40 sps:$4 sm:$0xff]  }
 0x152   :  { %4012 = vmatpush1.bf16.msra.mxu1 %v12405_v11  ;;  %v3637_v21 = vpop.f32.mrf.mxu0  ;;  %3947 = vmatprep.subr.bf16.mxu0 %v12410_v12  ;;  %v12470_v11 = vld [vmem:[%s20170_s24 + $0x3dc] ss:$40 sps:$4 sm:$0xff]   ;;  %v12471_v15 = vld [vmem:[%s20170_s24 + $0x658] ss:$40 sps:$4 sm:$0xff]  }
 0x153   :  { %4013 = vmatprep.subr.bf16.mxu1 %v12413_v13  ;;  %v14853_v24 = vadd.f32 %v14740_v37, %v3636_v18  ;;  %v3638_v25 = vadd.f32 %v3637_v21, %v14652_v63  ;;  %4043 = vmatprep.mubr.bf16.mxu1 %v13923_v47  ;;  %v12422_v63 = vld [vmem:[%s20170_s24 + $0xdd4] ss:$40 sps:$4 sm:$0xff]   ;;  %v12428_v37 = vld [vmem:[%s20170_s24 + $0xd84] ss:$40 sps:$4 sm:$0xff]   ;;  %v12477_v21 = vld [vmem:[%s20170_s24 + $0x608] ss:$40 sps:$4 sm:$0xff]  }
 0x154   :  { %v3639_v26 = vpop.f32.mrf.mxu0  ;;  %v12473_v12 = vld [vmem:[%s20170_s24 + $0x65c] ss:$40 sps:$4 sm:$0xff]   ;;  %v12476_v18 = vld [vmem:[%s20170_s24 + $0x38c] ss:$40 sps:$4 sm:$0xff]  }
 0x155   :  { %v14858_v27 = vadd.f32 %v14748_v41, %v3638_v25  ;;  %3948 = vmatpush2.bf16.msra.mxu0 %v12408_v19  ;;  %v12429_v41 = vld [vmem:[%s20170_s24 + $0x108] ss:$40 sps:$4 sm:$0xff]   ;;  %v12479_v19 = vld [vmem:[%s20170_s24 + $0x60c] ss:$40 sps:$4 sm:$0xff]   ;;  %v12480_v25 = vld [vmem:[%s20170_s24 + $0x338] ss:$40 sps:$4 sm:$0xff]  }
 0x156   :  { %4014 = vmatpush1.bf16.msra.mxu1 %v12411_v20  ;;  %v3640_v31 = vpop.f32.mrf.mxu0  ;;  %3949 = vmatprep.subr.bf16.mxu0 %v12416_v22  ;;  %v12474_v20 = vld [vmem:[%s20170_s24 + $0x388] ss:$40 sps:$4 sm:$0xff]   ;;  %v12482_v22 = vld [vmem:[%s20170_s24 + $0x33c] ss:$40 sps:$4 sm:$0xff]   ;;  %v12483_v26 = vld [vmem:[%s20170_s24 + $0x5b8] ss:$40 sps:$4 sm:$0xff]  }
 0x157   :  { %4015 = vmatprep.subr.bf16.mxu1 %v12419_v58  ;;  %v12485_v58 = vld [vmem:[%s20170_s24 + $0x5bc] ss:$40 sps:$4 sm:$0xff]   ;;  %v12486_v31 = vld [vmem:[%s20170_s24 + $0x2e8] ss:$40 sps:$4 sm:$0xff]  }
 0x159   :  { %3950 = vmatpush2.bf16.msra.mxu0 %v12414_v29  ;;  %v12488_v29 = vld [vmem:[%s20170_s24 + $0x2ec] ss:$40 sps:$4 sm:$0xff]  }
 0x15a   :  { %4016 = vmatpush1.bf16.msra.mxu1 %v12417_v30  ;;  %3951 = vmatprep.subr.bf16.mxu0 %v12422_v63  ;;  %v12491_v30 = vld [vmem:[%s20170_s24 + $0x56c] ss:$40 sps:$4 sm:$0xff]   ;;  %v12489_v63 = vld [vmem:[%s20170_s24 + $0x568] ss:$40 sps:$4 sm:$0xff]  }
 0x15b   :  { %4017 = vmatprep.subr.bf16.mxu1 %v12425_v32  ;;  %v15017_v32 = vsub.s32 2, %v14589_v28 }
 0x15d   :  { %3952 = vmatpush2.bf16.msra.mxu0 %v12420_v33  ;;  %20175 = vst [vmem:[#allocation7_spill] sm:$0xff] %v15017_v32  ;;  %v12494_v33 = vld [vmem:[%s20170_s24 + $0x29c] ss:$40 sps:$4 sm:$0xff]  }
 0x15e   :  { %4018 = vmatpush1.bf16.msra.mxu1 %v12423_v36  ;;  %3953 = vmatprep.subr.bf16.mxu0 %v12428_v37  ;;  %v12497_v36 = vld [vmem:[%s20170_s24 + $0x51c] ss:$40 sps:$4 sm:$0xff]   ;;  %v15026_v37 = vsub.s32 3, %v14589_v28 }
 0x15f   :  { %4019 = vmatprep.subr.bf16.mxu1 %v12431_v39  ;;  %v12492_v39 = vld [vmem:[%s20170_s24 + $0x298] ss:$40 sps:$4 sm:$0xff]  }
 0x160   :  { %20176 = vst [vmem:[#allocation8_spill] sm:$0xff] %v15026_v37 }
 0x161   :  { %3954 = vmatpush2.bf16.msra.mxu0 %v12426_v40  ;;  %v12495_v40 = vld [vmem:[%s20170_s24 + $0x518] ss:$40 sps:$4 sm:$0xff]  }
 0x162   :  { %4020 = vmatpush1.bf16.msra.mxu1 %v12429_v41  ;;  %3955 = vmatprep.subr.bf16.mxu0 %v12434_v42  ;;  %v15037_v41 = vld [vmem:[%s20172_s7] sm:$0xff] }
 0x163   :  { %4021 = vmatprep.subr.bf16.mxu1 %v12437_v43  ;;  %v655_v42 = vrot.slane %v15037_v41, %v15017_v32  ;;  %v12500_v43 = vld [vmem:[%s20170_s24 + $0x9cc] ss:$40 sps:$4 sm:$0xff]  }
 0x165   :  { %3956 = vmatpush2.bf16.msra.mxu0 %v12432_v45  ;;  %v12503_v45 = vld [vmem:[%s20170_s24 + $0xc4c] ss:$40 sps:$4 sm:$0xff]  }
 0x166   :  { %4022 = vmatpush1.bf16.msra.mxu1 %v12435_v46  ;;  %3957 = vmatprep.subr.bf16.mxu0 %v12440_v48  ;;  %v659_v46 = vrot.slane %v15037_v41, %v15026_v37  ;;  %v12498_v48 = vld [vmem:[%s20170_s24 + $0x9c8] ss:$40 sps:$4 sm:$0xff]  }
 0x167   :  { %4023 = vmatprep.subr.bf16.mxu1 %v12443_v49  ;;  %v12501_v49 = vld [vmem:[%s20170_s24 + $0xc48] ss:$40 sps:$4 sm:$0xff]  }
 0x169   :  { %3958 = vmatpush2.bf16.msra.mxu0 %v12438_v50 }
 0x16a   :  { %4024 = vmatpush1.bf16.msra.mxu1 %v12441_v52  ;;  %3959 = vmatprep.subr.bf16.mxu0 %v12446_v53  ;;  %v12506_v52 = vld [vmem:[%s20170_s24 + $0x97c] ss:$40 sps:$4 sm:$0xff]  }
 0x16b   :  { %4025 = vmatprep.subr.bf16.mxu1 %v12449_v54  ;;  %v12509_v53 = vld [vmem:[%s20170_s24 + $0xbfc] ss:$40 sps:$4 sm:$0xff]  }
 0x16d   :  { %3960 = vmatpush2.bf16.msra.mxu0 %v12444_v55 }
 0x16e   :  { %4026 = vmatpush1.bf16.msra.mxu1 %v12447_v56  ;;  %4052 = vmatprep.subr.bf16.mxu0 %v12455_v59  ;;  %v12507_v59 = vld [vmem:[%s20170_s24 + $0xbf8] ss:$40 sps:$4 sm:$0xff]  }
 0x16f   :  { %4027 = vmatprep.subr.bf16.mxu1 %v12452_v57  ;;  %v12504_v57 = vld [vmem:[%s20170_s24 + $0x978] ss:$40 sps:$4 sm:$0xff]  }
 0x170   :  { %3962 = vmatmul.mubr.bf16.vlgmr.msra.gmra.mxu0 %v14210_v17 }
 0x171   :  { %v14945_v1 = vpop.f32.mrf.mxu1  ;;  %4053 = vmatpush1.bf16.msra.mxu0 %v12453_v61  ;;  %4084 = vmatprep.mubr.bf16.mxu0 %v13934_v51  ;;  %v12512_v61 = vld [vmem:[%s20170_s24 + $0x92c] ss:$40 sps:$4 sm:$0xff]  }
 0x172   :  { %4028 = vmatpush2.bf16.msra.mxu1 %v12450_v60  ;;  %4054 = vmatprep.subr.bf16.mxu0 %v12461_v0  ;;  %v3718_v50 = vadd.f32 %v14945_v1, %v655_v42  ;;  %v12552_v42 = vld [vmem:[%s20170_s24 + $0xe78] ss:$40 sps:$4 sm:$0xff]  }
 0x173   :  { %4029 = vmatprep.subr.bf16.mxu1 %v12458_v62  ;;  %v14959_v5 = vpop.f32.mrf.mxu1  ;;  %v12515_v62 = vld [vmem:[%s20170_s24 + $0xbac] ss:$40 sps:$4 sm:$0xff]  }
 0x174   :  { %v3720_v54 = vadd.f32 %v14959_v5, %v659_v46  ;;  %v12521_v5 = vld [vmem:[%s20170_s24 + $0xb5c] ss:$40 sps:$4 sm:$0xff]  }
 0x175   :  { %v3721_v10 = vpop.f32.mrf.mxu1  ;;  %4055 = vmatpush1.bf16.msra.mxu0 %v12459_v3  ;;  %v12513_v3 = vld [vmem:[%s20170_s24 + $0xba8] ss:$40 sps:$4 sm:$0xff]  }
 0x176   :  { %4030 = vmatpush2.bf16.msra.mxu1 %v12456_v2  ;;  %4056 = vmatprep.subr.bf16.mxu0 %v12467_v44  ;;  %v12510_v2 = vld [vmem:[%s20170_s24 + $0x928] ss:$40 sps:$4 sm:$0xff]   ;;  %v12518_v44 = vld [vmem:[%s20170_s24 + $0x8dc] ss:$40 sps:$4 sm:$0xff]   ;;  %v12524_v10 = vld [vmem:[%s20170_s24 + $0x88c] ss:$40 sps:$4 sm:$0xff]  }
 0x177   :  { %4031 = vmatprep.subr.bf16.mxu1 %v12464_v4  ;;  %v3722_v13 = vpop.f32.mrf.mxu1 }
 0x178   :  { %v12525_v13 = vld [vmem:[%s20170_s24 + $0xb08] ss:$40 sps:$4 sm:$0xff]  }
 0x179   :  { %4057 = vmatpush1.bf16.msra.mxu0 %v12465_v9  ;;  %v12519_v9 = vld [vmem:[%s20170_s24 + $0xb58] ss:$40 sps:$4 sm:$0xff]  }
 0x17a   :  { %4032 = vmatpush2.bf16.msra.mxu1 %v12462_v8  ;;  %4058 = vmatprep.subr.bf16.mxu0 %v12473_v12  ;;  %v12516_v8 = vld [vmem:[%s20170_s24 + $0x8d8] ss:$40 sps:$4 sm:$0xff]   ;;  %v12522_v12 = vld [vmem:[%s20170_s24 + $0x888] ss:$40 sps:$4 sm:$0xff]  }
 0x17b   :  { %4033 = vmatprep.subr.bf16.mxu1 %v12470_v11  ;;  %v12527_v11 = vld [vmem:[%s20170_s24 + $0xb0c] ss:$40 sps:$4 sm:$0xff]  }
 0x17d   :  { %4059 = vmatpush1.bf16.msra.mxu0 %v12471_v15  ;;  %v12533_v15 = vld [vmem:[%s20170_s24 + $0xabc] ss:$40 sps:$4 sm:$0xff]  }
 0x17e   :  { %4034 = vmatpush2.bf16.msra.mxu1 %v12468_v14  ;;  %4060 = vmatprep.subr.bf16.mxu0 %v12479_v19  ;;  %v12530_v14 = vld [vmem:[%s20170_s24 + $0x83c] ss:$40 sps:$4 sm:$0xff]   ;;  %v12531_v19 = vld [vmem:[%s20170_s24 + $0xab8] ss:$40 sps:$4 sm:$0xff]  }
 0x17f   :  { %4035 = vmatprep.subr.bf16.mxu1 %v12476_v18  ;;  %v12528_v18 = vld [vmem:[%s20170_s24 + $0x838] ss:$40 sps:$4 sm:$0xff]  }
 0x181   :  { %4061 = vmatpush1.bf16.msra.mxu0 %v12477_v21  ;;  %v12539_v21 = vld [vmem:[%s20170_s24 + $0xa6c] ss:$40 sps:$4 sm:$0xff]  }
 0x182   :  { %4036 = vmatpush2.bf16.msra.mxu1 %v12474_v20  ;;  %4062 = vmatprep.subr.bf16.mxu0 %v12485_v58  ;;  %v12536_v20 = vld [vmem:[%s20170_s24 + $0x7ec] ss:$40 sps:$4 sm:$0xff]   ;;  %v12537_v58 = vld [vmem:[%s20170_s24 + $0xa68] ss:$40 sps:$4 sm:$0xff]  }
 0x183   :  { %4037 = vmatprep.subr.bf16.mxu1 %v12482_v22  ;;  %v12534_v22 = vld [vmem:[%s20170_s24 + $0x7e8] ss:$40 sps:$4 sm:$0xff]  }
 0x185   :  { %4063 = vmatpush1.bf16.msra.mxu0 %v12483_v26  ;;  %v12545_v26 = vld [vmem:[%s20170_s24 + $0xa1c] ss:$40 sps:$4 sm:$0xff]  }
 0x186   :  { %4038 = vmatpush2.bf16.msra.mxu1 %v12480_v25  ;;  %4064 = vmatprep.subr.bf16.mxu0 %v12491_v30  ;;  %v12542_v25 = vld [vmem:[%s20170_s24 + $0x79c] ss:$40 sps:$4 sm:$0xff]   ;;  %v12543_v30 = vld [vmem:[%s20170_s24 + $0xa18] ss:$40 sps:$4 sm:$0xff]  }
 0x187   :  { %4039 = vmatprep.subr.bf16.mxu1 %v12488_v29  ;;  %v12540_v29 = vld [vmem:[%s20170_s24 + $0x798] ss:$40 sps:$4 sm:$0xff]  }
 0x189   :  { %4065 = vmatpush1.bf16.msra.mxu0 %v12489_v63  ;;  %v12551_v63 = vld [vmem:[%s20170_s24 + $0x114c] ss:$40 sps:$4 sm:$0xff]  }
 0x18a   :  { %4040 = vmatpush2.bf16.msra.mxu1 %v12486_v31  ;;  %4066 = vmatprep.subr.bf16.mxu0 %v12497_v36  ;;  %v12548_v31 = vld [vmem:[%s20170_s24 + $0xecc] ss:$40 sps:$4 sm:$0xff]   ;;  %v12549_v36 = vld [vmem:[%s20170_s24 + $0x1148] ss:$40 sps:$4 sm:$0xff]  }
 0x18b   :  { %4041 = vmatprep.subr.bf16.mxu1 %v12494_v33  ;;  %v12546_v33 = vld [vmem:[%s20170_s24 + $0xec8] ss:$40 sps:$4 sm:$0xff]  }
 0x18d   :  { %4067 = vmatpush1.bf16.msra.mxu0 %v12495_v40  ;;  %v12557_v40 = vld [vmem:[%s20170_s24 + $0x10fc] ss:$40 sps:$4 sm:$0xff]  }
 0x18e   :  { %4042 = vmatpush2.bf16.msra.mxu1 %v12492_v39  ;;  %4068 = vmatprep.subr.bf16.mxu0 %v12500_v43  ;;  %v12554_v39 = vld [vmem:[%s20170_s24 + $0xe7c] ss:$40 sps:$4 sm:$0xff]   ;;  %v12555_v43 = vld [vmem:[%s20170_s24 + $0x10f8] ss:$40 sps:$4 sm:$0xff]  }
 0x18f   :  { %4093 = vmatprep.subr.bf16.mxu1 %v12503_v45 }
 0x190   :  { %v3758_v55 = vpop.f32.mrf.mxu0 }
 0x191   :  { %4044 = vmatmul.mubr.bf16.vlgmr.msra.gmra.mxu1 %v13992_v6  ;;  %v15064_v56 = vadd.f32 %v3758_v55, %v3718_v50  ;;  %4069 = vmatpush2.bf16.msra.mxu0 %v12498_v48  ;;  %v12560_v48 = vld [vmem:[%s20170_s24 + $0xe2c] ss:$40 sps:$4 sm:$0xff]  }
 0x192   :  { %4094 = vmatpush1.bf16.msra.mxu1 %v12501_v49  ;;  %v3760_v60 = vpop.f32.mrf.mxu0  ;;  %4070 = vmatprep.subr.bf16.mxu0 %v12506_v52 }
 0x193   :  { %4095 = vmatprep.subr.bf16.mxu1 %v12509_v53  ;;  %v15078_v0 = vadd.f32 %v3760_v60, %v3720_v54  ;;  %4125 = vmatprep.mubr.bf16.mxu1 %v14081_v35  ;;  %v12563_v53 = vld [vmem:[%s20170_s24 + $0x10ac] ss:$40 sps:$4 sm:$0xff]  }
 0x194   :  { %v3762_v1 = vpop.f32.mrf.mxu0 }
 0x195   :  { %4071 = vmatpush2.bf16.msra.mxu0 %v12504_v57  ;;  %v12569_v1 = vld [vmem:[%s20170_s24 + $0x105c] ss:$40 sps:$4 sm:$0xff]  }
 0x196   :  { %4096 = vmatpush1.bf16.msra.mxu1 %v12507_v59  ;;  %v3763_v4 = vpop.f32.mrf.mxu0  ;;  %4072 = vmatprep.subr.bf16.mxu0 %v12512_v61  ;;  %v12561_v59 = vld [vmem:[%s20170_s24 + $0x10a8] ss:$40 sps:$4 sm:$0xff]  }
 0x197   :  { %4097 = vmatprep.subr.bf16.mxu1 %v12515_v62  ;;  %v12566_v62 = vld [vmem:[%s20170_s24 + $0xddc] ss:$40 sps:$4 sm:$0xff]   ;;  %v12567_v4 = vld [vmem:[%s20170_s24 + $0x1058] ss:$40 sps:$4 sm:$0xff]  }
 0x199   :  { %4073 = vmatpush2.bf16.msra.mxu0 %v12510_v2 }
 0x19a   :  { %4098 = vmatpush1.bf16.msra.mxu1 %v12513_v3  ;;  %4074 = vmatprep.subr.bf16.mxu0 %v12518_v44  ;;  %v12564_v3 = vld [vmem:[%s20170_s24 + $0xdd8] ss:$40 sps:$4 sm:$0xff]   ;;  %v12572_v44 = vld [vmem:[%s20170_s24 + $0xd8c] ss:$40 sps:$4 sm:$0xff]  }
 0x19b   :  { %4099 = vmatprep.subr.bf16.mxu1 %v12521_v5  ;;  %v12575_v5 = vld [vmem:[%s20170_s24 + $0x100c] ss:$40 sps:$4 sm:$0xff]  }
 0x19d   :  { %4075 = vmatpush2.bf16.msra.mxu0 %v12516_v8  ;;  %v12570_v8 = vld [vmem:[%s20170_s24 + $0xd88] ss:$40 sps:$4 sm:$0xff]  }
 0x19e   :  { %4100 = vmatpush1.bf16.msra.mxu1 %v12519_v9  ;;  %4076 = vmatprep.subr.bf16.mxu0 %v12524_v10  ;;  %v12573_v9 = vld [vmem:[%s20170_s24 + $0x1008] ss:$40 sps:$4 sm:$0xff]   ;;  %v12578_v10 = vld [vmem:[%s20170_s24 + $0xd3c] ss:$40 sps:$4 sm:$0xff]  }
 0x19f   :  { %4101 = vmatprep.subr.bf16.mxu1 %v12527_v11  ;;  %v12581_v11 = vld [vmem:[%s20170_s24 + $0xfbc] ss:$40 sps:$4 sm:$0xff]  }
 0x1a1   :  { %4077 = vmatpush2.bf16.msra.mxu0 %v12522_v12  ;;  %v12576_v12 = vld [vmem:[%s20170_s24 + $0xd38] ss:$40 sps:$4 sm:$0xff]  }
 0x1a2   :  { %4102 = vmatpush1.bf16.msra.mxu1 %v12525_v13  ;;  %4078 = vmatprep.subr.bf16.mxu0 %v12530_v14  ;;  %v12579_v13 = vld [vmem:[%s20170_s24 + $0xfb8] ss:$40 sps:$4 sm:$0xff]   ;;  %v12584_v14 = vld [vmem:[%s20170_s24 + $0xcec] ss:$40 sps:$4 sm:$0xff]  }
 0x1a3   :  { %4103 = vmatprep.subr.bf16.mxu1 %v12533_v15  ;;  %v12587_v15 = vld [vmem:[%s20170_s24 + $0xf6c] ss:$40 sps:$4 sm:$0xff]  }
 0x1a5   :  { %4079 = vmatpush2.bf16.msra.mxu0 %v12528_v18  ;;  %v12582_v18 = vld [vmem:[%s20170_s24 + $0xce8] ss:$40 sps:$4 sm:$0xff]  }
 0x1a6   :  { %4104 = vmatpush1.bf16.msra.mxu1 %v12531_v19  ;;  %4080 = vmatprep.subr.bf16.mxu0 %v12536_v20  ;;  %v12585_v19 = vld [vmem:[%s20170_s24 + $0xf68] ss:$40 sps:$4 sm:$0xff]   ;;  %v12590_v20 = vld [vmem:[%s20170_s24 + $0xc9c] ss:$40 sps:$4 sm:$0xff]  }
 0x1a7   :  { %4105 = vmatprep.subr.bf16.mxu1 %v12539_v21  ;;  %v12593_v21 = vld [vmem:[%s20170_s24 + $0xf1c] ss:$40 sps:$4 sm:$0xff]  }
 0x1a9   :  { %4081 = vmatpush2.bf16.msra.mxu0 %v12534_v22  ;;  %v12588_v22 = vld [vmem:[%s20170_s24 + $0xc98] ss:$40 sps:$4 sm:$0xff]  }
 0x1aa   :  { %4106 = vmatpush1.bf16.msra.mxu1 %v12537_v58  ;;  %4082 = vmatprep.subr.bf16.mxu0 %v12542_v25  ;;  %v12591_v58 = vld [vmem:[%s20170_s24 + $0xf18] ss:$40 sps:$4 sm:$0xff]   ;;  %v12596_v25 = vld [vmem:[%s20170_s24 + $0x254] ss:$40 sps:$4 sm:$0xff]  }
 0x1ab   :  { %4107 = vmatprep.subr.bf16.mxu1 %v12545_v26  ;;  %v12599_v26 = vld [vmem:[%s20170_s24 + $0x754] ss:$40 sps:$4 sm:$0xff]  }
 0x1ad   :  { %4083 = vmatpush2.bf16.msra.mxu0 %v12540_v29  ;;  %v12594_v29 = vld [vmem:[%s20170_s24 + $0x250] ss:$40 sps:$4 sm:$0xff]  }
 0x1ae   :  { %4108 = vmatpush1.bf16.msra.mxu1 %v12543_v30  ;;  %4134 = vmatprep.subr.bf16.mxu0 %v12551_v63  ;;  %v12597_v30 = vld [vmem:[%s20170_s24 + $0x750] ss:$40 sps:$4 sm:$0xff]   ;;  %v12605_v63 = vld [vmem:[%s20170_s24 + $0x704] ss:$40 sps:$4 sm:$0xff]  }
 0x1af   :  { %4109 = vmatprep.subr.bf16.mxu1 %v12548_v31  ;;  %v12602_v31 = vld [vmem:[%s20170_s24 + $0x204] ss:$40 sps:$4 sm:$0xff]  }
 0x1b0   :  { %v3840_v46 = vpop.f32.mrf.mxu0  ;;  %4085 = vmatmul.mubr.bf16.vlgmr.msra.gmra.mxu0 %v13994_v7 }
 0x1b1   :  { %v3799_v45 = vpop.f32.mrf.mxu1  ;;  %4135 = vmatpush1.bf16.msra.mxu0 %v12549_v36  ;;  %4166 = vmatprep.mubr.bf16.mxu0 %v13658_v16  ;;  %v12600_v36 = vld [vmem:[%s20170_s24 + $0x200] ss:$40 sps:$4 sm:$0xff]  }
 0x1b2   :  { %v3800_v49 = vadd.f32 %v3799_v45, %v15064_v56  ;;  %4110 = vmatpush2.bf16.msra.mxu1 %v12546_v33  ;;  %v3842_v52 = vpop.f32.mrf.mxu0  ;;  %4136 = vmatprep.subr.bf16.mxu0 %v12557_v40  ;;  %v12558_v56 = vld [vmem:[%s20170_s24 + $0xe28] ss:$40 sps:$4 sm:$0xff]   ;;  %v15273_v33 = vld [vmem:[%s20171_s28 + $0x18] ss:$0 sps:$4 sm:$0xff]   ;;  %v12608_v40 = vld [vmem:[%s20170_s24 + $0x1b4] ss:$40 sps:$4 sm:$0xff]  }
 0x1b3   :  { %v3801_v50 = vpop.f32.mrf.mxu1  ;;  %4111 = vmatprep.subr.bf16.mxu1 %v12554_v39  ;;  %v12603_v39 = vld [vmem:[%s20170_s24 + $0x700] ss:$40 sps:$4 sm:$0xff]   ;;  %v12609_v45 = vld [vmem:[%s20170_s24 + $0x6b0] ss:$40 sps:$4 sm:$0xff]  }
 0x1b4   :  { %v15179_v54 = vadd.f32 %v3840_v46, %v3800_v49  ;;  %v3802_v55 = vadd.f32 %v3801_v50, %v15078_v0  ;;  %v3844_v57 = vpop.f32.mrf.mxu0  ;;  %v12614_v46 = vld [vmem:[%s20170_s24 + $0x164] ss:$40 sps:$4 sm:$0xff]   ;;  %v12620_v49 = vld [vmem:[%s20170_s24 + $0x114] ss:$40 sps:$4 sm:$0xff]  }
 0x1b5   :  { %v3803_v60 = vpop.f32.mrf.mxu1  ;;  %4137 = vmatpush1.bf16.msra.mxu0 %v12555_v43  ;;  %v12606_v43 = vld [vmem:[%s20170_s24 + $0x1b0] ss:$40 sps:$4 sm:$0xff]   ;;  %v12623_v50 = vld [vmem:[%s20170_s24 + $0x614] ss:$40 sps:$4 sm:$0xff]   ;;  %v12629_v57 = vld [vmem:[%s20170_s24 + $0x5c4] ss:$40 sps:$4 sm:$0xff]  }
 0x1b6   :  { %v15189_v61 = vadd.f32 %v3842_v52, %v3802_v55  ;;  %4112 = vmatpush2.bf16.msra.mxu1 %v12552_v42  ;;  %v3845_v0 = vpop.f32.mrf.mxu0  ;;  %4138 = vmatprep.subr.bf16.mxu0 %v12563_v53  ;;  %v12611_v42 = vld [vmem:[%s20170_s24 + $0x6b4] ss:$40 sps:$4 sm:$0xff]   ;;  %v12618_v52 = vld [vmem:[%s20170_s24 + $0x110] ss:$40 sps:$4 sm:$0xff]   ;;  %v12626_v55 = vld [vmem:[%s20170_s24 + $0xc4] ss:$40 sps:$4 sm:$0xff]  }
 0x1b7   :  { %4113 = vmatprep.subr.bf16.mxu1 %v12560_v48  ;;  %v3804_v2 = vpop.f32.mrf.mxu1  ;;  %v12615_v48 = vld [vmem:[%s20170_s24 + $0x660] ss:$40 sps:$4 sm:$0xff]   ;;  %v12621_v53 = vld [vmem:[%s20170_s24 + $0x610] ss:$40 sps:$4 sm:$0xff]   ;;  %v12632_v60 = vld [vmem:[%s20170_s24 + $0x74] ss:$40 sps:$4 sm:$0xff]  }
 0x1b8   :  { %v12630_v0 = vld [vmem:[%s20170_s24 + $0x70] ss:$40 sps:$4 sm:$0xff]   ;;  %v12638_v2 = vld [vmem:[%s20170_s24 + $0x24] ss:$40 sps:$4 sm:$0xff]  }
 0x1b9   :  { %4139 = vmatpush1.bf16.msra.mxu0 %v12561_v59  ;;  %v12627_v59 = vld [vmem:[%s20170_s24 + $0x5c0] ss:$40 sps:$4 sm:$0xff]  }
 0x1ba   :  { %4114 = vmatpush2.bf16.msra.mxu1 %v12558_v56  ;;  %4140 = vmatprep.subr.bf16.mxu0 %v12569_v1  ;;  %v12624_v56 = vld [vmem:[%s20170_s24 + $0xc0] ss:$40 sps:$4 sm:$0xff]   ;;  %v12633_v1 = vld [vmem:[%s20170_s24 + $0x570] ss:$40 sps:$4 sm:$0xff]  }
 0x1bb   :  { %4115 = vmatprep.subr.bf16.mxu1 %v12566_v62  ;;  %v12635_v62 = vld [vmem:[%s20170_s24 + $0x574] ss:$40 sps:$4 sm:$0xff]  }
 0x1bd   :  { %4141 = vmatpush1.bf16.msra.mxu0 %v12567_v4  ;;  %v12636_v4 = vld [vmem:[%s20170_s24 + $0x20] ss:$40 sps:$4 sm:$0xff]  }
 0x1be   :  { %4116 = vmatpush2.bf16.msra.mxu1 %v12564_v3  ;;  %4142 = vmatprep.subr.bf16.mxu0 %v12575_v5  ;;  %v12641_v3 = vld [vmem:[%s20170_s24 + $0x524] ss:$40 sps:$4 sm:$0xff]   ;;  %v15357_v5 = vsub.s32 4, %v14589_v28 }
 0x1bf   :  { %4117 = vmatprep.subr.bf16.mxu1 %v12572_v44  ;;  %v12639_v44 = vld [vmem:[%s20170_s24 + $0x520] ss:$40 sps:$4 sm:$0xff]  }
 0x1c0   :  { %20177 = vst [vmem:[#allocation9_spill] sm:$0xff] %v15357_v5 }
 0x1c1   :  { %4143 = vmatpush1.bf16.msra.mxu0 %v12573_v9  ;;  %v12647_v9 = vld [vmem:[%s20170_s24 + $0x9d4] ss:$40 sps:$4 sm:$0xff]  }
 0x1c2   :  { %4118 = vmatpush2.bf16.msra.mxu1 %v12570_v8  ;;  %4144 = vmatprep.subr.bf16.mxu0 %v12581_v11  ;;  %v12644_v8 = vld [vmem:[%s20170_s24 + $0x4d4] ss:$40 sps:$4 sm:$0xff]   ;;  %v663_v11 = vrot.slane %v15037_v41, %v15357_v5 }
 0x1c3   :  { %4119 = vmatprep.subr.bf16.mxu1 %v12578_v10  ;;  %v15366_v10 = vsub.s32 5, %v14589_v28 }
 0x1c5   :  { %4145 = vmatpush1.bf16.msra.mxu0 %v12579_v13  ;;  %20178 = vst [vmem:[#allocation10_spill] sm:$0xff] %v15366_v10  ;;  %v12645_v13 = vld [vmem:[%s20170_s24 + $0x9d0] ss:$40 sps:$4 sm:$0xff]  }
 0x1c6   :  { %4120 = vmatpush2.bf16.msra.mxu1 %v12576_v12  ;;  %4146 = vmatprep.subr.bf16.mxu0 %v12587_v15  ;;  %v12642_v12 = vld [vmem:[%s20170_s24 + $0x4d0] ss:$40 sps:$4 sm:$0xff]   ;;  %v12653_v15 = vld [vmem:[%s20170_s24 + $0x984] ss:$40 sps:$4 sm:$0xff]  }
 0x1c7   :  { %4121 = vmatprep.subr.bf16.mxu1 %v12584_v14  ;;  %v12650_v14 = vld [vmem:[%s20170_s24 + $0x484] ss:$40 sps:$4 sm:$0xff]  }
 0x1c9   :  { %4147 = vmatpush1.bf16.msra.mxu0 %v12585_v19  ;;  %v12648_v19 = vld [vmem:[%s20170_s24 + $0x480] ss:$40 sps:$4 sm:$0xff]  }
 0x1ca   :  { %4122 = vmatpush2.bf16.msra.mxu1 %v12582_v18  ;;  %4148 = vmatprep.subr.bf16.mxu0 %v12593_v21  ;;  %v667_v18 = vrot.slane %v15037_v41, %v15366_v10 }
 0x1cb   :  { %4123 = vmatprep.subr.bf16.mxu1 %v12590_v20  ;;  %v12651_v20 = vld [vmem:[%s20170_s24 + $0x980] ss:$40 sps:$4 sm:$0xff]  }
 0x1cd   :  { %4149 = vmatpush1.bf16.msra.mxu0 %v12591_v58  ;;  %v12656_v58 = vld [vmem:[%s20170_s24 + $0x434] ss:$40 sps:$4 sm:$0xff]  }
 0x1ce   :  { %4124 = vmatpush2.bf16.msra.mxu1 %v12588_v22  ;;  %4175 = vmatprep.subr.bf16.mxu0 %v12596_v25  ;;  %v12659_v25 = vld [vmem:[%s20170_s24 + $0x934] ss:$40 sps:$4 sm:$0xff]  }
 0x1cf   :  { %4216 = vmatprep.subr.bf16.mxu1 %v12599_v26 }
 0x1d0   :  { %4167 = vmatmul.mubr.bf16.vlgmr.msra.gmra.mxu0 %v15273_v33 }
 0x1d1   :  { %4126 = vmatmul.mubr.bf16.vlgmr.msra.gmra.mxu1 %v14210_v17  ;;  %4176 = vmatpush1.bf16.msra.mxu0 %v12594_v29 }
 0x1d2   :  { %4217 = vmatpush1.bf16.msra.mxu1 %v12597_v30  ;;  %4177 = vmatprep.subr.bf16.mxu0 %v12602_v31 }
 0x1d3   :  { %4218 = vmatprep.subr.bf16.mxu1 %v12605_v63  ;;  %4207 = vmatprep.mubr.bf16.mxu0 %v13923_v47  ;;  %v12617_v47 = vld [vmem:[%s20170_s24 + $0x664] ss:$40 sps:$4 sm:$0xff]   ;;  %v12654_v63 = vld [vmem:[%s20170_s24 + $0x430] ss:$40 sps:$4 sm:$0xff]  }
 0x1d4   :  { %4248 = vmatprep.mubr.bf16.mxu1 %v13934_v51  ;;  %v12612_v51 = vld [vmem:[%s20170_s24 + $0x160] ss:$40 sps:$4 sm:$0xff]  }
 0x1d5   :  { %4178 = vmatpush1.bf16.msra.mxu0 %v12600_v36  ;;  %v12657_v36 = vld [vmem:[%s20170_s24 + $0x930] ss:$40 sps:$4 sm:$0xff]  }
 0x1d6   :  { %4219 = vmatpush1.bf16.msra.mxu1 %v12603_v39  ;;  %4179 = vmatprep.subr.bf16.mxu0 %v12608_v40 }
 0x1d7   :  { %4220 = vmatprep.subr.bf16.mxu1 %v12611_v42 }
 0x1d9   :  { %4180 = vmatpush1.bf16.msra.mxu0 %v12606_v43 }
 0x1da   :  { %4221 = vmatpush1.bf16.msra.mxu1 %v12609_v45  ;;  %4181 = vmatprep.subr.bf16.mxu0 %v12614_v46  ;;  %v12662_v45 = vld [vmem:[%s20170_s24 + $0x3e4] ss:$40 sps:$4 sm:$0xff]  }
 0x1db   :  { %4222 = vmatprep.subr.bf16.mxu1 %v12617_v47  ;;  %v12665_v46 = vld [vmem:[%s20170_s24 + $0x8e4] ss:$40 sps:$4 sm:$0xff]  }
 0x1dd   :  { %4182 = vmatpush1.bf16.msra.mxu0 %v12612_v51  ;;  %v12660_v51 = vld [vmem:[%s20170_s24 + $0x3e0] ss:$40 sps:$4 sm:$0xff]  }
 0x1de   :  { %4223 = vmatpush1.bf16.msra.mxu1 %v12615_v48  ;;  %4183 = vmatprep.subr.bf16.mxu0 %v12620_v49  ;;  %v12663_v48 = vld [vmem:[%s20170_s24 + $0x8e0] ss:$40 sps:$4 sm:$0xff]   ;;  %v12668_v49 = vld [vmem:[%s20170_s24 + $0x394] ss:$40 sps:$4 sm:$0xff]  }
 0x1df   :  { %4224 = vmatprep.subr.bf16.mxu1 %v12623_v50  ;;  %v12671_v50 = vld [vmem:[%s20170_s24 + $0x894] ss:$40 sps:$4 sm:$0xff]  }
 0x1e1   :  { %4184 = vmatpush1.bf16.msra.mxu0 %v12618_v52  ;;  %v12666_v52 = vld [vmem:[%s20170_s24 + $0x390] ss:$40 sps:$4 sm:$0xff]  }
 0x1e2   :  { %4225 = vmatpush1.bf16.msra.mxu1 %v12621_v53  ;;  %4185 = vmatprep.subr.bf16.mxu0 %v12626_v55  ;;  %v12669_v53 = vld [vmem:[%s20170_s24 + $0x890] ss:$40 sps:$4 sm:$0xff]   ;;  %v12674_v55 = vld [vmem:[%s20170_s24 + $0x344] ss:$40 sps:$4 sm:$0xff]  }
 0x1e3   :  { %4226 = vmatprep.subr.bf16.mxu1 %v12629_v57  ;;  %v12677_v57 = vld [vmem:[%s20170_s24 + $0x844] ss:$40 sps:$4 sm:$0xff]  }
 0x1e5   :  { %4186 = vmatpush1.bf16.msra.mxu0 %v12624_v56  ;;  %v12672_v56 = vld [vmem:[%s20170_s24 + $0x340] ss:$40 sps:$4 sm:$0xff]  }
 0x1e6   :  { %4227 = vmatpush1.bf16.msra.mxu1 %v12627_v59  ;;  %4187 = vmatprep.subr.bf16.mxu0 %v12632_v60  ;;  %v12675_v59 = vld [vmem:[%s20170_s24 + $0x840] ss:$40 sps:$4 sm:$0xff]   ;;  %v12680_v60 = vld [vmem:[%s20170_s24 + $0x2f4] ss:$40 sps:$4 sm:$0xff]  }
 0x1e7   :  { %4228 = vmatprep.subr.bf16.mxu1 %v12635_v62  ;;  %v12683_v62 = vld [vmem:[%s20170_s24 + $0x7f4] ss:$40 sps:$4 sm:$0xff]  }
 0x1e9   :  { %4188 = vmatpush1.bf16.msra.mxu0 %v12630_v0  ;;  %v12678_v0 = vld [vmem:[%s20170_s24 + $0x2f0] ss:$40 sps:$4 sm:$0xff]  }
 0x1ea   :  { %4229 = vmatpush1.bf16.msra.mxu1 %v12633_v1  ;;  %4189 = vmatprep.subr.bf16.mxu0 %v12638_v2  ;;  %v12681_v1 = vld [vmem:[%s20170_s24 + $0x7f0] ss:$40 sps:$4 sm:$0xff]   ;;  %v12686_v2 = vld [vmem:[%s20170_s24 + $0x2a4] ss:$40 sps:$4 sm:$0xff]  }
 0x1eb   :  { %4230 = vmatprep.subr.bf16.mxu1 %v12641_v3  ;;  %v12689_v3 = vld [vmem:[%s20170_s24 + $0x7a4] ss:$40 sps:$4 sm:$0xff]  }
 0x1ed   :  { %4190 = vmatpush1.bf16.msra.mxu0 %v12636_v4  ;;  %v12684_v4 = vld [vmem:[%s20170_s24 + $0x2a0] ss:$40 sps:$4 sm:$0xff]  }
 0x1ee   :  { %4231 = vmatpush1.bf16.msra.mxu1 %v12639_v44  ;;  %4191 = vmatprep.subr.bf16.mxu0 %v12644_v8  ;;  %v12687_v44 = vld [vmem:[%s20170_s24 + $0x7a0] ss:$40 sps:$4 sm:$0xff]   ;;  %v12692_v8 = vld [vmem:[%s20170_s24 + $0xc54] ss:$40 sps:$4 sm:$0xff]  }
 0x1ef   :  { %4232 = vmatprep.subr.bf16.mxu1 %v12647_v9  ;;  %v12695_v9 = vld [vmem:[%s20170_s24 + $0x1154] ss:$40 sps:$4 sm:$0xff]  }
 0x1f0   :  { %v3881_v21 = vpop.f32.mrf.mxu0 }
 0x1f1   :  { %v3922_v22 = vpop.f32.mrf.mxu1  ;;  %v3882_v26 = vadd.f32 %v3881_v21, %v663_v11  ;;  %4192 = vmatpush2.bf16.msra.mxu0 %v12642_v12  ;;  %v12690_v11 = vld [vmem:[%s20170_s24 + $0xc50] ss:$40 sps:$4 sm:$0xff]  }
 0x1f2   :  { %4233 = vmatpush2.bf16.msra.mxu1 %v12645_v13  ;;  %v3883_v41 = vpop.f32.mrf.mxu0  ;;  %4193 = vmatprep.subr.bf16.mxu0 %v12650_v14  ;;  %v12693_v12 = vld [vmem:[%s20170_s24 + $0x1150] ss:$40 sps:$4 sm:$0xff]   ;;  %v4349_v13 = vrot.slane %v14858_v27, 4  ;;  %v12698_v14 = vld [vmem:[%s20170_s24 + $0xc04] ss:$40 sps:$4 sm:$0xff]  }
 0x1f3   :  { %v3924_v29 = vpop.f32.mrf.mxu1  ;;  %4234 = vmatprep.subr.bf16.mxu1 %v12653_v15  ;;  %v3884_v30 = vadd.f32 %v3883_v41, %v667_v18  ;;  %v15396_v31 = vadd.f32 %v3922_v22, %v3882_v26  ;;  %v12701_v15 = vld [vmem:[%s20170_s24 + $0x1104] ss:$40 sps:$4 sm:$0xff]   ;;  %v12696_v18 = vld [vmem:[%s20170_s24 + $0xc00] ss:$40 sps:$4 sm:$0xff]   ;;  %v12704_v22 = vld [vmem:[%s20170_s24 + $0xbb4] ss:$40 sps:$4 sm:$0xff]  }
 0x1f4   :  { %v3885_v39 = vpop.f32.mrf.mxu0 }
 0x1f5   :  { %v3926_v40 = vpop.f32.mrf.mxu1  ;;  %v15404_v42 = vadd.f32 %v3924_v29, %v3884_v30  ;;  %4194 = vmatpush2.bf16.msra.mxu0 %v12648_v19  ;;  %v12699_v19 = vld [vmem:[%s20170_s24 + $0x1100] ss:$40 sps:$4 sm:$0xff]   ;;  %v12710_v29 = vld [vmem:[%s20170_s24 + $0xb64] ss:$40 sps:$4 sm:$0xff]   ;;  %v12719_v39 = vld [vmem:[%s20170_s24 + $0x1014] ss:$40 sps:$4 sm:$0xff]  }
 0x1f6   :  { %4235 = vmatpush2.bf16.msra.mxu1 %v12651_v20  ;;  %v3886_v43 = vpop.f32.mrf.mxu0  ;;  %4195 = vmatprep.subr.bf16.mxu0 %v12656_v58  ;;  %v4350_v20 = vadd.f32 %v4349_v13, %v14858_v27  ;;  %v12707_v58 = vld [vmem:[%s20170_s24 + $0x10b4] ss:$40 sps:$4 sm:$0xff]   ;;  %v4416_v13 = vld [vmem:[%s20179_s26 + $0x68] sm:$0xff] }
 0x1f7   :  { %4236 = vmatprep.subr.bf16.mxu1 %v12659_v25  ;;  %v3927_v47 = vpop.f32.mrf.mxu1  ;;  %v12714_v43 = vld [vmem:[%s20170_s24 + $0xb10] ss:$40 sps:$4 sm:$0xff]  }
 0x1f8   :  { %v4351_v41 = vrot.slane %v4350_v20, 2  ;;  %v12725_v47 = vld [vmem:[%s20170_s24 + $0xfc4] ss:$40 sps:$4 sm:$0xff]  }
 0x1f9   :  { %4196 = vmatpush2.bf16.msra.mxu0 %v12654_v63  ;;  %v12711_v63 = vld [vmem:[%s20170_s24 + $0x1060] ss:$40 sps:$4 sm:$0xff]  }
 0x1fa   :  { %4237 = vmatpush2.bf16.msra.mxu1 %v12657_v36  ;;  %4197 = vmatprep.subr.bf16.mxu0 %v12662_v45  ;;  %v12716_v36 = vld [vmem:[%s20170_s24 + $0xb14] ss:$40 sps:$4 sm:$0xff]   ;;  %v4352_v40 = vadd.f32 %v4351_v41, %v4350_v20  ;;  %v12717_v45 = vld [vmem:[%s20170_s24 + $0x1010] ss:$40 sps:$4 sm:$0xff]  }
 0x1fb   :  { %4238 = vmatprep.subr.bf16.mxu1 %v12665_v46  ;;  %v12722_v46 = vld [vmem:[%s20170_s24 + $0xac4] ss:$40 sps:$4 sm:$0xff]  }
 0x1fd   :  { %4198 = vmatpush2.bf16.msra.mxu0 %v12660_v51  ;;  %v4353_v51 = vrot.slane %v4352_v40, 1 }
 0x1fe   :  { %4239 = vmatpush2.bf16.msra.mxu1 %v12663_v48  ;;  %4199 = vmatprep.subr.bf16.mxu0 %v12668_v49  ;;  %v12720_v48 = vld [vmem:[%s20170_s24 + $0xac0] ss:$40 sps:$4 sm:$0xff]  }
 0x1ff   :  { %4240 = vmatprep.subr.bf16.mxu1 %v12671_v50  ;;  %v12723_v49 = vld [vmem:[%s20170_s24 + $0xfc0] ss:$40 sps:$4 sm:$0xff]   ;;  %v12728_v50 = vld [vmem:[%s20170_s24 + $0xa74] ss:$40 sps:$4 sm:$0xff]  }
 0x201   :  { %4200 = vmatpush2.bf16.msra.mxu0 %v12666_v52  ;;  %v12731_v52 = vld [vmem:[%s20170_s24 + $0xf74] ss:$40 sps:$4 sm:$0xff]  }
 0x202   :  { %4241 = vmatpush2.bf16.msra.mxu1 %v12669_v53  ;;  %4201 = vmatprep.subr.bf16.mxu0 %v12674_v55  ;;  %v12726_v53 = vld [vmem:[%s20170_s24 + $0xa70] ss:$40 sps:$4 sm:$0xff]  }
 0x203   :  { %4242 = vmatprep.subr.bf16.mxu1 %v12677_v57  ;;  %v12729_v55 = vld [vmem:[%s20170_s24 + $0xf70] ss:$40 sps:$4 sm:$0xff]   ;;  %v12734_v57 = vld [vmem:[%s20170_s24 + $0xa24] ss:$40 sps:$4 sm:$0xff]  }
 0x205   :  { %4202 = vmatpush2.bf16.msra.mxu0 %v12672_v56  ;;  %v12737_v56 = vld [vmem:[%s20170_s24 + $0xf24] ss:$40 sps:$4 sm:$0xff]  }
 0x206   :  { %4243 = vmatpush2.bf16.msra.mxu1 %v12675_v59  ;;  %4203 = vmatprep.subr.bf16.mxu0 %v12680_v60  ;;  %v12732_v59 = vld [vmem:[%s20170_s24 + $0xa20] ss:$40 sps:$4 sm:$0xff]  }
 0x207   :  { %4244 = vmatprep.subr.bf16.mxu1 %v12683_v62  ;;  %v12735_v60 = vld [vmem:[%s20170_s24 + $0xf20] ss:$40 sps:$4 sm:$0xff]   ;;  %v12740_v62 = vld [vmem:[%s20170_s24 + $0xed4] ss:$40 sps:$4 sm:$0xff]  }
 0x209   :  { %4204 = vmatpush2.bf16.msra.mxu0 %v12678_v0  ;;  %v4434_v0 = vld [vmem:[%s20179_s26 + $0xf8] sm:$0xff] }
 0x20a   :  { %4245 = vmatpush2.bf16.msra.mxu1 %v12681_v1  ;;  %4205 = vmatprep.subr.bf16.mxu0 %v12686_v2  ;;  %v12738_v1 = vld [vmem:[%s20170_s24 + $0xed0] ss:$40 sps:$4 sm:$0xff]  }
 0x20b   :  { %4246 = vmatprep.subr.bf16.mxu1 %v12689_v3  ;;  %v4418_v2 = vld [vmem:[%s20179_s26 + $0x78] sm:$0xff]  ;;  %v4433_v3 = vld [vmem:[%s20179_s26 + $0xf0] sm:$0xff] }
 0x20d   :  { %4206 = vmatpush2.bf16.msra.mxu0 %v12684_v4  ;;  %v12743_v4 = vld [vmem:[%s20170_s24 + $0xe84] ss:$40 sps:$4 sm:$0xff]  }
 0x20e   :  { %4247 = vmatpush2.bf16.msra.mxu1 %v12687_v44  ;;  %4257 = vmatprep.subr.bf16.mxu0 %v12692_v8  ;;  %v4417_v44 = vld [vmem:[%s20179_s26 + $0x70] sm:$0xff]  ;;  %v12741_v8 = vld [vmem:[%s20170_s24 + $0xe80] ss:$40 sps:$4 sm:$0xff]  }
 0x20f   :  { %4298 = vmatprep.subr.bf16.mxu1 %v12695_v9  ;;  %v4432_v9 = vld [vmem:[%s20179_s26 + $0xe8] sm:$0xff] }
 0x210   :  { %4208 = vmatmul.mubr.bf16.vlgmr.msra.gmra.mxu0 %v13992_v6  ;;  %v12702_v6 = vld [vmem:[%s20170_s24 + $0xbb0] ss:$40 sps:$4 sm:$0xff]  }
 0x211   :  { %4249 = vmatmul.mubr.bf16.vlgmr.msra.gmra.mxu1 %v13994_v7  ;;  %v15494_v21 = vpop.f32.mrf.mxu1  ;;  %4258 = vmatpush1.bf16.msra.mxu0 %v12690_v11  ;;  %v12705_v7 = vld [vmem:[%s20170_s24 + $0x10b0] ss:$40 sps:$4 sm:$0xff]  }
 0x212   :  { %4299 = vmatpush1.bf16.msra.mxu1 %v12693_v12  ;;  %4259 = vmatprep.subr.bf16.mxu0 %v12698_v14  ;;  %v4354_v12 = vadd.f32 %v4353_v51, %v4352_v40  ;;  %v12746_v14 = vld [vmem:[%s20170_s24 + $0xe34] ss:$40 sps:$4 sm:$0xff]   ;;  %v4361_v40 = vrot.slane %v15189_v61, 4 }
 0x213   :  { %4300 = vmatprep.subr.bf16.mxu1 %v12701_v15  ;;  %v15502_v25 = vpop.f32.mrf.mxu1  ;;  %4330 = vmatprep.mubr.bf16.mxu1 %v13658_v16  ;;  %v12713_v16 = vld [vmem:[%s20170_s24 + $0x1064] ss:$40 sps:$4 sm:$0xff]  }
 0x214   :  { %4289 = vmatprep.mubr.bf16.mxu0 %v14081_v35  ;;  %v12708_v35 = vld [vmem:[%s20170_s24 + $0xb60] ss:$40 sps:$4 sm:$0xff]  }
 0x215   :  { %v4008_v26 = vpop.f32.mrf.mxu1  ;;  %4260 = vmatpush1.bf16.msra.mxu0 %v12696_v18  ;;  %v4431_v18 = vld [vmem:[%s20179_s26 + $0xe0] sm:$0xff] }
 0x216   :  { %4301 = vmatpush1.bf16.msra.mxu1 %v12699_v19  ;;  %4261 = vmatprep.subr.bf16.mxu0 %v12704_v22  ;;  %v4430_v22 = vld [vmem:[%s20179_s26 + $0xd8] sm:$0xff]  ;;  %v12749_v26 = vld [vmem:[%s20170_s24 + $0xde4] ss:$40 sps:$4 sm:$0xff]  }
 0x217   :  { %4302 = vmatprep.subr.bf16.mxu1 %v12707_v58  ;;  %v4009_v30 = vpop.f32.mrf.mxu1 }
 0x218   :  { %v4428_v30 = vld [vmem:[%s20179_s26 + $0xc8] sm:$0xff] }
 0x219   :  { %4262 = vmatpush1.bf16.msra.mxu0 %v12702_v6  ;;  %v4414_v6 = vld [vmem:[%s20179_s26 + $0x58] sm:$0xff] }
 0x21a   :  { %4303 = vmatpush1.bf16.msra.mxu1 %v12705_v7  ;;  %4263 = vmatprep.subr.bf16.mxu0 %v12710_v29  ;;  %v4413_v29 = vld [vmem:[%s20179_s26 + $0x50] sm:$0xff] }
 0x21b   :  { %4304 = vmatprep.subr.bf16.mxu1 %v12713_v16  ;;  %v4343_v16 = vrot.slane %v14853_v24, 4 }
 0x21d   :  { %4264 = vmatpush1.bf16.msra.mxu0 %v12708_v35  ;;  %v4412_v35 = vld [vmem:[%s20179_s26 + $0x48] sm:$0xff] }
 0x21e   :  { %4305 = vmatpush1.bf16.msra.mxu1 %v12711_v63  ;;  %4265 = vmatprep.subr.bf16.mxu0 %v12716_v36  ;;  %v12752_v36 = vld [vmem:[%s20170_s24 + $0xd94] ss:$40 sps:$4 sm:$0xff]  }
 0x21f   :  { %4306 = vmatprep.subr.bf16.mxu1 %v12719_v39  ;;  %v4427_v39 = vld [vmem:[%s20179_s26 + $0xc0] sm:$0xff] }
 0x221   :  { %4266 = vmatpush1.bf16.msra.mxu0 %v12714_v43 }
 0x222   :  { %4307 = vmatpush1.bf16.msra.mxu1 %v12717_v45  ;;  %4267 = vmatprep.subr.bf16.mxu0 %v12722_v46 }
 0x223   :  { %4308 = vmatprep.subr.bf16.mxu1 %v12725_v47 }
 0x225   :  { %4268 = vmatpush1.bf16.msra.mxu0 %v12720_v48 }
 0x226   :  { %4309 = vmatpush1.bf16.msra.mxu1 %v12723_v49  ;;  %4269 = vmatprep.subr.bf16.mxu0 %v12728_v50 }
 0x227   :  { %4310 = vmatprep.subr.bf16.mxu1 %v12731_v52 }
 0x229   :  { %4270 = vmatpush1.bf16.msra.mxu0 %v12726_v53 }
 0x22a   :  { %4311 = vmatpush1.bf16.msra.mxu1 %v12729_v55  ;;  %4271 = vmatprep.subr.bf16.mxu0 %v12734_v57 }
 0x22b   :  { %4312 = vmatprep.subr.bf16.mxu1 %v12737_v56 }
 0x22d   :  { %4272 = vmatpush1.bf16.msra.mxu0 %v12732_v59 }
 0x22e   :  { %4313 = vmatpush1.bf16.msra.mxu1 %v12735_v60  ;;  %4273 = vmatprep.subr.bf16.mxu0 %v12740_v62 }
 0x22f   :  { %11319 = vmatprep.subr.mxu1 %v4434_v0 }
 0x230   :  { %v3963_v11 = vpop.f32.mrf.mxu0 }
 0x231   :  { %4331 = vmatmul.mubr.bf16.vlgmr.msra.gmra.mxu1 %v15273_v33  ;;  %v3964_v15 = vadd.f32 %v3963_v11, %v15396_v31  ;;  %4274 = vmatpush2.bf16.msra.mxu0 %v12738_v1  ;;  %v4415_v33 = vld [vmem:[%s20179_s26 + $0x60] sm:$0xff]  ;;  %v12744_v31 = vld [vmem:[%s20170_s24 + $0xe30] ss:$40 sps:$4 sm:$0xff]  }
 0x232   :  { %11320 = vmatpush3.msra.mxu1 %v4418_v2  ;;  %4627 = vmatprep.mubr.f32.mxu1 %v4354_v12  ;;  %v3965_v19 = vpop.f32.mrf.mxu0 }
 0x233   :  { %11321 = vmatprep.subr.mxu1 %v4433_v3  ;;  %v15614_v20 = vadd.f32 %v15494_v21, %v3964_v15  ;;  %4275 = vmatprep.subr.bf16.mxu0 %v12743_v4  ;;  %v3966_v7 = vadd.f32 %v3965_v19, %v15404_v42  ;;  %v4429_v21 = vld [vmem:[%s20179_s26 + $0xd0] sm:$0xff]  ;;  %v12747_v42 = vld [vmem:[%s20170_s24 + $0xde0] ss:$40 sps:$4 sm:$0xff]  }
 0x234   :  { %11322 = vmatpush3.msra.mxu1 %v4417_v44  ;;  %v3967_v58 = vpop.f32.mrf.mxu0 }
 0x235   :  { %11323 = vmatprep.subr.mxu1 %v4432_v9  ;;  %4276 = vmatpush2.bf16.msra.mxu0 %v12741_v8  ;;  %v15646_v63 = vadd.f32 %v15502_v25, %v3966_v7  ;;  %v4411_v25 = vld [vmem:[%s20179_s26 + $0x40] sm:$0xff] }
 0x236   :  { %11324 = vmatpush3.msra.mxu1 %v4416_v13  ;;  %v3968_v41 = vpop.f32.mrf.mxu0  ;;  %4277 = vmatprep.subr.bf16.mxu0 %v12746_v14 }
 0x237   :  { %11325 = vmatprep.subr.mxu1 %v4431_v18 }
 0x238   :  { %11326 = vmatpush3.msra.mxu1 %v4415_v33 }
 0x239   :  { %11327 = vmatprep.subr.mxu1 %v4430_v22  ;;  %4278 = vmatpush2.bf16.msra.mxu0 %v12744_v31 }
 0x23a   :  { %11328 = vmatpush3.msra.mxu1 %v4414_v6  ;;  %4279 = vmatprep.subr.bf16.mxu0 %v12749_v26 }
 0x23b   :  { %11329 = vmatprep.subr.mxu1 %v4429_v21 }
 0x23c   :  { %11330 = vmatpush3.msra.mxu1 %v4413_v29 }
 0x23d   :  { %11331 = vmatprep.subr.mxu1 %v4428_v30 }
 0x23e   :  { %28 = vsyncpa [#allocation3], 0  ;;  %v4373_v43 = vrot.slane %v15646_v63, 4  ;;  %4280 = vmatpush2.bf16.msra.mxu0 %v12747_v42  ;;  %11332 = vmatpush3.msra.mxu1 %v4412_v35  ;;  %v12750_v45 = vld [vmem:[%s20170_s24 + $0xd90] ss:$40 sps:$4 sm:$0xff]   ;;  %v4344_v47 = vadd.f32 %v4343_v16, %v14853_v24  ;;  %v4362_v50 = vadd.f32 %v4361_v40, %v15189_v61  ;;  %v4424_v57 = vld [vmem:[%s20179_s26 + $0xa8] sm:$0xff] }
 0x23f   :  { %v4426_v46 = vld [vmem:[%s20179_s26 + $0xb8] sm:$0xff]  ;;  %11333 = vmatprep.subr.mxu1 %v4427_v39  ;;  %4281 = vmatprep.subr.bf16.mxu0 %v12752_v36  ;;  %v12755_v48 = vld [vmem:[%s20170_s24 + $0xd44] ss:$40 sps:$4 sm:$0xff]   ;;  %v4425_v49 = vld [vmem:[%s20179_s26 + $0xb0] sm:$0xff]  ;;  %s20203_s5 = sld [smem:[#allocation92_spill]]  ;;  %vm13660_vm0 = vmmov 0  }
 0x240   :  { %v4410_v51 = vld [vmem:[%s20179_s26 + $0x38] sm:$0xff]  ;;  %11334 = vmatpush3.msra.mxu1 %v4411_v25  ;;  %v4409_v52 = vld [vmem:[%s20179_s26 + $0x30] sm:$0xff]  ;;  %v4374_v53 = vadd.f32 %v4373_v43, %v15646_v63  ;;  %v12753_v55 = vld [vmem:[%s20170_s24 + $0xd40] ss:$40 sps:$4 sm:$0xff]   ;;  %v4345_v56 = vrot.slane %v4344_v47, 2  ;;  %v4363_v0 = vrot.slane %v4362_v50, 2 }
 0x241   :  { %11335 = vmatprep.subr.mxu1 %v4426_v46  ;;  %v4408_v59 = vld [vmem:[%s20179_s26 + $0x28] sm:$0xff]  ;;  %v12758_v60 = vld [vmem:[%s20170_s24 + $0xcf4] ss:$40 sps:$4 sm:$0xff]   ;;  %v4423_v62 = vld [vmem:[%s20179_s26 + $0xa0] sm:$0xff]  ;;  %s20220_s4 = sld [smem:[#allocation89_spill]] }
 0x242   :  { %4282 = vmatpush2.bf16.msra.mxu0 %v12750_v45  ;;  %11336 = vmatpush3.msra.mxu1 %v4410_v51  ;;  %v4407_v1 = vld [vmem:[%s20179_s26 + $0x20] sm:$0xff]  ;;  %v12756_v2 = vld [vmem:[%s20170_s24 + $0xcf0] ss:$40 sps:$4 sm:$0xff]   ;;  %v4375_v4 = vrot.slane %v4374_v53, 2  ;;  %v4346_v44 = vadd.f32 %v4345_v56, %v4344_v47  ;;  %v4364_v13 = vadd.f32 %v4363_v0, %v4362_v50  ;;  %v4420_v15 = vld [vmem:[%s20179_s26 + $0x88] sm:$0xff] }
 0x243   :  { %11337 = vmatprep.subr.mxu1 %v4425_v49  ;;  %4283 = vmatprep.subr.bf16.mxu0 %v12755_v48  ;;  %v4422_v3 = vld [vmem:[%s20179_s26 + $0x98] sm:$0xff]  ;;  %v12761_v9 = vld [vmem:[%s20170_s24 + $0xca4] ss:$40 sps:$4 sm:$0xff]   ;;  %v4421_v11 = vld [vmem:[%s20179_s26 + $0x90] sm:$0xff] }
 0x244   :  { %11338 = vmatpush3.msra.mxu1 %v4409_v52  ;;  %v4406_v8 = vld [vmem:[%s20179_s26 + $0x18] sm:$0xff]  ;;  %v4405_v12 = vld [vmem:[%s20179_s26 + $0x10] sm:$0xff]  ;;  %v12759_v14 = vld [vmem:[%s20170_s24 + $0xca0] ss:$40 sps:$4 sm:$0xff]   ;;  %v4376_v18 = vadd.f32 %v4375_v4, %v4374_v53  ;;  %v4347_v33 = vrot.slane %v4346_v44, 1  ;;  %v4365_v6 = vrot.slane %v4364_v13, 1 }
 0x245   :  { %11339 = vmatprep.subr.mxu1 %v4424_v57  ;;  %v4404_v19 = vld [vmem:[%s20179_s26 + $0x8] sm:$0xff]  ;;  %v4419_v31 = vld [vmem:[%s20179_s26 + $0x80] sm:$0xff]  ;;  %v4466_v22 = vld [vmem:[%s20179_s26 + $0x1f8] sm:$0xff]  ;;  %s20182_s24 = sld [smem:[#allocation91_spill]] }
 0x246   :  { %4284 = vmatpush2.bf16.msra.mxu0 %v12753_v55  ;;  %11340 = vmatpush3.msra.mxu1 %v4408_v59  ;;  %v4403_v58 = vld [vmem:[%s20179_s26] sm:$0xff]  ;;  %v4377_v7 = vrot.slane %v4376_v18, 1  ;;  %v4348_v21 = vadd.f32 %v4347_v33, %v4346_v44  ;;  %v4498_v26 = vld [vmem:[%s20179_s26 + $0x2f8] sm:$0xff]  ;;  %v4366_v16 = vadd.f32 %v4365_v6, %v4364_v13  ;;  %v4465_v42 = vld [vmem:[%s20179_s26 + $0x1f0] sm:$0xff]  ;;  %v4367_v44 = vrot.slane %v15614_v20, 4 }
 0x247   :  { %11341 = vmatprep.subr.mxu1 %v4423_v62  ;;  %4285 = vmatprep.subr.bf16.mxu0 %v12758_v60  ;;  %v4450_v41 = vld [vmem:[%s20179_s26 + $0x178] sm:$0xff]  ;;  %v4497_v36 = vld [vmem:[%s20179_s26 + $0x2f0] sm:$0xff]  ;;  %v4464_v40 = vld [vmem:[%s20179_s26 + $0x1e8] sm:$0xff] }
 0x248   :  { %11342 = vmatpush3.msra.mxu1 %v4407_v1  ;;  %v4482_v29 = vld [vmem:[%s20179_s26 + $0x278] sm:$0xff]  ;;  %v4378_v35 = vadd.f32 %v4377_v7, %v4376_v18  ;;  %v4449_v39 = vld [vmem:[%s20179_s26 + $0x170] sm:$0xff]  ;;  %v4496_v43 = vld [vmem:[%s20179_s26 + $0x2e8] sm:$0xff]  ;;  %v4368_v33 = vadd.f32 %v4367_v44, %v15614_v20 }
 0x249   :  { %11343 = vmatprep.subr.mxu1 %v4422_v3  ;;  %v4448_v45 = vld [vmem:[%s20179_s26 + $0x168] sm:$0xff]  ;;  %v4463_v47 = vld [vmem:[%s20179_s26 + $0x1e0] sm:$0xff]  ;;  %v4462_v52 = vld [vmem:[%s20179_s26 + $0x1d8] sm:$0xff] }
 0x24a   :  { %4286 = vmatpush2.bf16.msra.mxu0 %v12756_v2  ;;  %11344 = vmatpush3.msra.mxu1 %v4406_v8  ;;  %v4480_v46 = vld [vmem:[%s20179_s26 + $0x268] sm:$0xff]  ;;  %v4495_v48 = vld [vmem:[%s20179_s26 + $0x2e0] sm:$0xff]  ;;  %v4494_v55 = vld [vmem:[%s20179_s26 + $0x2d8] sm:$0xff]  ;;  %v4355_v2 = vrot.slane %v15179_v54, 4 }
 0x24b   :  { %11345 = vmatprep.subr.mxu1 %v4421_v11  ;;  %4287 = vmatprep.subr.bf16.mxu0 %v12761_v9  ;;  %v4447_v49 = vld [vmem:[%s20179_s26 + $0x160] sm:$0xff]  ;;  %v4446_v57 = vld [vmem:[%s20179_s26 + $0x158] sm:$0xff]  ;;  %v4461_v59 = vld [vmem:[%s20179_s26 + $0x1d0] sm:$0xff] }
 0x24c   :  { %11346 = vmatpush3.msra.mxu1 %v4405_v12  ;;  %v4479_v50 = vld [vmem:[%s20179_s26 + $0x260] sm:$0xff]  ;;  %v4478_v56 = vld [vmem:[%s20179_s26 + $0x258] sm:$0xff]  ;;  %v4493_v60 = vld [vmem:[%s20179_s26 + $0x2d0] sm:$0xff] }
 0x24d   :  { %11347 = vmatprep.subr.mxu1 %v4420_v15  ;;  %v4445_v62 = vld [vmem:[%s20179_s26 + $0x150] sm:$0xff]  ;;  %v4460_v1 = vld [vmem:[%s20179_s26 + $0x1c8] sm:$0xff]  ;;  %v4459_v9 = vld [vmem:[%s20179_s26 + $0x1c0] sm:$0xff]  ;;  %v4356_v15 = vadd.f32 %v4355_v2, %v15179_v54 }
 0x24e   :  { %4288 = vmatpush2.bf16.msra.mxu0 %v12759_v14  ;;  %11348 = vmatpush3.msra.mxu1 %v4404_v19  ;;  %v4477_v0 = vld [vmem:[%s20179_s26 + $0x250] sm:$0xff]  ;;  %v4492_v3 = vld [vmem:[%s20179_s26 + $0x2c8] sm:$0xff]  ;;  %v4491_v11 = vld [vmem:[%s20179_s26 + $0x2c0] sm:$0xff] }
 0x24f   :  { %11349 = vmatprep.subr.mxu1 %v4419_v31  ;;  %11354 = vmatprep.subr.mxu0 %v4466_v22  ;;  %v4444_v4 = vld [vmem:[%s20179_s26 + $0x148] sm:$0xff]  ;;  %v4443_v12 = vld [vmem:[%s20179_s26 + $0x140] sm:$0xff]  ;;  %v4458_v14 = vld [vmem:[%s20179_s26 + $0x1b8] sm:$0xff] }
 0x250   :  { %11350 = vmatpush3.msra.mxu1 %v4403_v58  ;;  %v4476_v8 = vld [vmem:[%s20179_s26 + $0x248] sm:$0xff]  ;;  %v4475_v13 = vld [vmem:[%s20179_s26 + $0x240] sm:$0xff]  ;;  %v4490_v18 = vld [vmem:[%s20179_s26 + $0x2b8] sm:$0xff] }
 0x251   :  { %4290 = vmatmul.mubr.bf16.vlgmr.msra.gmra.mxu0 %v14210_v17  ;;  %4628 = vmatmul.mubr.f32.vlgmr.msra.gmra.mxu1 %v4348_v21  ;;  %v15747_v30 = vpop.f32.mrf.mxu1  ;;  %v4481_v17 = vld [vmem:[%s20179_s26 + $0x270] sm:$0xff]  ;;  %v4442_v19 = vld [vmem:[%s20179_s26 + $0x138] sm:$0xff]  ;;  %v4456_v21 = vld [vmem:[%s20179_s26 + $0x1a8] sm:$0xff] }
 0x252   :  { %11389 = vmatprep.subr.mxu1 %v4498_v26  ;;  %11355 = vmatpush3.msra.mxu0 %v4450_v41  ;;  %v4474_v31 = vld [vmem:[%s20179_s26 + $0x238] sm:$0xff]  ;;  %v4457_v22 = vld [vmem:[%s20179_s26 + $0x1b0] sm:$0xff]  ;;  %v4357_v26 = vrot.slane %v4356_v15, 2  ;;  %v4488_v41 = vld [vmem:[%s20179_s26 + $0x2a8] sm:$0xff] }
 0x253   :  { %4697 = vmatprep.mubr.f32.mxu0 %v4366_v16  ;;  %11390 = vmatpush3.msra.mxu1 %v4482_v29  ;;  %v15761_v25 = vpop.f32.mrf.mxu1  ;;  %v4489_v58 = vld [vmem:[%s20179_s26 + $0x2b0] sm:$0xff]  ;;  %v4440_v29 = vld [vmem:[%s20179_s26 + $0x128] sm:$0xff]  ;;  %v4369_v16 = vrot.slane %v4368_v33, 2  ;;  %v4467_v2 = vld [vmem:[%s20179_s26 + $0x200] sm:$0xff] }
 0x254   :  { %4767 = vmatprep.mubr.f32.mxu1 %v4378_v35  ;;  %11356 = vmatprep.subr.mxu0 %v4465_v42  ;;  %v4441_v6 = vld [vmem:[%s20179_s26 + $0x130] sm:$0xff]  ;;  %v4472_v42 = vld [vmem:[%s20179_s26 + $0x228] sm:$0xff]  ;;  %v4455_v35 = vld [vmem:[%s20179_s26 + $0x1a0] sm:$0xff] }
 0x255   :  { %11391 = vmatprep.subr.mxu1 %v4497_v36  ;;  %11357 = vmatpush3.msra.mxu0 %v4449_v39  ;;  %v4049_v51 = vpop.f32.mrf.mxu1  ;;  %v4473_v7 = vld [vmem:[%s20179_s26 + $0x230] sm:$0xff]  ;;  %v4487_v36 = vld [vmem:[%s20179_s26 + $0x2a0] sm:$0xff]  ;;  %v16872_v5 = vld [vmem:[%s20182_s24 + $0x48] sm:$0xff] }
 0x256   :  { %11392 = vmatpush3.msra.mxu1 %v4481_v17  ;;  %11358 = vmatprep.subr.mxu0 %v4464_v40  ;;  %v4439_v39 = vld [vmem:[%s20179_s26 + $0x120] sm:$0xff]  ;;  %v4454_v40 = vld [vmem:[%s20179_s26 + $0x198] sm:$0xff]  ;;  %20196 = vst [vmem:[#allocation26_spill] sm:$0xff] %v16872_v5  ;;  %v13390_v10 = vld [vmem:[%s20179_s26 + $0x88] sm:$0xff] }
 0x257   :  { %11393 = vmatprep.subr.mxu1 %v4496_v43  ;;  %11359 = vmatpush3.msra.mxu0 %v4448_v45  ;;  %v4050_v53 = vpop.f32.mrf.mxu1  ;;  %v4471_v17 = vld [vmem:[%s20179_s26 + $0x220] sm:$0xff]  ;;  %v4358_v43 = vadd.f32 %v4357_v26, %v4356_v15  ;;  %v4486_v45 = vld [vmem:[%s20179_s26 + $0x298] sm:$0xff]  ;;  %v4513_v15 = vld [vmem:[%s20179_s26 + $0x370] sm:$0xff] }
 0x258   :  { %11394 = vmatpush3.msra.mxu1 %v4480_v46  ;;  %11360 = vmatprep.subr.mxu0 %v4463_v47  ;;  %v4438_v46 = vld [vmem:[%s20179_s26 + $0x118] sm:$0xff]  ;;  %v4370_v47 = vadd.f32 %v4369_v16, %v4368_v33  ;;  %v4452_v53 = vld [vmem:[%s20179_s26 + $0x188] sm:$0xff]  ;;  %v4545_v33 = vld [vmem:[%s20179_s26 + $0x470] sm:$0xff] }
 0x259   :  { %11395 = vmatprep.subr.mxu1 %v4495_v48  ;;  %11361 = vmatpush3.msra.mxu0 %v4447_v49  ;;  %v4470_v51 = vld [vmem:[%s20179_s26 + $0x218] sm:$0xff]  ;;  %v4453_v48 = vld [vmem:[%s20179_s26 + $0x190] sm:$0xff]  ;;  %v4511_v26 = vld [vmem:[%s20179_s26 + $0x360] sm:$0xff] }
 0x25a   :  { %11396 = vmatpush3.msra.mxu1 %v4479_v50  ;;  %11362 = vmatprep.subr.mxu0 %v4462_v52  ;;  %v4485_v49 = vld [vmem:[%s20179_s26 + $0x290] sm:$0xff]  ;;  %v4543_v16 = vld [vmem:[%s20179_s26 + $0x460] sm:$0xff]  ;;  %v13394_v37 = vld [vmem:[%s20179_s26 + $0x178] sm:$0xff] }
 0x25b   :  { %11397 = vmatprep.subr.mxu1 %v4494_v55  ;;  %11363 = vmatpush3.msra.mxu0 %v4446_v57  ;;  %v4437_v50 = vld [vmem:[%s20179_s26 + $0x110] sm:$0xff]  ;;  %v4359_v55 = vrot.slane %v4358_v43, 1  ;;  %v4484_v57 = vld [vmem:[%s20179_s26 + $0x288] sm:$0xff]  ;;  %v16845_v23 = vld [vmem:[%s20182_s24 + $0xe0] sm:$0xff] }
 0x25c   :  { %11398 = vmatpush3.msra.mxu1 %v4478_v56  ;;  %11364 = vmatprep.subr.mxu0 %v4461_v59  ;;  %v4469_v52 = vld [vmem:[%s20179_s26 + $0x210] sm:$0xff]  ;;  %v4436_v56 = vld [vmem:[%s20179_s26 + $0x108] sm:$0xff]  ;;  %20193 = vst [vmem:[#allocation23_spill] sm:$0xff] %v16845_v23 }
 0x25d   :  { %11399 = vmatprep.subr.mxu1 %v4493_v60  ;;  %11365 = vmatpush3.msra.mxu0 %v4445_v62  ;;  %v4468_v59 = vld [vmem:[%s20179_s26 + $0x208] sm:$0xff]  ;;  %v4451_v60 = vld [vmem:[%s20179_s26 + $0x180] sm:$0xff]  ;;  %v4371_v62 = vrot.slane %v4370_v47, 1 }
 0x25e   :  { %11400 = vmatpush3.msra.mxu1 %v4477_v0  ;;  %11366 = vmatprep.subr.mxu0 %v4460_v1  ;;  %v4483_v0 = vld [vmem:[%s20179_s26 + $0x280] sm:$0xff] }
 0x25f   :  { %11401 = vmatprep.subr.mxu1 %v4492_v3  ;;  %11367 = vmatpush3.msra.mxu0 %v4444_v4  ;;  %v4435_v1 = vld [vmem:[%s20179_s26 + $0x100] sm:$0xff]  ;;  %v4360_v3 = vadd.f32 %v4359_v55, %v4358_v43  ;;  %v4530_v4 = vld [vmem:[%s20179_s26 + $0x3f8] sm:$0xff]  ;;  %v4524_v43 = vld [vmem:[%s20179_s26 + $0x3c8] sm:$0xff] }
 0x260   :  { %11402 = vmatpush3.msra.mxu1 %v4476_v8  ;;  %11368 = vmatprep.subr.mxu0 %v4459_v9  ;;  %v4372_v8 = vadd.f32 %v4371_v62, %v4370_v47  ;;  %v4514_v9 = vld [vmem:[%s20179_s26 + $0x378] sm:$0xff]  ;;  %v4523_v47 = vld [vmem:[%s20179_s26 + $0x3c0] sm:$0xff]  ;;  %v4520_v55 = vld [vmem:[%s20179_s26 + $0x3a8] sm:$0xff] }
 0x261   :  { %11403 = vmatprep.subr.mxu1 %v4491_v11  ;;  %11369 = vmatpush3.msra.mxu0 %v4443_v12  ;;  %v4562_v11 = vld [vmem:[%s20179_s26 + $0x4f8] sm:$0xff]  ;;  %v4529_v12 = vld [vmem:[%s20179_s26 + $0x3f0] sm:$0xff]  ;;  %v13361_v62 = vld [vmem:[%s20172_s7] sm:$0xff] }
 0x262   :  { %11404 = vmatpush3.msra.mxu1 %v4475_v13  ;;  %11370 = vmatprep.subr.mxu0 %v4458_v14  ;;  %v4546_v13 = vld [vmem:[%s20179_s26 + $0x478] sm:$0xff] }
 0x263   :  { %11405 = vmatprep.subr.mxu1 %v4490_v18  ;;  %11371 = vmatpush3.msra.mxu0 %v4442_v19  ;;  %v4561_v18 = vld [vmem:[%s20179_s26 + $0x4f0] sm:$0xff]  ;;  %v4528_v19 = vld [vmem:[%s20179_s26 + $0x3e8] sm:$0xff] }
 0x264   :  { %11406 = vmatpush3.msra.mxu1 %v4474_v31  ;;  %11372 = vmatprep.subr.mxu0 %v4457_v22  ;;  %v4512_v22 = vld [vmem:[%s20179_s26 + $0x368] sm:$0xff] }
 0x265   :  { %11407 = vmatprep.subr.mxu1 %v4489_v58  ;;  %11373 = vmatpush3.msra.mxu0 %v4441_v6  ;;  %v4560_v58 = vld [vmem:[%s20179_s26 + $0x4e8] sm:$0xff]  ;;  %v4527_v6 = vld [vmem:[%s20179_s26 + $0x3e0] sm:$0xff] }
 0x266   :  { %11408 = vmatpush3.msra.mxu1 %v4473_v7  ;;  %11374 = vmatprep.subr.mxu0 %v4456_v21  ;;  %v4544_v7 = vld [vmem:[%s20179_s26 + $0x468] sm:$0xff] }
 0x267   :  { %11409 = vmatprep.subr.mxu1 %v4488_v41  ;;  %11375 = vmatpush3.msra.mxu0 %v4440_v29  ;;  %v4559_v41 = vld [vmem:[%s20179_s26 + $0x4e0] sm:$0xff]  ;;  %v4526_v29 = vld [vmem:[%s20179_s26 + $0x3d8] sm:$0xff] }
 0x268   :  { %11410 = vmatpush3.msra.mxu1 %v4472_v42  ;;  %11376 = vmatprep.subr.mxu0 %v4455_v35  ;;  %v4510_v42 = vld [vmem:[%s20179_s26 + $0x358] sm:$0xff] }
 0x269   :  { %11411 = vmatprep.subr.mxu1 %v4487_v36  ;;  %11377 = vmatpush3.msra.mxu0 %v4439_v39  ;;  %v4558_v35 = vld [vmem:[%s20179_s26 + $0x4d8] sm:$0xff]  ;;  %v4525_v36 = vld [vmem:[%s20179_s26 + $0x3d0] sm:$0xff] }
 0x26a   :  { %11412 = vmatpush3.msra.mxu1 %v4471_v17  ;;  %11378 = vmatprep.subr.mxu0 %v4454_v40  ;;  %v4542_v39 = vld [vmem:[%s20179_s26 + $0x458] sm:$0xff]  ;;  %v4509_v17 = vld [vmem:[%s20179_s26 + $0x350] sm:$0xff] }
 0x26b   :  { %11413 = vmatprep.subr.mxu1 %v4486_v45  ;;  %11379 = vmatpush3.msra.mxu0 %v4438_v46  ;;  %v4557_v40 = vld [vmem:[%s20179_s26 + $0x4d0] sm:$0xff]  ;;  %v4508_v46 = vld [vmem:[%s20179_s26 + $0x348] sm:$0xff] }
 0x26c   :  { %11414 = vmatpush3.msra.mxu1 %v4470_v51  ;;  %11380 = vmatprep.subr.mxu0 %v4453_v48  ;;  %v4541_v45 = vld [vmem:[%s20179_s26 + $0x450] sm:$0xff]  ;;  %v4507_v51 = vld [vmem:[%s20179_s26 + $0x340] sm:$0xff]  ;;  %v4522_v48 = vld [vmem:[%s20179_s26 + $0x3b8] sm:$0xff] }
 0x26d   :  { %11415 = vmatprep.subr.mxu1 %v4485_v49  ;;  %11381 = vmatpush3.msra.mxu0 %v4437_v50  ;;  %v4506_v49 = vld [vmem:[%s20179_s26 + $0x338] sm:$0xff]  ;;  %v4521_v50 = vld [vmem:[%s20179_s26 + $0x3b0] sm:$0xff] }
 0x26e   :  { %11416 = vmatpush3.msra.mxu1 %v4469_v52  ;;  %11382 = vmatprep.subr.mxu0 %v4452_v53  ;;  %v4505_v52 = vld [vmem:[%s20179_s26 + $0x330] sm:$0xff]  ;;  %v16033_v53 = vsub.s32 6, %v14589_v28 }
 0x26f   :  { %11417 = vmatprep.subr.mxu1 %v4484_v57  ;;  %11383 = vmatpush3.msra.mxu0 %v4436_v56  ;;  %v4504_v57 = vld [vmem:[%s20179_s26 + $0x328] sm:$0xff]  ;;  %v16042_v56 = vsub.s32 7, %v14589_v28  ;;  %v4518_v28 = vld [vmem:[%s20179_s26 + $0x398] sm:$0xff] }
 0x270   :  { %11418 = vmatpush3.msra.mxu1 %v4468_v59  ;;  %11384 = vmatprep.subr.mxu0 %v4451_v60  ;;  %v15935_v44 = vpop.f32.mrf.mxu0  ;;  %20180 = vst [vmem:[#allocation11_spill] sm:$0xff] %v16033_v53  ;;  %v4519_v59 = vld [vmem:[%s20179_s26 + $0x3a0] sm:$0xff] }
 0x271   :  { %11419 = vmatprep.subr.mxu1 %v4483_v0  ;;  %11385 = vmatpush3.msra.mxu0 %v4435_v1  ;;  %20181 = vst [vmem:[#allocation12_spill] sm:$0xff] %v16042_v56  ;;  %v4503_v60 = vld [vmem:[%s20179_s26 + $0x320] sm:$0xff]  ;;  %v671_v0 = vrot.slane %v13361_v62, %v16033_v53  ;;  %v4502_v1 = vld [vmem:[%s20179_s26 + $0x318] sm:$0xff]  ;;  %v16863_v53 = vld [vmem:[%s20182_s24 + $0x90] sm:$0xff] }
 0x272   :  { %11420 = vmatpush3.msra.mxu1 %v4467_v2  ;;  %4698 = vmatmul.mubr.f32.vlgmr.msra.gmra.mxu0 %v4360_v3  ;;  %v15949_v14 = vpop.f32.mrf.mxu0  ;;  %v675_v2 = vrot.slane %v13361_v62, %v16042_v56  ;;  %v4517_v3 = vld [vmem:[%s20179_s26 + $0x390] sm:$0xff]  ;;  %20195 = vst [vmem:[#allocation25_spill] sm:$0xff] %v16863_v53  ;;  %v16881_v56 = vld [vmem:[%s20182_s24 + $0x40] sm:$0xff] }
 0x273   :  { %4768 = vmatmul.mubr.f32.vlgmr.msra.gmra.mxu1 %v4372_v8  ;;  %11424 = vmatprep.subr.mxu0 %v4530_v4  ;;  %v4501_v4 = vld [vmem:[%s20179_s26 + $0x310] sm:$0xff]  ;;  %v4046_v8 = vadd.f32 %v15747_v30, %v671_v0  ;;  %v4499_v30 = vld [vmem:[%s20179_s26 + $0x300] sm:$0xff]  ;;  %20197 = vst [vmem:[#allocation27_spill] sm:$0xff] %v16881_v56 }
 0x274   :  { %11425 = vmatpush3.msra.mxu0 %v4514_v9  ;;  %11459 = vmatprep.subr.mxu1 %v4562_v11  ;;  %v4090_v31 = vpop.f32.mrf.mxu0  ;;  %v4516_v9 = vld [vmem:[%s20179_s26 + $0x388] sm:$0xff]  ;;  %v4549_v62 = vld [vmem:[%s20179_s26 + $0x490] sm:$0xff] }
 0x275   :  { %11426 = vmatprep.subr.mxu0 %v4529_v12  ;;  %11460 = vmatpush3.msra.mxu1 %v4546_v13  ;;  %v4500_v11 = vld [vmem:[%s20179_s26 + $0x308] sm:$0xff]  ;;  %v4048_v12 = vadd.f32 %v15761_v25, %v675_v2  ;;  %v4515_v13 = vld [vmem:[%s20179_s26 + $0x380] sm:$0xff] }
 0x276   :  { %11427 = vmatpush3.msra.mxu0 %v4513_v15  ;;  %11461 = vmatprep.subr.mxu1 %v4561_v18  ;;  %v4091_v21 = vpop.f32.mrf.mxu0  ;;  %v4087_v15 = vadd.f32 %v15935_v44, %v4046_v8  ;;  %v4556_v25 = vld [vmem:[%s20179_s26 + $0x4c8] sm:$0xff]  ;;  %v4547_v8 = vld [vmem:[%s20179_s26 + $0x480] sm:$0xff] }
 0x277   :  { %11428 = vmatprep.subr.mxu0 %v4528_v19  ;;  %11462 = vmatpush3.msra.mxu1 %v4545_v33  ;;  %v4089_v33 = vadd.f32 %v15949_v14, %v4048_v12  ;;  %v4555_v14 = vld [vmem:[%s20179_s26 + $0x4c0] sm:$0xff]  ;;  %v4548_v2 = vld [vmem:[%s20179_s26 + $0x488] sm:$0xff] }
 0x278   :  { %11429 = vmatpush3.msra.mxu0 %v4512_v22  ;;  %11463 = vmatprep.subr.mxu1 %v4560_v58 }
 0x279   :  { %11430 = vmatprep.subr.mxu0 %v4527_v6  ;;  %11464 = vmatpush3.msra.mxu1 %v4544_v7  ;;  %v4540_v6 = vld [vmem:[%s20179_s26 + $0x448] sm:$0xff] }
 0x27a   :  { %11431 = vmatpush3.msra.mxu0 %v4511_v26  ;;  %11465 = vmatprep.subr.mxu1 %v4559_v41  ;;  %v4539_v41 = vld [vmem:[%s20179_s26 + $0x440] sm:$0xff] }
 0x27b   :  { %11432 = vmatprep.subr.mxu0 %v4526_v29  ;;  %11466 = vmatpush3.msra.mxu1 %v4543_v16 }
 0x27c   :  { %11433 = vmatpush3.msra.mxu0 %v4510_v42  ;;  %11467 = vmatprep.subr.mxu1 %v4558_v35  ;;  %v4554_v42 = vld [vmem:[%s20179_s26 + $0x4b8] sm:$0xff] }
 0x27d   :  { %11434 = vmatprep.subr.mxu0 %v4525_v36  ;;  %11468 = vmatpush3.msra.mxu1 %v4542_v39  ;;  %v4538_v39 = vld [vmem:[%s20179_s26 + $0x438] sm:$0xff] }
 0x27e   :  { %11435 = vmatpush3.msra.mxu0 %v4509_v17  ;;  %11469 = vmatprep.subr.mxu1 %v4557_v40 }
 0x27f   :  { %11436 = vmatprep.subr.mxu0 %v4524_v43  ;;  %11470 = vmatpush3.msra.mxu1 %v4541_v45  ;;  %v4553_v43 = vld [vmem:[%s20179_s26 + $0x4b0] sm:$0xff] }
 0x280   :  { %11437 = vmatpush3.msra.mxu0 %v4508_v46  ;;  %11471 = vmatprep.subr.mxu1 %v4556_v25  ;;  %v4537_v45 = vld [vmem:[%s20179_s26 + $0x430] sm:$0xff]  ;;  %v5065_v25 = vld [vmem:[%s20182_s24 + $0x4b8] sm:$0xff] }
 0x281   :  { %11438 = vmatprep.subr.mxu0 %v4523_v47  ;;  %11472 = vmatpush3.msra.mxu1 %v4540_v6  ;;  %v5055_v6 = vld [vmem:[%s20182_s24 + $0x468] sm:$0xff] }
 0x282   :  { %11439 = vmatpush3.msra.mxu0 %v4507_v51  ;;  %11473 = vmatprep.subr.mxu1 %v4555_v14  ;;  %v4552_v51 = vld [vmem:[%s20179_s26 + $0x4a8] sm:$0xff]  ;;  %v5045_v14 = vld [vmem:[%s20182_s24 + $0x418] sm:$0xff] }
 0x283   :  { %11440 = vmatprep.subr.mxu0 %v4522_v48  ;;  %11474 = vmatpush3.msra.mxu1 %v4539_v41  ;;  %v4536_v48 = vld [vmem:[%s20179_s26 + $0x428] sm:$0xff]  ;;  %v5034_v41 = vld [vmem:[%s20182_s24 + $0x3c0] sm:$0xff] }
 0x284   :  { %11441 = vmatpush3.msra.mxu0 %v4506_v49  ;;  %11475 = vmatprep.subr.mxu1 %v4554_v42 }
 0x285   :  { %11442 = vmatprep.subr.mxu0 %v4521_v50  ;;  %11476 = vmatpush3.msra.mxu1 %v4538_v39 }
 0x286   :  { %11443 = vmatpush3.msra.mxu0 %v4505_v52  ;;  %11477 = vmatprep.subr.mxu1 %v4553_v43  ;;  %v4551_v52 = vld [vmem:[%s20179_s26 + $0x4a0] sm:$0xff] }
 0x287   :  { %11444 = vmatprep.subr.mxu0 %v4520_v55  ;;  %11478 = vmatpush3.msra.mxu1 %v4537_v45  ;;  %v4535_v55 = vld [vmem:[%s20179_s26 + $0x420] sm:$0xff]  ;;  %v5004_v45 = vld [vmem:[%s20182_s24 + $0x2d0] sm:$0xff] }
 0x288   :  { %11445 = vmatpush3.msra.mxu0 %v4504_v57  ;;  %11479 = vmatprep.subr.mxu1 %v4552_v51  ;;  %v4550_v57 = vld [vmem:[%s20179_s26 + $0x498] sm:$0xff]  ;;  %v4994_v51 = vld [vmem:[%s20182_s24 + $0x280] sm:$0xff] }
 0x289   :  { %11446 = vmatprep.subr.mxu0 %v4519_v59  ;;  %11480 = vmatpush3.msra.mxu1 %v4536_v48  ;;  %v4534_v59 = vld [vmem:[%s20179_s26 + $0x418] sm:$0xff] }
 0x28a   :  { %11447 = vmatpush3.msra.mxu0 %v4503_v60  ;;  %11481 = vmatprep.subr.mxu1 %v4551_v52  ;;  %v4985_v48 = vld [vmem:[%s20182_s24 + $0x238] sm:$0xff]  ;;  %v4974_v52 = vld [vmem:[%s20182_s24 + $0x1e0] sm:$0xff] }
 0x28b   :  { %11448 = vmatprep.subr.mxu0 %v4518_v28  ;;  %11482 = vmatpush3.msra.mxu1 %v4535_v55  ;;  %v4533_v28 = vld [vmem:[%s20179_s26 + $0x410] sm:$0xff]  ;;  %v4965_v55 = vld [vmem:[%s20182_s24 + $0x198] sm:$0xff] }
 0x28c   :  { %11449 = vmatpush3.msra.mxu0 %v4502_v1  ;;  %11483 = vmatprep.subr.mxu1 %v4550_v57  ;;  %v4964_v57 = vld [vmem:[%s20182_s24 + $0x190] sm:$0xff] }
 0x28d   :  { %11450 = vmatprep.subr.mxu0 %v4517_v3  ;;  %11484 = vmatpush3.msra.mxu1 %v4534_v59  ;;  %v4532_v3 = vld [vmem:[%s20179_s26 + $0x408] sm:$0xff] }
 0x28e   :  { %11451 = vmatpush3.msra.mxu0 %v4501_v4  ;;  %11485 = vmatprep.subr.mxu1 %v4549_v62  ;;  %v4955_v59 = vld [vmem:[%s20182_s24 + $0x148] sm:$0xff] }
 0x28f   :  { %11452 = vmatprep.subr.mxu0 %v4516_v9  ;;  %11486 = vmatpush3.msra.mxu1 %v4533_v28  ;;  %v641_v62 = vld [vmem:[%s20172_s7 + $0x8] sm:$0x3] }
 0x290   :  { %11453 = vmatpush3.msra.mxu0 %v4500_v11  ;;  %v4168_v19 = vpop.f32.mrf.mxu0  ;;  %11487 = vmatprep.subr.mxu1 %v4548_v2  ;;  %v4531_v11 = vld [vmem:[%s20179_s26 + $0x400] sm:$0xff]  ;;  %v683_v28 = vrot.slane %v641_v62, %v14616_v38 }
 0x291   :  { %v4127_v18 = vpop.f32.mrf.mxu1  ;;  %11454 = vmatprep.subr.mxu0 %v4515_v13  ;;  %11488 = vmatpush3.msra.mxu1 %v4532_v3 }
 0x292   :  { %v4128_v31 = vadd.f32 %v4127_v18, %v4087_v15  ;;  %11455 = vmatpush3.msra.mxu0 %v4499_v30  ;;  %v4170_v58 = vpop.f32.mrf.mxu0  ;;  %11489 = vmatprep.subr.mxu1 %v4547_v8 }
 0x293   :  { %v4129_v22 = vpop.f32.mrf.mxu1  ;;  %11490 = vmatpush3.msra.mxu1 %v4531_v11  ;;  %5074 = vmatprep.subr.mxu0 %v5065_v25 }
 0x294   :  { %v16089_v44 = vadd.f32 %v4168_v19, %v4128_v31  ;;  %v4130_v7 = vadd.f32 %v4129_v22, %v4089_v33  ;;  %v4172_v21 = vpop.f32.mrf.mxu0  ;;  %v5067_v22 = vld [vmem:[%s20182_s24 + $0x4c8] sm:$0xff] }
 0x295   :  { %v4131_v26 = vpop.f32.mrf.mxu1  ;;  %5145 = vmatprep.subr.mxu1 %v5067_v22  ;;  %v5044_v21 = vld [vmem:[%s20182_s24 + $0x410] sm:$0xff] }
 0x296   :  { %v4379_v29 = vrot.slane %v16089_v44, 4  ;;  %v16098_v16 = vadd.f32 %v4170_v58, %v4130_v7  ;;  %v4173_v35 = vpop.f32.mrf.mxu0  ;;  %v5064_v58 = vld [vmem:[%s20182_s24 + $0x4b0] sm:$0xff]  ;;  %v5054_v7 = vld [vmem:[%s20182_s24 + $0x460] sm:$0xff]  ;;  %v5035_v26 = vld [vmem:[%s20182_s24 + $0x3c8] sm:$0xff] }
 0x297   :  { %v4132_v36 = vpop.f32.mrf.mxu1  ;;  %v5024_v35 = vld [vmem:[%s20182_s24 + $0x370] sm:$0xff] }
 0x298   :  { %v4380_v17 = vadd.f32 %v4379_v29, %v16089_v44  ;;  %v4385_v40 = vrot.slane %v16098_v16, 4  ;;  %v5025_v29 = vld [vmem:[%s20182_s24 + $0x378] sm:$0xff]  ;;  %v5015_v36 = vld [vmem:[%s20182_s24 + $0x328] sm:$0xff] }
 0x29a   :  { %v4381_v46 = vrot.slane %v4380_v17, 2  ;;  %v4386_v47 = vadd.f32 %v4385_v40, %v16098_v16  ;;  %v5005_v40 = vld [vmem:[%s20182_s24 + $0x2d8] sm:$0xff] }
 0x29c   :  { %v4382_v49 = vadd.f32 %v4381_v46, %v4380_v17  ;;  %v4387_v50 = vrot.slane %v4386_v47, 2  ;;  %v5014_v17 = vld [vmem:[%s20182_s24 + $0x320] sm:$0xff]  ;;  %v4995_v46 = vld [vmem:[%s20182_s24 + $0x288] sm:$0xff] }
 0x29e   :  { %v4388_v60 = vadd.f32 %v4387_v50, %v4386_v47  ;;  %v4383_v0 = vrot.slane %v4382_v49, 1  ;;  %v4975_v50 = vld [vmem:[%s20182_s24 + $0x1e8] sm:$0xff] }
 0x2a0   :  { %v4389_v1 = vrot.slane %v4388_v60, 1  ;;  %v4384_v9 = vadd.f32 %v4383_v0, %v4382_v49  ;;  %v4984_v49 = vld [vmem:[%s20182_s24 + $0x230] sm:$0xff]  ;;  %v679_v0 = vrot.slane %v641_v62, %v14607_v34  ;;  %v4966_v62 = vld [vmem:[%s20182_s24 + $0x1a0] sm:$0xff] }
 0x2a2   :  { %v4390_v4 = vadd.f32 %v4389_v1, %v4388_v60  ;;  %v4954_v60 = vld [vmem:[%s20182_s24 + $0x140] sm:$0xff] }
 0x2a4   :  { %4837 = vmatprep.mubr.f32.mxu0 %v4390_v4 }
 0x2a5   :  { %4838 = vmatmul.mubr.f32.vlgmr.msra.gmra.mxu0 %v4384_v9 }
 0x2a6   :  { %5075 = vmatpush1.msra.mxu0 %v5064_v58 }
 0x2a7   :  { %5076 = vmatprep.subr.mxu0 %v5055_v6 }
 0x2a8   :  { %5077 = vmatpush1.msra.mxu0 %v5054_v7 }
 0x2a9   :  { %5078 = vmatprep.subr.mxu0 %v5045_v14 }
 0x2aa   :  { %5079 = vmatpush1.msra.mxu0 %v5044_v21 }
 0x2ab   :  { %5080 = vmatprep.subr.mxu0 %v5035_v26 }
 0x2ac   :  { %5081 = vmatpush1.msra.mxu0 %v5034_v41 }
 0x2ad   :  { %5082 = vmatprep.subr.mxu0 %v5025_v29  ;;  %v5066_v29 = vld [vmem:[%s20182_s24 + $0x4c0] sm:$0xff] }
 0x2ae   :  { %5083 = vmatpush1.msra.mxu0 %v5024_v35  ;;  %v5056_v35 = vld [vmem:[%s20182_s24 + $0x470] sm:$0xff] }
 0x2af   :  { %5084 = vmatprep.subr.mxu0 %v5015_v36  ;;  %v5047_v36 = vld [vmem:[%s20182_s24 + $0x428] sm:$0xff] }
 0x2b0   :  { %5085 = vmatpush1.msra.mxu0 %v5014_v17  ;;  %v5037_v17 = vld [vmem:[%s20182_s24 + $0x3d8] sm:$0xff] }
 0x2b1   :  { %5086 = vmatprep.subr.mxu0 %v5005_v40  ;;  %v5036_v40 = vld [vmem:[%s20182_s24 + $0x3d0] sm:$0xff] }
 0x2b2   :  { %5087 = vmatpush1.msra.mxu0 %v5004_v45  ;;  %v5026_v45 = vld [vmem:[%s20182_s24 + $0x380] sm:$0xff] }
 0x2b3   :  { %5088 = vmatprep.subr.mxu0 %v4995_v46  ;;  %v5017_v46 = vld [vmem:[%s20182_s24 + $0x338] sm:$0xff] }
 0x2b4   :  { %5089 = vmatpush1.msra.mxu0 %v4994_v51  ;;  %v5007_v51 = vld [vmem:[%s20182_s24 + $0x2e8] sm:$0xff] }
 0x2b5   :  { %5090 = vmatprep.subr.mxu0 %v4985_v48  ;;  %v5006_v48 = vld [vmem:[%s20182_s24 + $0x2e0] sm:$0xff] }
 0x2b6   :  { %5091 = vmatpush1.msra.mxu0 %v4984_v49  ;;  %v4997_v49 = vld [vmem:[%s20182_s24 + $0x298] sm:$0xff] }
 0x2b7   :  { %5092 = vmatprep.subr.mxu0 %v4975_v50  ;;  %v4996_v50 = vld [vmem:[%s20182_s24 + $0x290] sm:$0xff] }
 0x2b8   :  { %5093 = vmatpush1.msra.mxu0 %v4974_v52  ;;  %v4987_v52 = vld [vmem:[%s20182_s24 + $0x248] sm:$0xff] }
 0x2b9   :  { %5094 = vmatprep.subr.mxu0 %v4965_v55  ;;  %v4986_v55 = vld [vmem:[%s20182_s24 + $0x240] sm:$0xff] }
 0x2ba   :  { %5095 = vmatpush1.msra.mxu0 %v4964_v57  ;;  %v4977_v57 = vld [vmem:[%s20182_s24 + $0x1f8] sm:$0xff] }
 0x2bb   :  { %5096 = vmatprep.subr.mxu0 %v4955_v59  ;;  %v4976_v59 = vld [vmem:[%s20182_s24 + $0x1f0] sm:$0xff] }
 0x2bc   :  { %5097 = vmatpush1.msra.mxu0 %v4954_v60  ;;  %v4967_v60 = vld [vmem:[%s20182_s24 + $0x1a8] sm:$0xff] }
 0x2d0   :  { %v16151_v12 = vpop.f32.mrf.mxu0 }
 0x2d1   :  { %v16153_v13 = vpop.f32.mrf.mxu1  ;;  %v4210_v1 = vadd.f32 %v16151_v12, %v679_v0  ;;  %v4957_v0 = vld [vmem:[%s20182_s24 + $0x158] sm:$0xff] }
 0x2d2   :  { %v16155_v30 = vpop.f32.mrf.mxu0 }
 0x2d3   :  { %v16157_v15 = vpop.f32.mrf.mxu1  ;;  %v4212_v2 = vadd.f32 %v16155_v30, %v683_v28  ;;  %v4251_v3 = vadd.f32 %v16153_v13, %v4210_v1  ;;  %v4956_v28 = vld [vmem:[%s20182_s24 + $0x150] sm:$0xff]  ;;  %v4945_v1 = vld [vmem:[%s20182_s24 + $0xf8] sm:$0xff] }
 0x2d4   :  { %v4213_v18 = vpop.f32.mrf.mxu0  ;;  %5098 = vmatprep.subr.mxu0 %v4945_v1  ;;  %v5049_v1 = vld [vmem:[%s20182_s24 + $0x438] sm:$0xff] }
 0x2d5   :  { %v4254_v19 = vpop.f32.mrf.mxu1  ;;  %v4253_v8 = vadd.f32 %v16157_v15, %v4212_v2  ;;  %v4947_v2 = vld [vmem:[%s20182_s24 + $0x108] sm:$0xff] }
 0x2d6   :  { %v4214_v33 = vpop.f32.mrf.mxu0 }
 0x2d7   :  { %v4255_v31 = vpop.f32.mrf.mxu1 }
 0x2f1   :  { %v4332_v42 = vpop.f32.mrf.mxu1 }
 0x2f3   :  { %v4334_v39 = vpop.f32.mrf.mxu1 }
 0x2f5   :  { %v4336_v43 = vpop.f32.mrf.mxu1 }
 0x2f6   :  { %v5027_v43 = vld [vmem:[%s20182_s24 + $0x388] sm:$0xff] }
 0x2f7   :  { %v4337_v47 = vpop.f32.mrf.mxu1 }
 0x2f8   :  { %v5016_v47 = vld [vmem:[%s20182_s24 + $0x330] sm:$0xff] }
 0x311   :  { %v4291_v4 = vpop.f32.mrf.mxu0 }
 0x312   :  { %v4292_v9 = vadd.f32 %v4291_v4, %v4251_v3  ;;  %v4944_v3 = vld [vmem:[%s20182_s24 + $0xf0] sm:$0xff]  ;;  %v4946_v4 = vld [vmem:[%s20182_s24 + $0x100] sm:$0xff] }
 0x313   :  { %v4293_v11 = vpop.f32.mrf.mxu0  ;;  %5099 = vmatpush1.msra.mxu0 %v4944_v3  ;;  %v5048_v3 = vld [vmem:[%s20182_s24 + $0x430] sm:$0xff] }
 0x314   :  { %v16243_v18 = vadd.f32 %v4332_v42, %v4292_v9  ;;  %v4294_v19 = vadd.f32 %v4293_v11, %v4253_v8  ;;  %v5057_v42 = vld [vmem:[%s20182_s24 + $0x478] sm:$0xff]  ;;  %v4935_v8 = vld [vmem:[%s20182_s24 + $0xa8] sm:$0xff]  ;;  %v4934_v11 = vld [vmem:[%s20182_s24 + $0xa0] sm:$0xff] }
 0x315   :  { %v4295_v33 = vpop.f32.mrf.mxu0  ;;  %v4937_v9 = vld [vmem:[%s20182_s24 + $0xb8] sm:$0xff]  ;;  %5100 = vmatprep.subr.mxu0 %v4935_v8  ;;  %v5039_v8 = vld [vmem:[%s20182_s24 + $0x3e8] sm:$0xff] }
 0x316   :  { %v4391_v31 = vrot.slane %v16243_v18, 4  ;;  %v16246_v25 = vadd.f32 %v4334_v39, %v4294_v19  ;;  %v5046_v39 = vld [vmem:[%s20182_s24 + $0x420] sm:$0xff]  ;;  %v4936_v19 = vld [vmem:[%s20182_s24 + $0xb0] sm:$0xff]  ;;  %5101 = vmatpush1.msra.mxu0 %v4934_v11  ;;  %v4925_v33 = vld [vmem:[%s20182_s24 + $0x58] sm:$0xff] }
 0x317   :  { %v4296_v22 = vpop.f32.mrf.mxu0  ;;  %5102 = vmatprep.subr.mxu0 %v4925_v33  ;;  %v5038_v11 = vld [vmem:[%s20182_s24 + $0x3e0] sm:$0xff]  ;;  %v5029_v33 = vld [vmem:[%s20182_s24 + $0x398] sm:$0xff] }
 0x318   :  { %v4392_v12 = vadd.f32 %v4391_v31, %v16243_v18  ;;  %v4397_v30 = vrot.slane %v16246_v25, 4  ;;  %v4927_v31 = vld [vmem:[%s20182_s24 + $0x68] sm:$0xff]  ;;  %v4924_v22 = vld [vmem:[%s20182_s24 + $0x50] sm:$0xff] }
 0x319   :  { %5103 = vmatpush1.msra.mxu0 %v4924_v22  ;;  %v5028_v22 = vld [vmem:[%s20182_s24 + $0x390] sm:$0xff] }
 0x31a   :  { %v4393_v58 = vrot.slane %v4392_v12, 2  ;;  %v4398_v13 = vadd.f32 %v4397_v30, %v16246_v25  ;;  %v4915_v30 = vld [vmem:[%s20182_s24 + $0x8] sm:$0xff] }
 0x31b   :  { %5104 = vmatprep.subr.mxu0 %v4915_v30  ;;  %v5019_v30 = vld [vmem:[%s20182_s24 + $0x348] sm:$0xff] }
 0x31c   :  { %v4394_v6 = vadd.f32 %v4393_v58, %v4392_v12  ;;  %v4399_v15 = vrot.slane %v4398_v13, 2  ;;  %v4926_v12 = vld [vmem:[%s20182_s24 + $0x60] sm:$0xff]  ;;  %v4917_v58 = vld [vmem:[%s20182_s24 + $0x18] sm:$0xff] }
 0x31e   :  { %v4400_v7 = vadd.f32 %v4399_v15, %v4398_v13  ;;  %v4395_v14 = vrot.slane %v4394_v6, 1  ;;  %v4914_v13 = vld [vmem:[%s20182_s24] sm:$0xff]  ;;  %v5069_v15 = vld [vmem:[%s20182_s24 + $0x4d8] sm:$0xff] }
 0x31f   :  { %5105 = vmatpush1.msra.mxu0 %v4914_v13  ;;  %v5018_v13 = vld [vmem:[%s20182_s24 + $0x340] sm:$0xff] }
 0x320   :  { %v4401_v21 = vrot.slane %v4400_v7, 1  ;;  %v4396_v41 = vadd.f32 %v4395_v14, %v4394_v6  ;;  %v4916_v6 = vld [vmem:[%s20182_s24 + $0x10] sm:$0xff]  ;;  %v20045_v14 = vmov 0.0   ;;  %5216 = vmatprep.subr.mxu0 %v5069_v15  ;;  %v5009_v15 = vld [vmem:[%s20182_s24 + $0x2f8] sm:$0xff] }
 0x321   :  { %5138 = vmatprep.mubr.f32.mxu0 %v20045_v14 }
 0x322   :  { %v4402_v26 = vadd.f32 %v4401_v21, %v4400_v7  ;;  %v5071_v7 = vld [vmem:[%s20182_s24 + $0x4e8] sm:$0xff]  ;;  %v11351_v21 = vpop.f32.mrf.mxu1 }
 0x324   :  { %4907 = vmatprep.mubr.f32.mxu1 %v4402_v26 }
 0x325   :  { %4908 = vmatmul.mubr.f32.vlgmr.msra.gmra.mxu1 %v4396_v41  ;;  %v11352_v41 = vpop.f32.mrf.mxu1 }
 0x326   :  { %5146 = vmatpush1.msra.mxu1 %v5066_v29  ;;  %5209 = vmatprep.mubr.f32.mxu1 %v20045_v14 }
 0x327   :  { %5147 = vmatprep.subr.mxu1 %v5057_v42 }
 0x328   :  { %5148 = vmatpush1.msra.mxu1 %v5056_v35 }
 0x329   :  { %5149 = vmatprep.subr.mxu1 %v5047_v36 }
 0x32a   :  { %5150 = vmatpush1.msra.mxu1 %v5046_v39  ;;  %v11353_v39 = vadd.f32 %v11352_v41, %v11351_v21  ;;  %v5008_v21 = vld [vmem:[%s20182_s24 + $0x2f0] sm:$0xff]  ;;  %v4999_v41 = vld [vmem:[%s20182_s24 + $0x2a8] sm:$0xff] }
 0x32b   :  { %5151 = vmatprep.subr.mxu1 %v5037_v17 }
 0x32c   :  { %5152 = vmatpush1.msra.mxu1 %v5036_v40 }
 0x32d   :  { %5153 = vmatprep.subr.mxu1 %v5027_v43 }
 0x32e   :  { %5154 = vmatpush1.msra.mxu1 %v5026_v45 }
 0x32f   :  { %5155 = vmatprep.subr.mxu1 %v5017_v46 }
 0x330   :  { %5156 = vmatpush1.msra.mxu1 %v5016_v47 }
 0x331   :  { %5157 = vmatprep.subr.mxu1 %v5007_v51 }
 0x332   :  { %5158 = vmatpush1.msra.mxu1 %v5006_v48  ;;  %v11386_v26 = vpop.f32.mrf.mxu0 }
 0x333   :  { %5159 = vmatprep.subr.mxu1 %v4997_v49  ;;  %v11421_v42 = vpop.f32.mrf.mxu1 }
 0x334   :  { %5160 = vmatpush1.msra.mxu1 %v4996_v50  ;;  %v11387_v29 = vpop.f32.mrf.mxu0 }
 0x335   :  { %5161 = vmatprep.subr.mxu1 %v4987_v52  ;;  %v11388_v36 = vadd.f32 %v11387_v29, %v11386_v26  ;;  %v11422_v17 = vpop.f32.mrf.mxu1  ;;  %v5010_v26 = vld [vmem:[%s20182_s24 + $0x300] sm:$0xff]  ;;  %v5001_v29 = vld [vmem:[%s20182_s24 + $0x2b8] sm:$0xff] }
 0x336   :  { %5162 = vmatpush1.msra.mxu1 %v4986_v55  ;;  %v11423_v45 = vadd.f32 %v11422_v17, %v11421_v42  ;;  %v4998_v42 = vld [vmem:[%s20182_s24 + $0x2a0] sm:$0xff]  ;;  %v4988_v17 = vld [vmem:[%s20182_s24 + $0x250] sm:$0xff] }
 0x337   :  { %5163 = vmatprep.subr.mxu1 %v4977_v57  ;;  %v4700_v43 = vadd.f32 %v11388_v36, %v11353_v39  ;;  %v5068_v57 = vld [vmem:[%s20182_s24 + $0x4d0] sm:$0xff]  ;;  %v4989_v36 = vld [vmem:[%s20182_s24 + $0x258] sm:$0xff]  ;;  %v4991_v39 = vld [vmem:[%s20182_s24 + $0x268] sm:$0xff] }
 0x338   :  { %5164 = vmatpush1.msra.mxu1 %v4976_v59  ;;  %v5070_v59 = vld [vmem:[%s20182_s24 + $0x4e0] sm:$0xff] }
 0x339   :  { %5165 = vmatprep.subr.mxu1 %v4967_v60  ;;  %v4770_v51 = vadd.f32 %v11423_v45, %v4700_v43  ;;  %v5059_v60 = vld [vmem:[%s20182_s24 + $0x488] sm:$0xff]  ;;  %v4981_v45 = vld [vmem:[%s20182_s24 + $0x218] sm:$0xff] }
 0x33a   :  { %5166 = vmatpush1.msra.mxu1 %v4966_v62  ;;  %v5061_v62 = vld [vmem:[%s20182_s24 + $0x498] sm:$0xff]  ;;  %v4979_v43 = vld [vmem:[%s20182_s24 + $0x208] sm:$0xff] }
 0x33b   :  { %5167 = vmatprep.subr.mxu1 %v4957_v0  ;;  %v5058_v0 = vld [vmem:[%s20182_s24 + $0x480] sm:$0xff] }
 0x33c   :  { %5168 = vmatpush1.msra.mxu1 %v4956_v28  ;;  %v5060_v28 = vld [vmem:[%s20182_s24 + $0x490] sm:$0xff] }
 0x33d   :  { %5169 = vmatprep.subr.mxu1 %v4947_v2  ;;  %v5051_v2 = vld [vmem:[%s20182_s24 + $0x448] sm:$0xff] }
 0x33e   :  { %5170 = vmatpush1.msra.mxu1 %v4946_v4  ;;  %v5050_v4 = vld [vmem:[%s20182_s24 + $0x440] sm:$0xff] }
 0x33f   :  { %5171 = vmatprep.subr.mxu1 %v4937_v9  ;;  %v5041_v9 = vld [vmem:[%s20182_s24 + $0x3f8] sm:$0xff] }
 0x340   :  { %5172 = vmatpush1.msra.mxu1 %v4936_v19  ;;  %v5040_v19 = vld [vmem:[%s20182_s24 + $0x3f0] sm:$0xff] }
 0x341   :  { %5173 = vmatprep.subr.mxu1 %v4927_v31  ;;  %v5031_v31 = vld [vmem:[%s20182_s24 + $0x3a8] sm:$0xff] }
 0x342   :  { %5174 = vmatpush1.msra.mxu1 %v4926_v12  ;;  %v5030_v12 = vld [vmem:[%s20182_s24 + $0x3a0] sm:$0xff] }
 0x343   :  { %5175 = vmatprep.subr.mxu1 %v4917_v58  ;;  %v5021_v58 = vld [vmem:[%s20182_s24 + $0x358] sm:$0xff] }
 0x344   :  { %5176 = vmatpush1.msra.mxu1 %v4916_v6  ;;  %v5020_v6 = vld [vmem:[%s20182_s24 + $0x350] sm:$0xff] }
 0x345   :  { %5287 = vmatprep.subr.mxu1 %v5071_v7  ;;  %v5011_v7 = vld [vmem:[%s20182_s24 + $0x308] sm:$0xff] }
 0x365   :  { %v11456_v35 = vpop.f32.mrf.mxu0 }
 0x367   :  { %v11457_v40 = vpop.f32.mrf.mxu0 }
 0x368   :  { %v11458_v46 = vadd.f32 %v11457_v40, %v11456_v35  ;;  %v5000_v35 = vld [vmem:[%s20182_s24 + $0x2b0] sm:$0xff]  ;;  %v4990_v40 = vld [vmem:[%s20182_s24 + $0x260] sm:$0xff] }
 0x36a   :  { %v4840_v49 = vadd.f32 %v11458_v46, %v4770_v51  ;;  %v4978_v46 = vld [vmem:[%s20182_s24 + $0x200] sm:$0xff]  ;;  %v4969_v51 = vld [vmem:[%s20182_s24 + $0x1b8] sm:$0xff] }
 0x3e5   :  { %v11491_v47 = vpop.f32.mrf.mxu1 }
 0x3e7   :  { %v11492_v48 = vpop.f32.mrf.mxu1 }
 0x3e8   :  { %v11493_v50 = vadd.f32 %v11492_v48, %v11491_v47  ;;  %v4980_v47 = vld [vmem:[%s20182_s24 + $0x210] sm:$0xff]  ;;  %v4971_v48 = vld [vmem:[%s20182_s24 + $0x1c8] sm:$0xff] }
 0x3ea   :  { %v4910_v52 = vadd.f32 %v11493_v50, %v4840_v49  ;;  %v4968_v49 = vld [vmem:[%s20182_s24 + $0x1b0] sm:$0xff]  ;;  %v4970_v50 = vld [vmem:[%s20182_s24 + $0x1c0] sm:$0xff] }
 0x3ec   :  { %v16376_v55 = vmul.f32 0.0006377551, %v4910_v52  ;;  %v4959_v52 = vld [vmem:[%s20182_s24 + $0x168] sm:$0xff] }
 0x3ee   :  { %5139 = vmatmul.mubr.f32.vlgmr.msra.gmra.mxu0 %v16376_v55  ;;  %5210 = vmatmul.mubr.f32.vlgmr.msra.gmra.mxu1 %v16376_v55 }
 0x3ef   :  { %5217 = vmatpush1.msra.mxu0 %v5068_v57  ;;  %5288 = vmatpush1.msra.mxu1 %v5070_v59  ;;  %v4961_v57 = vld [vmem:[%s20182_s24 + $0x178] sm:$0xff]  ;;  %v4958_v59 = vld [vmem:[%s20182_s24 + $0x160] sm:$0xff] }
 0x3f0   :  { %5218 = vmatprep.subr.mxu0 %v5059_v60  ;;  %5289 = vmatprep.subr.mxu1 %v5061_v62  ;;  %v4960_v60 = vld [vmem:[%s20182_s24 + $0x170] sm:$0xff]  ;;  %v4949_v62 = vld [vmem:[%s20182_s24 + $0x118] sm:$0xff] }
 0x3f1   :  { %5219 = vmatpush1.msra.mxu0 %v5058_v0  ;;  %5290 = vmatpush1.msra.mxu1 %v5060_v28  ;;  %v4951_v0 = vld [vmem:[%s20182_s24 + $0x128] sm:$0xff]  ;;  %v16527_v28 = vld [vmem:[%s20182_s24 + $0x110] sm:$0xff] }
 0x3f2   :  { %5220 = vmatprep.subr.mxu0 %v5049_v1  ;;  %5291 = vmatprep.subr.mxu1 %v5051_v2  ;;  %v16532_v1 = vld [vmem:[%s20182_s24 + $0x120] sm:$0xff]  ;;  %v16537_v2 = vld [vmem:[%s20182_s24 + $0xc8] sm:$0xff] }
 0x3f3   :  { %5221 = vmatpush1.msra.mxu0 %v5048_v3  ;;  %5292 = vmatpush1.msra.mxu1 %v5050_v4  ;;  %v16542_v3 = vld [vmem:[%s20182_s24 + $0xd8] sm:$0xff]  ;;  %v16547_v4 = vld [vmem:[%s20182_s24 + $0xc0] sm:$0xff] }
 0x3f4   :  { %5222 = vmatprep.subr.mxu0 %v5039_v8  ;;  %5293 = vmatprep.subr.mxu1 %v5041_v9  ;;  %v16552_v8 = vld [vmem:[%s20182_s24 + $0xd0] sm:$0xff]  ;;  %v16559_v9 = vld [vmem:[%s20182_s24 + $0x78] sm:$0xff] }
 0x3f5   :  { %5223 = vmatpush1.msra.mxu0 %v5038_v11  ;;  %5294 = vmatpush1.msra.mxu1 %v5040_v19  ;;  %v16564_v11 = vld [vmem:[%s20182_s24 + $0x88] sm:$0xff]  ;;  %v16571_v19 = vld [vmem:[%s20182_s24 + $0x70] sm:$0xff] }
 0x3f6   :  { %5224 = vmatprep.subr.mxu0 %v5029_v33  ;;  %5295 = vmatprep.subr.mxu1 %v5031_v31  ;;  %v16576_v33 = vld [vmem:[%s20182_s24 + $0x80] sm:$0xff]  ;;  %v16583_v31 = vld [vmem:[%s20182_s24 + $0x28] sm:$0xff] }
 0x3f7   :  { %5225 = vmatpush1.msra.mxu0 %v5028_v22  ;;  %5296 = vmatpush1.msra.mxu1 %v5030_v12  ;;  %v16588_v22 = vld [vmem:[%s20182_s24 + $0x38] sm:$0xff]  ;;  %v16595_v12 = vld [vmem:[%s20182_s24 + $0x20] sm:$0xff] }
 0x3f8   :  { %5226 = vmatprep.subr.mxu0 %v5019_v30  ;;  %5297 = vmatprep.subr.mxu1 %v5021_v58  ;;  %v16602_v30 = vld [vmem:[%s20182_s24 + $0x30] sm:$0xff]  ;;  %v16611_v58 = vld [vmem:[%s20182_s24 + $0x4f8] sm:$0xff] }
 0x3f9   :  { %5227 = vmatpush1.msra.mxu0 %v5018_v13  ;;  %5298 = vmatpush1.msra.mxu1 %v5020_v6  ;;  %v16618_v13 = vld [vmem:[%s20182_s24 + $0x4f0] sm:$0xff]  ;;  %v16625_v6 = vld [vmem:[%s20182_s24 + $0x4a8] sm:$0xff] }
 0x3fa   :  { %5228 = vmatprep.subr.mxu0 %v5009_v15  ;;  %5299 = vmatprep.subr.mxu1 %v5011_v7  ;;  %v16631_v15 = vld [vmem:[%s20182_s24 + $0x4a0] sm:$0xff]  ;;  %v16638_v7 = vld [vmem:[%s20182_s24 + $0x458] sm:$0xff] }
 0x3fb   :  { %5229 = vmatpush1.msra.mxu0 %v5008_v21  ;;  %5300 = vmatpush1.msra.mxu1 %v5010_v26  ;;  %v13362_v21 = vld [vmem:[%s20179_s26 + $0xf8] sm:$0xff]  ;;  %v16647_v26 = vld [vmem:[%s20182_s24 + $0x450] sm:$0xff] }
 0x3fc   :  { %5230 = vmatprep.subr.mxu0 %v4999_v41  ;;  %5301 = vmatprep.subr.mxu1 %v5001_v29  ;;  %v13363_v41 = vld [vmem:[%s20179_s26 + $0x78] sm:$0xff]  ;;  %v16656_v29 = vld [vmem:[%s20182_s24 + $0x408] sm:$0xff] }
 0x3fd   :  { %5231 = vmatpush1.msra.mxu0 %v4998_v42  ;;  %5302 = vmatpush1.msra.mxu1 %v5000_v35  ;;  %v13364_v42 = vld [vmem:[%s20179_s26 + $0xf0] sm:$0xff]  ;;  %v16665_v35 = vld [vmem:[%s20182_s24 + $0x400] sm:$0xff] }
 0x3fe   :  { %5232 = vmatprep.subr.mxu0 %v4989_v36  ;;  %5303 = vmatprep.subr.mxu1 %v4991_v39  ;;  %v13365_v36 = vld [vmem:[%s20179_s26 + $0x70] sm:$0xff]  ;;  %v16674_v39 = vld [vmem:[%s20182_s24 + $0x3b8] sm:$0xff] }
 0x3ff   :  { %5233 = vmatpush1.msra.mxu0 %v4988_v17  ;;  %5304 = vmatpush1.msra.mxu1 %v4990_v40  ;;  %v13366_v17 = vld [vmem:[%s20179_s26 + $0xe8] sm:$0xff]  ;;  %v16683_v40 = vld [vmem:[%s20182_s24 + $0x3b0] sm:$0xff] }
 0x400   :  { %5234 = vmatprep.subr.mxu0 %v4979_v43  ;;  %5305 = vmatprep.subr.mxu1 %v4981_v45  ;;  %v13367_v43 = vld [vmem:[%s20179_s26 + $0x68] sm:$0xff] }
 0x401   :  { %5235 = vmatpush1.msra.mxu0 %v4978_v46  ;;  %5306 = vmatpush1.msra.mxu1 %v4980_v47  ;;  %v16692_v45 = vld [vmem:[%s20182_s24 + $0x368] sm:$0xff]  ;;  %v13368_v46 = vld [vmem:[%s20179_s26 + $0xe0] sm:$0xff] }
 0x402   :  { %5236 = vmatprep.subr.mxu0 %v4969_v51  ;;  %5307 = vmatprep.subr.mxu1 %v4971_v48  ;;  %v16701_v47 = vld [vmem:[%s20182_s24 + $0x360] sm:$0xff]  ;;  %v16710_v48 = vld [vmem:[%s20182_s24 + $0x318] sm:$0xff] }
 0x403   :  { %5237 = vmatpush1.msra.mxu0 %v4968_v49  ;;  %5308 = vmatpush1.msra.mxu1 %v4970_v50  ;;  %v13369_v51 = vld [vmem:[%s20179_s26 + $0x60] sm:$0xff]  ;;  %v13370_v49 = vld [vmem:[%s20179_s26 + $0xd8] sm:$0xff]  ;;  %v16719_v50 = vld [vmem:[%s20182_s24 + $0x310] sm:$0xff] }
 0x404   :  { %5238 = vmatprep.subr.mxu0 %v4959_v52  ;;  %5309 = vmatprep.subr.mxu1 %v4961_v57  ;;  %v13371_v52 = vld [vmem:[%s20179_s26 + $0x58] sm:$0xff]  ;;  %v16728_v57 = vld [vmem:[%s20182_s24 + $0x2c8] sm:$0xff] }
 0x405   :  { %5239 = vmatpush1.msra.mxu0 %v4958_v59  ;;  %5310 = vmatpush1.msra.mxu1 %v4960_v60  ;;  %v13372_v59 = vld [vmem:[%s20179_s26 + $0xd0] sm:$0xff]  ;;  %v16737_v60 = vld [vmem:[%s20182_s24 + $0x2c0] sm:$0xff] }
 0x406   :  { %5240 = vmatprep.subr.mxu0 %v4949_v62  ;;  %5311 = vmatprep.subr.mxu1 %v4951_v0  ;;  %v13373_v62 = vld [vmem:[%s20179_s26 + $0x50] sm:$0xff]  ;;  %v16746_v0 = vld [vmem:[%s20182_s24 + $0x278] sm:$0xff] }
 0x407   :  { %5241 = vmatpush1.msra.mxu0 %v16527_v28  ;;  %5312 = vmatpush1.msra.mxu1 %v16532_v1 }
 0x408   :  { %5242 = vmatprep.subr.mxu0 %v16537_v2  ;;  %5313 = vmatprep.subr.mxu1 %v16542_v3 }
 0x409   :  { %5243 = vmatpush1.msra.mxu0 %v16547_v4  ;;  %5314 = vmatpush1.msra.mxu1 %v16552_v8 }
 0x40a   :  { %5244 = vmatprep.subr.mxu0 %v16559_v9  ;;  %5315 = vmatprep.subr.mxu1 %v16564_v11 }
 0x40b   :  { %5245 = vmatpush1.msra.mxu0 %v16571_v19  ;;  %5316 = vmatpush1.msra.mxu1 %v16576_v33 }
 0x40c   :  { %5246 = vmatprep.subr.mxu0 %v16583_v31  ;;  %5317 = vmatprep.subr.mxu1 %v16588_v22 }
 0x40d   :  { %5247 = vmatpush1.msra.mxu0 %v16595_v12  ;;  %5280 = vmatprep.mubr.f32.mxu0 %v20045_v14 }
 0x40e   :  { %5318 = vmatpush1.msra.mxu1 %v16602_v30  ;;  %5351 = vmatprep.mubr.f32.mxu1 %v20045_v14 }
 0x40f   :  { %5281 = vmatmul.mubr.f32.vlgmr.msra.gmra.mxu0 %v16376_v55  ;;  %5352 = vmatmul.mubr.f32.vlgmr.msra.gmra.mxu1 %v16376_v55 }
 0x410   :  { %5358 = vmatprep.subr.mxu0 %v16611_v58  ;;  %5422 = vmatprep.mubr.f32.mxu0 %v20045_v14  ;;  %v16854_v14 = vld [vmem:[%s20182_s24 + $0x98] sm:$0xff] }
 0x411   :  { %5359 = vmatpush1.msra.mxu0 %v16618_v13  ;;  %11494 = vmatprep.subr.mxu1 %v13362_v21  ;;  %v13374_v21 = vld [vmem:[%s20179_s26 + $0xc8] sm:$0xff]  ;;  %20194 = vst [vmem:[#allocation24_spill] sm:$0xff] %v16854_v14 }
 0x412   :  { %5360 = vmatprep.subr.mxu0 %v16625_v6  ;;  %11495 = vmatpush3.msra.mxu1 %v13363_v41  ;;  %v16755_v41 = vld [vmem:[%s20182_s24 + $0x270] sm:$0xff] }
 0x413   :  { %5361 = vmatpush1.msra.mxu0 %v16631_v15  ;;  %11496 = vmatprep.subr.mxu1 %v13364_v42  ;;  %20183 = vst [vmem:[#allocation13_spill] sm:$0xff] %v16755_v41  ;;  %v13375_v42 = vld [vmem:[%s20179_s26 + $0x48] sm:$0xff] }
 0x414   :  { %5362 = vmatprep.subr.mxu0 %v16638_v7  ;;  %11497 = vmatpush3.msra.mxu1 %v13365_v36  ;;  %v16764_v36 = vld [vmem:[%s20182_s24 + $0x228] sm:$0xff] }
 0x415   :  { %5363 = vmatpush1.msra.mxu0 %v16647_v26  ;;  %11498 = vmatprep.subr.mxu1 %v13366_v17  ;;  %20184 = vst [vmem:[#allocation14_spill] sm:$0xff] %v16764_v36  ;;  %v13376_v17 = vld [vmem:[%s20179_s26 + $0xc0] sm:$0xff] }
 0x416   :  { %5364 = vmatprep.subr.mxu0 %v16656_v29  ;;  %11499 = vmatpush3.msra.mxu1 %v13367_v43  ;;  %v16773_v43 = vld [vmem:[%s20182_s24 + $0x220] sm:$0xff] }
 0x417   :  { %5365 = vmatpush1.msra.mxu0 %v16665_v35  ;;  %11500 = vmatprep.subr.mxu1 %v13368_v46  ;;  %20185 = vst [vmem:[#allocation15_spill] sm:$0xff] %v16773_v43  ;;  %v13377_v46 = vld [vmem:[%s20179_s26 + $0x40] sm:$0xff] }
 0x418   :  { %5366 = vmatprep.subr.mxu0 %v16674_v39  ;;  %11501 = vmatpush3.msra.mxu1 %v13369_v51  ;;  %v16782_v51 = vld [vmem:[%s20182_s24 + $0x1d8] sm:$0xff] }
 0x419   :  { %5367 = vmatpush1.msra.mxu0 %v16683_v40  ;;  %11502 = vmatprep.subr.mxu1 %v13370_v49  ;;  %20186 = vst [vmem:[#allocation16_spill] sm:$0xff] %v16782_v51  ;;  %v13378_v49 = vld [vmem:[%s20179_s26 + $0xb8] sm:$0xff] }
 0x41a   :  { %5368 = vmatprep.subr.mxu0 %v16692_v45  ;;  %11503 = vmatpush3.msra.mxu1 %v13371_v52  ;;  %v16791_v52 = vld [vmem:[%s20182_s24 + $0x1d0] sm:$0xff] }
 0x41b   :  { %5369 = vmatpush1.msra.mxu0 %v16701_v47  ;;  %11504 = vmatprep.subr.mxu1 %v13372_v59  ;;  %20187 = vst [vmem:[#allocation17_spill] sm:$0xff] %v16791_v52  ;;  %v13379_v59 = vld [vmem:[%s20179_s26 + $0x38] sm:$0xff] }
 0x41c   :  { %5370 = vmatprep.subr.mxu0 %v16710_v48  ;;  %11505 = vmatpush3.msra.mxu1 %v13373_v62  ;;  %v16800_v62 = vld [vmem:[%s20182_s24 + $0x188] sm:$0xff] }
 0x41d   :  { %5371 = vmatpush1.msra.mxu0 %v16719_v50  ;;  %11506 = vmatprep.subr.mxu1 %v13374_v21  ;;  %20188 = vst [vmem:[#allocation18_spill] sm:$0xff] %v16800_v62  ;;  %v13380_v21 = vld [vmem:[%s20179_s26 + $0xb0] sm:$0xff] }
 0x41e   :  { %5372 = vmatprep.subr.mxu0 %v16728_v57  ;;  %11507 = vmatpush3.msra.mxu1 %v13375_v42  ;;  %v16809_v42 = vld [vmem:[%s20182_s24 + $0x180] sm:$0xff] }
 0x41f   :  { %5373 = vmatpush1.msra.mxu0 %v16737_v60  ;;  %11508 = vmatprep.subr.mxu1 %v13376_v17  ;;  %20189 = vst [vmem:[#allocation19_spill] sm:$0xff] %v16809_v42  ;;  %v13381_v17 = vld [vmem:[%s20179_s26 + $0x30] sm:$0xff] }
 0x420   :  { %5374 = vmatprep.subr.mxu0 %v16746_v0  ;;  %11509 = vmatpush3.msra.mxu1 %v13377_v46  ;;  %v16818_v46 = vld [vmem:[%s20182_s24 + $0x138] sm:$0xff] }
 0x421   :  { %5375 = vmatpush1.msra.mxu0 %v16755_v41  ;;  %11510 = vmatprep.subr.mxu1 %v13378_v49  ;;  %20190 = vst [vmem:[#allocation20_spill] sm:$0xff] %v16818_v46  ;;  %v13382_v49 = vld [vmem:[%s20179_s26 + $0xa8] sm:$0xff] }
 0x422   :  { %5376 = vmatprep.subr.mxu0 %v16764_v36  ;;  %11511 = vmatpush3.msra.mxu1 %v13379_v59  ;;  %v16827_v59 = vld [vmem:[%s20182_s24 + $0x130] sm:$0xff] }
 0x423   :  { %5377 = vmatpush1.msra.mxu0 %v16773_v43  ;;  %11512 = vmatprep.subr.mxu1 %v13380_v21  ;;  %20191 = vst [vmem:[#allocation21_spill] sm:$0xff] %v16827_v59  ;;  %v13383_v21 = vld [vmem:[%s20179_s26 + $0x28] sm:$0xff] }
 0x424   :  { %5378 = vmatprep.subr.mxu0 %v16782_v51  ;;  %11513 = vmatpush3.msra.mxu1 %v13381_v17  ;;  %v16836_v17 = vld [vmem:[%s20182_s24 + $0xe8] sm:$0xff] }
 0x425   :  { %5379 = vmatpush1.msra.mxu0 %v16791_v52  ;;  %11514 = vmatprep.subr.mxu1 %v13382_v49  ;;  %20192 = vst [vmem:[#allocation22_spill] sm:$0xff] %v16836_v17  ;;  %v13384_v49 = vld [vmem:[%s20179_s26 + $0xa0] sm:$0xff] }
 0x426   :  { %5380 = vmatprep.subr.mxu0 %v16800_v62  ;;  %11515 = vmatpush3.msra.mxu1 %v13383_v21  ;;  %v13385_v21 = vld [vmem:[%s20179_s26 + $0x20] sm:$0xff] }
 0x427   :  { %5381 = vmatpush1.msra.mxu0 %v16809_v42  ;;  %11516 = vmatprep.subr.mxu1 %v13384_v49  ;;  %v13386_v49 = vld [vmem:[%s20179_s26 + $0x98] sm:$0xff] }
 0x428   :  { %5382 = vmatprep.subr.mxu0 %v16818_v46  ;;  %11517 = vmatpush3.msra.mxu1 %v13385_v21  ;;  %v13387_v21 = vld [vmem:[%s20179_s26 + $0x18] sm:$0xff] }
 0x429   :  { %5383 = vmatpush1.msra.mxu0 %v16827_v59  ;;  %11518 = vmatprep.subr.mxu1 %v13386_v49  ;;  %v13388_v49 = vld [vmem:[%s20179_s26 + $0x90] sm:$0xff] }
 0x42a   :  { %5384 = vmatprep.subr.mxu0 %v16836_v17  ;;  %11519 = vmatpush3.msra.mxu1 %v13387_v21  ;;  %v13389_v21 = vld [vmem:[%s20179_s26 + $0x10] sm:$0xff] }
 0x42b   :  { %5385 = vmatpush1.msra.mxu0 %v16845_v23  ;;  %11520 = vmatprep.subr.mxu1 %v13388_v49  ;;  %v13391_v49 = vld [vmem:[%s20179_s26 + $0x8] sm:$0xff] }
 0x42c   :  { %5386 = vmatprep.subr.mxu0 %v16854_v14  ;;  %11521 = vmatpush3.msra.mxu1 %v13389_v21  ;;  %v13392_v21 = vld [vmem:[%s20179_s26 + $0x80] sm:$0xff] }
 0x42d   :  { %5387 = vmatpush1.msra.mxu0 %v16863_v53  ;;  %11522 = vmatprep.subr.mxu1 %v13390_v10  ;;  %v13393_v10 = vld [vmem:[%s20179_s26 + $0x1f8] sm:$0xff] }
 0x42e   :  { %5388 = vmatprep.subr.mxu0 %v16872_v5  ;;  %11523 = vmatpush3.msra.mxu1 %v13391_v49  ;;  %v13395_v49 = vld [vmem:[%s20179_s26] sm:$0xff] }
 0x42f   :  { %5389 = vmatpush1.msra.mxu0 %v16881_v56  ;;  %11524 = vmatprep.subr.mxu1 %v13392_v21  ;;  %v13396_v21 = vld [vmem:[%s20179_s26 + $0x1f0] sm:$0xff] }
 0x430   :  { %5423 = vmatmul.mubr.f32.vlgmr.msra.gmra.mxu0 %v16376_v55  ;;  %11529 = vmatprep.subr.mxu0 %v13393_v10  ;;  %v13397_v55 = vld [vmem:[%s20179_s26 + $0x2f8] sm:$0xff]  ;;  %v13398_v10 = vld [vmem:[%s20179_s26 + $0x170] sm:$0xff] }
 0x431   :  { %11530 = vmatpush3.msra.mxu0 %v13394_v37  ;;  %11525 = vmatpush3.msra.mxu1 %v13395_v49  ;;  %v13399_v37 = vld [vmem:[%s20179_s26 + $0x1e8] sm:$0xff] }
 0x432   :  { %11531 = vmatprep.subr.mxu0 %v13396_v21  ;;  %11564 = vmatprep.subr.mxu1 %v13397_v55  ;;  %v13400_v49 = vld [vmem:[%s20179_s26 + $0x168] sm:$0xff]  ;;  %v13401_v21 = vld [vmem:[%s20179_s26 + $0x1e0] sm:$0xff] }
 0x433   :  { %11532 = vmatpush3.msra.mxu0 %v13398_v10  ;;  %v13402_v55 = vld [vmem:[%s20179_s26 + $0x160] sm:$0xff]  ;;  %v13403_v10 = vld [vmem:[%s20179_s26 + $0x1d8] sm:$0xff] }
 0x434   :  { %11533 = vmatprep.subr.mxu0 %v13399_v37  ;;  %v13404_v37 = vld [vmem:[%s20179_s26 + $0x158] sm:$0xff] }
 0x435   :  { %11534 = vmatpush3.msra.mxu0 %v13400_v49  ;;  %v13405_v49 = vld [vmem:[%s20179_s26 + $0x1d0] sm:$0xff] }
 0x436   :  { %11535 = vmatprep.subr.mxu0 %v13401_v21  ;;  %v13406_v21 = vld [vmem:[%s20179_s26 + $0x150] sm:$0xff] }
 0x437   :  { %11536 = vmatpush3.msra.mxu0 %v13402_v55  ;;  %v13407_v55 = vld [vmem:[%s20179_s26 + $0x1c8] sm:$0xff] }
 0x438   :  { %11537 = vmatprep.subr.mxu0 %v13403_v10  ;;  %v13408_v10 = vld [vmem:[%s20179_s26 + $0x148] sm:$0xff] }
 0x439   :  { %11538 = vmatpush3.msra.mxu0 %v13404_v37  ;;  %v13409_v37 = vld [vmem:[%s20179_s26 + $0x1c0] sm:$0xff] }
 0x43a   :  { %11539 = vmatprep.subr.mxu0 %v13405_v49  ;;  %v13410_v49 = vld [vmem:[%s20179_s26 + $0x140] sm:$0xff] }
 0x43b   :  { %11540 = vmatpush3.msra.mxu0 %v13406_v21  ;;  %v13411_v21 = vld [vmem:[%s20179_s26 + $0x1b8] sm:$0xff] }
 0x43c   :  { %11541 = vmatprep.subr.mxu0 %v13407_v55  ;;  %v13412_v55 = vld [vmem:[%s20179_s26 + $0x138] sm:$0xff] }
 0x43d   :  { %11542 = vmatpush3.msra.mxu0 %v13408_v10  ;;  %v13413_v10 = vld [vmem:[%s20179_s26 + $0x1b0] sm:$0xff] }
 0x43e   :  { %11543 = vmatprep.subr.mxu0 %v13409_v37  ;;  %v13414_v37 = vld [vmem:[%s20179_s26 + $0x130] sm:$0xff] }
 0x43f   :  { %11544 = vmatpush3.msra.mxu0 %v13410_v49  ;;  %v13415_v49 = vld [vmem:[%s20179_s26 + $0x1a8] sm:$0xff] }
 0x440   :  { %11545 = vmatprep.subr.mxu0 %v13411_v21  ;;  %v13416_v21 = vld [vmem:[%s20179_s26 + $0x128] sm:$0xff] }
 0x441   :  { %11546 = vmatpush3.msra.mxu0 %v13412_v55  ;;  %v13417_v55 = vld [vmem:[%s20179_s26 + $0x1a0] sm:$0xff] }
 0x442   :  { %11547 = vmatprep.subr.mxu0 %v13413_v10  ;;  %v13418_v10 = vld [vmem:[%s20179_s26 + $0x120] sm:$0xff] }
 0x443   :  { %11548 = vmatpush3.msra.mxu0 %v13414_v37  ;;  %v13419_v37 = vld [vmem:[%s20179_s26 + $0x198] sm:$0xff] }
 0x444   :  { %11549 = vmatprep.subr.mxu0 %v13415_v49  ;;  %v13420_v49 = vld [vmem:[%s20179_s26 + $0x118] sm:$0xff] }
 0x445   :  { %11550 = vmatpush3.msra.mxu0 %v13416_v21  ;;  %v13421_v21 = vld [vmem:[%s20179_s26 + $0x190] sm:$0xff] }
 0x446   :  { %11551 = vmatprep.subr.mxu0 %v13417_v55  ;;  %v13422_v55 = vld [vmem:[%s20179_s26 + $0x110] sm:$0xff] }
 0x447   :  { %11552 = vmatpush3.msra.mxu0 %v13418_v10  ;;  %v13423_v10 = vld [vmem:[%s20179_s26 + $0x188] sm:$0xff] }
 0x448   :  { %11553 = vmatprep.subr.mxu0 %v13419_v37  ;;  %v13424_v37 = vld [vmem:[%s20179_s26 + $0x108] sm:$0xff] }
 0x449   :  { %11554 = vmatpush3.msra.mxu0 %v13420_v49  ;;  %v13425_v49 = vld [vmem:[%s20179_s26 + $0x180] sm:$0xff] }
 0x44a   :  { %11555 = vmatprep.subr.mxu0 %v13421_v21  ;;  %v13426_v21 = vld [vmem:[%s20179_s26 + $0x100] sm:$0xff] }
 0x44b   :  { %11556 = vmatpush3.msra.mxu0 %v13422_v55  ;;  %v13427_v55 = vld [vmem:[%s20179_s26 + $0x3f8] sm:$0xff] }
 0x44c   :  { %11557 = vmatprep.subr.mxu0 %v13423_v10 }
 0x44d   :  { %11558 = vmatpush3.msra.mxu0 %v13424_v37 }
 0x44e   :  { %11559 = vmatprep.subr.mxu0 %v13425_v49 }
 0x44f   :  { %11560 = vmatpush3.msra.mxu0 %v13426_v21 }
 0x450   :  { %11599 = vmatprep.subr.mxu0 %v13427_v55 }
 0x4ae   :  { %v5140_v10 = vpop.f32.mrf.mxu0  ;;  %v5211_v38 = vpop.f32.mrf.mxu1 }
 0x4af   :  { %v5432_v32 = vrot.slane %v5140_v10, %v14607_v34  ;;  %v5440_v37 = vrot.slane %v5211_v38, %v14607_v34 }
 0x4b0   :  { %v5142_v56 = vpop.f32.mrf.mxu0  ;;  %v5213_v5 = vpop.f32.mrf.mxu1 }
 0x4b1   :  { %v17007_v49 = vsub.f32 %v14853_v24, %v5432_v32  ;;  %v17010_v53 = vsub.f32 %v15179_v54, %v5440_v37  ;;  %v5436_v21 = vrot.slane %v5142_v56, %v14607_v34  ;;  %v5444_v14 = vrot.slane %v5213_v5, %v14607_v34 }
 0x4b3   :  { %20198 = vst [vmem:[#allocation28_spill] sm:$0xff] %v17007_v49  ;;  %20199 = vst [vmem:[#allocation29_spill] sm:$0xff] %v17010_v53  ;;  %v5479_v55 = vmul.f32 %v17007_v49, %v17007_v49  ;;  %v5481_v10 = vmul.f32 %v17010_v53, %v17010_v53  ;;  %v17019_v38 = vsub.f32 %v14858_v27, %v5436_v21 }
 0x4b4   :  { %v17022_v23 = vsub.f32 %v15189_v61, %v5444_v14 }
 0x4b5   :  { %20200 = vst [vmem:[#allocation30_spill] sm:$0xff] %v17019_v38  ;;  %v5489_v24 = vrot.slane %v5479_v55, 4  ;;  %v5501_v32 = vrot.slane %v5481_v10, 4  ;;  %v5480_v54 = vmul.f32 %v17019_v38, %v17019_v38 }
 0x4b6   :  { %20201 = vst [vmem:[#allocation31_spill] sm:$0xff] %v17022_v23  ;;  %v5482_v5 = vmul.f32 %v17022_v23, %v17022_v23 }
 0x4b7   :  { %v5490_v56 = vadd.f32 %v5489_v24, %v5479_v55  ;;  %v5502_v37 = vadd.f32 %v5501_v32, %v5481_v10  ;;  %v5495_v49 = vrot.slane %v5480_v54, 4  ;;  %v13442_v24 = vld [vmem:[%s20179_s26 + $0x2d8] sm:$0xff] }
 0x4b8   :  { %v5507_v17 = vrot.slane %v5482_v5, 4  ;;  %v13443_v32 = vld [vmem:[%s20179_s26 + $0x3d8] sm:$0xff] }
 0x4b9   :  { %v5491_v59 = vrot.slane %v5490_v56, 2  ;;  %v5503_v53 = vrot.slane %v5502_v37, 2  ;;  %v5496_v46 = vadd.f32 %v5495_v49, %v5480_v54  ;;  %v13440_v49 = vld [vmem:[%s20179_s26 + $0x260] sm:$0xff]  ;;  %v13444_v54 = vld [vmem:[%s20179_s26 + $0x258] sm:$0xff] }
 0x4ba   :  { %v5508_v27 = vadd.f32 %v5507_v17, %v5482_v5  ;;  %v13439_v17 = vld [vmem:[%s20179_s26 + $0x3e0] sm:$0xff]  ;;  %v13445_v5 = vld [vmem:[%s20179_s26 + $0x358] sm:$0xff] }
 0x4bb   :  { %v5492_v21 = vadd.f32 %v5491_v59, %v5490_v56  ;;  %v5504_v42 = vadd.f32 %v5503_v53, %v5502_v37  ;;  %v5497_v61 = vrot.slane %v5496_v46, 2  ;;  %v13428_v53 = vld [vmem:[%s20179_s26 + $0x278] sm:$0xff]  ;;  %v13438_v59 = vld [vmem:[%s20179_s26 + $0x2e0] sm:$0xff]  ;;  %v13446_v56 = vld [vmem:[%s20179_s26 + $0x2d0] sm:$0xff] }
 0x4bc   :  { %v5509_v14 = vrot.slane %v5508_v27, 2  ;;  %v13447_v37 = vld [vmem:[%s20179_s26 + $0x3d0] sm:$0xff] }
 0x4bd   :  { %v5498_v62 = vadd.f32 %v5497_v61, %v5496_v46  ;;  %v5493_v51 = vrot.slane %v5492_v21, 1  ;;  %v5505_v43 = vrot.slane %v5504_v42, 1  ;;  %v13429_v46 = vld [vmem:[%s20179_s26 + $0x378] sm:$0xff]  ;;  %v13448_v61 = vld [vmem:[%s20179_s26 + $0x250] sm:$0xff] }
 0x4be   :  { %v5510_v52 = vadd.f32 %v5509_v14, %v5508_v27  ;;  %v13449_v14 = vld [vmem:[%s20179_s26 + $0x350] sm:$0xff] }
 0x4bf   :  { %v5499_v38 = vrot.slane %v5498_v62, 1  ;;  %v5494_v55 = vadd.f32 %v5493_v51, %v5492_v21  ;;  %v5506_v10 = vadd.f32 %v5505_v43, %v5504_v42  ;;  %v13433_v43 = vld [vmem:[%s20179_s26 + $0x370] sm:$0xff]  ;;  %v13434_v51 = vld [vmem:[%s20179_s26 + $0x2e8] sm:$0xff] }
 0x4c0   :  { %v5511_v36 = vrot.slane %v5510_v52, 1  ;;  %v13437_v42 = vld [vmem:[%s20179_s26 + $0x368] sm:$0xff] }
 0x4c1   :  { %v5500_v41 = vadd.f32 %v5499_v38, %v5498_v62  ;;  %v13436_v62 = vld [vmem:[%s20179_s26 + $0x268] sm:$0xff]  ;;  %v13441_v38 = vld [vmem:[%s20179_s26 + $0x360] sm:$0xff] }
 0x4c2   :  { %v5512_v23 = vadd.f32 %v5511_v36, %v5510_v52  ;;  %v13430_v36 = vld [vmem:[%s20179_s26 + $0x2f0] sm:$0xff]  ;;  %v13435_v52 = vld [vmem:[%s20179_s26 + $0x3e8] sm:$0xff] }
 0x4c3   :  { %5613 = vmatprep.mubr.f32.mxu1 %v5500_v41  ;;  %v13432_v41 = vld [vmem:[%s20179_s26 + $0x270] sm:$0xff] }
 0x4c4   :  { %5683 = vmatprep.mubr.f32.mxu0 %v5512_v23  ;;  %5614 = vmatmul.mubr.f32.vlgmr.msra.gmra.mxu1 %v5494_v55  ;;  %v13431_v23 = vld [vmem:[%s20179_s26 + $0x3f0] sm:$0xff] }
 0x4c5   :  { %5684 = vmatmul.mubr.f32.vlgmr.msra.gmra.mxu0 %v5506_v10  ;;  %11565 = vmatpush3.msra.mxu1 %v13428_v53  ;;  %v13450_v53 = vld [vmem:[%s20179_s26 + $0x2c8] sm:$0xff] }
 0x4c6   :  { %11600 = vmatpush3.msra.mxu0 %v13429_v46  ;;  %11566 = vmatprep.subr.mxu1 %v13430_v36  ;;  %v13451_v46 = vld [vmem:[%s20179_s26 + $0x3c8] sm:$0xff] }
 0x4c7   :  { %11601 = vmatprep.subr.mxu0 %v13431_v23  ;;  %11567 = vmatpush3.msra.mxu1 %v13432_v41  ;;  %v13452_v41 = vld [vmem:[%s20179_s26 + $0x248] sm:$0xff] }
 0x4c8   :  { %11602 = vmatpush3.msra.mxu0 %v13433_v43  ;;  %11568 = vmatprep.subr.mxu1 %v13434_v51  ;;  %v13453_v43 = vld [vmem:[%s20179_s26 + $0x348] sm:$0xff] }
 0x4c9   :  { %11603 = vmatprep.subr.mxu0 %v13435_v52  ;;  %11569 = vmatpush3.msra.mxu1 %v13436_v62 }
 0x4ca   :  { %11604 = vmatpush3.msra.mxu0 %v13437_v42  ;;  %11570 = vmatprep.subr.mxu1 %v13438_v59  ;;  %v13454_v59 = vld [vmem:[%s20179_s26 + $0x2c0] sm:$0xff] }
 0x4cb   :  { %11605 = vmatprep.subr.mxu0 %v13439_v17  ;;  %11571 = vmatpush3.msra.mxu1 %v13440_v49  ;;  %v13455_v17 = vld [vmem:[%s20179_s26 + $0x3c0] sm:$0xff] }
 0x4cc   :  { %11606 = vmatpush3.msra.mxu0 %v13441_v38  ;;  %11572 = vmatprep.subr.mxu1 %v13442_v24 }
 0x4cd   :  { %11607 = vmatprep.subr.mxu0 %v13443_v32  ;;  %11573 = vmatpush3.msra.mxu1 %v13444_v54  ;;  %v13457_v32 = vld [vmem:[%s20179_s26 + $0x340] sm:$0xff]  ;;  %v13458_v54 = vld [vmem:[%s20179_s26 + $0x2b8] sm:$0xff] }
 0x4ce   :  { %11608 = vmatpush3.msra.mxu0 %v13445_v5  ;;  %11574 = vmatprep.subr.mxu1 %v13446_v56  ;;  %v13459_v5 = vld [vmem:[%s20179_s26 + $0x3b8] sm:$0xff] }
 0x4cf   :  { %11609 = vmatprep.subr.mxu0 %v13447_v37  ;;  %v5282_v27 = vpop.f32.mrf.mxu0  ;;  %v5353_v21 = vpop.f32.mrf.mxu1  ;;  %11575 = vmatpush3.msra.mxu1 %v13448_v61  ;;  %v13462_v61 = vld [vmem:[%s20179_s26 + $0x2b0] sm:$0xff] }
 0x4d0   :  { %11610 = vmatpush3.msra.mxu0 %v13449_v14  ;;  %v5448_v55 = vrot.slane %v5282_v27, %v14607_v34  ;;  %v5456_v10 = vrot.slane %v5353_v21, %v14607_v34  ;;  %11576 = vmatprep.subr.mxu1 %v13450_v53  ;;  %v13460_v27 = vld [vmem:[%s20179_s26 + $0x238] sm:$0xff]  ;;  %v13463_v14 = vld [vmem:[%s20179_s26 + $0x3b0] sm:$0xff] }
 0x4d1   :  { %11611 = vmatprep.subr.mxu0 %v13451_v46  ;;  %v5284_v36 = vpop.f32.mrf.mxu0  ;;  %v5355_v23 = vpop.f32.mrf.mxu1  ;;  %11577 = vmatpush3.msra.mxu1 %v13452_v41  ;;  %v13461_v21 = vld [vmem:[%s20179_s26 + $0x338] sm:$0xff]  ;;  %v13466_v41 = vld [vmem:[%s20179_s26 + $0x2a8] sm:$0xff] }
 0x4d2   :  { %11612 = vmatpush3.msra.mxu0 %v13453_v43  ;;  %v17109_v51 = vsub.f32 %v15614_v20, %v5448_v55  ;;  %v17112_v52 = vsub.f32 %v16089_v44, %v5456_v10  ;;  %v5452_v62 = vrot.slane %v5284_v36, %v14607_v34  ;;  %v5460_v42 = vrot.slane %v5355_v23, %v14607_v34  ;;  %v13456_v20 = vld [vmem:[%s20179_s26 + $0x240] sm:$0xff]  ;;  %v13464_v36 = vld [vmem:[%s20179_s26 + $0x230] sm:$0xff]  ;;  %v13467_v43 = vld [vmem:[%s20179_s26 + $0x3a8] sm:$0xff] }
 0x4d3   :  { %11578 = vmatprep.subr.mxu1 %v13454_v59  ;;  %11613 = vmatprep.subr.mxu0 %v13455_v17  ;;  %v13465_v23 = vld [vmem:[%s20179_s26 + $0x330] sm:$0xff] }
 0x4d4   :  { %11579 = vmatpush3.msra.mxu1 %v13456_v20  ;;  %v5483_v44 = vmul.f32 %v17109_v51, %v17109_v51  ;;  %v5485_v49 = vmul.f32 %v17112_v52, %v17112_v52  ;;  %v17130_v38 = vsub.f32 %v15646_v63, %v5452_v62  ;;  %v17133_v24 = vsub.f32 %v16098_v16, %v5460_v42  ;;  %v13468_v20 = vld [vmem:[%s20179_s26 + $0x228] sm:$0xff] }
 0x4d5   :  { %11614 = vmatpush3.msra.mxu0 %v13457_v32  ;;  %11580 = vmatprep.subr.mxu1 %v13458_v54  ;;  %v13471_v32 = vld [vmem:[%s20179_s26 + $0x3a0] sm:$0xff] }
 0x4d6   :  { %11615 = vmatprep.subr.mxu0 %v13459_v5  ;;  %v5513_v63 = vrot.slane %v5483_v44, 4  ;;  %v5525_v56 = vrot.slane %v5485_v49, 4  ;;  %v5484_v16 = vmul.f32 %v17130_v38, %v17130_v38  ;;  %v5486_v37 = vmul.f32 %v17133_v24, %v17133_v24  ;;  %11581 = vmatpush3.msra.mxu1 %v13460_v27  ;;  %v13474_v27 = vld [vmem:[%s20179_s26 + $0x298] sm:$0xff] }
 0x4d7   :  { %11616 = vmatpush3.msra.mxu0 %v13461_v21  ;;  %11582 = vmatprep.subr.mxu1 %v13462_v61  ;;  %v13475_v21 = vld [vmem:[%s20179_s26 + $0x398] sm:$0xff] }
 0x4d8   :  { %11617 = vmatprep.subr.mxu0 %v13463_v14  ;;  %v5514_v55 = vadd.f32 %v5513_v63, %v5483_v44  ;;  %v5526_v10 = vadd.f32 %v5525_v56, %v5485_v49  ;;  %v5519_v53 = vrot.slane %v5484_v16, 4  ;;  %v5531_v46 = vrot.slane %v5486_v37, 4  ;;  %11583 = vmatpush3.msra.mxu1 %v13464_v36  ;;  %v13469_v44 = vld [vmem:[%s20179_s26 + $0x328] sm:$0xff]  ;;  %v13470_v49 = vld [vmem:[%s20179_s26 + $0x2a0] sm:$0xff]  ;;  %v13476_v61 = vld [vmem:[%s20179_s26 + $0x218] sm:$0xff] }
 0x4d9   :  { %11618 = vmatpush3.msra.mxu0 %v13465_v23  ;;  %11584 = vmatprep.subr.mxu1 %v13466_v41  ;;  %v13472_v63 = vld [vmem:[%s20179_s26 + $0x220] sm:$0xff]  ;;  %v13477_v14 = vld [vmem:[%s20179_s26 + $0x318] sm:$0xff]  ;;  %v13480_v36 = vld [vmem:[%s20179_s26 + $0x210] sm:$0xff] }
 0x4da   :  { %11619 = vmatprep.subr.mxu0 %v13467_v43  ;;  %v5515_v62 = vrot.slane %v5514_v55, 2  ;;  %v5527_v42 = vrot.slane %v5526_v10, 2  ;;  %v5520_v59 = vadd.f32 %v5519_v53, %v5484_v16  ;;  %v5532_v17 = vadd.f32 %v5531_v46, %v5486_v37  ;;  %11585 = vmatpush3.msra.mxu1 %v13468_v20  ;;  %v13473_v56 = vld [vmem:[%s20179_s26 + $0x320] sm:$0xff]  ;;  %v13478_v53 = vld [vmem:[%s20179_s26 + $0x290] sm:$0xff]  ;;  %v13484_v20 = vld [vmem:[%s20179_s26 + $0x208] sm:$0xff] }
 0x4db   :  { %11620 = vmatpush3.msra.mxu0 %v13469_v44  ;;  %11586 = vmatprep.subr.mxu1 %v13470_v49  ;;  %v13479_v46 = vld [vmem:[%s20179_s26 + $0x390] sm:$0xff]  ;;  %v13485_v44 = vld [vmem:[%s20179_s26 + $0x308] sm:$0xff] }
 0x4dc   :  { %11621 = vmatprep.subr.mxu0 %v13471_v32  ;;  %v5516_v54 = vadd.f32 %v5515_v62, %v5514_v55  ;;  %v5528_v5 = vadd.f32 %v5527_v42, %v5526_v10  ;;  %11587 = vmatpush3.msra.mxu1 %v13472_v63  ;;  %v5521_v16 = vrot.slane %v5520_v59, 2  ;;  %v5533_v37 = vrot.slane %v5532_v17, 2  ;;  %v13481_v23 = vld [vmem:[%s20179_s26 + $0x310] sm:$0xff]  ;;  %v13486_v63 = vld [vmem:[%s20179_s26 + $0x280] sm:$0xff] }
 0x4dd   :  { %11622 = vmatpush3.msra.mxu0 %v13473_v56  ;;  %11588 = vmatprep.subr.mxu1 %v13474_v27  ;;  %v13487_v56 = vld [vmem:[%s20179_s26 + $0x380] sm:$0xff] }
 0x4de   :  { %11623 = vmatprep.subr.mxu0 %v13475_v21  ;;  %11589 = vmatpush3.msra.mxu1 %v13476_v61  ;;  %v5522_v55 = vadd.f32 %v5521_v16, %v5520_v59  ;;  %v5534_v10 = vadd.f32 %v5533_v37, %v5532_v17  ;;  %v5517_v62 = vrot.slane %v5516_v54, 1  ;;  %v5529_v42 = vrot.slane %v5528_v5, 1  ;;  %v13482_v59 = vld [vmem:[%s20179_s26 + $0x288] sm:$0xff]  ;;  %v13488_v16 = vld [vmem:[%s20179_s26 + $0x200] sm:$0xff]  ;;  %v13490_v61 = vld [vmem:[%s20179_s26 + $0x4f8] sm:$0xff] }
 0x4df   :  { %11624 = vmatpush3.msra.mxu0 %v13477_v14  ;;  %11590 = vmatprep.subr.mxu1 %v13478_v53  ;;  %v13483_v17 = vld [vmem:[%s20179_s26 + $0x388] sm:$0xff]  ;;  %v13489_v21 = vld [vmem:[%s20179_s26 + $0x300] sm:$0xff]  ;;  %v13491_v14 = vld [vmem:[%s20182_s24 + $0x4b8] sm:$0xff] }
 0x4e0   :  { %11625 = vmatprep.subr.mxu0 %v13479_v46  ;;  %11591 = vmatpush3.msra.mxu1 %v13480_v36  ;;  %v5523_v41 = vrot.slane %v5522_v55, 1  ;;  %v5535_v43 = vrot.slane %v5534_v10, 1  ;;  %v5518_v37 = vadd.f32 %v5517_v62, %v5516_v54  ;;  %v5530_v27 = vadd.f32 %v5529_v42, %v5528_v5  ;;  %v13492_v54 = vld [vmem:[%s20179_s26 + $0x478] sm:$0xff]  ;;  %v13493_v5 = vld [vmem:[%s20182_s24 + $0x4b0] sm:$0xff]  ;;  %v13497_v46 = vld [vmem:[%s20182_s24 + $0x460] sm:$0xff] }
 0x4e1   :  { %11626 = vmatpush3.msra.mxu0 %v13481_v23  ;;  %11592 = vmatprep.subr.mxu1 %v13482_v59  ;;  %v13496_v53 = vld [vmem:[%s20179_s26 + $0x470] sm:$0xff]  ;;  %v13498_v36 = vld [vmem:[%s20179_s26 + $0x4e8] sm:$0xff]  ;;  %v13499_v23 = vld [vmem:[%s20182_s24 + $0x418] sm:$0xff] }
 0x4e2   :  { %11627 = vmatprep.subr.mxu0 %v13483_v17  ;;  %11593 = vmatpush3.msra.mxu1 %v13484_v20  ;;  %v5524_v49 = vadd.f32 %v5523_v41, %v5522_v55  ;;  %v5536_v32 = vadd.f32 %v5535_v43, %v5534_v10  ;;  %v13494_v55 = vld [vmem:[%s20179_s26 + $0x4f0] sm:$0xff]  ;;  %v13495_v10 = vld [vmem:[%s20182_s24 + $0x468] sm:$0xff]  ;;  %v13502_v62 = vld [vmem:[%s20179_s26 + $0x4e0] sm:$0xff] }
 0x4e3   :  { %11628 = vmatpush3.msra.mxu0 %v13485_v44  ;;  %11594 = vmatprep.subr.mxu1 %v13486_v63  ;;  %v13500_v41 = vld [vmem:[%s20179_s26 + $0x468] sm:$0xff]  ;;  %v13501_v43 = vld [vmem:[%s20182_s24 + $0x410] sm:$0xff]  ;;  %v13504_v59 = vld [vmem:[%s20179_s26 + $0x460] sm:$0xff] }
 0x4e4   :  { %11629 = vmatprep.subr.mxu0 %v13487_v56  ;;  %11595 = vmatpush3.msra.mxu1 %v13488_v16  ;;  %v13503_v42 = vld [vmem:[%s20182_s24 + $0x3c8] sm:$0xff]  ;;  %v13505_v17 = vld [vmem:[%s20182_s24 + $0x3c0] sm:$0xff]  ;;  %v13506_v20 = vld [vmem:[%s20179_s26 + $0x4d8] sm:$0xff] }
 0x4e5   :  { %5753 = vmatprep.mubr.f32.mxu1 %v5524_v49  ;;  %11630 = vmatpush3.msra.mxu0 %v13489_v21  ;;  %v13507_v44 = vld [vmem:[%s20182_s24 + $0x378] sm:$0xff]  ;;  %v13509_v63 = vld [vmem:[%s20182_s24 + $0x370] sm:$0xff] }
 0x4e6   :  { %5823 = vmatprep.mubr.f32.mxu0 %v5536_v32  ;;  %5754 = vmatmul.mubr.f32.vlgmr.msra.gmra.mxu1 %v5518_v37  ;;  %v13508_v49 = vld [vmem:[%s20179_s26 + $0x458] sm:$0xff]  ;;  %v13510_v16 = vld [vmem:[%s20179_s26 + $0x4d0] sm:$0xff]  ;;  %v13511_v37 = vld [vmem:[%s20182_s24 + $0x328] sm:$0xff] }
 0x4e7   :  { %5824 = vmatmul.mubr.f32.vlgmr.msra.gmra.mxu0 %v5530_v27  ;;  %11634 = vmatprep.subr.mxu1 %v13490_v61  ;;  %v13512_v27 = vld [vmem:[%s20179_s26 + $0x450] sm:$0xff]  ;;  %v13513_v61 = vld [vmem:[%s20182_s24 + $0x320] sm:$0xff] }
 0x4e8   :  { %5900 = vmatprep.subr.mxu0 %v13491_v14  ;;  %11635 = vmatpush3.msra.mxu1 %v13492_v54 }
 0x4e9   :  { %5901 = vmatpush1.msra.mxu0 %v13493_v5  ;;  %11636 = vmatprep.subr.mxu1 %v13494_v55  ;;  %v13514_v5 = vld [vmem:[%s20179_s26 + $0x4c8] sm:$0xff]  ;;  %v13515_v55 = vld [vmem:[%s20182_s24 + $0x2d8] sm:$0xff] }
 0x4ea   :  { %5902 = vmatprep.subr.mxu0 %v13495_v10  ;;  %11637 = vmatpush3.msra.mxu1 %v13496_v53  ;;  %v13516_v10 = vld [vmem:[%s20179_s26 + $0x448] sm:$0xff] }
 0x4eb   :  { %5903 = vmatpush1.msra.mxu0 %v13497_v46  ;;  %11638 = vmatprep.subr.mxu1 %v13498_v36  ;;  %v13518_v36 = vld [vmem:[%s20179_s26 + $0x4c0] sm:$0xff] }
 0x4ec   :  { %5904 = vmatprep.subr.mxu0 %v13499_v23  ;;  %11639 = vmatpush3.msra.mxu1 %v13500_v41  ;;  %v13519_v23 = vld [vmem:[%s20182_s24 + $0x288] sm:$0xff]  ;;  %v13520_v41 = vld [vmem:[%s20179_s26 + $0x440] sm:$0xff] }
 0x4ed   :  { %5905 = vmatpush1.msra.mxu0 %v13501_v43  ;;  %11640 = vmatprep.subr.mxu1 %v13502_v62 }
 0x4ee   :  { %5906 = vmatprep.subr.mxu0 %v13503_v42  ;;  %11641 = vmatpush3.msra.mxu1 %v13504_v59  ;;  %v13522_v42 = vld [vmem:[%s20179_s26 + $0x4b8] sm:$0xff] }
 0x4ef   :  { %5907 = vmatpush1.msra.mxu0 %v13505_v17  ;;  %11642 = vmatprep.subr.mxu1 %v13506_v20  ;;  %v13523_v59 = vld [vmem:[%s20182_s24 + $0x238] sm:$0xff]  ;;  %v13525_v20 = vld [vmem:[%s20182_s24 + $0x230] sm:$0xff] }
 0x4f0   :  { %5908 = vmatprep.subr.mxu0 %v13507_v44  ;;  %11643 = vmatpush3.msra.mxu1 %v13508_v49  ;;  %v5424_v32 = vpop.f32.mrf.mxu0  ;;  %v13524_v17 = vld [vmem:[%s20179_s26 + $0x438] sm:$0xff] }
 0x4f1   :  { %5909 = vmatpush1.msra.mxu0 %v13509_v63  ;;  %v5464_v56 = vrot.slane %v5424_v32, %v14607_v34  ;;  %11644 = vmatprep.subr.mxu1 %v13510_v16  ;;  %v13526_v32 = vld [vmem:[%s20179_s26 + $0x4b0] sm:$0xff]  ;;  %v13527_v63 = vld [vmem:[%s20182_s24 + $0x1e8] sm:$0xff]  ;;  %v13529_v16 = vld [vmem:[%s20182_s24 + $0x1e0] sm:$0xff] }
 0x4f2   :  { %5910 = vmatprep.subr.mxu0 %v13511_v37  ;;  %11645 = vmatpush3.msra.mxu1 %v13512_v27  ;;  %v5426_v21 = vpop.f32.mrf.mxu0 }
 0x4f3   :  { %5911 = vmatpush1.msra.mxu0 %v13513_v61  ;;  %v17312_v14 = vsub.f32 %v16243_v18, %v5464_v56  ;;  %v5468_v54 = vrot.slane %v5426_v21, %v14607_v34  ;;  %11646 = vmatprep.subr.mxu1 %v13514_v5  ;;  %v13517_v18 = vld [vmem:[%s20182_s24 + $0x2d0] sm:$0xff]  ;;  %v13530_v21 = vld [vmem:[%s20179_s26 + $0x4a8] sm:$0xff]  ;;  %v13531_v61 = vld [vmem:[%s20182_s24 + $0x198] sm:$0xff] }
 0x4f4   :  { %5912 = vmatprep.subr.mxu0 %v13515_v55  ;;  %11647 = vmatpush3.msra.mxu1 %v13516_v10  ;;  %v13528_v56 = vld [vmem:[%s20179_s26 + $0x430] sm:$0xff]  ;;  %v13534_v10 = vld [vmem:[%s20179_s26 + $0x4a0] sm:$0xff] }
 0x4f5   :  { %5913 = vmatpush1.msra.mxu0 %v13517_v18  ;;  %v5487_v53 = vmul.f32 %v17312_v14, %v17312_v14  ;;  %v17330_v46 = vsub.f32 %v16246_v25, %v5468_v54  ;;  %11648 = vmatprep.subr.mxu1 %v13518_v36  ;;  %v13521_v25 = vld [vmem:[%s20182_s24 + $0x280] sm:$0xff]  ;;  %v13532_v54 = vld [vmem:[%s20179_s26 + $0x428] sm:$0xff]  ;;  %v13533_v5 = vld [vmem:[%s20182_s24 + $0x190] sm:$0xff] }
 0x4f6   :  { %5914 = vmatprep.subr.mxu0 %v13519_v23  ;;  %11649 = vmatpush3.msra.mxu1 %v13520_v41  ;;  %v13536_v36 = vld [vmem:[%s20179_s26 + $0x420] sm:$0xff]  ;;  %v13538_v41 = vld [vmem:[%s20179_s26 + $0x498] sm:$0xff] }
 0x4f7   :  { %5915 = vmatpush1.msra.mxu0 %v13521_v25  ;;  %v5537_v43 = vrot.slane %v5487_v53, 4  ;;  %v5488_v62 = vmul.f32 %v17330_v46, %v17330_v46  ;;  %11650 = vmatprep.subr.mxu1 %v13522_v42  ;;  %v13537_v23 = vld [vmem:[%s20182_s24 + $0x140] sm:$0xff]  ;;  %v13541_v42 = vld [vmem:[%s20182_s24 + $0xf0] sm:$0xff] }
 0x4f8   :  { %5916 = vmatprep.subr.mxu0 %v13523_v59  ;;  %11651 = vmatpush3.msra.mxu1 %v13524_v17  ;;  %v13542_v59 = vld [vmem:[%s20179_s26 + $0x490] sm:$0xff] }
 0x4f9   :  { %5917 = vmatpush1.msra.mxu0 %v13525_v20  ;;  %v5538_v44 = vadd.f32 %v5537_v43, %v5487_v53  ;;  %v5543_v49 = vrot.slane %v5488_v62, 4  ;;  %11652 = vmatprep.subr.mxu1 %v13526_v32  ;;  %v13535_v53 = vld [vmem:[%s20182_s24 + $0x148] sm:$0xff]  ;;  %v13539_v43 = vld [vmem:[%s20182_s24 + $0xf8] sm:$0xff]  ;;  %v13545_v32 = vld [vmem:[%s20182_s24 + $0xa0] sm:$0xff] }
 0x4fa   :  { %5918 = vmatprep.subr.mxu0 %v13527_v63  ;;  %11653 = vmatpush3.msra.mxu1 %v13528_v56  ;;  %v13546_v63 = vld [vmem:[%s20179_s26 + $0x488] sm:$0xff] }
 0x4fb   :  { %5919 = vmatpush1.msra.mxu0 %v13529_v16  ;;  %v5539_v37 = vrot.slane %v5538_v44, 2  ;;  %v5544_v27 = vadd.f32 %v5543_v49, %v5488_v62  ;;  %11654 = vmatprep.subr.mxu1 %v13530_v21  ;;  %v13540_v62 = vld [vmem:[%s20179_s26 + $0x418] sm:$0xff]  ;;  %v13544_v49 = vld [vmem:[%s20179_s26 + $0x410] sm:$0xff]  ;;  %v13550_v21 = vld [vmem:[%s20179_s26 + $0x480] sm:$0xff] }
 0x4fc   :  { %5920 = vmatprep.subr.mxu0 %v13531_v61  ;;  %11655 = vmatpush3.msra.mxu1 %v13532_v54  ;;  %v13547_v16 = vld [vmem:[%s20182_s24 + $0x58] sm:$0xff]  ;;  %v13551_v54 = vld [vmem:[%s20179_s26 + $0x400] sm:$0xff] }
 0x4fd   :  { %5921 = vmatpush1.msra.mxu0 %v13533_v5  ;;  %v5540_v55 = vadd.f32 %v5539_v37, %v5538_v44  ;;  %11656 = vmatprep.subr.mxu1 %v13534_v10  ;;  %v5545_v18 = vrot.slane %v5544_v27, 2  ;;  %v13543_v44 = vld [vmem:[%s20182_s24 + $0xa8] sm:$0xff] }
 0x4fe   :  { %5922 = vmatprep.subr.mxu0 %v13535_v53  ;;  %11657 = vmatpush3.msra.mxu1 %v13536_v36  ;;  %v13548_v37 = vld [vmem:[%s20179_s26 + $0x408] sm:$0xff]  ;;  %v13556_v53 = vld [vmem:[%s20182_s24 + $0x478] sm:$0xff]  ;;  %v20202_v36 = vmov 0.0   ;;  %s20219_s26 = sld [smem:[#allocation88_spill]] }
 0x4ff   :  { %5923 = vmatpush1.msra.mxu0 %v13537_v23  ;;  %11658 = vmatprep.subr.mxu1 %v13538_v41  ;;  %v5546_v25 = vadd.f32 %v5545_v18, %v5544_v27  ;;  %v5541_v20 = vrot.slane %v5540_v55, 1  ;;  %v13549_v27 = vld [vmem:[%s20182_s24 + $0x50] sm:$0xff]  ;;  %v13552_v5 = vld [vmem:[%s20182_s24 + $0x8] sm:$0xff]  ;;  %v13555_v18 = vld [vmem:[%s20182_s24] sm:$0xff] }
 0x500   :  { %5924 = vmatprep.subr.mxu0 %v13539_v43  ;;  %11659 = vmatpush3.msra.mxu1 %v13540_v62  ;;  %v13553_v10 = vld [vmem:[%s20182_s24 + $0x4c8] sm:$0xff]  ;;  %v13557_v23 = vld [vmem:[%s20182_s24 + $0x470] sm:$0xff]  ;;  %v13560_v43 = vld [vmem:[%s20182_s24 + $0x420] sm:$0xff] }
 0x501   :  { %5925 = vmatpush1.msra.mxu0 %v13541_v42  ;;  %11660 = vmatprep.subr.mxu1 %v13542_v59  ;;  %v5547_v17 = vrot.slane %v5546_v25, 1  ;;  %v5542_v61 = vadd.f32 %v5541_v20, %v5540_v55  ;;  %v13554_v55 = vld [vmem:[%s20182_s24 + $0x4c0] sm:$0xff]  ;;  %v13558_v41 = vld [vmem:[%s20182_s24 + $0x428] sm:$0xff]  ;;  %v13561_v62 = vld [vmem:[%s20182_s24 + $0x3d8] sm:$0xff] }
 0x502   :  { %5926 = vmatprep.subr.mxu0 %v13543_v44  ;;  %11661 = vmatpush3.msra.mxu1 %v13544_v49  ;;  %v13562_v42 = vld [vmem:[%s20182_s24 + $0x3d0] sm:$0xff]  ;;  %v13563_v59 = vld [vmem:[%s20182_s24 + $0x388] sm:$0xff]  ;;  %v13565_v20 = vld [vmem:[%s20182_s24 + $0x338] sm:$0xff] }
 0x503   :  { %5927 = vmatpush1.msra.mxu0 %v13545_v32  ;;  %11662 = vmatprep.subr.mxu1 %v13546_v63  ;;  %v5548_v56 = vadd.f32 %v5547_v17, %v5546_v25  ;;  %v13559_v25 = vld [vmem:[%s20182_s24 + $0x4d8] sm:$0xff]  ;;  %v13564_v17 = vld [vmem:[%s20182_s24 + $0x380] sm:$0xff]  ;;  %v13566_v44 = vld [vmem:[%s20182_s24 + $0x330] sm:$0xff] }
 0x504   :  { %5928 = vmatprep.subr.mxu0 %v13547_v16  ;;  %11663 = vmatpush3.msra.mxu1 %v13548_v37  ;;  %v13567_v49 = vld [vmem:[%s20182_s24 + $0x2e8] sm:$0xff]  ;;  %v13568_v32 = vld [vmem:[%s20182_s24 + $0x2e0] sm:$0xff]  ;;  %v13569_v63 = vld [vmem:[%s20182_s24 + $0x298] sm:$0xff] }
 0x505   :  { %5929 = vmatpush1.msra.mxu0 %v13549_v27  ;;  %11664 = vmatprep.subr.mxu1 %v13550_v21  ;;  %v13571_v16 = vld [vmem:[%s20182_s24 + $0x248] sm:$0xff]  ;;  %v13572_v37 = vld [vmem:[%s20182_s24 + $0x240] sm:$0xff]  ;;  %v13573_v27 = vld [vmem:[%s20182_s24 + $0x1f8] sm:$0xff] }
 0x506   :  { %5893 = vmatprep.mubr.f32.mxu1 %v5548_v56  ;;  %11665 = vmatpush3.msra.mxu1 %v13551_v54  ;;  %v13570_v56 = vld [vmem:[%s20182_s24 + $0x290] sm:$0xff]  ;;  %v13576_v54 = vld [vmem:[%s20182_s24 + $0x1a0] sm:$0xff] }
 0x507   :  { %5930 = vmatprep.subr.mxu0 %v13552_v5  ;;  %5894 = vmatmul.mubr.f32.vlgmr.msra.gmra.mxu1 %v5542_v61  ;;  %v13574_v21 = vld [vmem:[%s20182_s24 + $0x1f0] sm:$0xff]  ;;  %v13575_v61 = vld [vmem:[%s20182_s24 + $0x1a8] sm:$0xff]  ;;  %v13577_v5 = vld [vmem:[%s20182_s24 + $0x158] sm:$0xff] }
 0x508   :  { %5971 = vmatprep.subr.mxu1 %v13553_v10  ;;  %5931 = vmatpush1.msra.mxu0 %v13555_v18  ;;  %v13578_v10 = vld [vmem:[%s20182_s24 + $0x150] sm:$0xff]  ;;  %v13580_v18 = vld [vmem:[%s20182_s24 + $0x100] sm:$0xff] }
 0x509   :  { %5972 = vmatpush1.msra.mxu1 %v13554_v55  ;;  %5964 = vmatprep.mubr.f32.mxu0 %v20202_v36  ;;  %v13579_v55 = vld [vmem:[%s20182_s24 + $0x108] sm:$0xff] }
 0x50a   :  { %5973 = vmatprep.subr.mxu1 %v13556_v53  ;;  %6035 = vmatprep.mubr.f32.mxu1 %v20202_v36  ;;  %v13581_v53 = vld [vmem:[%s20182_s24 + $0xb8] sm:$0xff] }
 0x50b   :  { %5974 = vmatpush1.msra.mxu1 %v13557_v23  ;;  %6042 = vmatprep.subr.mxu0 %v13559_v25  ;;  %v13582_v23 = vld [vmem:[%s20182_s24 + $0xb0] sm:$0xff]  ;;  %v13584_v25 = vld [vmem:[%s20182_s24 + $0x60] sm:$0xff] }
 0x50c   :  { %5975 = vmatprep.subr.mxu1 %v13558_v41  ;;  %v13583_v41 = vld [vmem:[%s20182_s24 + $0x68] sm:$0xff] }
 0x50d   :  { %5976 = vmatpush1.msra.mxu1 %v13560_v43  ;;  %v13585_v43 = vld [vmem:[%s20182_s24 + $0x18] sm:$0xff] }
 0x50e   :  { %5977 = vmatprep.subr.mxu1 %v13561_v62  ;;  %v13586_v62 = vld [vmem:[%s20182_s24 + $0x10] sm:$0xff] }
 0x50f   :  { %5978 = vmatpush1.msra.mxu1 %v13562_v42  ;;  %v13587_v42 = vld [vmem:[%s20182_s24 + $0x4e8] sm:$0xff] }
 0x510   :  { %5979 = vmatprep.subr.mxu1 %v13563_v59 }
 0x511   :  { %5980 = vmatpush1.msra.mxu1 %v13564_v17 }
 0x512   :  { %5981 = vmatprep.subr.mxu1 %v13565_v20 }
 0x513   :  { %5982 = vmatpush1.msra.mxu1 %v13566_v44 }
 0x514   :  { %5983 = vmatprep.subr.mxu1 %v13567_v49 }
 0x515   :  { %5984 = vmatpush1.msra.mxu1 %v13568_v32 }
 0x516   :  { %5985 = vmatprep.subr.mxu1 %v13569_v63 }
 0x517   :  { %5986 = vmatpush1.msra.mxu1 %v13570_v56 }
 0x518   :  { %5987 = vmatprep.subr.mxu1 %v13571_v16 }
 0x519   :  { %5988 = vmatpush1.msra.mxu1 %v13572_v37 }
 0x51a   :  { %5989 = vmatprep.subr.mxu1 %v13573_v27 }
 0x51b   :  { %5990 = vmatpush1.msra.mxu1 %v13574_v21 }
 0x51c   :  { %5991 = vmatprep.subr.mxu1 %v13575_v61 }
 0x51d   :  { %5992 = vmatpush1.msra.mxu1 %v13576_v54 }
 0x51e   :  { %5993 = vmatprep.subr.mxu1 %v13577_v5 }
 0x51f   :  { %5994 = vmatpush1.msra.mxu1 %v13578_v10 }
 0x520   :  { %5995 = vmatprep.subr.mxu1 %v13579_v55 }
 0x521   :  { %5996 = vmatpush1.msra.mxu1 %v13580_v18 }
 0x522   :  { %5997 = vmatprep.subr.mxu1 %v13581_v53 }
 0x523   :  { %5998 = vmatpush1.msra.mxu1 %v13582_v23 }
 0x524   :  { %5999 = vmatprep.subr.mxu1 %v13583_v41  ;;  %v13588_v41 = vld [vmem:[%s20182_s24 + $0x4d0] sm:$0xff] }
 0x525   :  { %6000 = vmatpush1.msra.mxu1 %v13584_v25  ;;  %v13589_v25 = vld [vmem:[%s20182_s24 + $0x4e0] sm:$0xff] }
 0x526   :  { %6001 = vmatprep.subr.mxu1 %v13585_v43  ;;  %v13590_v43 = vld [vmem:[%s20182_s24 + $0x488] sm:$0xff] }
 0x527   :  { %6002 = vmatpush1.msra.mxu1 %v13586_v62  ;;  %v13591_v62 = vld [vmem:[%s20182_s24 + $0x498] sm:$0xff] }
 0x528   :  { %6113 = vmatprep.subr.mxu1 %v13587_v42  ;;  %v13592_v42 = vld [vmem:[%s20182_s24 + $0x480] sm:$0xff] }
 0x584   :  { %v11526_v59 = vpop.f32.mrf.mxu1 }
 0x585   :  { %v11561_v17 = vpop.f32.mrf.mxu0 }
 0x586   :  { %v11527_v20 = vpop.f32.mrf.mxu1 }
 0x587   :  { %v11562_v49 = vpop.f32.mrf.mxu0  ;;  %v11528_v63 = vadd.f32 %v11527_v20, %v11526_v59  ;;  %v13593_v59 = vld [vmem:[%s20182_s24 + $0x490] sm:$0xff]  ;;  %v13595_v20 = vld [vmem:[%s20182_s24 + $0x448] sm:$0xff] }
 0x588   :  { %v11563_v56 = vadd.f32 %v11562_v49, %v11561_v17  ;;  %v13594_v17 = vld [vmem:[%s20182_s24 + $0x438] sm:$0xff]  ;;  %v13597_v49 = vld [vmem:[%s20182_s24 + $0x440] sm:$0xff] }
 0x58a   :  { %v5686_v27 = vadd.f32 %v11563_v56, %v11528_v63  ;;  %v13599_v63 = vld [vmem:[%s20182_s24 + $0x3f8] sm:$0xff]  ;;  %v13600_v56 = vld [vmem:[%s20182_s24 + $0x3e0] sm:$0xff] }
 0x5a6   :  { %v11596_v44 = vpop.f32.mrf.mxu1 }
 0x5a7   :  { %v11631_v16 = vpop.f32.mrf.mxu0 }
 0x5a8   :  { %v11597_v32 = vpop.f32.mrf.mxu1 }
 0x5a9   :  { %v11598_v37 = vadd.f32 %v11597_v32, %v11596_v44  ;;  %v11632_v21 = vpop.f32.mrf.mxu0  ;;  %v13596_v44 = vld [vmem:[%s20182_s24 + $0x430] sm:$0xff]  ;;  %v13598_v32 = vld [vmem:[%s20182_s24 + $0x3e8] sm:$0xff] }
 0x5aa   :  { %v11633_v5 = vadd.f32 %v11632_v21, %v11631_v16  ;;  %v13601_v16 = vld [vmem:[%s20182_s24 + $0x3f0] sm:$0xff] }
 0x5ab   :  { %v5756_v61 = vadd.f32 %v11598_v37, %v5686_v27  ;;  %v13602_v37 = vld [vmem:[%s20182_s24 + $0x398] sm:$0xff]  ;;  %v13603_v27 = vld [vmem:[%s20182_s24 + $0x3a8] sm:$0xff]  ;;  %v13604_v21 = vld [vmem:[%s20182_s24 + $0x390] sm:$0xff] }
 0x5ad   :  { %v5826_v55 = vadd.f32 %v11633_v5, %v5756_v61  ;;  %v13605_v61 = vld [vmem:[%s20182_s24 + $0x3a0] sm:$0xff]  ;;  %v13607_v5 = vld [vmem:[%s20182_s24 + $0x358] sm:$0xff] }
 0x5c7   :  { %v11666_v54 = vpop.f32.mrf.mxu1 }
 0x5c9   :  { %v11667_v10 = vpop.f32.mrf.mxu1 }
 0x5ca   :  { %v11668_v18 = vadd.f32 %v11667_v10, %v11666_v54  ;;  %v13606_v54 = vld [vmem:[%s20182_s24 + $0x348] sm:$0xff]  ;;  %v13608_v10 = vld [vmem:[%s20182_s24 + $0x340] sm:$0xff] }
 0x5cc   :  { %v5896_v53 = vadd.f32 %v11668_v18, %v5826_v55  ;;  %v13609_v55 = vld [vmem:[%s20182_s24 + $0x350] sm:$0xff]  ;;  %v13610_v18 = vld [vmem:[%s20182_s24 + $0x2f8] sm:$0xff] }
 0x5ce   :  { %v17546_v23 = vmul.f32 0.0006377551, %v5896_v53  ;;  %v13611_v53 = vld [vmem:[%s20182_s24 + $0x308] sm:$0xff] }
 0x5d0   :  { %5965 = vmatmul.mubr.f32.vlgmr.msra.gmra.mxu0 %v17546_v23  ;;  %6036 = vmatmul.mubr.f32.vlgmr.msra.gmra.mxu1 %v17546_v23 }
 0x5d1   :  { %6043 = vmatpush1.msra.mxu0 %v13588_v41  ;;  %6114 = vmatpush1.msra.mxu1 %v13589_v25  ;;  %v13612_v41 = vld [vmem:[%s20182_s24 + $0x2f0] sm:$0xff]  ;;  %v13613_v25 = vld [vmem:[%s20182_s24 + $0x300] sm:$0xff] }
 0x5d2   :  { %6044 = vmatprep.subr.mxu0 %v13590_v43  ;;  %6115 = vmatprep.subr.mxu1 %v13591_v62  ;;  %v13614_v43 = vld [vmem:[%s20182_s24 + $0x2a8] sm:$0xff]  ;;  %v13615_v62 = vld [vmem:[%s20182_s24 + $0x2b8] sm:$0xff] }
 0x5d3   :  { %6045 = vmatpush1.msra.mxu0 %v13592_v42  ;;  %6116 = vmatpush1.msra.mxu1 %v13593_v59  ;;  %v13616_v42 = vld [vmem:[%s20182_s24 + $0x2a0] sm:$0xff]  ;;  %v13617_v59 = vld [vmem:[%s20182_s24 + $0x2b0] sm:$0xff] }
 0x5d4   :  { %6046 = vmatprep.subr.mxu0 %v13594_v17  ;;  %6117 = vmatprep.subr.mxu1 %v13595_v20  ;;  %v13618_v17 = vld [vmem:[%s20182_s24 + $0x258] sm:$0xff]  ;;  %v13619_v20 = vld [vmem:[%s20182_s24 + $0x268] sm:$0xff] }
 0x5d5   :  { %6047 = vmatpush1.msra.mxu0 %v13596_v44  ;;  %6118 = vmatpush1.msra.mxu1 %v13597_v49  ;;  %v13620_v44 = vld [vmem:[%s20182_s24 + $0x250] sm:$0xff]  ;;  %v13621_v49 = vld [vmem:[%s20182_s24 + $0x260] sm:$0xff] }
 0x5d6   :  { %6048 = vmatprep.subr.mxu0 %v13598_v32  ;;  %6119 = vmatprep.subr.mxu1 %v13599_v63  ;;  %v13622_v32 = vld [vmem:[%s20182_s24 + $0x208] sm:$0xff]  ;;  %v13623_v63 = vld [vmem:[%s20182_s24 + $0x218] sm:$0xff] }
 0x5d7   :  { %6049 = vmatpush1.msra.mxu0 %v13600_v56  ;;  %6120 = vmatpush1.msra.mxu1 %v13601_v16  ;;  %v13624_v56 = vld [vmem:[%s20182_s24 + $0x200] sm:$0xff]  ;;  %v13625_v16 = vld [vmem:[%s20182_s24 + $0x210] sm:$0xff] }
 0x5d8   :  { %6050 = vmatprep.subr.mxu0 %v13602_v37  ;;  %6121 = vmatprep.subr.mxu1 %v13603_v27  ;;  %v13626_v37 = vld [vmem:[%s20182_s24 + $0x1b8] sm:$0xff]  ;;  %v13627_v27 = vld [vmem:[%s20182_s24 + $0x1c8] sm:$0xff] }
 0x5d9   :  { %6051 = vmatpush1.msra.mxu0 %v13604_v21  ;;  %6122 = vmatpush1.msra.mxu1 %v13605_v61  ;;  %v13628_v21 = vld [vmem:[%s20182_s24 + $0x1b0] sm:$0xff]  ;;  %v13629_v61 = vld [vmem:[%s20182_s24 + $0x1c0] sm:$0xff] }
 0x5da   :  { %6052 = vmatprep.subr.mxu0 %v13606_v54  ;;  %6123 = vmatprep.subr.mxu1 %v13607_v5  ;;  %v13630_v54 = vld [vmem:[%s20182_s24 + $0x168] sm:$0xff]  ;;  %v13631_v5 = vld [vmem:[%s20182_s24 + $0x178] sm:$0xff] }
 0x5db   :  { %6053 = vmatpush1.msra.mxu0 %v13608_v10  ;;  %6124 = vmatpush1.msra.mxu1 %v13609_v55  ;;  %v13632_v10 = vld [vmem:[%s20182_s24 + $0x160] sm:$0xff]  ;;  %v13633_v55 = vld [vmem:[%s20182_s24 + $0x170] sm:$0xff] }
 0x5dc   :  { %6054 = vmatprep.subr.mxu0 %v13610_v18  ;;  %6125 = vmatprep.subr.mxu1 %v13611_v53  ;;  %v13634_v18 = vld [vmem:[%s20182_s24 + $0x118] sm:$0xff]  ;;  %v13635_v53 = vld [vmem:[%s20182_s24 + $0x128] sm:$0xff] }
 0x5dd   :  { %6055 = vmatpush1.msra.mxu0 %v13612_v41  ;;  %6126 = vmatpush1.msra.mxu1 %v13613_v25  ;;  %v12792_v41 = vld [vmem:[%s20203_s5 + $0x40] ss:$16 sps:$4 sm:$0xff]   ;;  %v12785_v25 = vld [vmem:[%s20203_s5 + $0x284] ss:$16 sps:$4 sm:$0xff]  }
 0x5de   :  { %6056 = vmatprep.subr.mxu0 %v13614_v43  ;;  %6127 = vmatprep.subr.mxu1 %v13615_v62  ;;  %v12800_v43 = vld [vmem:[%s20203_s5 + $0x24] ss:$16 sps:$4 sm:$0xff]   ;;  %v12783_v62 = vld [vmem:[%s20203_s5 + $0x280] ss:$16 sps:$4 sm:$0xff]  }
 0x5df   :  { %6057 = vmatpush1.msra.mxu0 %v13616_v42  ;;  %6128 = vmatpush1.msra.mxu1 %v13617_v59  ;;  %v12798_v42 = vld [vmem:[%s20203_s5 + $0x20] ss:$16 sps:$4 sm:$0xff]   ;;  %v12791_v59 = vld [vmem:[%s20203_s5 + $0x264] ss:$16 sps:$4 sm:$0xff]  }
 0x5e0   :  { %6058 = vmatprep.subr.mxu0 %v13618_v17  ;;  %6129 = vmatprep.subr.mxu1 %v13619_v20  ;;  %v12806_v17 = vld [vmem:[%s20203_s5 + $0x4] ss:$16 sps:$4 sm:$0xff]   ;;  %v12789_v20 = vld [vmem:[%s20203_s5 + $0x260] ss:$16 sps:$4 sm:$0xff]  }
 0x5e1   :  { %6059 = vmatpush1.msra.mxu0 %v13620_v44  ;;  %6130 = vmatpush1.msra.mxu1 %v13621_v49  ;;  %v12804_v44 = vld [vmem:[%s20203_s5] ss:$16 sps:$4 sm:$0xff]   ;;  %v12797_v49 = vld [vmem:[%s20203_s5 + $0x244] ss:$16 sps:$4 sm:$0xff]  }
 0x5e2   :  { %6060 = vmatprep.subr.mxu0 %v13622_v32  ;;  %6131 = vmatprep.subr.mxu1 %v13623_v63  ;;  %v12812_v32 = vld [vmem:[%s20203_s5 + $0x1e4] ss:$16 sps:$4 sm:$0xff]   ;;  %v12795_v63 = vld [vmem:[%s20203_s5 + $0x240] ss:$16 sps:$4 sm:$0xff]  }
 0x5e3   :  { %6061 = vmatpush1.msra.mxu0 %v13624_v56  ;;  %6132 = vmatpush1.msra.mxu1 %v13625_v16  ;;  %v12810_v56 = vld [vmem:[%s20203_s5 + $0x1e0] ss:$16 sps:$4 sm:$0xff]   ;;  %v12803_v16 = vld [vmem:[%s20203_s5 + $0x224] ss:$16 sps:$4 sm:$0xff]  }
 0x5e4   :  { %6062 = vmatprep.subr.mxu0 %v13626_v37  ;;  %6133 = vmatprep.subr.mxu1 %v13627_v27  ;;  %v12818_v37 = vld [vmem:[%s20203_s5 + $0x1c4] ss:$16 sps:$4 sm:$0xff]   ;;  %v12816_v27 = vld [vmem:[%s20203_s5 + $0x1c0] ss:$16 sps:$4 sm:$0xff]  }
 0x5e5   :  { %6063 = vmatpush1.msra.mxu0 %v13628_v21  ;;  %6134 = vmatpush1.msra.mxu1 %v13629_v61  ;;  %v12824_v21 = vld [vmem:[%s20203_s5 + $0x1a4] ss:$16 sps:$4 sm:$0xff]   ;;  %v12801_v61 = vld [vmem:[%s20203_s5 + $0x220] ss:$16 sps:$4 sm:$0xff]  }
 0x5e6   :  { %6064 = vmatprep.subr.mxu0 %v13630_v54  ;;  %6135 = vmatprep.subr.mxu1 %v13631_v5  ;;  %v12809_v54 = vld [vmem:[%s20203_s5 + $0x204] ss:$16 sps:$4 sm:$0xff]   ;;  %v12822_v5 = vld [vmem:[%s20203_s5 + $0x1a0] ss:$16 sps:$4 sm:$0xff]  }
 0x5e7   :  { %6065 = vmatpush1.msra.mxu0 %v13632_v10  ;;  %6136 = vmatpush1.msra.mxu1 %v13633_v55  ;;  %v12830_v10 = vld [vmem:[%s20203_s5 + $0x184] ss:$16 sps:$4 sm:$0xff]   ;;  %v12807_v55 = vld [vmem:[%s20203_s5 + $0x200] ss:$16 sps:$4 sm:$0xff]  }
 0x5e8   :  { %6066 = vmatprep.subr.mxu0 %v13634_v18  ;;  %6137 = vmatprep.subr.mxu1 %v13635_v53  ;;  %v12815_v18 = vld [vmem:[%s20203_s5 + $0x3e4] ss:$16 sps:$4 sm:$0xff]   ;;  %v12828_v53 = vld [vmem:[%s20203_s5 + $0x180] ss:$16 sps:$4 sm:$0xff]  }
 0x5e9   :  { %6067 = vmatpush1.msra.mxu0 %v16527_v28  ;;  %6138 = vmatpush1.msra.mxu1 %v16532_v1  ;;  %v12764_v28 = vld [vmem:[%s20203_s5 + $0xe4] ss:$16 sps:$4 sm:$0xff]   ;;  %v12762_v1 = vld [vmem:[%s20203_s5 + $0xe0] ss:$16 sps:$4 sm:$0xff]  }
 0x5ea   :  { %6068 = vmatprep.subr.mxu0 %v16537_v2  ;;  %6139 = vmatprep.subr.mxu1 %v16542_v3  ;;  %v12770_v2 = vld [vmem:[%s20203_s5 + $0xc4] ss:$16 sps:$4 sm:$0xff]   ;;  %v12768_v3 = vld [vmem:[%s20203_s5 + $0xc0] ss:$16 sps:$4 sm:$0xff]  }
 0x5eb   :  { %6069 = vmatpush1.msra.mxu0 %v16547_v4  ;;  %6140 = vmatpush1.msra.mxu1 %v16552_v8  ;;  %v12776_v4 = vld [vmem:[%s20203_s5 + $0xa4] ss:$16 sps:$4 sm:$0xff]   ;;  %v12774_v8 = vld [vmem:[%s20203_s5 + $0xa0] ss:$16 sps:$4 sm:$0xff]  }
 0x5ec   :  { %6070 = vmatprep.subr.mxu0 %v16559_v9  ;;  %6141 = vmatprep.subr.mxu1 %v16564_v11  ;;  %v12782_v9 = vld [vmem:[%s20203_s5 + $0x84] ss:$16 sps:$4 sm:$0xff]   ;;  %v12780_v11 = vld [vmem:[%s20203_s5 + $0x80] ss:$16 sps:$4 sm:$0xff]  }
 0x5ed   :  { %6071 = vmatpush1.msra.mxu0 %v16571_v19  ;;  %6142 = vmatpush1.msra.mxu1 %v16576_v33  ;;  %v20204_v19 = vld [vmem:[#allocation13_spill] sm:$0xff]  ;;  %v20205_v33 = vld [vmem:[#allocation14_spill] sm:$0xff] }
 0x5ee   :  { %6072 = vmatprep.subr.mxu0 %v16583_v31  ;;  %6143 = vmatprep.subr.mxu1 %v16588_v22  ;;  %v20206_v31 = vld [vmem:[#allocation15_spill] sm:$0xff]  ;;  %v20207_v22 = vld [vmem:[#allocation16_spill] sm:$0xff] }
 0x5ef   :  { %6073 = vmatpush1.msra.mxu0 %v16595_v12  ;;  %6106 = vmatprep.mubr.f32.mxu0 %v20202_v36  ;;  %v20208_v12 = vld [vmem:[#allocation17_spill] sm:$0xff] }
 0x5f0   :  { %6144 = vmatpush1.msra.mxu1 %v16602_v30  ;;  %6177 = vmatprep.mubr.f32.mxu1 %v20202_v36  ;;  %v20209_v30 = vld [vmem:[#allocation18_spill] sm:$0xff] }
 0x5f1   :  { %6107 = vmatmul.mubr.f32.vlgmr.msra.gmra.mxu0 %v17546_v23  ;;  %6178 = vmatmul.mubr.f32.vlgmr.msra.gmra.mxu1 %v17546_v23 }
 0x5f2   :  { %6184 = vmatprep.subr.mxu0 %v16611_v58  ;;  %6248 = vmatprep.mubr.f32.mxu0 %v20202_v36  ;;  %v20210_v58 = vld [vmem:[#allocation19_spill] sm:$0xff] }
 0x5f3   :  { %6185 = vmatpush1.msra.mxu0 %v16618_v13  ;;  %8431 = vmatprep.subr.bf16.mxu1 %v12764_v28  ;;  %v20211_v13 = vld [vmem:[#allocation20_spill] sm:$0xff]  ;;  %v12813_v28 = vld [vmem:[%s20203_s5 + $0x3e0] ss:$16 sps:$4 sm:$0xff]  }
 0x5f4   :  { %6186 = vmatprep.subr.mxu0 %v16625_v6  ;;  %8432 = vmatpush1.bf16.msra.mxu1 %v12762_v1  ;;  %v20212_v6 = vld [vmem:[#allocation21_spill] sm:$0xff] }
 0x5f5   :  { %6187 = vmatpush1.msra.mxu0 %v16631_v15  ;;  %8433 = vmatprep.subr.bf16.mxu1 %v12770_v2  ;;  %v20213_v15 = vld [vmem:[#allocation22_spill] sm:$0xff]  ;;  %v12821_v1 = vld [vmem:[%s20203_s5 + $0x3c4] ss:$16 sps:$4 sm:$0xff]  }
 0x5f6   :  { %6188 = vmatprep.subr.mxu0 %v16638_v7  ;;  %v20214_v7 = vld [vmem:[#allocation23_spill] sm:$0xff] }
 0x5f7   :  { %6189 = vmatpush1.msra.mxu0 %v16647_v26  ;;  %v20215_v26 = vld [vmem:[#allocation24_spill] sm:$0xff]  ;;  %v12836_v2 = vld [vmem:[%s20203_s5 + $0x164] ss:$16 sps:$4 sm:$0xff]  }
 0x5f8   :  { %6190 = vmatprep.subr.mxu0 %v16656_v29  ;;  %8434 = vmatpush1.bf16.msra.mxu1 %v12768_v3  ;;  %v12767_v29 = vld [vmem:[%s20203_s5 + $0x2e4] ss:$16 sps:$4 sm:$0xff]   ;;  %v12819_v3 = vld [vmem:[%s20203_s5 + $0x3c0] ss:$16 sps:$4 sm:$0xff]  }
 0x5f9   :  { %6191 = vmatpush1.msra.mxu0 %v16665_v35  ;;  %8435 = vmatprep.subr.bf16.mxu1 %v12776_v4  ;;  %v20216_v35 = vld [vmem:[#allocation25_spill] sm:$0xff] }
 0x5fa   :  { %6192 = vmatprep.subr.mxu0 %v16674_v39  ;;  %v12765_v39 = vld [vmem:[%s20203_s5 + $0x2e0] ss:$16 sps:$4 sm:$0xff]  }
 0x5fb   :  { %6193 = vmatpush1.msra.mxu0 %v16683_v40  ;;  %v20217_v40 = vld [vmem:[#allocation26_spill] sm:$0xff]  ;;  %v12834_v4 = vld [vmem:[%s20203_s5 + $0x160] ss:$16 sps:$4 sm:$0xff]  }
 0x5fc   :  { %6194 = vmatprep.subr.mxu0 %v16692_v45  ;;  %8436 = vmatpush1.bf16.msra.mxu1 %v12774_v8  ;;  %v12773_v45 = vld [vmem:[%s20203_s5 + $0x2c4] ss:$16 sps:$4 sm:$0xff]  }
 0x5fd   :  { %6195 = vmatpush1.msra.mxu0 %v16701_v47  ;;  %8437 = vmatprep.subr.bf16.mxu1 %v12782_v9  ;;  %v20218_v47 = vld [vmem:[#allocation27_spill] sm:$0xff] }
 0x5fe   :  { %6196 = vmatprep.subr.mxu0 %v16710_v48  ;;  %v12788_v48 = vld [vmem:[%s20203_s5 + $0x64] ss:$16 sps:$4 sm:$0xff]  }
 0x5ff   :  { %6197 = vmatpush1.msra.mxu0 %v16719_v50  ;;  %v12771_v50 = vld [vmem:[%s20203_s5 + $0x2c0] ss:$16 sps:$4 sm:$0xff]   ;;  %v12827_v8 = vld [vmem:[%s20203_s5 + $0x3a4] ss:$16 sps:$4 sm:$0xff]  }
 0x600   :  { %6198 = vmatprep.subr.mxu0 %v16728_v57  ;;  %8438 = vmatpush1.bf16.msra.mxu1 %v12780_v11  ;;  %v12786_v57 = vld [vmem:[%s20203_s5 + $0x60] ss:$16 sps:$4 sm:$0xff]   ;;  %v12842_v9 = vld [vmem:[%s20203_s5 + $0x144] ss:$16 sps:$4 sm:$0xff]  }
 0x601   :  { %6199 = vmatpush1.msra.mxu0 %v16737_v60  ;;  %v12779_v60 = vld [vmem:[%s20203_s5 + $0x2a4] ss:$16 sps:$4 sm:$0xff]   ;;  %8439 = vmatprep.subr.bf16.mxu1 %v12788_v48  ;;  %v12825_v11 = vld [vmem:[%s20203_s5 + $0x3a0] ss:$16 sps:$4 sm:$0xff]  }
 0x602   :  { %6200 = vmatprep.subr.mxu0 %v16746_v0  ;;  %v12794_v0 = vld [vmem:[%s20203_s5 + $0x44] ss:$16 sps:$4 sm:$0xff]  }
 0x603   :  { %6201 = vmatpush1.msra.mxu0 %v20204_v19  ;;  %v12840_v19 = vld [vmem:[%s20203_s5 + $0x140] ss:$16 sps:$4 sm:$0xff]  }
 0x604   :  { %6202 = vmatprep.subr.mxu0 %v20205_v33  ;;  %8440 = vmatpush1.bf16.msra.mxu1 %v12786_v57  ;;  %v12833_v33 = vld [vmem:[%s20203_s5 + $0x384] ss:$16 sps:$4 sm:$0xff]  }
 0x605   :  { %6203 = vmatpush1.msra.mxu0 %v20206_v31  ;;  %8441 = vmatprep.subr.bf16.mxu1 %v12794_v0  ;;  %v12848_v31 = vld [vmem:[%s20203_s5 + $0x124] ss:$16 sps:$4 sm:$0xff]  }
 0x606   :  { %6204 = vmatprep.subr.mxu0 %v20207_v22  ;;  %v12831_v22 = vld [vmem:[%s20203_s5 + $0x380] ss:$16 sps:$4 sm:$0xff]  }
 0x607   :  { %6205 = vmatpush1.msra.mxu0 %v20208_v12  ;;  %v12846_v12 = vld [vmem:[%s20203_s5 + $0x120] ss:$16 sps:$4 sm:$0xff]  }
 0x608   :  { %6206 = vmatprep.subr.mxu0 %v20209_v30  ;;  %8442 = vmatpush1.bf16.msra.mxu1 %v12792_v41  ;;  %v12839_v30 = vld [vmem:[%s20203_s5 + $0x364] ss:$16 sps:$4 sm:$0xff]  }
 0x609   :  { %6207 = vmatpush1.msra.mxu0 %v20210_v58  ;;  %8443 = vmatprep.subr.bf16.mxu1 %v12800_v43  ;;  %v12854_v58 = vld [vmem:[%s20203_s5 + $0x104] ss:$16 sps:$4 sm:$0xff]  }
 0x60a   :  { %6208 = vmatprep.subr.mxu0 %v20211_v13  ;;  %v12837_v13 = vld [vmem:[%s20203_s5 + $0x360] ss:$16 sps:$4 sm:$0xff]  }
 0x60b   :  { %6209 = vmatpush1.msra.mxu0 %v20212_v6  ;;  %v12852_v6 = vld [vmem:[%s20203_s5 + $0x100] ss:$16 sps:$4 sm:$0xff]  }
 0x60c   :  { %6210 = vmatprep.subr.mxu0 %v20213_v15  ;;  %8444 = vmatpush1.bf16.msra.mxu1 %v12798_v42  ;;  %v12845_v15 = vld [vmem:[%s20203_s5 + $0x344] ss:$16 sps:$4 sm:$0xff]  }
 0x60d   :  { %6211 = vmatpush1.msra.mxu0 %v20214_v7  ;;  %8445 = vmatprep.subr.bf16.mxu1 %v12806_v17  ;;  %v12860_v7 = vld [vmem:[%s20203_s5 + $0x4e4] ss:$16 sps:$4 sm:$0xff]  }
 0x60e   :  { %6212 = vmatprep.subr.mxu0 %v20215_v26  ;;  %v12843_v26 = vld [vmem:[%s20203_s5 + $0x340] ss:$16 sps:$4 sm:$0xff]  }
 0x60f   :  { %6213 = vmatpush1.msra.mxu0 %v20216_v35  ;;  %v12849_v35 = vld [vmem:[%s20203_s5 + $0x320] ss:$16 sps:$4 sm:$0xff]  }
 0x610   :  { %6214 = vmatprep.subr.mxu0 %v20217_v40  ;;  %8446 = vmatpush1.bf16.msra.mxu1 %v12804_v44  ;;  %v12855_v40 = vld [vmem:[%s20203_s5 + $0x300] ss:$16 sps:$4 sm:$0xff]  }
 0x611   :  { %6215 = vmatpush1.msra.mxu0 %v20218_v47  ;;  %8447 = vmatprep.subr.bf16.mxu1 %v12812_v32 }
 0x612   :  { %6249 = vmatmul.mubr.f32.vlgmr.msra.gmra.mxu0 %v17546_v23  ;;  %8472 = vmatprep.subr.bf16.mxu0 %v12767_v29  ;;  %v12777_v23 = vld [vmem:[%s20203_s5 + $0x2a0] ss:$16 sps:$4 sm:$0xff]   ;;  %v12851_v29 = vld [vmem:[%s20203_s5 + $0x324] ss:$16 sps:$4 sm:$0xff]  }
 0x613   :  { %8473 = vmatpush1.bf16.msra.mxu0 %v12765_v39  ;;  %v12857_v39 = vld [vmem:[%s20203_s5 + $0x304] ss:$16 sps:$4 sm:$0xff]  }
 0x614   :  { %8474 = vmatprep.subr.bf16.mxu0 %v12773_v45  ;;  %8448 = vmatpush2.bf16.msra.mxu1 %v12810_v56  ;;  %v12863_v45 = vld [vmem:[%s20203_s5 + $0x6e4] ss:$16 sps:$4 sm:$0xff]  }
 0x615   :  { %8449 = vmatprep.subr.bf16.mxu1 %v12818_v37 }
 0x617   :  { %8475 = vmatpush1.bf16.msra.mxu0 %v12771_v50 }
 0x618   :  { %8476 = vmatprep.subr.bf16.mxu0 %v12779_v60  ;;  %8450 = vmatpush2.bf16.msra.mxu1 %v12816_v27  ;;  %v20223_v27 = vld [vmem:[#allocation28_spill] sm:$0xff] }
 0x619   :  { %8451 = vmatprep.subr.bf16.mxu1 %v12824_v21 }
 0x61b   :  { %8477 = vmatpush1.bf16.msra.mxu0 %v12777_v23 }
 0x61c   :  { %8478 = vmatprep.subr.bf16.mxu0 %v12785_v25  ;;  %8452 = vmatpush2.bf16.msra.mxu1 %v12822_v5  ;;  %v17947_v25 = vld [vmem:[%s20219_s26] sm:$0xff]  ;;  %v20224_v5 = vld [vmem:[#allocation8_spill] sm:$0xff] }
 0x61d   :  { %8453 = vmatprep.subr.bf16.mxu1 %v12830_v10  ;;  %v6320_v17 = vrot.slane %v17947_v25, %v14607_v34  ;;  %v6332_v10 = vrot.slane %v17947_v25, %v20224_v5 }
 0x61f   :  { %8479 = vmatpush1.bf16.msra.mxu0 %v12783_v62  ;;  %v17952_v62 = vld [vmem:[%s20220_s4] sm:$0xff] }
 0x620   :  { %8480 = vmatprep.subr.bf16.mxu0 %v12791_v59  ;;  %8454 = vmatpush2.bf16.msra.mxu1 %v12828_v53 }
 0x621   :  { %8455 = vmatprep.subr.bf16.mxu1 %v12836_v2 }
 0x623   :  { %8481 = vmatpush1.bf16.msra.mxu0 %v12789_v20 }
 0x624   :  { %8482 = vmatprep.subr.bf16.mxu0 %v12797_v49  ;;  %8456 = vmatpush2.bf16.msra.mxu1 %v12834_v4  ;;  %v20221_v49 = vld [vmem:[#allocation7_spill] sm:$0xff] }
 0x625   :  { %8457 = vmatprep.subr.bf16.mxu1 %v12842_v9  ;;  %v6328_v32 = vrot.slane %v17947_v25, %v20221_v49  ;;  %v6390_v53 = vrot.slane %v17952_v62, %v20221_v49  ;;  %v20227_v4 = vld [vmem:[#allocation31_spill] sm:$0xff]  ;;  %v6394_v9 = vrot.slane %v17952_v62, %v20224_v5 }
 0x627   :  { %8483 = vmatpush1.bf16.msra.mxu0 %v12795_v63 }
 0x628   :  { %8484 = vmatprep.subr.bf16.mxu0 %v12803_v16  ;;  %8458 = vmatpush2.bf16.msra.mxu1 %v12840_v19  ;;  %v20222_v16 = vld [vmem:[#allocation6_spill] sm:$0xff] }
 0x629   :  { %8459 = vmatprep.subr.bf16.mxu1 %v12848_v31  ;;  %v6324_v37 = vrot.slane %v17947_v25, %v20222_v16  ;;  %v6386_v2 = vrot.slane %v17952_v62, %v20222_v16 }
 0x62b   :  { %8485 = vmatpush1.bf16.msra.mxu0 %v12801_v61  ;;  %v6382_v61 = vrot.slane %v17952_v62, %v14607_v34 }
 0x62c   :  { %8486 = vmatprep.subr.bf16.mxu0 %v12809_v54  ;;  %8460 = vmatpush2.bf16.msra.mxu1 %v12846_v12 }
 0x62d   :  { %8461 = vmatprep.subr.bf16.mxu1 %v12854_v58 }
 0x62f   :  { %8487 = vmatpush1.bf16.msra.mxu0 %v12807_v55  ;;  %v20225_v55 = vld [vmem:[#allocation29_spill] sm:$0xff] }
 0x630   :  { %8488 = vmatprep.subr.bf16.mxu0 %v12815_v18  ;;  %8462 = vmatpush2.bf16.msra.mxu1 %v12852_v6 }
 0x631   :  { %8513 = vmatprep.subr.bf16.mxu1 %v12860_v7 }
 0x633   :  { %8489 = vmatpush2.bf16.msra.mxu0 %v12813_v28  ;;  %v20226_v28 = vld [vmem:[#allocation30_spill] sm:$0xff] }
 0x634   :  { %8490 = vmatprep.subr.bf16.mxu0 %v12821_v1 }
 0x637   :  { %8491 = vmatpush2.bf16.msra.mxu0 %v12819_v3 }
 0x638   :  { %8492 = vmatprep.subr.bf16.mxu0 %v12827_v8 }
 0x63b   :  { %8493 = vmatpush2.bf16.msra.mxu0 %v12825_v11 }
 0x63c   :  { %8494 = vmatprep.subr.bf16.mxu0 %v12833_v33 }
 0x63f   :  { %8495 = vmatpush2.bf16.msra.mxu0 %v12831_v22 }
 0x640   :  { %8496 = vmatprep.subr.bf16.mxu0 %v12839_v30 }
 0x643   :  { %8497 = vmatpush2.bf16.msra.mxu0 %v12837_v13 }
 0x644   :  { %8498 = vmatprep.subr.bf16.mxu0 %v12845_v15 }
 0x647   :  { %8499 = vmatpush2.bf16.msra.mxu0 %v12843_v26 }
 0x648   :  { %8500 = vmatprep.subr.bf16.mxu0 %v12851_v29 }
 0x64b   :  { %8501 = vmatpush2.bf16.msra.mxu0 %v12849_v35 }
 0x64c   :  { %8502 = vmatprep.subr.bf16.mxu0 %v12857_v39 }
 0x64f   :  { %8503 = vmatpush2.bf16.msra.mxu0 %v12855_v40 }
 0x650   :  { %8554 = vmatprep.subr.bf16.mxu0 %v12863_v45 }
 0x690   :  { %v5966_v47 = vpop.f32.mrf.mxu0  ;;  %v6037_v48 = vpop.f32.mrf.mxu1 }
 0x691   :  { %v5967_v50 = vadd.f32 1e-05, %v5966_v47  ;;  %v6038_v57 = vadd.f32 1e-05, %v6037_v48 }
 0x692   :  { %v5968_v60 = vpop.f32.mrf.mxu0  ;;  %v6039_v0 = vpop.f32.mrf.mxu1 }
 0x693   :  { %13290 = vrsqrt.f32 %v5967_v50  ;;  %v5969_v23 = vadd.f32 1e-05, %v5968_v60  ;;  %v6040_v41 = vadd.f32 1e-05, %v6039_v0 }
 0x694   :  { %13292 = vrsqrt.f32 %v6038_v57 }
 0x695   :  { %13294 = vrsqrt.f32 %v5969_v23 }
 0x696   :  { %13296 = vrsqrt.f32 %v6040_v41 }
 0x6a0   :  { %v13291_v43 = vpop.eup %13290 }
 0x6a1   :  { %v13293_v42 = vpop.eup %13292  ;;  %v6268_v59 = vrot.slane %v13291_v43, %v14607_v34 }
 0x6a2   :  { %v13295_v20 = vpop.eup %13294  ;;  %v6276_v44 = vrot.slane %v13293_v42, %v14607_v34 }
 0x6a3   :  { %v13297_v63 = vpop.eup %13296  ;;  %v6272_v56 = vrot.slane %v13295_v20, %v14607_v34  ;;  %v6305_v21 = vmul.f32 %v6268_v59, %v20223_v27  ;;  %v12858_v20 = vld [vmem:[%s20203_s5 + $0x4e0] ss:$16 sps:$4 sm:$0xff]  }
 0x6a4   :  { %v6280_v54 = vrot.slane %v13297_v63, %v14607_v34  ;;  %v6307_v18 = vmul.f32 %v6276_v44, %v20225_v55  ;;  %v12861_v63 = vld [vmem:[%s20203_s5 + $0x6e0] ss:$16 sps:$4 sm:$0xff]  }
 0x6a5   :  { %v6306_v1 = vmul.f32 %v6272_v56, %v20226_v28  ;;  %v6367_v3 = vmul.f32 %v6320_v17, %v6305_v21 }
 0x6a6   :  { %v6308_v8 = vmul.f32 %v6280_v54, %v20227_v4  ;;  %v6369_v11 = vmul.f32 %v6328_v32, %v6307_v18  ;;  %v20228_v18 = vld [vmem:[#allocation10_spill] sm:$0xff] }
 0x6a7   :  { %v6368_v19 = vmul.f32 %v6324_v37, %v6306_v1  ;;  %v6429_v33 = vadd.f32 %v6382_v61, %v6367_v3  ;;  %v12866_v37 = vld [vmem:[%s20203_s5 + $0x4c4] ss:$16 sps:$4 sm:$0xff]   ;;  %v12867_v1 = vld [vmem:[%s20203_s5 + $0x6c0] ss:$16 sps:$4 sm:$0xff]   ;;  %v20229_v3 = vld [vmem:[#allocation12_spill] sm:$0xff] }
 0x6a8   :  { %v6370_v31 = vmul.f32 %v6332_v10, %v6308_v8  ;;  %v6431_v22 = vadd.f32 %v6390_v53, %v6369_v11  ;;  %v12869_v61 = vld [vmem:[%s20203_s5 + $0x6c4] ss:$16 sps:$4 sm:$0xff]   ;;  %v12864_v10 = vld [vmem:[%s20203_s5 + $0x4c0] ss:$16 sps:$4 sm:$0xff]   ;;  %v6340_v53 = vrot.slane %v17947_v25, %v20228_v18  ;;  %v6348_v4 = vrot.slane %v17947_v25, %v20229_v3 }
 0x6a9   :  { %v6430_v12 = vadd.f32 %v6386_v2, %v6368_v19  ;;  %v6439_v30 = vmul.f32 0.5, %v6429_v33  ;;  %v12872_v2 = vld [vmem:[%s20203_s5 + $0x4a4] ss:$16 sps:$4 sm:$0xff]   ;;  %v6402_v19 = vrot.slane %v17952_v62, %v20228_v18  ;;  %v12870_v33 = vld [vmem:[%s20203_s5 + $0x4a0] ss:$16 sps:$4 sm:$0xff]  }
 0x6aa   :  { %v6432_v58 = vadd.f32 %v6394_v9, %v6370_v31  ;;  %v6441_v13 = vmul.f32 0.5, %v6431_v22  ;;  %v12875_v9 = vld [vmem:[%s20203_s5 + $0x6a4] ss:$16 sps:$4 sm:$0xff]   ;;  %v6410_v22 = vrot.slane %v17952_v62, %v20229_v3 }
 0x6ab   :  { %v6440_v6 = vmul.f32 0.5, %v6430_v12  ;;  %13298 = vtanh.f32 %v6439_v30  ;;  %v12873_v12 = vld [vmem:[%s20203_s5 + $0x6a0] ss:$16 sps:$4 sm:$0xff]  }
 0x6ac   :  { %v6442_v15 = vmul.f32 0.5, %v6432_v58  ;;  %13300 = vtanh.f32 %v6441_v13  ;;  %v12881_v58 = vld [vmem:[%s20203_s5 + $0x684] ss:$16 sps:$4 sm:$0xff]  }
 0x6ad   :  { %13302 = vtanh.f32 %v6440_v6  ;;  %v12876_v6 = vld [vmem:[%s20203_s5 + $0x480] ss:$16 sps:$4 sm:$0xff]  }
 0x6ae   :  { %13304 = vtanh.f32 %v6442_v15 }
 0x6b1   :  { %v6108_v7 = vpop.f32.mrf.mxu0  ;;  %v6179_v26 = vpop.f32.mrf.mxu1 }
 0x6b2   :  { %v6109_v44 = vadd.f32 1e-05, %v6108_v7  ;;  %v6180_v27 = vadd.f32 1e-05, %v6179_v26  ;;  %v12879_v7 = vld [vmem:[%s20203_s5 + $0x680] ss:$16 sps:$4 sm:$0xff]  }
 0x6b3   :  { %v6110_v29 = vpop.f32.mrf.mxu0  ;;  %v6181_v35 = vpop.f32.mrf.mxu1  ;;  %v12884_v26 = vld [vmem:[%s20203_s5 + $0x464] ss:$16 sps:$4 sm:$0xff]  }
 0x6b4   :  { %v6111_v39 = vadd.f32 1e-05, %v6110_v29  ;;  %v6182_v40 = vadd.f32 1e-05, %v6181_v35  ;;  %v12887_v35 = vld [vmem:[%s20203_s5 + $0x664] ss:$16 sps:$4 sm:$0xff]  }
 0x6b6   :  { %13306 = vrsqrt.f32 %v6111_v39 }
 0x6b7   :  { %13308 = vrsqrt.f32 %v6182_v40  ;;  %v12882_v40 = vld [vmem:[%s20203_s5 + $0x460] ss:$16 sps:$4 sm:$0xff]  }
 0x6b8   :  { %v13299_v45 = vpop.eup %13298  ;;  %13310 = vrsqrt.f32 %v6109_v44  ;;  %v12899_v44 = vld [vmem:[%s20203_s5 + $0x624] ss:$16 sps:$4 sm:$0xff]  }
 0x6b9   :  { %v13301_v47 = vpop.eup %13300  ;;  %v6459_v48 = vadd.f32 1.0, %v13299_v45  ;;  %13312 = vrsqrt.f32 %v6180_v27  ;;  %v12885_v45 = vld [vmem:[%s20203_s5 + $0x660] ss:$16 sps:$4 sm:$0xff]  }
 0x6ba   :  { %v13303_v50 = vpop.eup %13302  ;;  %v6461_v57 = vadd.f32 1.0, %v13301_v47  ;;  %v12890_v47 = vld [vmem:[%s20203_s5 + $0x444] ss:$16 sps:$4 sm:$0xff]  }
 0x6bb   :  { %v13305_v60 = vpop.eup %13304  ;;  %v6460_v0 = vadd.f32 1.0, %v13303_v50  ;;  %v6469_v41 = vmul.f32 0.5, %v6459_v48  ;;  %v12893_v50 = vld [vmem:[%s20203_s5 + $0x644] ss:$16 sps:$4 sm:$0xff]  }
 0x6bc   :  { %v6462_v23 = vadd.f32 1.0, %v13305_v60  ;;  %v6471_v42 = vmul.f32 0.5, %v6461_v57 }
 0x6bd   :  { %v6470_v43 = vmul.f32 0.5, %v6460_v0  ;;  %v17988_v56 = vpack.c.bf16 %v6469_v41, %v6469_v41  ;;  %v12888_v0 = vld [vmem:[%s20203_s5 + $0x440] ss:$16 sps:$4 sm:$0xff]  }
 0x6be   :  { %v6472_v59 = vmul.f32 0.5, %v6462_v23  ;;  %v17994_v21 = vpack.c.bf16 %v6471_v42, %v6471_v42  ;;  %v12896_v42 = vld [vmem:[%s20203_s5 + $0x424] ss:$16 sps:$4 sm:$0xff]  }
 0x6bf   :  { %v17978_v17 = vpack.c.bf16 %v6470_v43, %v6470_v43  ;;  %v12891_v43 = vld [vmem:[%s20203_s5 + $0x640] ss:$16 sps:$4 sm:$0xff]  }
 0x6c0   :  { %v17983_v32 = vpack.c.bf16 %v6472_v59, %v6472_v59 }
 0x6c1   :  { %8463 = vmatprep.mubr.bf16.mxu1 %v17978_v17 }
 0x6c2   :  { %8504 = vmatprep.mubr.bf16.mxu0 %v17983_v32  ;;  %8464 = vmatmul.mubr.bf16.vlgmr.msra.gmra.mxu1 %v17988_v56 }
 0x6c3   :  { %v13307_v54 = vpop.eup %13306  ;;  %8505 = vmatmul.mubr.bf16.vlgmr.msra.gmra.mxu0 %v17994_v21  ;;  %8514 = vmatpush1.bf16.msra.mxu1 %v12858_v20 }
 0x6c4   :  { %v13309_v55 = vpop.eup %13308  ;;  %v6288_v28 = vrot.slane %v13307_v54, %v14607_v34  ;;  %8555 = vmatpush1.bf16.msra.mxu0 %v12861_v63  ;;  %8515 = vmatprep.subr.bf16.mxu1 %v12866_v37  ;;  %v12894_v63 = vld [vmem:[%s20203_s5 + $0x420] ss:$16 sps:$4 sm:$0xff]   ;;  %v12902_v54 = vld [vmem:[%s20203_s5 + $0x404] ss:$16 sps:$4 sm:$0xff]  }
 0x6c5   :  { %v6296_v8 = vrot.slane %v13309_v55, %v14607_v34  ;;  %8556 = vmatprep.subr.bf16.mxu0 %v12869_v61  ;;  %v13311_v48 = vpop.eup %13310  ;;  %v20230_v37 = vld [vmem:[#allocation9_spill] sm:$0xff]  ;;  %v20231_v55 = vld [vmem:[#allocation11_spill] sm:$0xff] }
 0x6c6   :  { %v6310_v11 = vmul.f32 %v6288_v28, %v17130_v38  ;;  %v12878_v38 = vld [vmem:[%s20203_s5 + $0x484] ss:$16 sps:$4 sm:$0xff]   ;;  %v13313_v57 = vpop.eup %13312  ;;  %v6284_v23 = vrot.slane %v13311_v48, %v14607_v34  ;;  %v6336_v27 = vrot.slane %v17947_v25, %v20230_v37  ;;  %v12897_v61 = vld [vmem:[%s20203_s5 + $0x620] ss:$16 sps:$4 sm:$0xff]   ;;  %v6344_v18 = vrot.slane %v17947_v25, %v20231_v55 }
 0x6c7   :  { %8516 = vmatpush1.bf16.msra.mxu1 %v12864_v10  ;;  %v6312_v31 = vmul.f32 %v6296_v8, %v17133_v24  ;;  %v6292_v59 = vrot.slane %v13313_v57, %v14607_v34  ;;  %v12903_v25 = vld [vmem:[%s20203_s5 + $0x600] ss:$16 sps:$4 sm:$0xff]  }
 0x6c8   :  { %8557 = vmatpush1.bf16.msra.mxu0 %v12867_v1  ;;  %8517 = vmatprep.subr.bf16.mxu1 %v12872_v2  ;;  %v6372_v30 = vmul.f32 %v6340_v53, %v6310_v11  ;;  %v6309_v10 = vmul.f32 %v6284_v23, %v17109_v51  ;;  %v12905_v53 = vld [vmem:[%s20203_s5 + $0x604] ss:$16 sps:$4 sm:$0xff]   ;;  %v12900_v2 = vld [vmem:[%s20203_s5 + $0x400] ss:$16 sps:$4 sm:$0xff]   ;;  %v6398_v51 = vrot.slane %v17952_v62, %v20230_v37 }
 0x6c9   :  { %8558 = vmatprep.subr.bf16.mxu0 %v12875_v9  ;;  %v6374_v24 = vmul.f32 %v6348_v4, %v6312_v31  ;;  %v6311_v28 = vmul.f32 %v6292_v59, %v17112_v52  ;;  %v12908_v52 = vld [vmem:[%s20203_s5 + $0x5e4] ss:$16 sps:$4 sm:$0xff]   ;;  %v6406_v9 = vrot.slane %v17952_v62, %v20231_v55  ;;  %v12909_v62 = vld [vmem:[%s20203_s5 + $0x7e0] ss:$16 sps:$4 sm:$0xff]  }
 0x6ca   :  { %v6434_v13 = vadd.f32 %v6402_v19, %v6372_v30  ;;  %v6371_v8 = vmul.f32 %v6336_v27, %v6309_v10  ;;  %v12911_v19 = vld [vmem:[%s20203_s5 + $0x7e4] ss:$16 sps:$4 sm:$0xff]   ;;  %v12918_v57 = vld [vmem:[%s20203_s5 + $0x5a0] ss:$16 sps:$4 sm:$0xff]  }
 0x6cb   :  { %8518 = vmatpush1.bf16.msra.mxu1 %v12870_v33  ;;  %v6436_v15 = vadd.f32 %v6410_v22, %v6374_v24  ;;  %v6373_v33 = vmul.f32 %v6344_v18, %v6311_v28  ;;  %v12914_v30 = vld [vmem:[%s20203_s5 + $0x5c4] ss:$16 sps:$4 sm:$0xff]   ;;  %v12924_v59 = vld [vmem:[%s20203_s5 + $0x580] ss:$16 sps:$4 sm:$0xff]  }
 0x6cc   :  { %8559 = vmatpush1.bf16.msra.mxu0 %v12873_v12  ;;  %8519 = vmatprep.subr.bf16.mxu1 %v12878_v38  ;;  %v6444_v29 = vmul.f32 0.5, %v6434_v13  ;;  %v12906_v12 = vld [vmem:[%s20203_s5 + $0x5e0] ss:$16 sps:$4 sm:$0xff]   ;;  %v12917_v13 = vld [vmem:[%s20203_s5 + $0x7c4] ss:$16 sps:$4 sm:$0xff]  }
 0x6cd   :  { %8560 = vmatprep.subr.bf16.mxu0 %v12881_v58  ;;  %v6446_v39 = vmul.f32 0.5, %v6436_v15  ;;  %v6433_v58 = vadd.f32 %v6398_v51, %v6371_v8  ;;  %v12912_v15 = vld [vmem:[%s20203_s5 + $0x5c0] ss:$16 sps:$4 sm:$0xff]   ;;  %v12935_v37 = vld [vmem:[%s20203_s5 + $0x764] ss:$16 sps:$4 sm:$0xff]  }
 0x6ce   :  { %13314 = vtanh.f32 %v6444_v29  ;;  %v12915_v29 = vld [vmem:[%s20203_s5 + $0x7c0] ss:$16 sps:$4 sm:$0xff]   ;;  %v12938_v10 = vld [vmem:[%s20203_s5 + $0x544] ss:$16 sps:$4 sm:$0xff]  }
 0x6cf   :  { %8520 = vmatpush1.bf16.msra.mxu1 %v12876_v6  ;;  %13316 = vtanh.f32 %v6446_v39  ;;  %v6435_v6 = vadd.f32 %v6406_v9, %v6373_v33  ;;  %v6443_v39 = vmul.f32 0.5, %v6433_v58  ;;  %v12941_v55 = vld [vmem:[%s20203_s5 + $0x744] ss:$16 sps:$4 sm:$0xff]   ;;  %v12936_v18 = vld [vmem:[%s20203_s5 + $0x540] ss:$16 sps:$4 sm:$0xff]  }
 0x6d0   :  { %8561 = vmatpush1.bf16.msra.mxu0 %v12879_v7  ;;  %8521 = vmatprep.subr.bf16.mxu1 %v12884_v26  ;;  %v18136_v7 = vld [vmem:[%s20219_s26 + $0x8] sm:$0x3]  ;;  %v12944_v28 = vld [vmem:[%s20203_s5 + $0x524] ss:$16 sps:$4 sm:$0xff]   ;;  %v12942_v51 = vld [vmem:[%s20203_s5 + $0x520] ss:$16 sps:$4 sm:$0xff]  }
 0x6d1   :  { %8562 = vmatprep.subr.bf16.mxu0 %v12887_v35  ;;  %v12920_v35 = vld [vmem:[%s20203_s5 + $0x5a4] ss:$16 sps:$4 sm:$0xff]   ;;  %v6356_v48 = vrot.slane %v18136_v7, %v20222_v16  ;;  %v12951_v33 = vld [vmem:[%s20203_s5 + $0x700] ss:$16 sps:$4 sm:$0xff]  }
 0x6d2   :  { %v18062_v60 = vpop.f32.mrf.mxu0  ;;  %v12953_v8 = vld [vmem:[%s20203_s5 + $0x704] ss:$16 sps:$4 sm:$0xff]   ;;  %v12954_v58 = vld [vmem:[%s20203_s5 + $0x8e0] ss:$16 sps:$4 sm:$0xff]  }
 0x6d3   :  { %8522 = vmatpush1.bf16.msra.mxu1 %v12882_v40 }
 0x6d4   :  { %v6252_v41 = vpop.f32.mrf.mxu0  ;;  %8563 = vmatpush1.bf16.msra.mxu0 %v12885_v45  ;;  %8523 = vmatprep.subr.bf16.mxu1 %v12890_v47  ;;  %v12923_v45 = vld [vmem:[%s20203_s5 + $0x7a4] ss:$16 sps:$4 sm:$0xff]   ;;  %v6445_v47 = vmul.f32 0.5, %v6435_v6  ;;  %v6251_v6 = vadd.f32 1e-05, %v18062_v60 }
 0x6d5   :  { %v6253_v20 = vadd.f32 1e-05, %v6252_v41  ;;  %8564 = vmatprep.subr.bf16.mxu0 %v12893_v50  ;;  %v18153_v50 = vld [vmem:[%s20220_s4 + $0x8] sm:$0x3]  ;;  %v12921_v41 = vld [vmem:[%s20203_s5 + $0x7a0] ss:$16 sps:$4 sm:$0xff]  }
 0x6d6   :  { %v6418_v23 = vrot.slane %v18153_v50, %v20222_v16  ;;  %v12965_v60 = vld [vmem:[%s20203_s5 + $0xcc] ss:$16 sps:$4 sm:$0xff]  }
 0x6d7   :  { %13318 = vrsqrt.f32 %v6253_v20  ;;  %8524 = vmatpush1.bf16.msra.mxu1 %v12888_v0 }
 0x6d8   :  { %8565 = vmatpush1.bf16.msra.mxu0 %v12891_v43  ;;  %8525 = vmatprep.subr.bf16.mxu1 %v12896_v42  ;;  %v12926_v43 = vld [vmem:[%s20203_s5 + $0x584] ss:$16 sps:$4 sm:$0xff]   ;;  %13320 = vtanh.f32 %v6443_v39 }
 0x6d9   :  { %8566 = vmatprep.subr.bf16.mxu0 %v12899_v44  ;;  %v12929_v42 = vld [vmem:[%s20203_s5 + $0x784] ss:$16 sps:$4 sm:$0xff]   ;;  %13322 = vtanh.f32 %v6445_v47  ;;  %v12927_v44 = vld [vmem:[%s20203_s5 + $0x780] ss:$16 sps:$4 sm:$0xff]  }
 0x6da   :  { %v12968_v47 = vld [vmem:[%s20203_s5 + $0x8a4] ss:$16 sps:$4 sm:$0xff]  }
 0x6db   :  { %v13315_v1 = vpop.eup %13314  ;;  %8526 = vmatpush1.bf16.msra.mxu1 %v12894_v63  ;;  %v12932_v63 = vld [vmem:[%s20203_s5 + $0x564] ss:$16 sps:$4 sm:$0xff]  }
 0x6dc   :  { %v13317_v3 = vpop.eup %13316  ;;  %8567 = vmatpush1.bf16.msra.mxu0 %v12897_v61  ;;  %8527 = vmatprep.subr.bf16.mxu1 %v12902_v54  ;;  %v6464_v4 = vadd.f32 1.0, %v13315_v1  ;;  %v12930_v61 = vld [vmem:[%s20203_s5 + $0x560] ss:$16 sps:$4 sm:$0xff]  }
 0x6dd   :  { %8568 = vmatprep.subr.bf16.mxu0 %v12905_v53  ;;  %v6466_v11 = vadd.f32 1.0, %v13317_v3  ;;  %v12933_v54 = vld [vmem:[%s20203_s5 + $0x760] ss:$16 sps:$4 sm:$0xff]  }
 0x6de   :  { %v6474_v31 = vmul.f32 0.5, %v6464_v4  ;;  %v12939_v53 = vld [vmem:[%s20203_s5 + $0x740] ss:$16 sps:$4 sm:$0xff]   ;;  %v12950_v4 = vld [vmem:[%s20203_s5 + $0x504] ss:$16 sps:$4 sm:$0xff]  }
 0x6df   :  { %8528 = vmatpush1.bf16.msra.mxu1 %v12900_v2  ;;  %v6476_v22 = vmul.f32 0.5, %v6466_v11  ;;  %v12947_v2 = vld [vmem:[%s20203_s5 + $0x724] ss:$16 sps:$4 sm:$0xff]   ;;  %v12948_v11 = vld [vmem:[%s20203_s5 + $0x500] ss:$16 sps:$4 sm:$0xff]  }
 0x6e0   :  { %8569 = vmatpush1.bf16.msra.mxu0 %v12903_v25  ;;  %v18115_v38 = vpack.c.bf16 %v6474_v31, %v6474_v31  ;;  %8529 = vmatprep.subr.bf16.mxu1 %v12908_v52  ;;  %v12945_v25 = vld [vmem:[%s20203_s5 + $0x720] ss:$16 sps:$4 sm:$0xff]  }
 0x6e1   :  { %v18123_v24 = vpack.c.bf16 %v6476_v22, %v6476_v22  ;;  %8570 = vmatprep.subr.bf16.mxu0 %v12911_v19  ;;  %v12956_v22 = vld [vmem:[%s20203_s5 + $0x8e4] ss:$16 sps:$4 sm:$0xff]  }
 0x6e2   :  { %8545 = vmatprep.mubr.bf16.mxu1 %v18115_v38 }
 0x6e3   :  { %8586 = vmatprep.mubr.bf16.mxu0 %v18123_v24  ;;  %8530 = vmatpush2.bf16.msra.mxu1 %v12906_v12 }
 0x6e4   :  { %v13319_v26 = vpop.eup %13318  ;;  %8571 = vmatpush2.bf16.msra.mxu0 %v12909_v62  ;;  %8531 = vmatprep.subr.bf16.mxu1 %v12914_v30  ;;  %v12959_v62 = vld [vmem:[%s20203_s5 + $0xec] ss:$16 sps:$4 sm:$0xff]  }
 0x6e5   :  { %v6304_v40 = vrot.slane %v13319_v26, %v14607_v34  ;;  %8572 = vmatprep.subr.bf16.mxu0 %v12917_v13  ;;  %v13321_v1 = vpop.eup %13320  ;;  %v12957_v26 = vld [vmem:[%s20203_s5 + $0xe8] ss:$16 sps:$4 sm:$0xff]  }
 0x6e6   :  { %v13323_v3 = vpop.eup %13322  ;;  %v6463_v52 = vadd.f32 1.0, %v13321_v1  ;;  %v12998_v1 = vld [vmem:[%s20203_s5 + $0x804] ss:$16 sps:$4 sm:$0xff]  }
 0x6e7   :  { %8532 = vmatpush2.bf16.msra.mxu1 %v12912_v15  ;;  %v6314_v0 = vmul.f32 %v6304_v40, %v17330_v46  ;;  %v6465_v9 = vadd.f32 1.0, %v13323_v3  ;;  %v12960_v40 = vld [vmem:[%s20203_s5 + $0x8c0] ss:$16 sps:$4 sm:$0xff]   ;;  %v13001_v3 = vld [vmem:[%s20203_s5 + $0xc] ss:$16 sps:$4 sm:$0xff]  }
 0x6e8   :  { %8573 = vmatpush2.bf16.msra.mxu0 %v12915_v29  ;;  %8533 = vmatprep.subr.bf16.mxu1 %v12920_v35  ;;  %v6473_v31 = vmul.f32 0.5, %v6463_v52  ;;  %v12962_v35 = vld [vmem:[%s20203_s5 + $0x8c4] ss:$16 sps:$4 sm:$0xff]   ;;  %v13007_v52 = vld [vmem:[%s20203_s5 + $0x1ec] ss:$16 sps:$4 sm:$0xff]  }
 0x6e9   :  { %8574 = vmatprep.subr.bf16.mxu0 %v12923_v45  ;;  %v6376_v46 = vmul.f32 %v6356_v48, %v6314_v0  ;;  %v6475_v12 = vmul.f32 0.5, %v6465_v9  ;;  %v12963_v45 = vld [vmem:[%s20203_s5 + $0xc8] ss:$16 sps:$4 sm:$0xff]   ;;  %v12971_v48 = vld [vmem:[%s20203_s5 + $0xac] ss:$16 sps:$4 sm:$0xff]  }
 0x6ea   :  { %v18234_v15 = vpack.c.bf16 %v6473_v31, %v6473_v31  ;;  %v12969_v0 = vld [vmem:[%s20203_s5 + $0xa8] ss:$16 sps:$4 sm:$0xff]   ;;  %v13010_v9 = vld [vmem:[%s20203_s5 + $0x9c4] ss:$16 sps:$4 sm:$0xff]  }
 0x6eb   :  { %8534 = vmatpush2.bf16.msra.mxu1 %v12918_v57  ;;  %v6438_v20 = vadd.f32 %v6418_v23, %v6376_v46  ;;  %v18239_v29 = vpack.c.bf16 %v6475_v12, %v6475_v12  ;;  %v12966_v57 = vld [vmem:[%s20203_s5 + $0x8a0] ss:$16 sps:$4 sm:$0xff]   ;;  %v12977_v23 = vld [vmem:[%s20203_s5 + $0x8c] ss:$16 sps:$4 sm:$0xff]   ;;  %v13011_v31 = vld [vmem:[%s20203_s5 + $0x1c8] ss:$16 sps:$4 sm:$0xff]  }
 0x6ec   :  { %8575 = vmatpush2.bf16.msra.mxu0 %v12921_v41  ;;  %8535 = vmatprep.subr.bf16.mxu1 %v12926_v43  ;;  %v12972_v41 = vld [vmem:[%s20203_s5 + $0x880] ss:$16 sps:$4 sm:$0xff]   ;;  %v12975_v43 = vld [vmem:[%s20203_s5 + $0x88] ss:$16 sps:$4 sm:$0xff]   ;;  %v12983_v46 = vld [vmem:[%s20203_s5 + $0x6c] ss:$16 sps:$4 sm:$0xff]  }
 0x6ed   :  { %8576 = vmatprep.subr.bf16.mxu0 %v12929_v42  ;;  %v6448_v27 = vmul.f32 0.5, %v6438_v20  ;;  %v12980_v42 = vld [vmem:[%s20203_s5 + $0x864] ss:$16 sps:$4 sm:$0xff]   ;;  %v12981_v20 = vld [vmem:[%s20203_s5 + $0x68] ss:$16 sps:$4 sm:$0xff]  }
 0x6ef   :  { %8536 = vmatpush2.bf16.msra.mxu1 %v12924_v59  ;;  %13324 = vtanh.f32 %v6448_v27  ;;  %v12978_v59 = vld [vmem:[%s20203_s5 + $0x860] ss:$16 sps:$4 sm:$0xff]  }
 0x6f0   :  { %8577 = vmatpush2.bf16.msra.mxu0 %v12927_v44  ;;  %8537 = vmatprep.subr.bf16.mxu1 %v12932_v63  ;;  %13326 = vrsqrt.f32 %v6251_v6  ;;  %v12986_v44 = vld [vmem:[%s20203_s5 + $0x844] ss:$16 sps:$4 sm:$0xff]   ;;  %v12984_v27 = vld [vmem:[%s20203_s5 + $0x840] ss:$16 sps:$4 sm:$0xff]   ;;  %v13025_v6 = vld [vmem:[%s20203_s5 + $0x18c] ss:$16 sps:$4 sm:$0xff]  }
 0x6f1   :  { %8578 = vmatprep.subr.bf16.mxu0 %v12935_v37  ;;  %v12989_v37 = vld [vmem:[%s20203_s5 + $0x4c] ss:$16 sps:$4 sm:$0xff]  }
 0x6f3   :  { %8538 = vmatpush2.bf16.msra.mxu1 %v12930_v61 }
 0x6f4   :  { %8579 = vmatpush2.bf16.msra.mxu0 %v12933_v54  ;;  %8539 = vmatprep.subr.bf16.mxu1 %v12938_v10  ;;  %v12987_v54 = vld [vmem:[%s20203_s5 + $0x48] ss:$16 sps:$4 sm:$0xff]   ;;  %v12992_v10 = vld [vmem:[%s20203_s5 + $0x824] ss:$16 sps:$4 sm:$0xff]  }
 0x6f5   :  { %8580 = vmatprep.subr.bf16.mxu0 %v12941_v55  ;;  %v12995_v55 = vld [vmem:[%s20203_s5 + $0x2c] ss:$16 sps:$4 sm:$0xff]  }
 0x6f7   :  { %8540 = vmatpush2.bf16.msra.mxu1 %v12936_v18  ;;  %v12990_v18 = vld [vmem:[%s20203_s5 + $0x820] ss:$16 sps:$4 sm:$0xff]  }
 0x6f8   :  { %8581 = vmatpush2.bf16.msra.mxu0 %v12939_v53  ;;  %8541 = vmatprep.subr.bf16.mxu1 %v12944_v28  ;;  %v6352_v53 = vrot.slane %v18136_v7, %v14607_v34  ;;  %v12993_v28 = vld [vmem:[%s20203_s5 + $0x28] ss:$16 sps:$4 sm:$0xff]   ;;  %v12996_v7 = vld [vmem:[%s20203_s5 + $0x800] ss:$16 sps:$4 sm:$0xff]  }
 0x6f9   :  { %8582 = vmatprep.subr.bf16.mxu0 %v12947_v2 }
 0x6fb   :  { %8542 = vmatpush2.bf16.msra.mxu1 %v12942_v51  ;;  %v6414_v51 = vrot.slane %v18153_v50, %v14607_v34  ;;  %v13002_v50 = vld [vmem:[%s20203_s5 + $0x9e0] ss:$16 sps:$4 sm:$0xff]  }
 0x6fc   :  { %v13325_v19 = vpop.eup %13324  ;;  %8583 = vmatpush2.bf16.msra.mxu0 %v12945_v25  ;;  %8543 = vmatprep.subr.bf16.mxu1 %v12950_v4  ;;  %v12999_v25 = vld [vmem:[%s20203_s5 + $0x8] ss:$16 sps:$4 sm:$0xff]  }
 0x6fd   :  { %8584 = vmatprep.subr.bf16.mxu0 %v12953_v8  ;;  %v6468_v30 = vadd.f32 1.0, %v13325_v19  ;;  %v13327_v63 = vpop.eup %13326  ;;  %v13005_v8 = vld [vmem:[%s20203_s5 + $0x1e8] ss:$16 sps:$4 sm:$0xff]   ;;  %v13013_v19 = vld [vmem:[%s20203_s5 + $0x1cc] ss:$16 sps:$4 sm:$0xff]  }
 0x6fe   :  { %v6300_v61 = vrot.slane %v13327_v63, %v14607_v34  ;;  %v13044_v63 = vld [vmem:[%s20203_s5 + $0x900] ss:$16 sps:$4 sm:$0xff]  }
 0x6ff   :  { %8544 = vmatpush2.bf16.msra.mxu1 %v12948_v11  ;;  %v6478_v13 = vmul.f32 0.5, %v6468_v30  ;;  %v13014_v30 = vld [vmem:[%s20203_s5 + $0x9a0] ss:$16 sps:$4 sm:$0xff]  }
 0x700   :  { %8585 = vmatpush2.bf16.msra.mxu0 %v12951_v33  ;;  %8595 = vmatprep.subr.bf16.mxu1 %v12956_v22  ;;  %v6313_v2 = vmul.f32 %v6300_v61, %v17312_v14  ;;  %v13004_v14 = vld [vmem:[%s20203_s5 + $0x9e4] ss:$16 sps:$4 sm:$0xff]   ;;  %v13008_v33 = vld [vmem:[%s20203_s5 + $0x9c0] ss:$16 sps:$4 sm:$0xff]   ;;  %v13052_v61 = vld [vmem:[%s20203_s5 + $0x2ec] ss:$16 sps:$4 sm:$0xff]  }
 0x701   :  { %8636 = vmatprep.subr.bf16.mxu0 %v12959_v62  ;;  %v18245_v39 = vpack.c.bf16 %v6478_v13, %v6478_v13  ;;  %v13016_v22 = vld [vmem:[%s20203_s5 + $0x9a4] ss:$16 sps:$4 sm:$0xff]   ;;  %v13019_v62 = vld [vmem:[%s20203_s5 + $0x1ac] ss:$16 sps:$4 sm:$0xff]  }
 0x702   :  { %8546 = vmatmul.mubr.bf16.vlgmr.msra.gmra.mxu1 %v18234_v15  ;;  %v6375_v4 = vmul.f32 %v6352_v53, %v6313_v2  ;;  %v13022_v13 = vld [vmem:[%s20203_s5 + $0x984] ss:$16 sps:$4 sm:$0xff]   ;;  %v13058_v53 = vld [vmem:[%s20203_s5 + $0x2cc] ss:$16 sps:$4 sm:$0xff]   ;;  %v13059_v2 = vld [vmem:[%s20203_s5 + $0x4c8] ss:$16 sps:$4 sm:$0xff]  }
 0x703   :  { %8587 = vmatmul.mubr.bf16.vlgmr.msra.gmra.mxu0 %v18239_v29  ;;  %8596 = vmatpush1.bf16.msra.mxu1 %v12954_v58  ;;  %v13017_v58 = vld [vmem:[%s20203_s5 + $0x1a8] ss:$16 sps:$4 sm:$0xff]  }
 0x704   :  { %8627 = vmatprep.mubr.bf16.mxu1 %v18245_v39  ;;  %8637 = vmatpush1.bf16.msra.mxu0 %v12957_v26  ;;  %v6437_v11 = vadd.f32 %v6414_v51, %v6375_v4  ;;  %v13020_v26 = vld [vmem:[%s20203_s5 + $0x980] ss:$16 sps:$4 sm:$0xff]   ;;  %v13073_v51 = vld [vmem:[%s20203_s5 + $0x48c] ss:$16 sps:$4 sm:$0xff]  }
 0x705   :  { %8668 = vmatprep.mubr.bf16.mxu0 %v17978_v17  ;;  %8597 = vmatprep.subr.bf16.mxu1 %v12962_v35  ;;  %v12974_v17 = vld [vmem:[%s20203_s5 + $0x884] ss:$16 sps:$4 sm:$0xff]   ;;  %v13023_v35 = vld [vmem:[%s20203_s5 + $0x188] ss:$16 sps:$4 sm:$0xff]   ;;  %v13076_v4 = vld [vmem:[%s20203_s5 + $0x26c] ss:$16 sps:$4 sm:$0xff]  }
 0x706   :  { %8638 = vmatprep.subr.bf16.mxu0 %v12965_v60  ;;  %v6447_v12 = vmul.f32 0.5, %v6437_v11  ;;  %v13028_v60 = vld [vmem:[%s20203_s5 + $0x964] ss:$16 sps:$4 sm:$0xff]   ;;  %v13085_v11 = vld [vmem:[%s20203_s5 + $0x44c] ss:$16 sps:$4 sm:$0xff]  }
 0x707   :  { %8598 = vmatpush1.bf16.msra.mxu1 %v12960_v40  ;;  %v13031_v40 = vld [vmem:[%s20203_s5 + $0x16c] ss:$16 sps:$4 sm:$0xff]  }
 0x708   :  { %8639 = vmatpush1.bf16.msra.mxu0 %v12963_v45  ;;  %8599 = vmatprep.subr.bf16.mxu1 %v12968_v47  ;;  %13328 = vtanh.f32 %v6447_v12  ;;  %v13026_v45 = vld [vmem:[%s20203_s5 + $0x960] ss:$16 sps:$4 sm:$0xff]   ;;  %v13029_v47 = vld [vmem:[%s20203_s5 + $0x168] ss:$16 sps:$4 sm:$0xff]  }
 0x709   :  { %8640 = vmatprep.subr.bf16.mxu0 %v12971_v48  ;;  %v13034_v48 = vld [vmem:[%s20203_s5 + $0x944] ss:$16 sps:$4 sm:$0xff]   ;;  %v13086_v12 = vld [vmem:[%s20203_s5 + $0x228] ss:$16 sps:$4 sm:$0xff]  }
 0x70b   :  { %8600 = vmatpush1.bf16.msra.mxu1 %v12966_v57  ;;  %v13037_v57 = vld [vmem:[%s20203_s5 + $0x14c] ss:$16 sps:$4 sm:$0xff]  }
 0x70c   :  { %8641 = vmatpush1.bf16.msra.mxu0 %v12969_v0  ;;  %8601 = vmatprep.subr.bf16.mxu1 %v12974_v17  ;;  %v13032_v0 = vld [vmem:[%s20203_s5 + $0x940] ss:$16 sps:$4 sm:$0xff]   ;;  %v13035_v17 = vld [vmem:[%s20203_s5 + $0x148] ss:$16 sps:$4 sm:$0xff]  }
 0x70d   :  { %8642 = vmatprep.subr.bf16.mxu0 %v12977_v23  ;;  %v13040_v23 = vld [vmem:[%s20203_s5 + $0x924] ss:$16 sps:$4 sm:$0xff]  }
 0x70f   :  { %8602 = vmatpush1.bf16.msra.mxu1 %v12972_v41 }
 0x710   :  { %8643 = vmatpush1.bf16.msra.mxu0 %v12975_v43  ;;  %8603 = vmatprep.subr.bf16.mxu1 %v12980_v42  ;;  %v13043_v43 = vld [vmem:[%s20203_s5 + $0x12c] ss:$16 sps:$4 sm:$0xff]   ;;  %v13038_v42 = vld [vmem:[%s20203_s5 + $0x920] ss:$16 sps:$4 sm:$0xff]  }
 0x711   :  { %8644 = vmatprep.subr.bf16.mxu0 %v12983_v46  ;;  %v13041_v46 = vld [vmem:[%s20203_s5 + $0x128] ss:$16 sps:$4 sm:$0xff]  }
 0x713   :  { %8604 = vmatpush1.bf16.msra.mxu1 %v12978_v59  ;;  %v13046_v59 = vld [vmem:[%s20203_s5 + $0x904] ss:$16 sps:$4 sm:$0xff]  }
 0x714   :  { %8645 = vmatpush1.bf16.msra.mxu0 %v12981_v20  ;;  %8605 = vmatprep.subr.bf16.mxu1 %v12986_v44  ;;  %v13049_v44 = vld [vmem:[%s20203_s5 + $0x10c] ss:$16 sps:$4 sm:$0xff]  }
 0x715   :  { %8646 = vmatprep.subr.bf16.mxu0 %v12989_v37  ;;  %v13329_v41 = vpop.eup %13328  ;;  %v13047_v37 = vld [vmem:[%s20203_s5 + $0x108] ss:$16 sps:$4 sm:$0xff]  }
 0x716   :  { %v6467_v20 = vadd.f32 1.0, %v13329_v41  ;;  %v13113_v41 = vld [vmem:[%s20203_s5 + $0x5a8] ss:$16 sps:$4 sm:$0xff]  }
 0x717   :  { %8606 = vmatpush1.bf16.msra.mxu1 %v12984_v27 }
 0x718   :  { %8647 = vmatpush1.bf16.msra.mxu0 %v12987_v54  ;;  %8607 = vmatprep.subr.bf16.mxu1 %v12992_v10  ;;  %v6477_v27 = vmul.f32 0.5, %v6467_v20  ;;  %v13055_v54 = vld [vmem:[%s20203_s5 + $0x4ec] ss:$16 sps:$4 sm:$0xff]   ;;  %v13050_v10 = vld [vmem:[%s20203_s5 + $0x2e8] ss:$16 sps:$4 sm:$0xff]  }
 0x719   :  { %8648 = vmatprep.subr.bf16.mxu0 %v12995_v55  ;;  %v13124_v20 = vld [vmem:[%s20203_s5 + $0x36c] ss:$16 sps:$4 sm:$0xff]  }
 0x71a   :  { %v18442_v55 = vpack.c.bf16 %v6477_v27, %v6477_v27  ;;  %v13130_v27 = vld [vmem:[%s20203_s5 + $0x34c] ss:$16 sps:$4 sm:$0xff]  }
 0x71b   :  { %8608 = vmatpush1.bf16.msra.mxu1 %v12990_v18  ;;  %v13053_v18 = vld [vmem:[%s20203_s5 + $0x4e8] ss:$16 sps:$4 sm:$0xff]  }
 0x71c   :  { %8649 = vmatpush1.bf16.msra.mxu0 %v12993_v28  ;;  %8609 = vmatprep.subr.bf16.mxu1 %v12998_v1  ;;  %v13061_v28 = vld [vmem:[%s20203_s5 + $0x4cc] ss:$16 sps:$4 sm:$0xff]   ;;  %v13056_v1 = vld [vmem:[%s20203_s5 + $0x2c8] ss:$16 sps:$4 sm:$0xff]  }
 0x71d   :  { %8650 = vmatprep.subr.bf16.mxu0 %v13001_v3  ;;  %v13064_v3 = vld [vmem:[%s20203_s5 + $0x2ac] ss:$16 sps:$4 sm:$0xff]  }
 0x71f   :  { %8610 = vmatpush1.bf16.msra.mxu1 %v12996_v7  ;;  %v13065_v7 = vld [vmem:[%s20203_s5 + $0x4a8] ss:$16 sps:$4 sm:$0xff]  }
 0x720   :  { %8651 = vmatpush1.bf16.msra.mxu0 %v12999_v25  ;;  %8611 = vmatprep.subr.bf16.mxu1 %v13004_v14  ;;  %v13068_v25 = vld [vmem:[%s20203_s5 + $0x288] ss:$16 sps:$4 sm:$0xff]  }
 0x721   :  { %8652 = vmatprep.subr.bf16.mxu0 %v13007_v52  ;;  %v13071_v14 = vld [vmem:[%s20203_s5 + $0x488] ss:$16 sps:$4 sm:$0xff]   ;;  %v13079_v52 = vld [vmem:[%s20203_s5 + $0x46c] ss:$16 sps:$4 sm:$0xff]  }
 0x723   :  { %8612 = vmatpush2.bf16.msra.mxu1 %v13002_v50  ;;  %v13074_v50 = vld [vmem:[%s20203_s5 + $0x268] ss:$16 sps:$4 sm:$0xff]  }
 0x724   :  { %8653 = vmatpush2.bf16.msra.mxu0 %v13005_v8  ;;  %8613 = vmatprep.subr.bf16.mxu1 %v13010_v9  ;;  %v13077_v8 = vld [vmem:[%s20203_s5 + $0x468] ss:$16 sps:$4 sm:$0xff]   ;;  %v13082_v9 = vld [vmem:[%s20203_s5 + $0x24c] ss:$16 sps:$4 sm:$0xff]  }
 0x725   :  { %8654 = vmatprep.subr.bf16.mxu0 %v13013_v19  ;;  %v13080_v19 = vld [vmem:[%s20203_s5 + $0x248] ss:$16 sps:$4 sm:$0xff]  }
 0x727   :  { %8614 = vmatpush2.bf16.msra.mxu1 %v13008_v33  ;;  %v13083_v33 = vld [vmem:[%s20203_s5 + $0x448] ss:$16 sps:$4 sm:$0xff]  }
 0x728   :  { %8655 = vmatpush2.bf16.msra.mxu0 %v13011_v31  ;;  %8615 = vmatprep.subr.bf16.mxu1 %v13016_v22  ;;  %v13088_v31 = vld [vmem:[%s20203_s5 + $0x22c] ss:$16 sps:$4 sm:$0xff]  }
 0x729   :  { %8656 = vmatprep.subr.bf16.mxu0 %v13019_v62  ;;  %v13091_v22 = vld [vmem:[%s20203_s5 + $0x42c] ss:$16 sps:$4 sm:$0xff]   ;;  %v13089_v62 = vld [vmem:[%s20203_s5 + $0x428] ss:$16 sps:$4 sm:$0xff]  }
 0x72b   :  { %8616 = vmatpush2.bf16.msra.mxu1 %v13014_v30  ;;  %v13094_v30 = vld [vmem:[%s20203_s5 + $0x20c] ss:$16 sps:$4 sm:$0xff]  }
 0x72c   :  { %8657 = vmatpush2.bf16.msra.mxu0 %v13017_v58  ;;  %8617 = vmatprep.subr.bf16.mxu1 %v13022_v13  ;;  %v13097_v58 = vld [vmem:[%s20203_s5 + $0x40c] ss:$16 sps:$4 sm:$0xff]   ;;  %v13092_v13 = vld [vmem:[%s20203_s5 + $0x208] ss:$16 sps:$4 sm:$0xff]  }
 0x72d   :  { %8658 = vmatprep.subr.bf16.mxu0 %v13025_v6  ;;  %v13095_v6 = vld [vmem:[%s20203_s5 + $0x408] ss:$16 sps:$4 sm:$0xff]  }
 0x72f   :  { %8618 = vmatpush2.bf16.msra.mxu1 %v13020_v26  ;;  %v13100_v26 = vld [vmem:[%s20203_s5 + $0x3ec] ss:$16 sps:$4 sm:$0xff]  }
 0x730   :  { %8659 = vmatpush2.bf16.msra.mxu0 %v13023_v35  ;;  %8619 = vmatprep.subr.bf16.mxu1 %v13028_v60  ;;  %v13103_v35 = vld [vmem:[%s20203_s5 + $0x5ec] ss:$16 sps:$4 sm:$0xff]   ;;  %v13098_v60 = vld [vmem:[%s20203_s5 + $0x3e8] ss:$16 sps:$4 sm:$0xff]  }
 0x731   :  { %8660 = vmatprep.subr.bf16.mxu0 %v13031_v40  ;;  %v13101_v40 = vld [vmem:[%s20203_s5 + $0x5e8] ss:$16 sps:$4 sm:$0xff]  }
 0x733   :  { %8620 = vmatpush2.bf16.msra.mxu1 %v13026_v45  ;;  %v13106_v45 = vld [vmem:[%s20203_s5 + $0x3cc] ss:$16 sps:$4 sm:$0xff]  }
 0x734   :  { %8661 = vmatpush2.bf16.msra.mxu0 %v13029_v47  ;;  %8621 = vmatprep.subr.bf16.mxu1 %v13034_v48  ;;  %v13109_v47 = vld [vmem:[%s20203_s5 + $0x5cc] ss:$16 sps:$4 sm:$0xff]   ;;  %v13104_v48 = vld [vmem:[%s20203_s5 + $0x3c8] ss:$16 sps:$4 sm:$0xff]  }
 0x735   :  { %8662 = vmatprep.subr.bf16.mxu0 %v13037_v57  ;;  %v13107_v57 = vld [vmem:[%s20203_s5 + $0x5c8] ss:$16 sps:$4 sm:$0xff]  }
 0x737   :  { %8622 = vmatpush2.bf16.msra.mxu1 %v13032_v0  ;;  %v13112_v0 = vld [vmem:[%s20203_s5 + $0x3ac] ss:$16 sps:$4 sm:$0xff]  }
 0x738   :  { %8663 = vmatpush2.bf16.msra.mxu0 %v13035_v17  ;;  %8623 = vmatprep.subr.bf16.mxu1 %v13040_v23  ;;  %v13115_v17 = vld [vmem:[%s20203_s5 + $0x5ac] ss:$16 sps:$4 sm:$0xff]   ;;  %v13110_v23 = vld [vmem:[%s20203_s5 + $0x3a8] ss:$16 sps:$4 sm:$0xff]  }
 0x739   :  { %8664 = vmatprep.subr.bf16.mxu0 %v13043_v43  ;;  %v13118_v43 = vld [vmem:[%s20203_s5 + $0x38c] ss:$16 sps:$4 sm:$0xff]  }
 0x73b   :  { %8624 = vmatpush2.bf16.msra.mxu1 %v13038_v42  ;;  %v13121_v42 = vld [vmem:[%s20203_s5 + $0x58c] ss:$16 sps:$4 sm:$0xff]  }
 0x73c   :  { %8665 = vmatpush2.bf16.msra.mxu0 %v13041_v46  ;;  %8625 = vmatprep.subr.bf16.mxu1 %v13046_v59  ;;  %v13116_v46 = vld [vmem:[%s20203_s5 + $0x388] ss:$16 sps:$4 sm:$0xff]  }
 0x73d   :  { %8666 = vmatprep.subr.bf16.mxu0 %v13049_v44  ;;  %v13119_v59 = vld [vmem:[%s20203_s5 + $0x588] ss:$16 sps:$4 sm:$0xff]   ;;  %v13127_v44 = vld [vmem:[%s20203_s5 + $0x56c] ss:$16 sps:$4 sm:$0xff]  }
 0x73f   :  { %8626 = vmatpush2.bf16.msra.mxu1 %v13044_v63  ;;  %v13122_v63 = vld [vmem:[%s20203_s5 + $0x368] ss:$16 sps:$4 sm:$0xff]  }
 0x740   :  { %8667 = vmatpush2.bf16.msra.mxu0 %v13047_v37  ;;  %8677 = vmatprep.subr.bf16.mxu1 %v13052_v61  ;;  %v13125_v37 = vld [vmem:[%s20203_s5 + $0x568] ss:$16 sps:$4 sm:$0xff]   ;;  %v13133_v61 = vld [vmem:[%s20203_s5 + $0x54c] ss:$16 sps:$4 sm:$0xff]  }
 0x741   :  { %8718 = vmatprep.subr.bf16.mxu0 %v13055_v54  ;;  %v13128_v54 = vld [vmem:[%s20203_s5 + $0x348] ss:$16 sps:$4 sm:$0xff]  }
 0x742   :  { %8628 = vmatmul.mubr.bf16.vlgmr.msra.gmra.mxu1 %v18442_v55 }
 0x743   :  { %8669 = vmatmul.mubr.bf16.vlgmr.msra.gmra.mxu0 %v17988_v56  ;;  %8678 = vmatpush1.bf16.msra.mxu1 %v13050_v10  ;;  %v13067_v56 = vld [vmem:[%s20203_s5 + $0x4ac] ss:$16 sps:$4 sm:$0xff]   ;;  %v13131_v10 = vld [vmem:[%s20203_s5 + $0x548] ss:$16 sps:$4 sm:$0xff]  }
 0x744   :  { %8709 = vmatprep.mubr.bf16.mxu1 %v17983_v32  ;;  %8719 = vmatpush1.bf16.msra.mxu0 %v13053_v18  ;;  %v13062_v32 = vld [vmem:[%s20203_s5 + $0x2a8] ss:$16 sps:$4 sm:$0xff]   ;;  %v13136_v18 = vld [vmem:[%s20203_s5 + $0x32c] ss:$16 sps:$4 sm:$0xff]  }
 0x745   :  { %8750 = vmatprep.mubr.bf16.mxu0 %v18115_v38  ;;  %8679 = vmatprep.subr.bf16.mxu1 %v13058_v53  ;;  %v13070_v38 = vld [vmem:[%s20203_s5 + $0x28c] ss:$16 sps:$4 sm:$0xff]  }
 0x746   :  { %8720 = vmatprep.subr.bf16.mxu0 %v13061_v28  ;;  %v13139_v53 = vld [vmem:[%s20203_s5 + $0x52c] ss:$16 sps:$4 sm:$0xff]   ;;  %v13134_v28 = vld [vmem:[%s20203_s5 + $0x328] ss:$16 sps:$4 sm:$0xff]  }
 0x747   :  { %8680 = vmatpush1.bf16.msra.mxu1 %v13056_v1  ;;  %v13137_v1 = vld [vmem:[%s20203_s5 + $0x528] ss:$16 sps:$4 sm:$0xff]  }
 0x748   :  { %8721 = vmatpush1.bf16.msra.mxu0 %v13059_v2  ;;  %8681 = vmatprep.subr.bf16.mxu1 %v13064_v3  ;;  %v13142_v2 = vld [vmem:[%s20203_s5 + $0x30c] ss:$16 sps:$4 sm:$0xff]  }
 0x749   :  { %8722 = vmatprep.subr.bf16.mxu0 %v13067_v56  ;;  %v13145_v3 = vld [vmem:[%s20203_s5 + $0x50c] ss:$16 sps:$4 sm:$0xff]   ;;  %v13140_v56 = vld [vmem:[%s20203_s5 + $0x308] ss:$16 sps:$4 sm:$0xff]  }
 0x74b   :  { %8682 = vmatpush1.bf16.msra.mxu1 %v13062_v32  ;;  %v13143_v32 = vld [vmem:[%s20203_s5 + $0x508] ss:$16 sps:$4 sm:$0xff]  }
 0x74c   :  { %8723 = vmatpush1.bf16.msra.mxu0 %v13065_v7  ;;  %8683 = vmatprep.subr.bf16.mxu1 %v13070_v38  ;;  %v13148_v7 = vld [vmem:[%s20203_s5 + $0x6ec] ss:$16 sps:$4 sm:$0xff]   ;;  %v18637_v38 = vld [vmem:[%s20020_s8] sm:$0xf] }
 0x74d   :  { %8724 = vmatprep.subr.bf16.mxu0 %v13073_v51  ;;  %v13151_v51 = vld [vmem:[%s20203_s5 + $0x8ec] ss:$16 sps:$4 sm:$0xff]  }
 0x74f   :  { %8684 = vmatpush1.bf16.msra.mxu1 %v13068_v25  ;;  %v13146_v25 = vld [vmem:[%s20203_s5 + $0x6e8] ss:$16 sps:$4 sm:$0xff]  }
 0x750   :  { %8725 = vmatpush1.bf16.msra.mxu0 %v13071_v14  ;;  %8685 = vmatprep.subr.bf16.mxu1 %v13076_v4  ;;  %v6814_v14 = vrot.slane %v18637_v38, %v14607_v34  ;;  %v13149_v4 = vld [vmem:[%s20203_s5 + $0x8e8] ss:$16 sps:$4 sm:$0xff]  }
 0x751   :  { %8726 = vmatprep.subr.bf16.mxu0 %v13079_v52  ;;  %v6818_v52 = vrot.slane %v18637_v38, %v20222_v16  ;;  %v19161_v16 = vld [vmem:[%s20023_s11 + $0x138] sm:$0xff] }
 0x753   :  { %8686 = vmatpush1.bf16.msra.mxu1 %v13074_v50  ;;  %v13154_v50 = vld [vmem:[%s20203_s5 + $0x6cc] ss:$16 sps:$4 sm:$0xff]  }
 0x754   :  { %8727 = vmatpush1.bf16.msra.mxu0 %v13077_v8  ;;  %8687 = vmatprep.subr.bf16.mxu1 %v13082_v9  ;;  %v13157_v9 = vld [vmem:[%s20203_s5 + $0x8cc] ss:$16 sps:$4 sm:$0xff]  }
 0x755   :  { %8728 = vmatprep.subr.bf16.mxu0 %v13085_v11 }
 0x757   :  { %8688 = vmatpush1.bf16.msra.mxu1 %v13080_v19 }
 0x758   :  { %8729 = vmatpush1.bf16.msra.mxu0 %v13083_v33  ;;  %8689 = vmatprep.subr.bf16.mxu1 %v13088_v31  ;;  %v13152_v33 = vld [vmem:[%s20203_s5 + $0x6c8] ss:$16 sps:$4 sm:$0xff]  }
 0x759   :  { %8730 = vmatprep.subr.bf16.mxu0 %v13091_v22  ;;  %v13160_v22 = vld [vmem:[%s20203_s5 + $0x6ac] ss:$16 sps:$4 sm:$0xff]  }
 0x75b   :  { %8690 = vmatpush1.bf16.msra.mxu1 %v13086_v12 }
 0x75c   :  { %8731 = vmatpush1.bf16.msra.mxu0 %v13089_v62  ;;  %8691 = vmatprep.subr.bf16.mxu1 %v13094_v30 }
 0x75d   :  { %8732 = vmatprep.subr.bf16.mxu0 %v13097_v58 }
 0x75f   :  { %8692 = vmatpush1.bf16.msra.mxu1 %v13092_v13 }
 0x760   :  { %8733 = vmatpush1.bf16.msra.mxu0 %v13095_v6  ;;  %8693 = vmatprep.subr.bf16.mxu1 %v13100_v26  ;;  %v13158_v6 = vld [vmem:[%s20203_s5 + $0x6a8] ss:$16 sps:$4 sm:$0xff]  }
 0x761   :  { %8734 = vmatprep.subr.bf16.mxu0 %v13103_v35  ;;  %v13166_v35 = vld [vmem:[%s20203_s5 + $0x68c] ss:$16 sps:$4 sm:$0xff]  }
 0x763   :  { %8694 = vmatpush2.bf16.msra.mxu1 %v13098_v60 }
 0x764   :  { %8735 = vmatpush2.bf16.msra.mxu0 %v13101_v40  ;;  %8695 = vmatprep.subr.bf16.mxu1 %v13106_v45  ;;  %v13169_v40 = vld [vmem:[%s20203_s5 + $0x88c] ss:$16 sps:$4 sm:$0xff]   ;;  %v13164_v45 = vld [vmem:[%s20203_s5 + $0x688] ss:$16 sps:$4 sm:$0xff]  }
 0x765   :  { %8736 = vmatprep.subr.bf16.mxu0 %v13109_v47  ;;  %v13167_v47 = vld [vmem:[%s20203_s5 + $0x888] ss:$16 sps:$4 sm:$0xff]  }
 0x767   :  { %8696 = vmatpush2.bf16.msra.mxu1 %v13104_v48  ;;  %v13172_v48 = vld [vmem:[%s20203_s5 + $0x66c] ss:$16 sps:$4 sm:$0xff]  }
 0x768   :  { %8737 = vmatpush2.bf16.msra.mxu0 %v13107_v57  ;;  %8697 = vmatprep.subr.bf16.mxu1 %v13112_v0  ;;  %v13175_v57 = vld [vmem:[%s20203_s5 + $0x86c] ss:$16 sps:$4 sm:$0xff]   ;;  %v13170_v0 = vld [vmem:[%s20203_s5 + $0x668] ss:$16 sps:$4 sm:$0xff]  }
 0x769   :  { %8738 = vmatprep.subr.bf16.mxu0 %v13115_v17  ;;  %v13173_v17 = vld [vmem:[%s20203_s5 + $0x868] ss:$16 sps:$4 sm:$0xff]  }
 0x76b   :  { %8698 = vmatpush2.bf16.msra.mxu1 %v13110_v23  ;;  %v13178_v23 = vld [vmem:[%s20203_s5 + $0x64c] ss:$16 sps:$4 sm:$0xff]  }
 0x76c   :  { %8739 = vmatpush2.bf16.msra.mxu0 %v13113_v41  ;;  %8699 = vmatprep.subr.bf16.mxu1 %v13118_v43  ;;  %v13181_v41 = vld [vmem:[%s20203_s5 + $0x84c] ss:$16 sps:$4 sm:$0xff]   ;;  %v13176_v43 = vld [vmem:[%s20203_s5 + $0x648] ss:$16 sps:$4 sm:$0xff]  }
 0x76d   :  { %8740 = vmatprep.subr.bf16.mxu0 %v13121_v42  ;;  %v13179_v42 = vld [vmem:[%s20203_s5 + $0x848] ss:$16 sps:$4 sm:$0xff]  }
 0x76f   :  { %8700 = vmatpush2.bf16.msra.mxu1 %v13116_v46  ;;  %v13184_v46 = vld [vmem:[%s20203_s5 + $0x62c] ss:$16 sps:$4 sm:$0xff]  }
 0x770   :  { %8741 = vmatpush2.bf16.msra.mxu0 %v13119_v59  ;;  %8701 = vmatprep.subr.bf16.mxu1 %v13124_v20  ;;  %v13187_v59 = vld [vmem:[%s20203_s5 + $0x82c] ss:$16 sps:$4 sm:$0xff]   ;;  %v13182_v20 = vld [vmem:[%s20203_s5 + $0x628] ss:$16 sps:$4 sm:$0xff]  }
 0x771   :  { %8742 = vmatprep.subr.bf16.mxu0 %v13127_v44  ;;  %v13185_v44 = vld [vmem:[%s20203_s5 + $0x828] ss:$16 sps:$4 sm:$0xff]  }
 0x773   :  { %8702 = vmatpush2.bf16.msra.mxu1 %v13122_v63  ;;  %v13190_v63 = vld [vmem:[%s20203_s5 + $0x60c] ss:$16 sps:$4 sm:$0xff]  }
 0x774   :  { %8743 = vmatpush2.bf16.msra.mxu0 %v13125_v37  ;;  %8703 = vmatprep.subr.bf16.mxu1 %v13130_v27  ;;  %v13193_v37 = vld [vmem:[%s20203_s5 + $0x80c] ss:$16 sps:$4 sm:$0xff]   ;;  %v13188_v27 = vld [vmem:[%s20203_s5 + $0x608] ss:$16 sps:$4 sm:$0xff]  }
 0x775   :  { %8744 = vmatprep.subr.bf16.mxu0 %v13133_v61  ;;  %v13191_v61 = vld [vmem:[%s20203_s5 + $0x808] ss:$16 sps:$4 sm:$0xff]  }
 0x777   :  { %8704 = vmatpush2.bf16.msra.mxu1 %v13128_v54  ;;  %v13196_v54 = vld [vmem:[%s20203_s5 + $0x7ec] ss:$16 sps:$4 sm:$0xff]  }
 0x778   :  { %8745 = vmatpush2.bf16.msra.mxu0 %v13131_v10  ;;  %8705 = vmatprep.subr.bf16.mxu1 %v13136_v18  ;;  %v13199_v10 = vld [vmem:[%s20203_s5 + $0x9ec] ss:$16 sps:$4 sm:$0xff]   ;;  %v13194_v18 = vld [vmem:[%s20203_s5 + $0x7e8] ss:$16 sps:$4 sm:$0xff]  }
 0x779   :  { %8746 = vmatprep.subr.bf16.mxu0 %v13139_v53  ;;  %v13197_v53 = vld [vmem:[%s20203_s5 + $0x9e8] ss:$16 sps:$4 sm:$0xff]  }
 0x77b   :  { %8706 = vmatpush2.bf16.msra.mxu1 %v13134_v28  ;;  %v13202_v28 = vld [vmem:[%s20203_s5 + $0x7cc] ss:$16 sps:$4 sm:$0xff]  }
 0x77c   :  { %8747 = vmatpush2.bf16.msra.mxu0 %v13137_v1  ;;  %8707 = vmatprep.subr.bf16.mxu1 %v13142_v2  ;;  %v13205_v1 = vld [vmem:[%s20203_s5 + $0x9cc] ss:$16 sps:$4 sm:$0xff]   ;;  %v13200_v2 = vld [vmem:[%s20203_s5 + $0x7c8] ss:$16 sps:$4 sm:$0xff]  }
 0x77d   :  { %8748 = vmatprep.subr.bf16.mxu0 %v13145_v3  ;;  %v13203_v3 = vld [vmem:[%s20203_s5 + $0x9c8] ss:$16 sps:$4 sm:$0xff]  }
 0x77f   :  { %8708 = vmatpush2.bf16.msra.mxu1 %v13140_v56  ;;  %v13208_v56 = vld [vmem:[%s20203_s5 + $0x7ac] ss:$16 sps:$4 sm:$0xff]  }
 0x780   :  { %8749 = vmatpush2.bf16.msra.mxu0 %v13143_v32  ;;  %8759 = vmatprep.subr.bf16.mxu1 %v13148_v7  ;;  %v13211_v32 = vld [vmem:[%s20203_s5 + $0x9ac] ss:$16 sps:$4 sm:$0xff]   ;;  %v13206_v7 = vld [vmem:[%s20203_s5 + $0x7a8] ss:$16 sps:$4 sm:$0xff]  }
 0x781   :  { %8800 = vmatprep.subr.bf16.mxu0 %v13151_v51  ;;  %v13209_v51 = vld [vmem:[%s20203_s5 + $0x9a8] ss:$16 sps:$4 sm:$0xff]  }
 0x782   :  { %8710 = vmatmul.mubr.bf16.vlgmr.msra.gmra.mxu1 %v17994_v21  ;;  %v8465_v8 = vpop.f32.mrf.mxu1  ;;  %v13155_v21 = vld [vmem:[%s20203_s5 + $0x8c8] ss:$16 sps:$4 sm:$0xff]  }
 0x783   :  { %8751 = vmatmul.mubr.bf16.vlgmr.msra.gmra.mxu0 %v18234_v15  ;;  %v8466_v11 = vadd.f32 %v8465_v8, %v6814_v14  ;;  %v8506_v19 = vpop.f32.mrf.mxu0  ;;  %8760 = vmatpush1.bf16.msra.mxu1 %v13146_v25  ;;  %v13214_v25 = vld [vmem:[%s20203_s5 + $0x78c] ss:$16 sps:$4 sm:$0xff]  }
 0x784   :  { %8791 = vmatprep.mubr.bf16.mxu1 %v18123_v24  ;;  %8801 = vmatpush1.bf16.msra.mxu0 %v13149_v4  ;;  %v8467_v31 = vpop.f32.mrf.mxu1  ;;  %v13163_v24 = vld [vmem:[%s20203_s5 + $0x8ac] ss:$16 sps:$4 sm:$0xff]   ;;  %v13212_v4 = vld [vmem:[%s20203_s5 + $0x788] ss:$16 sps:$4 sm:$0xff]  }
 0x785   :  { %v18670_v15 = vadd.f32 %v8506_v19, %v8466_v11  ;;  %8832 = vmatprep.mubr.bf16.mxu0 %v18245_v39  ;;  %v8468_v12 = vadd.f32 %v8467_v31, %v6818_v52  ;;  %v8508_v62 = vpop.f32.mrf.mxu0  ;;  %8761 = vmatprep.subr.bf16.mxu1 %v13154_v50  ;;  %v13161_v39 = vld [vmem:[%s20203_s5 + $0x8a8] ss:$16 sps:$4 sm:$0xff]   ;;  %v13217_v14 = vld [vmem:[%s20203_s5 + $0x98c] ss:$16 sps:$4 sm:$0xff]  }
 0x786   :  { %8802 = vmatprep.subr.bf16.mxu0 %v13157_v9  ;;  %v8469_v30 = vpop.f32.mrf.mxu1  ;;  %v13215_v52 = vld [vmem:[%s20203_s5 + $0x988] ss:$16 sps:$4 sm:$0xff]   ;;  %v13220_v50 = vld [vmem:[%s20203_s5 + $0x76c] ss:$16 sps:$4 sm:$0xff]  }
 0x787   :  { %v18676_v58 = vadd.f32 %v8508_v62, %v8468_v12  ;;  %v8510_v13 = vpop.f32.mrf.mxu0  ;;  %8762 = vmatpush1.bf16.msra.mxu1 %v13152_v33  ;;  %v13223_v8 = vld [vmem:[%s20203_s5 + $0x96c] ss:$16 sps:$4 sm:$0xff]   ;;  %v13218_v9 = vld [vmem:[%s20203_s5 + $0x768] ss:$16 sps:$4 sm:$0xff]  }
 0x788   :  { %8803 = vmatpush1.bf16.msra.mxu0 %v13155_v21  ;;  %v8470_v26 = vpop.f32.mrf.mxu1  ;;  %8763 = vmatprep.subr.bf16.mxu1 %v13160_v22  ;;  %v13221_v11 = vld [vmem:[%s20203_s5 + $0x968] ss:$16 sps:$4 sm:$0xff]   ;;  %v13226_v19 = vld [vmem:[%s20203_s5 + $0x74c] ss:$16 sps:$4 sm:$0xff]  }
 0x789   :  { %v8511_v60 = vpop.f32.mrf.mxu0  ;;  %8804 = vmatprep.subr.bf16.mxu0 %v13163_v24  ;;  %v13229_v33 = vld [vmem:[%s20203_s5 + $0x94c] ss:$16 sps:$4 sm:$0xff]   ;;  %v13224_v31 = vld [vmem:[%s20203_s5 + $0x748] ss:$16 sps:$4 sm:$0xff]  }
 0x78a   :  { %v13227_v21 = vld [vmem:[%s20203_s5 + $0x948] ss:$16 sps:$4 sm:$0xff]   ;;  %v13232_v22 = vld [vmem:[%s20203_s5 + $0x72c] ss:$16 sps:$4 sm:$0xff]   ;;  %v18854_v60 = vld [vmem:[%s20023_s11 + $0xf0] sm:$0xff] }
 0x78b   :  { %8764 = vmatpush1.bf16.msra.mxu1 %v13158_v6  ;;  %v13235_v12 = vld [vmem:[%s20203_s5 + $0x92c] ss:$16 sps:$4 sm:$0xff]   ;;  %v13230_v62 = vld [vmem:[%s20203_s5 + $0x728] ss:$16 sps:$4 sm:$0xff]  }
 0x78c   :  { %8805 = vmatpush1.bf16.msra.mxu0 %v13161_v39  ;;  %8765 = vmatprep.subr.bf16.mxu1 %v13166_v35  ;;  %v13233_v24 = vld [vmem:[%s20203_s5 + $0x928] ss:$16 sps:$4 sm:$0xff]   ;;  %v13238_v30 = vld [vmem:[%s20203_s5 + $0x70c] ss:$16 sps:$4 sm:$0xff]  }
 0x78d   :  { %8806 = vmatprep.subr.bf16.mxu0 %v13169_v40  ;;  %v13241_v13 = vld [vmem:[%s20203_s5 + $0x90c] ss:$16 sps:$4 sm:$0xff]   ;;  %v13236_v6 = vld [vmem:[%s20203_s5 + $0x708] ss:$16 sps:$4 sm:$0xff]  }
 0x78e   :  { %v13239_v26 = vld [vmem:[%s20203_s5 + $0x908] ss:$16 sps:$4 sm:$0xff]  }
 0x78f   :  { %8766 = vmatpush1.bf16.msra.mxu1 %v13164_v45  ;;  %v18843_v39 = vld [vmem:[%s20023_s11 + $0xf8] sm:$0xff]  ;;  %v18860_v45 = vld [vmem:[%s20023_s11 + $0x70] sm:$0xff] }
 0x790   :  { %8807 = vmatpush1.bf16.msra.mxu0 %v13167_v47  ;;  %8767 = vmatprep.subr.bf16.mxu1 %v13172_v48  ;;  %v18849_v35 = vld [vmem:[%s20023_s11 + $0x78] sm:$0xff] }
 0x791   :  { %8808 = vmatprep.subr.bf16.mxu0 %v13175_v57  ;;  %v18868_v57 = vld [vmem:[%s20023_s11 + $0xe8] sm:$0xff] }
 0x793   :  { %8768 = vmatpush1.bf16.msra.mxu1 %v13170_v0 }
 0x794   :  { %8809 = vmatpush1.bf16.msra.mxu0 %v13173_v17  ;;  %8769 = vmatprep.subr.bf16.mxu1 %v13178_v23 }
 0x795   :  { %8810 = vmatprep.subr.bf16.mxu0 %v13181_v41  ;;  %v18892_v41 = vld [vmem:[%s20023_s11 + $0x60] sm:$0xff] }
 0x797   :  { %8770 = vmatpush1.bf16.msra.mxu1 %v13176_v43 }
 0x798   :  { %8811 = vmatpush1.bf16.msra.mxu0 %v13179_v42  ;;  %8771 = vmatprep.subr.bf16.mxu1 %v13184_v46  ;;  %v18898_v42 = vld [vmem:[%s20023_s11 + $0xd8] sm:$0xff] }
 0x799   :  { %8812 = vmatprep.subr.bf16.mxu0 %v13187_v59  ;;  %v18904_v59 = vld [vmem:[%s20023_s11 + $0x58] sm:$0xff] }
 0x79b   :  { %8772 = vmatpush1.bf16.msra.mxu1 %v13182_v20  ;;  %v18909_v20 = vld [vmem:[%s20023_s11 + $0xd0] sm:$0xff] }
 0x79c   :  { %8813 = vmatpush1.bf16.msra.mxu0 %v13185_v44  ;;  %8773 = vmatprep.subr.bf16.mxu1 %v13190_v63  ;;  %v18915_v63 = vld [vmem:[%s20023_s11 + $0x1f8] sm:$0xff] }
 0x79d   :  { %8814 = vmatprep.subr.bf16.mxu0 %v13193_v37  ;;  %v18920_v37 = vld [vmem:[%s20023_s11 + $0x178] sm:$0xff] }
 0x79f   :  { %8774 = vmatpush1.bf16.msra.mxu1 %v13188_v27  ;;  %v18925_v27 = vld [vmem:[%s20023_s11 + $0x1f0] sm:$0xff] }
 0x7a0   :  { %8815 = vmatpush1.bf16.msra.mxu0 %v13191_v61  ;;  %8775 = vmatprep.subr.bf16.mxu1 %v13196_v54  ;;  %v18931_v61 = vld [vmem:[%s20023_s11 + $0x50] sm:$0xff] }
 0x7a1   :  { %8816 = vmatprep.subr.bf16.mxu0 %v13199_v10  ;;  %v18937_v54 = vld [vmem:[%s20023_s11 + $0x170] sm:$0xff]  ;;  %v18943_v10 = vld [vmem:[%s20023_s11 + $0xc8] sm:$0xff] }
 0x7a3   :  { %8776 = vmatpush2.bf16.msra.mxu1 %v13194_v18  ;;  %v18949_v18 = vld [vmem:[%s20023_s11 + $0x1e8] sm:$0xff] }
 0x7a4   :  { %8817 = vmatpush2.bf16.msra.mxu0 %v13197_v53  ;;  %8777 = vmatprep.subr.bf16.mxu1 %v13202_v28  ;;  %v18955_v53 = vld [vmem:[%s20023_s11 + $0x48] sm:$0xff] }
 0x7a5   :  { %8818 = vmatprep.subr.bf16.mxu0 %v13205_v1  ;;  %v18961_v28 = vld [vmem:[%s20023_s11 + $0x168] sm:$0xff]  ;;  %v18967_v1 = vld [vmem:[%s20023_s11 + $0xc0] sm:$0xff] }
 0x7a7   :  { %8778 = vmatpush2.bf16.msra.mxu1 %v13200_v2  ;;  %v18973_v2 = vld [vmem:[%s20023_s11 + $0x1e0] sm:$0xff] }
 0x7a8   :  { %8819 = vmatpush2.bf16.msra.mxu0 %v13203_v3  ;;  %8779 = vmatprep.subr.bf16.mxu1 %v13208_v56  ;;  %v18979_v3 = vld [vmem:[%s20023_s11 + $0x40] sm:$0xff] }
 0x7a9   :  { %8820 = vmatprep.subr.bf16.mxu0 %v13211_v32  ;;  %v18985_v56 = vld [vmem:[%s20023_s11 + $0x160] sm:$0xff]  ;;  %v18991_v32 = vld [vmem:[%s20023_s11 + $0xb8] sm:$0xff] }
 0x7ab   :  { %8780 = vmatpush2.bf16.msra.mxu1 %v13206_v7  ;;  %v18997_v7 = vld [vmem:[%s20023_s11 + $0x1d8] sm:$0xff] }
 0x7ac   :  { %8821 = vmatpush2.bf16.msra.mxu0 %v13209_v51  ;;  %8781 = vmatprep.subr.bf16.mxu1 %v13214_v25  ;;  %v19003_v51 = vld [vmem:[%s20023_s11 + $0x38] sm:$0xff] }
 0x7ad   :  { %8822 = vmatprep.subr.bf16.mxu0 %v13217_v14  ;;  %v19009_v25 = vld [vmem:[%s20023_s11 + $0x158] sm:$0xff]  ;;  %v19015_v14 = vld [vmem:[%s20023_s11 + $0xb0] sm:$0xff] }
 0x7af   :  { %8782 = vmatpush2.bf16.msra.mxu1 %v13212_v4  ;;  %v19021_v4 = vld [vmem:[%s20023_s11 + $0x1d0] sm:$0xff] }
 0x7b0   :  { %8823 = vmatpush2.bf16.msra.mxu0 %v13215_v52  ;;  %8783 = vmatprep.subr.bf16.mxu1 %v13220_v50  ;;  %v19027_v52 = vld [vmem:[%s20023_s11 + $0x30] sm:$0xff] }
 0x7b1   :  { %8824 = vmatprep.subr.bf16.mxu0 %v13223_v8  ;;  %v19033_v50 = vld [vmem:[%s20023_s11 + $0x150] sm:$0xff]  ;;  %v19039_v8 = vld [vmem:[%s20023_s11 + $0xa8] sm:$0xff] }
 0x7b3   :  { %8784 = vmatpush2.bf16.msra.mxu1 %v13218_v9  ;;  %v19046_v9 = vld [vmem:[%s20023_s11 + $0x28] sm:$0xff] }
 0x7b4   :  { %8825 = vmatpush2.bf16.msra.mxu0 %v13221_v11  ;;  %8785 = vmatprep.subr.bf16.mxu1 %v13226_v19  ;;  %20232 = vst [vmem:[#allocation13_spill] sm:$0xff] %v19046_v9  ;;  %v19053_v11 = vld [vmem:[%s20023_s11 + $0xa0] sm:$0xff] }
 0x7b5   :  { %8826 = vmatprep.subr.bf16.mxu0 %v13229_v33  ;;  %20233 = vst [vmem:[#allocation14_spill] sm:$0xff] %v19053_v11  ;;  %v19060_v19 = vld [vmem:[%s20023_s11 + $0x20] sm:$0xff]  ;;  %v19066_v33 = vld [vmem:[%s20023_s11 + $0x98] sm:$0xff] }
 0x7b6   :  { %20234 = vst [vmem:[#allocation15_spill] sm:$0xff] %v19060_v19  ;;  %20235 = vst [vmem:[#allocation16_spill] sm:$0xff] %v19066_v33 }
 0x7b7   :  { %8786 = vmatpush2.bf16.msra.mxu1 %v13224_v31  ;;  %v19072_v31 = vld [vmem:[%s20023_s11 + $0x18] sm:$0xff] }
 0x7b8   :  { %8827 = vmatpush2.bf16.msra.mxu0 %v13227_v21  ;;  %8787 = vmatprep.subr.bf16.mxu1 %v13232_v22  ;;  %20236 = vst [vmem:[#allocation17_spill] sm:$0xff] %v19072_v31  ;;  %v19078_v21 = vld [vmem:[%s20023_s11 + $0x90] sm:$0xff] }
 0x7b9   :  { %8828 = vmatprep.subr.bf16.mxu0 %v13235_v12  ;;  %20237 = vst [vmem:[#allocation18_spill] sm:$0xff] %v19078_v21  ;;  %v19084_v22 = vld [vmem:[%s20023_s11 + $0x10] sm:$0xff]  ;;  %v19090_v12 = vld [vmem:[%s20023_s11 + $0x88] sm:$0xff] }
 0x7ba   :  { %20238 = vst [vmem:[#allocation19_spill] sm:$0xff] %v19084_v22  ;;  %20239 = vst [vmem:[#allocation20_spill] sm:$0xff] %v19090_v12 }
 0x7bb   :  { %8788 = vmatpush2.bf16.msra.mxu1 %v13230_v62  ;;  %v19096_v62 = vld [vmem:[%s20023_s11 + $0x8] sm:$0xff] }
 0x7bc   :  { %8829 = vmatpush2.bf16.msra.mxu0 %v13233_v24  ;;  %8789 = vmatprep.subr.bf16.mxu1 %v13238_v30  ;;  %20240 = vst [vmem:[#allocation21_spill] sm:$0xff] %v19096_v62  ;;  %v19102_v24 = vld [vmem:[%s20023_s11 + $0x80] sm:$0xff] }
 0x7bd   :  { %8830 = vmatprep.subr.bf16.mxu0 %v13241_v13  ;;  %20241 = vst [vmem:[#allocation22_spill] sm:$0xff] %v19102_v24  ;;  %v19108_v30 = vld [vmem:[%s20023_s11] sm:$0xff] }
 0x7be   :  { %20242 = vst [vmem:[#allocation23_spill] sm:$0xff] %v19108_v30 }
 0x7bf   :  { %8790 = vmatpush2.bf16.msra.mxu1 %v13236_v6 }
 0x7c0   :  { %8831 = vmatpush2.bf16.msra.mxu0 %v13239_v26  ;;  %11669 = vmatprep.subr.mxu1 %v18843_v39 }
 0x7c1   :  { %11704 = vmatprep.subr.mxu0 %v18915_v63 }
 0x7c2   :  { %v8547_v40 = vpop.f32.mrf.mxu1  ;;  %8792 = vmatmul.mubr.bf16.vlgmr.msra.gmra.mxu1 %v18239_v29  ;;  %v18876_v29 = vld [vmem:[%s20023_s11 + $0x68] sm:$0xff] }
 0x7c3   :  { %v8548_v47 = vadd.f32 %v8547_v40, %v18670_v15  ;;  %v8588_v48 = vpop.f32.mrf.mxu0  ;;  %8833 = vmatmul.mubr.bf16.vlgmr.msra.gmra.mxu0 %v18442_v55  ;;  %11670 = vmatpush3.msra.mxu1 %v18849_v35  ;;  %v18886_v55 = vld [vmem:[%s20023_s11 + $0xe0] sm:$0xff] }
 0x7c4   :  { %v18870_v0 = vpop.f32.mrf.mxu1  ;;  %11671 = vmatprep.subr.mxu1 %v18854_v60  ;;  %11705 = vmatpush3.msra.mxu0 %v18920_v37 }
 0x7c5   :  { %v18878_v15 = vadd.f32 %v8588_v48, %v8548_v47  ;;  %v18880_v17 = vpop.f32.mrf.mxu0  ;;  %11672 = vmatpush3.msra.mxu1 %v18860_v45  ;;  %11706 = vmatprep.subr.mxu0 %v18925_v27  ;;  %v8550_v13 = vadd.f32 %v18870_v0, %v18676_v58  ;;  %v19124_v48 = vld [vmem:[%s20023_s11 + $0x1c8] sm:$0xff] }
 0x7c6   :  { %v8551_v23 = vpop.f32.mrf.mxu1  ;;  %11673 = vmatprep.subr.mxu1 %v18868_v57  ;;  %11707 = vmatpush3.msra.mxu0 %v18937_v54  ;;  %v19130_v58 = vld [vmem:[%s20023_s11 + $0x148] sm:$0xff] }
 0x7c7   :  { %v8592_v43 = vpop.f32.mrf.mxu0  ;;  %11674 = vmatpush3.msra.mxu1 %v18876_v29  ;;  %11708 = vmatprep.subr.mxu0 %v18949_v18  ;;  %v8591_v26 = vadd.f32 %v18880_v17, %v8550_v13 }
 0x7c8   :  { %v8552_v46 = vpop.f32.mrf.mxu1  ;;  %11675 = vmatprep.subr.mxu1 %v18886_v55  ;;  %11709 = vmatpush3.msra.mxu0 %v18961_v28  ;;  %v19141_v43 = vld [vmem:[%s20023_s11 + $0x1c0] sm:$0xff] }
 0x7c9   :  { %v8593_v44 = vpop.f32.mrf.mxu0  ;;  %11676 = vmatpush3.msra.mxu1 %v18892_v41  ;;  %11710 = vmatprep.subr.mxu0 %v18973_v2 }
 0x7ca   :  { %11677 = vmatprep.subr.mxu1 %v18898_v42  ;;  %11711 = vmatpush3.msra.mxu0 %v18985_v56  ;;  %v19147_v44 = vld [vmem:[%s20023_s11 + $0x140] sm:$0xff] }
 0x7cb   :  { %11678 = vmatpush3.msra.mxu1 %v18904_v59  ;;  %11712 = vmatprep.subr.mxu0 %v18997_v7 }
 0x7cc   :  { %11679 = vmatprep.subr.mxu1 %v18909_v20  ;;  %11713 = vmatpush3.msra.mxu0 %v19009_v25 }
 0x7cd   :  { %11680 = vmatpush3.msra.mxu1 %v18931_v61  ;;  %11714 = vmatprep.subr.mxu0 %v19021_v4 }
 0x7ce   :  { %11681 = vmatprep.subr.mxu1 %v18943_v10  ;;  %11715 = vmatpush3.msra.mxu0 %v19033_v50 }
 0x7cf   :  { %11682 = vmatpush3.msra.mxu1 %v18955_v53  ;;  %11716 = vmatprep.subr.mxu0 %v19124_v48 }
 0x7d0   :  { %11683 = vmatprep.subr.mxu1 %v18967_v1  ;;  %11717 = vmatpush3.msra.mxu0 %v19130_v58 }
 0x7d1   :  { %11684 = vmatpush3.msra.mxu1 %v18979_v3  ;;  %11718 = vmatprep.subr.mxu0 %v19141_v43 }
 0x7d2   :  { %11685 = vmatprep.subr.mxu1 %v18991_v32  ;;  %11719 = vmatpush3.msra.mxu0 %v19147_v44 }
 0x7d3   :  { %11686 = vmatpush3.msra.mxu1 %v19003_v51 }
 0x7d4   :  { %11687 = vmatprep.subr.mxu1 %v19015_v14 }
 0x7d5   :  { %11688 = vmatpush3.msra.mxu1 %v19027_v52 }
 0x7d6   :  { %11689 = vmatprep.subr.mxu1 %v19039_v8 }
 0x7d7   :  { %11690 = vmatpush3.msra.mxu1 %v19046_v9 }
 0x7d8   :  { %11691 = vmatprep.subr.mxu1 %v19053_v11 }
 0x7d9   :  { %11692 = vmatpush3.msra.mxu1 %v19060_v19 }
 0x7da   :  { %11693 = vmatprep.subr.mxu1 %v19066_v33  ;;  %v19226_v33 = vld [vmem:[%s20023_s11 + $0x188] sm:$0xff] }
 0x7db   :  { %11694 = vmatpush3.msra.mxu1 %v19072_v31  ;;  %20253 = vst [vmem:[#allocation9_spill] sm:$0xff] %v19226_v33 }
 0x7dc   :  { %11695 = vmatprep.subr.mxu1 %v19078_v21  ;;  %v19220_v21 = vld [vmem:[%s20023_s11 + $0x110] sm:$0xff] }
 0x7dd   :  { %11696 = vmatpush3.msra.mxu1 %v19084_v22  ;;  %v19214_v22 = vld [vmem:[%s20023_s11 + $0x190] sm:$0xff]  ;;  %20252 = vst [vmem:[#allocation12_spill] sm:$0xff] %v19220_v21 }
 0x7de   :  { %11697 = vmatprep.subr.mxu1 %v19090_v12  ;;  %20251 = vst [vmem:[#allocation10_spill] sm:$0xff] %v19214_v22 }
 0x7df   :  { %11698 = vmatpush3.msra.mxu1 %v19096_v62  ;;  %v19198_v62 = vld [vmem:[%s20023_s11 + $0x120] sm:$0xff] }
 0x7e0   :  { %11699 = vmatprep.subr.mxu1 %v19102_v24  ;;  %20248 = vst [vmem:[#allocation29_spill] sm:$0xff] %v19198_v62 }
 0x7e1   :  { %11700 = vmatpush3.msra.mxu1 %v19108_v30 }
 0x802   :  { %v8629_v6 = vpop.f32.mrf.mxu1 }
 0x803   :  { %v19117_v40 = vadd.f32 %v8629_v6, %v18878_v15  ;;  %v19119_v47 = vpop.f32.mrf.mxu0 }
 0x804   :  { %v8631_v23 = vpop.f32.mrf.mxu1 }
 0x805   :  { %20243 = vst [vmem:[#allocation24_spill] sm:$0xff] %v19117_v40  ;;  %v8843_v0 = vrot.slane %v19117_v40, 4  ;;  %v19133_v17 = vadd.f32 %v8631_v23, %v8591_v26  ;;  %v19135_v15 = vpop.f32.mrf.mxu0  ;;  %v19155_v23 = vld [vmem:[%s20023_s11 + $0x1b8] sm:$0xff] }
 0x806   :  { %v8633_v46 = vpop.f32.mrf.mxu1  ;;  %11720 = vmatprep.subr.mxu0 %v19155_v23 }
 0x807   :  { %20244 = vst [vmem:[#allocation25_spill] sm:$0xff] %v19133_v17  ;;  %v8844_v13 = vadd.f32 %v8843_v0, %v19117_v40  ;;  %v8849_v6 = vrot.slane %v19133_v17, 4  ;;  %v8674_v26 = vpop.f32.mrf.mxu0  ;;  %11721 = vmatpush3.msra.mxu0 %v19161_v16 }
 0x808   :  { %v8634_v46 = vpop.f32.mrf.mxu1  ;;  %v19168_v26 = vld [vmem:[%s20023_s11 + $0x1b0] sm:$0xff] }
 0x809   :  { %v8845_v34 = vrot.slane %v8844_v13, 2  ;;  %v8850_v0 = vadd.f32 %v8849_v6, %v19133_v17  ;;  %v8675_v40 = vpop.f32.mrf.mxu0  ;;  %11722 = vmatprep.subr.mxu0 %v19168_v26  ;;  %v19174_v46 = vld [vmem:[%s20023_s11 + $0x130] sm:$0xff]  ;;  %v19186_v6 = vld [vmem:[%s20023_s11 + $0x128] sm:$0xff] }
 0x80a   :  { %11723 = vmatpush3.msra.mxu0 %v19174_v46  ;;  %v19180_v40 = vld [vmem:[%s20023_s11 + $0x1a8] sm:$0xff]  ;;  %20246 = vst [vmem:[#allocation27_spill] sm:$0xff] %v19186_v6 }
 0x80b   :  { %v8846_v30 = vadd.f32 %v8845_v34, %v8844_v13  ;;  %v8851_v24 = vrot.slane %v8850_v0, 2  ;;  %20245 = vst [vmem:[#allocation26_spill] sm:$0xff] %v19180_v40  ;;  %11724 = vmatprep.subr.mxu0 %v19180_v40  ;;  %v19192_v34 = vld [vmem:[%s20023_s11 + $0x1a0] sm:$0xff] }
 0x80c   :  { %11725 = vmatpush3.msra.mxu0 %v19186_v6  ;;  %20247 = vst [vmem:[#allocation28_spill] sm:$0xff] %v19192_v34 }
 0x80d   :  { %v8852_v17 = vadd.f32 %v8851_v24, %v8850_v0  ;;  %v8847_v13 = vrot.slane %v8846_v30, 1  ;;  %11726 = vmatprep.subr.mxu0 %v19192_v34  ;;  %v19204_v24 = vld [vmem:[%s20023_s11 + $0x198] sm:$0xff] }
 0x80e   :  { %11727 = vmatpush3.msra.mxu0 %v19198_v62  ;;  %20249 = vst [vmem:[#allocation30_spill] sm:$0xff] %v19204_v24  ;;  %v19209_v0 = vld [vmem:[%s20023_s11 + $0x118] sm:$0xff] }
 0x80f   :  { %v8853_v12 = vrot.slane %v8852_v17, 1  ;;  %20250 = vst [vmem:[#allocation31_spill] sm:$0xff] %v19209_v0  ;;  %11728 = vmatprep.subr.mxu0 %v19204_v24  ;;  %v8848_v62 = vadd.f32 %v8847_v13, %v8846_v30  ;;  %v19232_v24 = vld [vmem:[%s20023_s11 + $0x108] sm:$0xff]  ;;  %v19244_v30 = vld [vmem:[%s20023_s11 + $0x100] sm:$0xff] }
 0x810   :  { %11729 = vmatpush3.msra.mxu0 %v19209_v0  ;;  %20254 = vst [vmem:[#allocation11_spill] sm:$0xff] %v19232_v24  ;;  %20256 = vst [vmem:[#allocation33_spill] sm:$0xff] %v19244_v30 }
 0x811   :  { %v8854_v31 = vadd.f32 %v8853_v12, %v8852_v17  ;;  %11730 = vmatprep.subr.mxu0 %v19214_v22  ;;  %v19238_v12 = vld [vmem:[%s20023_s11 + $0x180] sm:$0xff] }
 0x812   :  { %11731 = vmatpush3.msra.mxu0 %v19220_v21  ;;  %20255 = vst [vmem:[#allocation32_spill] sm:$0xff] %v19238_v12 }
 0x813   :  { %8995 = vmatprep.mubr.f32.mxu1 %v8854_v31  ;;  %11732 = vmatprep.subr.mxu0 %v19226_v33  ;;  %v6822_v31 = vrot.slane %v18637_v38, %v20221_v49  ;;  %v19261_v49 = vld [vmem:[%s20024_s12 + $0x1f8] sm:$0xff] }
 0x814   :  { %8996 = vmatmul.mubr.f32.vlgmr.msra.gmra.mxu1 %v8848_v62  ;;  %11733 = vmatpush3.msra.mxu0 %v19232_v24  ;;  %20258 = vst [vmem:[#allocation35_spill] sm:$0xff] %v19261_v49 }
 0x815   :  { %9200 = vmatprep.mubr.f32.mxu1 %v20202_v36  ;;  %11734 = vmatprep.subr.mxu0 %v19238_v12  ;;  %v8671_v62 = vadd.f32 %v19119_v47, %v6822_v31  ;;  %v19256_v12 = vld [vmem:[%s20024_s12 + $0x1e8] sm:$0xff]  ;;  %v19266_v47 = vld [vmem:[%s20024_s12 + $0x1e0] sm:$0xff] }
 0x816   :  { %11735 = vmatpush3.msra.mxu0 %v19244_v30  ;;  %20257 = vst [vmem:[#allocation34_spill] sm:$0xff] %v19256_v12  ;;  %20259 = vst [vmem:[#allocation36_spill] sm:$0xff] %v19266_v47  ;;  %9136 = vmatprep.subr.mxu1 %v19256_v12  ;;  %v19302_v31 = vld [vmem:[%s20024_s12 + $0x180] sm:$0xff] }
 0x817   :  { %9207 = vmatprep.subr.mxu0 %v19261_v49  ;;  %9137 = vmatpush1.msra.mxu1 %v19266_v47  ;;  %20265 = vst [vmem:[#allocation42_spill] sm:$0xff] %v19302_v31 }
 0x842   :  { %v8711_v17 = vpop.f32.mrf.mxu1 }
 0x843   :  { %v8712_v13 = vadd.f32 %v8711_v17, %v8671_v62  ;;  %v8752_v33 = vpop.f32.mrf.mxu0  ;;  %v19308_v62 = vld [vmem:[%s20024_s12 + $0x168] sm:$0xff]  ;;  %v19314_v17 = vld [vmem:[%s20024_s12 + $0x160] sm:$0xff] }
 0x844   :  { %v8713_v21 = vpop.f32.mrf.mxu1  ;;  %20266 = vst [vmem:[#allocation43_spill] sm:$0xff] %v19308_v62  ;;  %20267 = vst [vmem:[#allocation44_spill] sm:$0xff] %v19314_v17 }
 0x845   :  { %v8753_v22 = vadd.f32 %v8752_v33, %v8712_v13  ;;  %v8754_v0 = vpop.f32.mrf.mxu0  ;;  %v19284_v33 = vld [vmem:[%s20024_s12 + $0x1a8] sm:$0xff] }
 0x846   :  { %v8715_v19 = vpop.f32.mrf.mxu1  ;;  %20262 = vst [vmem:[#allocation39_spill] sm:$0xff] %v19284_v33  ;;  %v19320_v13 = vld [vmem:[%s20024_s12 + $0x148] sm:$0xff] }
 0x847   :  { %v8756_v34 = vpop.f32.mrf.mxu0  ;;  %v19279_v19 = vld [vmem:[%s20024_s12 + $0x1c0] sm:$0xff]  ;;  %20268 = vst [vmem:[#allocation45_spill] sm:$0xff] %v19320_v13 }
 0x848   :  { %v8716_v24 = vpop.f32.mrf.mxu1  ;;  %20261 = vst [vmem:[#allocation38_spill] sm:$0xff] %v19279_v19  ;;  %v19290_v34 = vld [vmem:[%s20024_s12 + $0x1a0] sm:$0xff] }
 0x849   :  { %v8757_v11 = vpop.f32.mrf.mxu0  ;;  %20263 = vst [vmem:[#allocation40_spill] sm:$0xff] %v19290_v34  ;;  %v19296_v24 = vld [vmem:[%s20024_s12 + $0x188] sm:$0xff] }
 0x84a   :  { %v19273_v11 = vld [vmem:[%s20024_s12 + $0x1c8] sm:$0xff]  ;;  %20264 = vst [vmem:[#allocation41_spill] sm:$0xff] %v19296_v24 }
 0x84b   :  { %20260 = vst [vmem:[#allocation37_spill] sm:$0xff] %v19273_v11  ;;  %9138 = vmatprep.subr.mxu1 %v19273_v11 }
 0x84c   :  { %9139 = vmatpush1.msra.mxu1 %v19279_v19 }
 0x84d   :  { %9140 = vmatprep.subr.mxu1 %v19284_v33 }
 0x84e   :  { %9141 = vmatpush1.msra.mxu1 %v19290_v34  ;;  %v19326_v34 = vld [vmem:[%s20024_s12 + $0x140] sm:$0xff] }
 0x84f   :  { %9142 = vmatprep.subr.mxu1 %v19296_v24  ;;  %20269 = vst [vmem:[#allocation46_spill] sm:$0xff] %v19326_v34  ;;  %v19332_v24 = vld [vmem:[%s20024_s12 + $0x128] sm:$0xff] }
 0x850   :  { %9143 = vmatpush1.msra.mxu1 %v19302_v31  ;;  %20270 = vst [vmem:[#allocation47_spill] sm:$0xff] %v19332_v24  ;;  %v19338_v31 = vld [vmem:[%s20024_s12 + $0x120] sm:$0xff] }
 0x851   :  { %9144 = vmatprep.subr.mxu1 %v19308_v62  ;;  %20271 = vst [vmem:[#allocation48_spill] sm:$0xff] %v19338_v31  ;;  %v19344_v62 = vld [vmem:[%s20024_s12 + $0x108] sm:$0xff] }
 0x852   :  { %9145 = vmatpush1.msra.mxu1 %v19314_v17  ;;  %20272 = vst [vmem:[#allocation49_spill] sm:$0xff] %v19344_v62  ;;  %v19350_v17 = vld [vmem:[%s20024_s12 + $0x100] sm:$0xff] }
 0x853   :  { %9146 = vmatprep.subr.mxu1 %v19320_v13  ;;  %20273 = vst [vmem:[#allocation50_spill] sm:$0xff] %v19350_v17  ;;  %v19356_v13 = vld [vmem:[%s20024_s12 + $0xe8] sm:$0xff] }
 0x854   :  { %9147 = vmatpush1.msra.mxu1 %v19326_v34  ;;  %20274 = vst [vmem:[#allocation51_spill] sm:$0xff] %v19356_v13  ;;  %v19362_v34 = vld [vmem:[%s20024_s12 + $0xe0] sm:$0xff] }
 0x855   :  { %9148 = vmatprep.subr.mxu1 %v19332_v24  ;;  %20275 = vst [vmem:[#allocation52_spill] sm:$0xff] %v19362_v34  ;;  %v19368_v24 = vld [vmem:[%s20024_s12 + $0xc8] sm:$0xff] }
 0x856   :  { %9149 = vmatpush1.msra.mxu1 %v19338_v31  ;;  %20276 = vst [vmem:[#allocation53_spill] sm:$0xff] %v19368_v24  ;;  %v19374_v31 = vld [vmem:[%s20024_s12 + $0xc0] sm:$0xff] }
 0x857   :  { %9150 = vmatprep.subr.mxu1 %v19344_v62  ;;  %20277 = vst [vmem:[#allocation54_spill] sm:$0xff] %v19374_v31  ;;  %v19380_v62 = vld [vmem:[%s20024_s12 + $0xa8] sm:$0xff] }
 0x858   :  { %9151 = vmatpush1.msra.mxu1 %v19350_v17  ;;  %20278 = vst [vmem:[#allocation55_spill] sm:$0xff] %v19380_v62  ;;  %v19386_v17 = vld [vmem:[%s20024_s12 + $0xa0] sm:$0xff] }
 0x859   :  { %9152 = vmatprep.subr.mxu1 %v19356_v13  ;;  %20279 = vst [vmem:[#allocation56_spill] sm:$0xff] %v19386_v17  ;;  %v19392_v13 = vld [vmem:[%s20024_s12 + $0x88] sm:$0xff] }
 0x85a   :  { %9153 = vmatpush1.msra.mxu1 %v19362_v34  ;;  %20280 = vst [vmem:[#allocation57_spill] sm:$0xff] %v19392_v13 }
 0x85b   :  { %9154 = vmatprep.subr.mxu1 %v19368_v24  ;;  %v6826_v24 = vrot.slane %v18637_v38, %v20224_v5  ;;  %v19524_v5 = vld [vmem:[%s20024_s12 + $0xb8] sm:$0xff] }
 0x85c   :  { %9155 = vmatpush1.msra.mxu1 %v19374_v31  ;;  %20291 = vst [vmem:[#allocation68_spill] sm:$0xff] %v19524_v5 }
 0x85d   :  { %9156 = vmatprep.subr.mxu1 %v19380_v62  ;;  %v8673_v34 = vadd.f32 %v19135_v15, %v6826_v24 }
 0x85e   :  { %9157 = vmatpush1.msra.mxu1 %v19386_v17 }
 0x85f   :  { %9158 = vmatprep.subr.mxu1 %v19392_v13  ;;  %v8714_v33 = vadd.f32 %v8713_v21, %v8673_v34 }
 0x861   :  { %v8755_v11 = vadd.f32 %v8754_v0, %v8714_v33 }
 0x882   :  { %v8793_v19 = vpop.f32.mrf.mxu1 }
 0x883   :  { %v8794_v31 = vadd.f32 %v8793_v19, %v8753_v22  ;;  %v8834_v47 = vpop.f32.mrf.mxu0 }
 0x884   :  { %v8795_v49 = vpop.f32.mrf.mxu1 }
 0x885   :  { %v19400_v12 = vadd.f32 %v8834_v47, %v8794_v31  ;;  %v8796_v30 = vadd.f32 %v8795_v49, %v8755_v11  ;;  %v8836_v6 = vpop.f32.mrf.mxu0  ;;  %v19427_v31 = vld [vmem:[%s20024_s12 + $0x1b8] sm:$0xff] }
 0x886   :  { %v8797_v62 = vpop.f32.mrf.mxu1 }
 0x887   :  { %v8855_v17 = vrot.slane %v19400_v12, 4  ;;  %v19403_v9 = vadd.f32 %v8836_v6, %v8796_v30  ;;  %v8838_v13 = vpop.f32.mrf.mxu0  ;;  %v19411_v6 = vld [vmem:[%s20024_s12 + $0x1f0] sm:$0xff] }
 0x888   :  { %v8798_v40 = vpop.f32.mrf.mxu1  ;;  %v19421_v30 = vld [vmem:[%s20024_s12 + $0x1d0] sm:$0xff] }
 0x889   :  { %v8856_v38 = vadd.f32 %v8855_v17, %v19400_v12  ;;  %v8861_v21 = vrot.slane %v19403_v9, 4  ;;  %v8839_v15 = vpop.f32.mrf.mxu0  ;;  %v19416_v40 = vld [vmem:[%s20024_s12 + $0x1d8] sm:$0xff]  ;;  %v19434_v62 = vld [vmem:[%s20024_s12 + $0x1b0] sm:$0xff] }
 0x88a   :  { %v19440_v17 = vld [vmem:[%s20024_s12 + $0x198] sm:$0xff]  ;;  %v19446_v13 = vld [vmem:[%s20024_s12 + $0x190] sm:$0xff] }
 0x88b   :  { %v8857_v0 = vrot.slane %v8856_v38, 2  ;;  %v8862_v22 = vadd.f32 %v8861_v21, %v19403_v9  ;;  %v19458_v21 = vld [vmem:[%s20024_s12 + $0x170] sm:$0xff]  ;;  %v19464_v15 = vld [vmem:[%s20024_s12 + $0x158] sm:$0xff] }
 0x88c   :  { %20281 = vst [vmem:[#allocation58_spill] sm:$0xff] %v19464_v15 }
 0x88d   :  { %v8858_v19 = vadd.f32 %v8857_v0, %v8856_v38  ;;  %v8863_v47 = vrot.slane %v8862_v22, 2  ;;  %v19452_v38 = vld [vmem:[%s20024_s12 + $0x178] sm:$0xff]  ;;  %v19470_v0 = vld [vmem:[%s20024_s12 + $0x150] sm:$0xff] }
 0x88e   :  { %20282 = vst [vmem:[#allocation59_spill] sm:$0xff] %v19470_v0 }
 0x88f   :  { %v8864_v33 = vadd.f32 %v8863_v47, %v8862_v22  ;;  %v8859_v49 = vrot.slane %v8858_v19, 1  ;;  %v19476_v22 = vld [vmem:[%s20024_s12 + $0x138] sm:$0xff] }
 0x890   :  { %20283 = vst [vmem:[#allocation60_spill] sm:$0xff] %v19476_v22  ;;  %v19488_v47 = vld [vmem:[%s20024_s12 + $0x118] sm:$0xff] }
 0x891   :  { %v8865_v11 = vrot.slane %v8864_v33, 1  ;;  %v8860_v24 = vadd.f32 %v8859_v49, %v8858_v19  ;;  %v19482_v19 = vld [vmem:[%s20024_s12 + $0x130] sm:$0xff]  ;;  %20285 = vst [vmem:[#allocation62_spill] sm:$0xff] %v19488_v47  ;;  %v19500_v49 = vld [vmem:[%s20024_s12 + $0xf8] sm:$0xff] }
 0x892   :  { %20284 = vst [vmem:[#allocation61_spill] sm:$0xff] %v19482_v19  ;;  %20287 = vst [vmem:[#allocation64_spill] sm:$0xff] %v19500_v49 }
 0x893   :  { %v8866_v34 = vadd.f32 %v8865_v11, %v8864_v33  ;;  %v19494_v33 = vld [vmem:[%s20024_s12 + $0x110] sm:$0xff] }
 0x894   :  { %20286 = vst [vmem:[#allocation63_spill] sm:$0xff] %v19494_v33  ;;  %v19506_v11 = vld [vmem:[%s20024_s12 + $0xf0] sm:$0xff] }
 0x895   :  { %9065 = vmatprep.mubr.f32.mxu0 %v8866_v34  ;;  %20288 = vst [vmem:[#allocation65_spill] sm:$0xff] %v19506_v11  ;;  %v19512_v34 = vld [vmem:[%s20024_s12 + $0xd8] sm:$0xff] }
 0x896   :  { %9066 = vmatmul.mubr.f32.vlgmr.msra.gmra.mxu0 %v8860_v24  ;;  %20289 = vst [vmem:[#allocation66_spill] sm:$0xff] %v19512_v34  ;;  %v19518_v24 = vld [vmem:[%s20024_s12 + $0xd0] sm:$0xff] }
 0x897   :  { %9208 = vmatpush1.msra.mxu0 %v19411_v6  ;;  %9271 = vmatprep.mubr.f32.mxu0 %v20202_v36  ;;  %20290 = vst [vmem:[#allocation67_spill] sm:$0xff] %v19518_v24  ;;  %v19530_v36 = vld [vmem:[%s20024_s12 + $0xb0] sm:$0xff] }
 0x898   :  { %9209 = vmatprep.subr.mxu0 %v19416_v40  ;;  %20292 = vst [vmem:[#allocation69_spill] sm:$0xff] %v19530_v36 }
 0x899   :  { %9210 = vmatpush1.msra.mxu0 %v19421_v30 }
 0x89a   :  { %9211 = vmatprep.subr.mxu0 %v19427_v31 }
 0x89b   :  { %9212 = vmatpush1.msra.mxu0 %v19434_v62 }
 0x89c   :  { %9213 = vmatprep.subr.mxu0 %v19440_v17 }
 0x89d   :  { %9214 = vmatpush1.msra.mxu0 %v19446_v13 }
 0x89e   :  { %9215 = vmatprep.subr.mxu0 %v19452_v38 }
 0x89f   :  { %9216 = vmatpush1.msra.mxu0 %v19458_v21 }
 0x8a0   :  { %9217 = vmatprep.subr.mxu0 %v19464_v15 }
 0x8a1   :  { %9218 = vmatpush1.msra.mxu0 %v19470_v0 }
 0x8a2   :  { %9219 = vmatprep.subr.mxu0 %v19476_v22 }
 0x8a3   :  { %9220 = vmatpush1.msra.mxu0 %v19482_v19 }
 0x8a4   :  { %9221 = vmatprep.subr.mxu0 %v19488_v47 }
 0x8a5   :  { %9222 = vmatpush1.msra.mxu0 %v19494_v33 }
 0x8a6   :  { %9223 = vmatprep.subr.mxu0 %v19500_v49  ;;  %v19536_v49 = vld [vmem:[%s20024_s12 + $0x98] sm:$0xff] }
 0x8a7   :  { %9224 = vmatpush1.msra.mxu0 %v19506_v11  ;;  %20293 = vst [vmem:[#allocation70_spill] sm:$0xff] %v19536_v49  ;;  %v19554_v11 = vld [vmem:[%s20024_s12 + $0x68] sm:$0xff] }
 0x8a8   :  { %9225 = vmatprep.subr.mxu0 %v19512_v34  ;;  %v19544_v34 = vld [vmem:[%s20024_s12 + $0x80] sm:$0xff]  ;;  %20296 = vst [vmem:[#allocation73_spill] sm:$0xff] %v19554_v11 }
 0x8a9   :  { %9226 = vmatpush1.msra.mxu0 %v19518_v24  ;;  %20294 = vst [vmem:[#allocation71_spill] sm:$0xff] %v19544_v34  ;;  %v19549_v24 = vld [vmem:[%s20024_s12 + $0x90] sm:$0xff]  ;;  %9159 = vmatpush1.msra.mxu1 %v19544_v34 }
 0x8aa   :  { %9227 = vmatprep.subr.mxu0 %v19524_v5  ;;  %20295 = vst [vmem:[#allocation72_spill] sm:$0xff] %v19549_v24  ;;  %9160 = vmatprep.subr.mxu1 %v19554_v11  ;;  %v19573_v34 = vld [vmem:[%s20024_s12 + $0x70] sm:$0xff]  ;;  %v19580_v11 = vld [vmem:[%s20024_s12 + $0x48] sm:$0xff] }
 0x8ab   :  { %9228 = vmatpush1.msra.mxu0 %v19530_v36  ;;  %v19568_v36 = vld [vmem:[%s20024_s12 + $0x60] sm:$0xff]  ;;  %20299 = vst [vmem:[#allocation76_spill] sm:$0xff] %v19573_v34  ;;  %20300 = vst [vmem:[#allocation77_spill] sm:$0xff] %v19580_v11  ;;  %v19643_v5 = vld [vmem:[%s20024_s12 + $0x10] sm:$0xff] }
 0x8ac   :  { %9229 = vmatprep.subr.mxu0 %v19536_v49  ;;  %v19561_v49 = vld [vmem:[%s20024_s12 + $0x78] sm:$0xff]  ;;  %20298 = vst [vmem:[#allocation75_spill] sm:$0xff] %v19568_v36  ;;  %9161 = vmatpush1.msra.mxu1 %v19568_v36  ;;  %v19592_v36 = vld [vmem:[%s20024_s12 + $0x40] sm:$0xff] }
 0x8ad   :  { %9230 = vmatpush1.msra.mxu0 %v19549_v24  ;;  %20297 = vst [vmem:[#allocation74_spill] sm:$0xff] %v19561_v49  ;;  %9162 = vmatprep.subr.mxu1 %v19580_v11  ;;  %20302 = vst [vmem:[#allocation79_spill] sm:$0xff] %v19592_v36  ;;  %v19604_v11 = vld [vmem:[%s20024_s12 + $0x28] sm:$0xff] }
 0x8ae   :  { %9231 = vmatprep.subr.mxu0 %v19561_v49  ;;  %v19585_v49 = vld [vmem:[%s20024_s12 + $0x58] sm:$0xff]  ;;  %9163 = vmatpush1.msra.mxu1 %v19592_v36  ;;  %20304 = vst [vmem:[#allocation81_spill] sm:$0xff] %v19604_v11  ;;  %v19616_v36 = vld [vmem:[%s20024_s12 + $0x20] sm:$0xff]  ;;  %v19626_v24 = vld [vmem:[%s20024_s12 + $0x8] sm:$0xff] }
 0x8af   :  { %9232 = vmatpush1.msra.mxu0 %v19573_v34  ;;  %20301 = vst [vmem:[#allocation78_spill] sm:$0xff] %v19585_v49  ;;  %v19597_v34 = vld [vmem:[%s20024_s12 + $0x50] sm:$0xff]  ;;  %9164 = vmatprep.subr.mxu1 %v19604_v11  ;;  %20306 = vst [vmem:[#allocation83_spill] sm:$0xff] %v19616_v36  ;;  %v19638_v11 = vld [vmem:[%s20024_s12] sm:$0xff] }
 0x8b0   :  { %9233 = vmatprep.subr.mxu0 %v19585_v49  ;;  %20303 = vst [vmem:[#allocation80_spill] sm:$0xff] %v19597_v34  ;;  %v19609_v49 = vld [vmem:[%s20024_s12 + $0x38] sm:$0xff]  ;;  %9165 = vmatpush1.msra.mxu1 %v19616_v36 }
 0x8b1   :  { %9234 = vmatpush1.msra.mxu0 %v19597_v34  ;;  %20305 = vst [vmem:[#allocation82_spill] sm:$0xff] %v19609_v49  ;;  %v19621_v34 = vld [vmem:[%s20024_s12 + $0x30] sm:$0xff]  ;;  %9166 = vmatprep.subr.mxu1 %v19626_v24 }
 0x8b2   :  { %9235 = vmatprep.subr.mxu0 %v19609_v49  ;;  %20307 = vst [vmem:[#allocation84_spill] sm:$0xff] %v19621_v34  ;;  %v19633_v49 = vld [vmem:[%s20024_s12 + $0x18] sm:$0xff]  ;;  %9167 = vmatpush1.msra.mxu1 %v19638_v11 }
 0x8b3   :  { %9236 = vmatpush1.msra.mxu0 %v19621_v34  ;;  %11739 = vmatprep.subr.mxu1 %v18843_v39  ;;  %v20309_v39 = vld [vmem:[#allocation13_spill] sm:$0xff] }
 0x8b4   :  { %9237 = vmatprep.subr.mxu0 %v19633_v49 }
 0x8b5   :  { %9238 = vmatpush1.msra.mxu0 %v19643_v5 }
 0x8b6   :  { %11774 = vmatprep.subr.mxu0 %v18915_v63  ;;  %v20321_v63 = vld [vmem:[#allocation19_spill] sm:$0xff] }
 0x8d4   :  { %v11701_v34 = vpop.f32.mrf.mxu1 }
 0x8d6   :  { %v11702_v36 = vpop.f32.mrf.mxu1 }
 0x8d7   :  { %v11703_v19 = vadd.f32 %v11702_v36, %v11701_v34  ;;  %v20308_v36 = vld [vmem:[#allocation26_spill] sm:$0xff] }
 0x956   :  { %v11736_v33 = vpop.f32.mrf.mxu0 }
 0x958   :  { %v11737_v47 = vpop.f32.mrf.mxu0 }
 0x959   :  { %v11738_v22 = vadd.f32 %v11737_v47, %v11736_v33 }
 0x95b   :  { %v9068_v0 = vadd.f32 %v11738_v22, %v11703_v19 }
 0x95d   :  { %v9071_v15 = vmul.f32 0.005, %v9068_v0 }
 0x95f   :  { %9201 = vmatmul.mubr.f32.vlgmr.msra.gmra.mxu1 %v9071_v15  ;;  %9272 = vmatmul.mubr.f32.vlgmr.msra.gmra.mxu0 %v9071_v15 }
 0x960   :  { %11740 = vmatpush3.msra.mxu1 %v18849_v35  ;;  %11775 = vmatpush3.msra.mxu0 %v18920_v37  ;;  %v20310_v35 = vld [vmem:[#allocation27_spill] sm:$0xff]  ;;  %v20322_v37 = vld [vmem:[#allocation12_spill] sm:$0xff] }
 0x961   :  { %11741 = vmatprep.subr.mxu1 %v18854_v60  ;;  %11776 = vmatprep.subr.mxu0 %v18925_v27  ;;  %v20311_v60 = vld [vmem:[#allocation14_spill] sm:$0xff]  ;;  %v20323_v27 = vld [vmem:[#allocation20_spill] sm:$0xff] }
 0x962   :  { %11742 = vmatpush3.msra.mxu1 %v18860_v45  ;;  %11777 = vmatpush3.msra.mxu0 %v18937_v54  ;;  %v20312_v45 = vld [vmem:[#allocation28_spill] sm:$0xff]  ;;  %v20325_v54 = vld [vmem:[#allocation21_spill] sm:$0xff] }
 0x963   :  { %11743 = vmatprep.subr.mxu1 %v18868_v57  ;;  %11778 = vmatprep.subr.mxu0 %v18949_v18  ;;  %v20314_v57 = vld [vmem:[#allocation29_spill] sm:$0xff]  ;;  %v20327_v18 = vld [vmem:[#allocation22_spill] sm:$0xff] }
 0x964   :  { %11744 = vmatpush3.msra.mxu1 %v18876_v29  ;;  %11779 = vmatpush3.msra.mxu0 %v18961_v28  ;;  %v20315_v29 = vld [vmem:[#allocation16_spill] sm:$0xff]  ;;  %v20329_v28 = vld [vmem:[#allocation23_spill] sm:$0xff] }
 0x965   :  { %11745 = vmatprep.subr.mxu1 %v18886_v55  ;;  %11780 = vmatprep.subr.mxu0 %v18973_v2  ;;  %v20316_v55 = vld [vmem:[#allocation30_spill] sm:$0xff] }
 0x966   :  { %11746 = vmatpush3.msra.mxu1 %v18892_v41  ;;  %11781 = vmatpush3.msra.mxu0 %v18985_v56  ;;  %v20317_v41 = vld [vmem:[#allocation17_spill] sm:$0xff]  ;;  %v20331_v2 = vld [vmem:[#allocation34_spill] sm:$0xff] }
 0x967   :  { %11747 = vmatprep.subr.mxu1 %v18898_v42  ;;  %11782 = vmatprep.subr.mxu0 %v18997_v7  ;;  %v20318_v42 = vld [vmem:[#allocation31_spill] sm:$0xff]  ;;  %v20333_v7 = vld [vmem:[#allocation5_spill] sm:$0xff] }
 0x968   :  { %11748 = vmatpush3.msra.mxu1 %v18904_v59  ;;  %11783 = vmatpush3.msra.mxu0 %v19009_v25  ;;  %v20319_v59 = vld [vmem:[#allocation18_spill] sm:$0xff] }
 0x969   :  { %11749 = vmatprep.subr.mxu1 %v18909_v20  ;;  %11784 = vmatprep.subr.mxu0 %v19021_v4  ;;  %v20320_v20 = vld [vmem:[#allocation10_spill] sm:$0xff] }
 0x96a   :  { %11750 = vmatpush3.msra.mxu1 %v18931_v61  ;;  %11785 = vmatpush3.msra.mxu0 %v19033_v50  ;;  %v20324_v61 = vld [vmem:[#allocation9_spill] sm:$0xff] }
 0x96b   :  { %11751 = vmatprep.subr.mxu1 %v18943_v10  ;;  %11786 = vmatprep.subr.mxu0 %v19124_v48  ;;  %v20326_v10 = vld [vmem:[#allocation11_spill] sm:$0xff] }
 0x96c   :  { %11752 = vmatpush3.msra.mxu1 %v18955_v53  ;;  %11787 = vmatpush3.msra.mxu0 %v19130_v58  ;;  %v20328_v53 = vld [vmem:[#allocation32_spill] sm:$0xff] }
 0x96d   :  { %11753 = vmatprep.subr.mxu1 %v18967_v1  ;;  %11788 = vmatprep.subr.mxu0 %v19141_v43  ;;  %v20330_v1 = vld [vmem:[#allocation33_spill] sm:$0xff] }
 0x96e   :  { %11754 = vmatpush3.msra.mxu1 %v18979_v3  ;;  %11789 = vmatpush3.msra.mxu0 %v19147_v44  ;;  %v20332_v3 = vld [vmem:[#allocation35_spill] sm:$0xff] }
 0x96f   :  { %11755 = vmatprep.subr.mxu1 %v18991_v32  ;;  %11790 = vmatprep.subr.mxu0 %v19155_v23  ;;  %v20335_v23 = vld [vmem:[#allocation25_spill] sm:$0xff] }
 0x970   :  { %11756 = vmatpush3.msra.mxu1 %v19003_v51  ;;  %11791 = vmatpush3.msra.mxu0 %v19161_v16  ;;  %v20313_v16 = vld [vmem:[#allocation15_spill] sm:$0xff] }
 0x971   :  { %11757 = vmatprep.subr.mxu1 %v19015_v14  ;;  %11792 = vmatprep.subr.mxu0 %v19168_v26 }
 0x972   :  { %11758 = vmatpush3.msra.mxu1 %v19027_v52  ;;  %11793 = vmatpush3.msra.mxu0 %v19174_v46  ;;  %v20334_v52 = vld [vmem:[#allocation24_spill] sm:$0xff] }
 0x973   :  { %11759 = vmatprep.subr.mxu1 %v19039_v8  ;;  %11794 = vmatprep.subr.mxu0 %v20308_v36 }
 0x974   :  { %11760 = vmatpush3.msra.mxu1 %v20309_v39  ;;  %11795 = vmatpush3.msra.mxu0 %v20310_v35 }
 0x975   :  { %11761 = vmatprep.subr.mxu1 %v20311_v60  ;;  %11796 = vmatprep.subr.mxu0 %v20312_v45 }
 0x976   :  { %11762 = vmatpush3.msra.mxu1 %v20313_v16  ;;  %11797 = vmatpush3.msra.mxu0 %v20314_v57 }
 0x977   :  { %11763 = vmatprep.subr.mxu1 %v20315_v29  ;;  %11798 = vmatprep.subr.mxu0 %v20316_v55 }
 0x978   :  { %11764 = vmatpush3.msra.mxu1 %v20317_v41  ;;  %11799 = vmatpush3.msra.mxu0 %v20318_v42 }
 0x979   :  { %11765 = vmatprep.subr.mxu1 %v20319_v59  ;;  %11800 = vmatprep.subr.mxu0 %v20320_v20 }
 0x97a   :  { %11766 = vmatpush3.msra.mxu1 %v20321_v63  ;;  %11801 = vmatpush3.msra.mxu0 %v20322_v37 }
 0x97b   :  { %11767 = vmatprep.subr.mxu1 %v20323_v27  ;;  %11802 = vmatprep.subr.mxu0 %v20324_v61 }
 0x97c   :  { %11768 = vmatpush3.msra.mxu1 %v20325_v54  ;;  %11803 = vmatpush3.msra.mxu0 %v20326_v10  ;;  %v20336_v54 = vld [vmem:[#allocation36_spill] sm:$0xff]  ;;  %v20337_v10 = vld [vmem:[#allocation37_spill] sm:$0xff] }
 0x97d   :  { %11769 = vmatprep.subr.mxu1 %v20327_v18  ;;  %11804 = vmatprep.subr.mxu0 %v20328_v53  ;;  %v20338_v18 = vld [vmem:[#allocation38_spill] sm:$0xff]  ;;  %v20339_v53 = vld [vmem:[#allocation39_spill] sm:$0xff] }
 0x97e   :  { %11770 = vmatpush3.msra.mxu1 %v20329_v28  ;;  %11805 = vmatpush3.msra.mxu0 %v20330_v1  ;;  %v20340_v28 = vld [vmem:[#allocation40_spill] sm:$0xff]  ;;  %v20341_v1 = vld [vmem:[#allocation41_spill] sm:$0xff] }
 0x97f   :  { %9467 = vmatprep.subr.mxu1 %v20331_v2  ;;  %9538 = vmatprep.subr.mxu0 %v20332_v3  ;;  %v20346_v2 = vld [vmem:[#allocation58_spill] sm:$0xff]  ;;  %v20348_v3 = vld [vmem:[#allocation59_spill] sm:$0xff] }
 0xa1f   :  { %v9202_v56 = vpop.f32.mrf.mxu1  ;;  %v9273_v32 = vpop.f32.mrf.mxu0 }
 0xa20   :  { %v9281_v51 = vrot.slane %v9202_v56, %v20333_v7  ;;  %v9289_v25 = vrot.slane %v9273_v32, %v20333_v7  ;;  %v20350_v56 = vld [vmem:[#allocation60_spill] sm:$0xff]  ;;  %v20352_v32 = vld [vmem:[#allocation61_spill] sm:$0xff] }
 0xa21   :  { %v9204_v14 = vpop.f32.mrf.mxu1  ;;  %v9275_v4 = vpop.f32.mrf.mxu0 }
 0xa22   :  { %v19718_v50 = vsub.f32 %v20334_v52, %v9281_v51  ;;  %v19721_v8 = vsub.f32 %v19400_v12, %v9289_v25  ;;  %v9285_v48 = vrot.slane %v9204_v14, %v20333_v7  ;;  %v9293_v58 = vrot.slane %v9275_v4, %v20333_v7  ;;  %v20354_v51 = vld [vmem:[#allocation62_spill] sm:$0xff]  ;;  %v20356_v25 = vld [vmem:[#allocation63_spill] sm:$0xff]  ;;  %v20358_v4 = vld [vmem:[#allocation64_spill] sm:$0xff] }
 0xa23   :  { %v20357_v14 = vld [vmem:[#allocation51_spill] sm:$0xff]  ;;  %v20359_v52 = vld [vmem:[#allocation52_spill] sm:$0xff] }
 0xa24   :  { %v9298_v43 = vmul.f32 %v19718_v50, %v19718_v50  ;;  %v9300_v44 = vmul.f32 %v19721_v8, %v19721_v8  ;;  %v19730_v26 = vsub.f32 %v20335_v23, %v9285_v48  ;;  %v19733_v46 = vsub.f32 %v19403_v9, %v9293_v58  ;;  %v20360_v48 = vld [vmem:[#allocation65_spill] sm:$0xff]  ;;  %v20364_v23 = vld [vmem:[#allocation67_spill] sm:$0xff] }
 0xa25   :  { %v20361_v58 = vld [vmem:[#allocation53_spill] sm:$0xff] }
 0xa26   :  { %v9302_v15 = vrot.slane %v9298_v43, 4  ;;  %v9314_v0 = vrot.slane %v9300_v44, 4  ;;  %v9299_v12 = vmul.f32 %v19730_v26, %v19730_v26  ;;  %v9301_v22 = vmul.f32 %v19733_v46, %v19733_v46 }
 0xa28   :  { %v9303_v19 = vadd.f32 %v9302_v15, %v9298_v43  ;;  %v9315_v47 = vadd.f32 %v9314_v0, %v9300_v44  ;;  %v9308_v33 = vrot.slane %v9299_v12, 4  ;;  %v9320_v34 = vrot.slane %v9301_v22, 4  ;;  %v20362_v43 = vld [vmem:[#allocation66_spill] sm:$0xff]  ;;  %v20365_v15 = vld [vmem:[#allocation55_spill] sm:$0xff]  ;;  %v20366_v0 = vld [vmem:[#allocation68_spill] sm:$0xff] }
 0xa29   :  { %v20363_v44 = vld [vmem:[#allocation54_spill] sm:$0xff] }
 0xa2a   :  { %v9304_v36 = vrot.slane %v9303_v19, 2  ;;  %v9316_v39 = vrot.slane %v9315_v47, 2  ;;  %v9309_v35 = vadd.f32 %v9308_v33, %v9299_v12  ;;  %v9321_v60 = vadd.f32 %v9320_v34, %v9301_v22  ;;  %v20367_v12 = vld [vmem:[#allocation56_spill] sm:$0xff]  ;;  %v20368_v22 = vld [vmem:[#allocation69_spill] sm:$0xff]  ;;  %v20371_v33 = vld [vmem:[#allocation71_spill] sm:$0xff] }
 0xa2b   :  { %v20372_v34 = vld [vmem:[#allocation72_spill] sm:$0xff] }
 0xa2c   :  { %v9305_v45 = vadd.f32 %v9304_v36, %v9303_v19  ;;  %v9317_v16 = vadd.f32 %v9316_v39, %v9315_v47  ;;  %v9310_v9 = vrot.slane %v9309_v35, 2  ;;  %v9322_v57 = vrot.slane %v9321_v60, 2  ;;  %v20369_v19 = vld [vmem:[#allocation57_spill] sm:$0xff]  ;;  %v20370_v47 = vld [vmem:[#allocation70_spill] sm:$0xff] }
 0xa2d   :  { %v20373_v36 = vld [vmem:[#allocation73_spill] sm:$0xff]  ;;  %v20374_v39 = vld [vmem:[#allocation74_spill] sm:$0xff] }
 0xa2e   :  { %v9311_v29 = vadd.f32 %v9310_v9, %v9309_v35  ;;  %v9323_v55 = vadd.f32 %v9322_v57, %v9321_v60  ;;  %v9306_v41 = vrot.slane %v9305_v45, 1  ;;  %v9318_v42 = vrot.slane %v9317_v16, 1  ;;  %v20375_v35 = vld [vmem:[#allocation75_spill] sm:$0xff]  ;;  %v20376_v60 = vld [vmem:[#allocation76_spill] sm:$0xff] }
 0xa2f   :  { %v20379_v9 = vld [vmem:[#allocation79_spill] sm:$0xff]  ;;  %v20380_v57 = vld [vmem:[#allocation80_spill] sm:$0xff] }
 0xa30   :  { %v9312_v59 = vrot.slane %v9311_v29, 1  ;;  %v9324_v20 = vrot.slane %v9323_v55, 1  ;;  %v9307_v27 = vadd.f32 %v9306_v41, %v9305_v45  ;;  %v9319_v61 = vadd.f32 %v9318_v42, %v9317_v16  ;;  %v20377_v45 = vld [vmem:[#allocation77_spill] sm:$0xff]  ;;  %v20378_v16 = vld [vmem:[#allocation78_spill] sm:$0xff]  ;;  %v20383_v41 = vld [vmem:[#allocation83_spill] sm:$0xff] }
 0xa31   :  { %v20384_v42 = vld [vmem:[#allocation84_spill] sm:$0xff] }
 0xa32   :  { %v9313_v63 = vadd.f32 %v9312_v59, %v9311_v29  ;;  %v9325_v37 = vadd.f32 %v9324_v20, %v9323_v55  ;;  %v20381_v29 = vld [vmem:[#allocation81_spill] sm:$0xff]  ;;  %v20382_v55 = vld [vmem:[#allocation82_spill] sm:$0xff]  ;;  %v20385_v59 = vmov 0.0  }
 0xa34   :  { %9390 = vmatprep.mubr.f32.mxu1 %v9313_v63  ;;  %9460 = vmatprep.mubr.f32.mxu0 %v9325_v37 }
 0xa35   :  { %9391 = vmatmul.mubr.f32.vlgmr.msra.gmra.mxu1 %v9307_v27  ;;  %9461 = vmatmul.mubr.f32.vlgmr.msra.gmra.mxu0 %v9319_v61 }
 0xa36   :  { %9468 = vmatpush1.msra.mxu1 %v20336_v54  ;;  %9539 = vmatpush1.msra.mxu0 %v19411_v6  ;;  %v20342_v6 = vld [vmem:[#allocation42_spill] sm:$0xff] }
 0xa37   :  { %9469 = vmatprep.subr.mxu1 %v20337_v10  ;;  %9540 = vmatprep.subr.mxu0 %v19416_v40  ;;  %v20343_v40 = vld [vmem:[#allocation43_spill] sm:$0xff] }
 0xa38   :  { %9470 = vmatpush1.msra.mxu1 %v20338_v18  ;;  %9541 = vmatpush1.msra.mxu0 %v19421_v30  ;;  %v20344_v30 = vld [vmem:[#allocation44_spill] sm:$0xff] }
 0xa39   :  { %9471 = vmatprep.subr.mxu1 %v20339_v53  ;;  %9542 = vmatprep.subr.mxu0 %v19427_v31  ;;  %v20345_v31 = vld [vmem:[#allocation45_spill] sm:$0xff] }
 0xa3a   :  { %9472 = vmatpush1.msra.mxu1 %v20340_v28  ;;  %9543 = vmatpush1.msra.mxu0 %v19434_v62  ;;  %v20347_v62 = vld [vmem:[#allocation46_spill] sm:$0xff]  ;;  %v13246_v53 = vld [vmem:[%s20025_s13 + $0x70] sm:$0xff]  }
 0xa3b   :  { %9473 = vmatprep.subr.mxu1 %v20341_v1  ;;  %9544 = vmatprep.subr.mxu0 %v19440_v17  ;;  %v20349_v17 = vld [vmem:[#allocation47_spill] sm:$0xff]  ;;  %v13247_v28 = vld [vmem:[%s20025_s13 + $0xf0] sm:$0xff]  }
 0xa3c   :  { %9474 = vmatpush1.msra.mxu1 %v20342_v6  ;;  %9545 = vmatpush1.msra.mxu0 %v19446_v13  ;;  %v20351_v13 = vld [vmem:[#allocation48_spill] sm:$0xff]  ;;  %v13248_v1 = vld [vmem:[%s20025_s13 + $0x30] sm:$0xff]  }
 0xa3d   :  { %9475 = vmatprep.subr.mxu1 %v20343_v40  ;;  %9546 = vmatprep.subr.mxu0 %v19452_v38  ;;  %v20353_v38 = vld [vmem:[#allocation49_spill] sm:$0xff]  ;;  %v13250_v40 = vld [vmem:[%s20025_s13 + $0x68] sm:$0xff]  }
 0xa3e   :  { %9476 = vmatpush1.msra.mxu1 %v20344_v30  ;;  %9547 = vmatpush1.msra.mxu0 %v19458_v21  ;;  %v20355_v21 = vld [vmem:[#allocation50_spill] sm:$0xff]  ;;  %v13249_v6 = vld [vmem:[%s20025_s13 + $0xb0] sm:$0xff]   ;;  %v13251_v30 = vld [vmem:[%s20025_s13 + $0xe8] sm:$0xff]  }
 0xa3f   :  { %9477 = vmatprep.subr.mxu1 %v20345_v31  ;;  %9548 = vmatprep.subr.mxu0 %v20346_v2  ;;  %v13252_v31 = vld [vmem:[%s20025_s13 + $0x28] sm:$0xff]  }
 0xa40   :  { %9478 = vmatpush1.msra.mxu1 %v20347_v62  ;;  %9549 = vmatpush1.msra.mxu0 %v20348_v3  ;;  %v13253_v2 = vld [vmem:[%s20025_s13 + $0xa8] sm:$0xff]   ;;  %v13254_v62 = vld [vmem:[%s20025_s13 + $0x60] sm:$0xff]  }
 0xa41   :  { %9479 = vmatprep.subr.mxu1 %v20349_v17  ;;  %9550 = vmatprep.subr.mxu0 %v20350_v56  ;;  %v13255_v3 = vld [vmem:[%s20025_s13 + $0xe0] sm:$0xff]  }
 0xa42   :  { %9480 = vmatpush1.msra.mxu1 %v20351_v13  ;;  %9551 = vmatpush1.msra.mxu0 %v20352_v32  ;;  %v13256_v17 = vld [vmem:[%s20025_s13 + $0x20] sm:$0xff]   ;;  %v13258_v13 = vld [vmem:[%s20025_s13 + $0x58] sm:$0xff]  }
 0xa43   :  { %9481 = vmatprep.subr.mxu1 %v20353_v38  ;;  %9552 = vmatprep.subr.mxu0 %v20354_v51  ;;  %v13257_v56 = vld [vmem:[%s20025_s13 + $0xa0] sm:$0xff]   ;;  %v13259_v32 = vld [vmem:[%s20025_s13 + $0xd8] sm:$0xff]  }
 0xa44   :  { %9482 = vmatpush1.msra.mxu1 %v20355_v21  ;;  %9553 = vmatpush1.msra.mxu0 %v20356_v25  ;;  %v13260_v38 = vld [vmem:[%s20025_s13 + $0x18] sm:$0xff]   ;;  %v13262_v21 = vld [vmem:[%s20025_s13 + $0x50] sm:$0xff]  }
 0xa45   :  { %9483 = vmatprep.subr.mxu1 %v20357_v14  ;;  %9554 = vmatprep.subr.mxu0 %v20358_v4  ;;  %v13261_v51 = vld [vmem:[%s20025_s13 + $0x98] sm:$0xff]   ;;  %v13263_v25 = vld [vmem:[%s20025_s13 + $0xd0] sm:$0xff]  }
 0xa46   :  { %9484 = vmatpush1.msra.mxu1 %v20359_v52  ;;  %9555 = vmatpush1.msra.mxu0 %v20360_v48  ;;  %v13264_v14 = vld [vmem:[%s20025_s13 + $0x10] sm:$0xff]   ;;  %v13266_v52 = vld [vmem:[%s20025_s13 + $0x48] sm:$0xff]  }
 0xa47   :  { %9485 = vmatprep.subr.mxu1 %v20361_v58  ;;  %9556 = vmatprep.subr.mxu0 %v20362_v43  ;;  %v13265_v4 = vld [vmem:[%s20025_s13 + $0x90] sm:$0xff]   ;;  %v13267_v48 = vld [vmem:[%s20025_s13 + $0xc8] sm:$0xff]  }
 0xa48   :  { %9486 = vmatpush1.msra.mxu1 %v20363_v44  ;;  %9557 = vmatpush1.msra.mxu0 %v20364_v23  ;;  %v13268_v58 = vld [vmem:[%s20025_s13 + $0x8] sm:$0xff]   ;;  %v13270_v44 = vld [vmem:[%s20025_s13 + $0x40] sm:$0xff]  }
 0xa49   :  { %9487 = vmatprep.subr.mxu1 %v20365_v15  ;;  %9558 = vmatprep.subr.mxu0 %v20366_v0  ;;  %v13269_v43 = vld [vmem:[%s20025_s13 + $0x88] sm:$0xff]   ;;  %v13271_v23 = vld [vmem:[%s20025_s13 + $0xc0] sm:$0xff]  }
 0xa4a   :  { %9488 = vmatpush1.msra.mxu1 %v20367_v12  ;;  %9559 = vmatpush1.msra.mxu0 %v20368_v22  ;;  %v13272_v15 = vld [vmem:[%s20025_s13] sm:$0xff]  }
 0xa4b   :  { %9489 = vmatprep.subr.mxu1 %v20369_v19  ;;  %9560 = vmatprep.subr.mxu0 %v20370_v47  ;;  %v13273_v0 = vld [vmem:[%s20025_s13 + $0x80] sm:$0xff]  }
 0xa4c   :  { %9490 = vmatpush1.msra.mxu1 %v20371_v33  ;;  %9561 = vmatpush1.msra.mxu0 %v20372_v34 }
 0xa4d   :  { %9491 = vmatprep.subr.mxu1 %v20373_v36  ;;  %9562 = vmatprep.subr.mxu0 %v20374_v39 }
 0xa4e   :  { %9492 = vmatpush1.msra.mxu1 %v20375_v35  ;;  %9563 = vmatpush1.msra.mxu0 %v20376_v60  ;;  %v8841_v35 = vld [vmem:[%s20021_s9] sm:$0xf] }
 0xa4f   :  { %9493 = vmatprep.subr.mxu1 %v20377_v45  ;;  %9564 = vmatprep.subr.mxu0 %v20378_v16  ;;  %v8842_v45 = vld [vmem:[%s20022_s10] sm:$0xf] }
 0xa50   :  { %9494 = vmatpush1.msra.mxu1 %v20379_v9  ;;  %9565 = vmatpush1.msra.mxu0 %v20380_v57  ;;  %v9637_v57 = vrot.slane %v8841_v35, %v20333_v7 }
 0xa51   :  { %9495 = vmatprep.subr.mxu1 %v20381_v29  ;;  %9566 = vmatprep.subr.mxu0 %v20382_v55 }
 0xa52   :  { %9496 = vmatpush1.msra.mxu1 %v20383_v41  ;;  %9567 = vmatpush1.msra.mxu0 %v20384_v42  ;;  %v20386_v41 = vld [vmem:[#allocation7_spill] sm:$0xff] }
 0xa53   :  { %9497 = vmatprep.subr.mxu1 %v19626_v24  ;;  %9568 = vmatprep.subr.mxu0 %v19633_v49  ;;  %v13242_v49 = vld [vmem:[%s20025_s13 + $0x78] sm:$0xff]   ;;  %v9645_v42 = vrot.slane %v8841_v35, %v20386_v41 }
 0xa54   :  { %9498 = vmatpush1.msra.mxu1 %v19638_v11  ;;  %9531 = vmatprep.mubr.f32.mxu1 %v20385_v59  ;;  %v13244_v11 = vld [vmem:[%s20025_s13 + $0x38] sm:$0xff]  }
 0xa55   :  { %9569 = vmatpush1.msra.mxu0 %v19643_v5  ;;  %9602 = vmatprep.mubr.f32.mxu0 %v20385_v59  ;;  %v13243_v5 = vld [vmem:[%s20025_s13 + $0xf8] sm:$0xff]  }
 0xa56   :  { %v13245_v24 = vld [vmem:[%s20025_s13 + $0xb8] sm:$0xff]   ;;  %11809 = vmatprep.subr.bf16.mxu1 %v13242_v49  ;;  %11831 = vmatprep.subr.bf16.mxu0 %v13243_v5 }
 0xaf5   :  { %v11771_v20 = vpop.f32.mrf.mxu1  ;;  %v11806_v63 = vpop.f32.mrf.mxu0 }
 0xaf7   :  { %v11772_v37 = vpop.f32.mrf.mxu1  ;;  %v11807_v27 = vpop.f32.mrf.mxu0 }
 0xaf8   :  { %v11773_v61 = vadd.f32 %v11772_v37, %v11771_v20  ;;  %v11808_v54 = vadd.f32 %v11807_v27, %v11806_v63  ;;  %v20387_v37 = vld [vmem:[#allocation6_spill] sm:$0xff] }
 0xaf9   :  { %v9641_v27 = vrot.slane %v8841_v35, %v20387_v37 }
 0xafa   :  { %v9463_v10 = vadd.f32 %v11808_v54, %v11773_v61  ;;  %v9662_v54 = vrot.slane %v8842_v45, %v20333_v7 }
 0xafc   :  { %v9466_v18 = vmul.f32 0.005, %v9463_v10 }
 0xafe   :  { %9532 = vmatmul.mubr.f32.vlgmr.msra.gmra.mxu1 %v9466_v18  ;;  %9603 = vmatmul.mubr.f32.vlgmr.msra.gmra.mxu0 %v9466_v18  ;;  %v20388_v18 = vld [vmem:[#allocation8_spill] sm:$0xff] }
 0xaff   :  { %11810 = vmatpush3.bf16.msra.mxu1 %v13244_v11  ;;  %11832 = vmatpush3.bf16.msra.mxu0 %v13245_v24  ;;  %v9649_v49 = vrot.slane %v8841_v35, %v20388_v18  ;;  %v9670_v11 = vrot.slane %v8842_v45, %v20386_v41  ;;  %v11264_v35 = vld [vmem:[%s20026_s14] ss:$0 sm:$0xff] }
 0xb00   :  { %11811 = vmatprep.subr.bf16.mxu1 %v13246_v53  ;;  %11833 = vmatprep.subr.bf16.mxu0 %v13247_v28  ;;  %v9666_v53 = vrot.slane %v8842_v45, %v20387_v37 }
 0xb03   :  { %11812 = vmatpush3.bf16.msra.mxu1 %v13248_v1  ;;  %11834 = vmatpush3.bf16.msra.mxu0 %v13249_v6  ;;  %v9674_v6 = vrot.slane %v8842_v45, %v20388_v18 }
 0xb04   :  { %11813 = vmatprep.subr.bf16.mxu1 %v13250_v40  ;;  %11835 = vmatprep.subr.bf16.mxu0 %v13251_v30 }
 0xb07   :  { %11814 = vmatpush3.bf16.msra.mxu1 %v13252_v31  ;;  %11836 = vmatpush3.bf16.msra.mxu0 %v13253_v2 }
 0xb08   :  { %11815 = vmatprep.subr.bf16.mxu1 %v13254_v62  ;;  %11837 = vmatprep.subr.bf16.mxu0 %v13255_v3 }
 0xb0b   :  { %11816 = vmatpush3.bf16.msra.mxu1 %v13256_v17  ;;  %11838 = vmatpush3.bf16.msra.mxu0 %v13257_v56 }
 0xb0c   :  { %11817 = vmatprep.subr.bf16.mxu1 %v13258_v13  ;;  %11839 = vmatprep.subr.bf16.mxu0 %v13259_v32 }
 0xb0f   :  { %11818 = vmatpush3.bf16.msra.mxu1 %v13260_v38  ;;  %11840 = vmatpush3.bf16.msra.mxu0 %v13261_v51 }
 0xb10   :  { %11819 = vmatprep.subr.bf16.mxu1 %v13262_v21  ;;  %11841 = vmatprep.subr.bf16.mxu0 %v13263_v25 }
 0xb13   :  { %11820 = vmatpush3.bf16.msra.mxu1 %v13264_v14  ;;  %11842 = vmatpush3.bf16.msra.mxu0 %v13265_v4 }
 0xb14   :  { %11821 = vmatprep.subr.bf16.mxu1 %v13266_v52  ;;  %11843 = vmatprep.subr.bf16.mxu0 %v13267_v48 }
 0xb17   :  { %11822 = vmatpush3.bf16.msra.mxu1 %v13268_v58  ;;  %11844 = vmatpush3.bf16.msra.mxu0 %v13269_v43 }
 0xb18   :  { %11823 = vmatprep.subr.bf16.mxu1 %v13270_v44  ;;  %11845 = vmatprep.subr.bf16.mxu0 %v13271_v23 }
 0xb1b   :  { %11824 = vmatpush3.bf16.msra.mxu1 %v13272_v15  ;;  %11846 = vmatpush3.bf16.msra.mxu0 %v13273_v0  ;;  %v13274_v15 = vld [vmem:[%s20029_s17 + $0x38] sm:$0xff]   ;;  %v13275_v0 = vld [vmem:[%s20029_s17 + $0x30] sm:$0xff]  }
 0xb1c   :  { %11871 = vmatprep.subr.bf16.mxu1 %v20385_v59  ;;  %11891 = vmatprep.subr.bf16.mxu0 %v20385_v59 }
 0xbbe   :  { %v9533_v12 = vpop.f32.mrf.mxu1  ;;  %v9604_v22 = vpop.f32.mrf.mxu0 }
 0xbbf   :  { %v9534_v19 = vadd.f32 1e-05, %v9533_v12  ;;  %v9605_v47 = vadd.f32 1e-05, %v9604_v22  ;;  %v13276_v12 = vld [vmem:[%s20029_s17 + $0x28] sm:$0xff]   ;;  %v13277_v22 = vld [vmem:[%s20029_s17 + $0x20] sm:$0xff]  }
 0xbc0   :  { %v9535_v33 = vpop.f32.mrf.mxu1  ;;  %v9606_v34 = vpop.f32.mrf.mxu0 }
 0xbc1   :  { %13330 = vrsqrt.f32 %v9534_v19  ;;  %v9536_v36 = vadd.f32 1e-05, %v9535_v33  ;;  %v9607_v39 = vadd.f32 1e-05, %v9606_v34  ;;  %v13278_v19 = vld [vmem:[%s20029_s17 + $0x18] sm:$0xff]   ;;  %v13280_v33 = vld [vmem:[%s20029_s17 + $0x8] sm:$0xff]  }
 0xbc2   :  { %13332 = vrsqrt.f32 %v9605_v47  ;;  %v13279_v47 = vld [vmem:[%s20029_s17 + $0x10] sm:$0xff]   ;;  %v13281_v34 = vld [vmem:[%s20029_s17] sm:$0xff]  }
 0xbc3   :  { %13334 = vrsqrt.f32 %v9536_v36 }
 0xbc4   :  { %13336 = vrsqrt.f32 %v9607_v39 }
 0xbce   :  { %v13331_v60 = vpop.eup %13330 }
 0xbcf   :  { %v13333_v16 = vpop.eup %13332  ;;  %v9616_v9 = vrot.slane %v13331_v60, %v20333_v7 }
 0xbd0   :  { %v13335_v29 = vpop.eup %13334  ;;  %v9624_v55 = vrot.slane %v13333_v16, %v20333_v7 }
 0xbd1   :  { %v13337_v20 = vpop.eup %13336  ;;  %v9620_v63 = vrot.slane %v13335_v29, %v20333_v7  ;;  %v9629_v61 = vmul.f32 %v9616_v9, %v19718_v50 }
 0xbd2   :  { %v9628_v10 = vrot.slane %v13337_v20, %v20333_v7  ;;  %v9631_v5 = vmul.f32 %v9624_v55, %v19721_v8 }
 0xbd3   :  { %v9630_v24 = vmul.f32 %v9620_v63, %v19730_v26  ;;  %v9654_v28 = vmul.f32 %v9637_v57, %v9629_v61 }
 0xbd4   :  { %v9632_v1 = vmul.f32 %v9628_v10, %v19733_v46  ;;  %v9656_v50 = vmul.f32 %v9645_v42, %v9631_v5 }
 0xbd5   :  { %v9655_v40 = vmul.f32 %v9641_v27, %v9630_v24  ;;  %v9679_v30 = vadd.f32 %v9662_v54, %v9654_v28 }
 0xbd6   :  { %v9657_v31 = vmul.f32 %v9649_v49, %v9632_v1  ;;  %v9681_v7 = vadd.f32 %v9670_v11, %v9656_v50 }
 0xbd7   :  { %v9680_v2 = vadd.f32 %v9666_v53, %v9655_v40  ;;  %v9683_v62 = vmul.f32 0.5, %v9679_v30 }
 0xbd8   :  { %v9682_v3 = vadd.f32 %v9674_v6, %v9657_v31  ;;  %v9685_v8 = vmul.f32 0.5, %v9681_v7  ;;  %v11297_v31 = vld [vmem:[%s20027_s15] ss:$0 sm:$0xff] }
 0xbd9   :  { %v9684_v17 = vmul.f32 0.5, %v9680_v2  ;;  %13338 = vtanh.f32 %v9683_v62  ;;  %v11298_v2 = vld [vmem:[%s20028_s16] ss:$0 sm:$0xff] }
 0xbda   :  { %v9686_v56 = vmul.f32 0.5, %v9682_v3  ;;  %13340 = vtanh.f32 %v9685_v8 }
 0xbdb   :  { %13342 = vtanh.f32 %v9684_v17 }
 0xbdc   :  { %13344 = vtanh.f32 %v9686_v56 }
 0xbe6   :  { %v13339_v26 = vpop.eup %13338 }
 0xbe7   :  { %v13341_v13 = vpop.eup %13340  ;;  %v9691_v46 = vadd.f32 1.0, %v13339_v26 }
 0xbe8   :  { %v13343_v32 = vpop.eup %13342  ;;  %v9693_v38 = vadd.f32 1.0, %v13341_v13 }
 0xbe9   :  { %v13345_v51 = vpop.eup %13344  ;;  %v9692_v21 = vadd.f32 1.0, %v13343_v32  ;;  %v9695_v14 = vmul.f32 0.5, %v9691_v46  ;;  %v13282_v46 = vld [vmem:[%s20033_s21 + $0x38] sm:$0xff]   ;;  %v13283_v32 = vld [vmem:[%s20033_s21 + $0x30] sm:$0xff]  }
 0xbea   :  { %v9694_v25 = vadd.f32 1.0, %v13345_v51  ;;  %v9697_v52 = vmul.f32 0.5, %v9693_v38  ;;  %v13284_v38 = vld [vmem:[%s20033_s21 + $0x28] sm:$0xff]   ;;  %v13285_v51 = vld [vmem:[%s20033_s21 + $0x20] sm:$0xff]  }
 0xbeb   :  { %v9696_v4 = vmul.f32 0.5, %v9692_v21  ;;  %v9699_v44 = vpack.c.bf16 %v9695_v14, %v9695_v14  ;;  %v13286_v21 = vld [vmem:[%s20033_s21 + $0x18] sm:$0xff]   ;;  %v13288_v14 = vld [vmem:[%s20033_s21 + $0x8] sm:$0xff]  }
 0xbec   :  { %v9698_v48 = vmul.f32 0.5, %v9694_v25  ;;  %v9701_v23 = vpack.c.bf16 %v9697_v52, %v9697_v52  ;;  %v13287_v25 = vld [vmem:[%s20033_s21 + $0x10] sm:$0xff]   ;;  %v11299_v52 = vld [vmem:[%s20030_s18] ss:$0 sm:$0xff] }
 0xbed   :  { %v9700_v58 = vpack.c.bf16 %v9696_v4, %v9696_v4  ;;  %v13289_v4 = vld [vmem:[%s20033_s21] sm:$0xff]  }
 0xbee   :  { %v9702_v43 = vpack.c.bf16 %v9698_v48, %v9698_v48 }
 0xbef   :  { %9998 = vmatprep.mubr.bf16.mxu1 %v9700_v58 }
 0xbf0   :  { %10038 = vmatprep.mubr.bf16.mxu0 %v9702_v43  ;;  %9999 = vmatmul.mubr.bf16.vlgmr.msra.gmra.mxu1 %v9699_v44 }
 0xbf1   :  { %10039 = vmatmul.mubr.bf16.vlgmr.msra.gmra.mxu0 %v9701_v23  ;;  %11872 = vmatpush3.bf16.msra.mxu1 %v13274_v15 }
 0xbf2   :  { %11873 = vmatprep.subr.bf16.mxu1 %v20385_v59  ;;  %11887 = vmatprep.mubr.msk.bf16.mxu1 %vm13660_vm0, %v20385_v59 }
 0xbf3   :  { %11907 = vmatprep.mubr.msk.bf16.mxu0 %vm13660_vm0, %v20385_v59  ;;  %11892 = vmatpush3.bf16.msra.mxu0 %v13282_v46 }
 0xbf4   :  { %11893 = vmatprep.subr.bf16.mxu0 %v20385_v59 }
 0xbf5   :  { %11874 = vmatpush3.bf16.msra.mxu1 %v13275_v0 }
 0xbf6   :  { %11875 = vmatprep.subr.bf16.mxu1 %v20385_v59 }
 0xbf7   :  { %11894 = vmatpush3.bf16.msra.mxu0 %v13283_v32 }
 0xbf8   :  { %11895 = vmatprep.subr.bf16.mxu0 %v20385_v59 }
 0xbf9   :  { %11876 = vmatpush3.bf16.msra.mxu1 %v13276_v12 }
 0xbfa   :  { %11877 = vmatprep.subr.bf16.mxu1 %v20385_v59 }
 0xbfb   :  { %11896 = vmatpush3.bf16.msra.mxu0 %v13284_v38 }
 0xbfc   :  { %11897 = vmatprep.subr.bf16.mxu0 %v20385_v59 }
 0xbfd   :  { %11878 = vmatpush3.bf16.msra.mxu1 %v13277_v22 }
 0xbfe   :  { %11879 = vmatprep.subr.bf16.mxu1 %v20385_v59 }
 0xbff   :  { %11898 = vmatpush3.bf16.msra.mxu0 %v13285_v51 }
 0xc00   :  { %11899 = vmatprep.subr.bf16.mxu0 %v20385_v59 }
 0xc01   :  { %11880 = vmatpush3.bf16.msra.mxu1 %v13278_v19 }
 0xc02   :  { %11881 = vmatprep.subr.bf16.mxu1 %v20385_v59 }
 0xc03   :  { %11900 = vmatpush3.bf16.msra.mxu0 %v13286_v21 }
 0xc04   :  { %11901 = vmatprep.subr.bf16.mxu0 %v20385_v59 }
 0xc05   :  { %11882 = vmatpush3.bf16.msra.mxu1 %v13279_v47 }
 0xc06   :  { %11883 = vmatprep.subr.bf16.mxu1 %v20385_v59 }
 0xc07   :  { %11902 = vmatpush3.bf16.msra.mxu0 %v13287_v25 }
 0xc08   :  { %11903 = vmatprep.subr.bf16.mxu0 %v20385_v59 }
 0xc09   :  { %11884 = vmatpush3.bf16.msra.mxu1 %v13280_v33 }
 0xc0a   :  { %11885 = vmatprep.subr.bf16.mxu1 %v20385_v59 }
 0xc0b   :  { %11904 = vmatpush3.bf16.msra.mxu0 %v13288_v14 }
 0xc0c   :  { %11905 = vmatprep.subr.bf16.mxu0 %v20385_v59 }
 0xc0d   :  { %11886 = vmatpush3.bf16.msra.mxu1 %v13281_v34 }
 0xc0f   :  { %11906 = vmatpush3.bf16.msra.mxu0 %v13289_v4 }
 0xcb0   :  { %v11825_v36 = vpop.f32.mrf.mxu1 }
 0xcb1   :  { %v11847_v39 = vpop.f32.mrf.mxu0 }
 0xcb2   :  { %v11826_v60 = vpop.f32.mrf.mxu1 }
 0xcb3   :  { %v11827_v45 = vadd.f32 %v11826_v60, %v11825_v36  ;;  %v11848_v16 = vpop.f32.mrf.mxu0 }
 0xcb4   :  { %v11828_v9 = vpop.f32.mrf.mxu1  ;;  %v11849_v29 = vadd.f32 %v11848_v16, %v11847_v39 }
 0xcb5   :  { %v10001_v57 = vadd.f32 %v11827_v45, %v11264_v35  ;;  %v11850_v55 = vpop.f32.mrf.mxu0 }
 0xcb6   :  { %v11829_v41 = vpop.f32.mrf.mxu1  ;;  %v11308_v55 = vld [vmem:[%s20031_s19] ss:$0 sm:$0xff]  ;;  %s13661_s19 = smov [#allocation2]  }
 0xcb7   :  { %v10041_v42 = vadd.f32 %v11849_v29, %v10001_v57  ;;  %v11851_v20 = vpop.f32.mrf.mxu0 }
 0xcb9   :  { %v10048_v63 = vrot.slane %v10041_v42, 4 }
 0xcbb   :  { %v10049_v37 = vadd.f32 %v10048_v63, %v10041_v42 }
 0xcbd   :  { %v10050_v27 = vrot.slane %v10049_v37, 2 }
 0xcbf   :  { %v10051_v61 = vadd.f32 %v10050_v27, %v10049_v37 }
 0xcc1   :  { %v10052_v54 = vrot.slane %v10051_v61, 1 }
 0xcc3   :  { %v10053_v10 = vadd.f32 %v10052_v54, %v10051_v61 }
 0xcc5   :  { %v10055_v18 = vmul.f32 0.125, %v10053_v10 }
 0xcc7   :  { %v10056_v49 = vsub.f32 %v10041_v42, %v10055_v18  ;;  %v11309_v42 = vld [vmem:[%s20032_s20] ss:$0 sm:$0xff]  ;;  %v20389_v18 = vlaneseq  ;;  %s10369_s20 = sshll.u32 %s13661_s19, 4  ;;  %s10370_s20 = int_to_ptr.vmem [resolvable:$true] %s10369_s20 }
 0xcc8   :  { %p13641_p1 = scmp.lt.s32.totalorder %s10370_s20, %s10370_s20 }
 0xcc9   :  { %v10057_v5 = vmul.f32 %v10056_v49, %v10056_v49 }
 0xccb   :  { %v10058_v11 = vrot.slane %v10057_v5, 4 }
 0xccd   :  { %v10059_v24 = vadd.f32 %v10058_v11, %v10057_v5  ;;  %v11310_v5 = vld [vmem:[%s20034_s22] ss:$0 sm:$0xff]  ;;  %s13636_s22 = scalar_lea.vmem %s10370_s20, 128 }
 0xcce   :  { %p13637_p0 = scmp.ne.s32.totalorder %s10370_s20, %s13636_s22  ;;  %p13642_p2 = scmp.lt.s32.totalorder %s13636_s22, %s13636_s22 }
 0xccf   :  { %v10060_v53 = vrot.slane %v10059_v24, 2 }
 0xcd0   :  { %p13643_p3 = por %p13642_p2, %p13641_p1 }
 0xcd1   :  { %v10061_v28 = vadd.f32 %v10060_v53, %v10059_v24 }
 0xcd2   :  { %p13644_p4 = pnand %p13643_p3, %p13637_p0 }
 0xcd3   :  { %v10062_v1 = vrot.slane %v10061_v28, 1 }
 0xcd5   :  { %v10063_v6 = vadd.f32 %v10062_v1, %v10061_v28 }
 0xcd7   :  { %v10064_v50 = vmul.f32 0.125, %v10063_v6 }
 0xcd9   :  { %v10065_v40 = vadd.f32 1e-05, %v10064_v50 }
 0xcdb   :  { %13346 = vrsqrt.f32 %v10065_v40 }
 0xce8   :  { %v13347_v30 = vpop.eup %13346 }
 0xce9   :  { %v10067_v7 = vmul.f32 %v13347_v30, %v10056_v49  ;;  %v10350_v49 = vand.u32 127, %v20389_v18 }
 0xceb   :  { %v10074_v62 = vmul.f32 %v11297_v31, %v10067_v7  ;;  %vm10351_vm1 = vcmp.lt.s32.totalorder %v10350_v49, 10 }
 0xced   :  { %v10081_v3 = vadd.f32 %v11298_v2, %v10074_v62 }
 0xcef   :  { %v10082_v8 = vmul.f32 0.5, %v10081_v3 }
 0xcf1   :  { %13348 = vtanh.f32 %v10082_v8 }
 0xcfe   :  { %v13349_v17 = vpop.eup %13348 }
 0xcff   :  { %v10084_v56 = vadd.f32 1.0, %v13349_v17 }
 0xd01   :  { %v10085_v26 = vmul.f32 0.5, %v10084_v56 }
 0xd03   :  { %v10086_v13 = vpack.c.bf16 %v10085_v26, %v10085_v26 }
 0xd05   :  { %11888 = vmatmul.mubr.bf16.vlgmr.msra.gmra.mxu1 %v10086_v13 }
 0xdc5   :  { %v10192_v48 = vpop.f32.mrf.mxu1 }
 0xdc6   :  { %v10193_v58 = vadd.f32 %v11299_v52, %v10192_v48 }
 0xdc7   :  { %v11889_v43 = vpop.f32.mrf.mxu1 }
 0xdc8   :  { %v10200_v44 = vrot.slane %v10193_v58, 4 }
 0xdc9   :  { %v10195_v23 = vpop.f32.mrf.mxu1 }
 0xdca   :  { %v10201_v15 = vadd.f32 %v10200_v44, %v10193_v58 }
 0xdcb   :  { %v11890_v0 = vpop.f32.mrf.mxu1 }
 0xdcc   :  { %v10202_v12 = vrot.slane %v10201_v15, 2 }
 0xdce   :  { %v10203_v22 = vadd.f32 %v10202_v12, %v10201_v15 }
 0xdd0   :  { %v10204_v19 = vrot.slane %v10203_v22, 1 }
 0xdd2   :  { %v10205_v47 = vadd.f32 %v10204_v19, %v10203_v22 }
 0xdd4   :  { %v10206_v33 = vmul.f32 0.125, %v10205_v47 }
 0xdd6   :  { %v10207_v34 = vsub.f32 %v10193_v58, %v10206_v33 }
 0xdd8   :  { %v10208_v36 = vmul.f32 %v10207_v34, %v10207_v34 }
 0xdda   :  { %v10209_v59 = vrot.slane %v10208_v36, 4 }
 0xddc   :  { %v10210_v39 = vadd.f32 %v10209_v59, %v10208_v36 }
 0xdde   :  { %v10211_v35 = vrot.slane %v10210_v39, 2 }
 0xde0   :  { %v10212_v60 = vadd.f32 %v10211_v35, %v10210_v39 }
 0xde2   :  { %v10213_v45 = vrot.slane %v10212_v60, 1 }
 0xde4   :  { %v10214_v16 = vadd.f32 %v10213_v45, %v10212_v60 }
 0xde6   :  { %v10215_v9 = vmul.f32 0.125, %v10214_v16 }
 0xde8   :  { %v10216_v57 = vadd.f32 1e-05, %v10215_v9 }
 0xdea   :  { %13350 = vrsqrt.f32 %v10216_v57 }
 0xdf7   :  { %v13351_v29 = vpop.eup %13350 }
 0xdf8   :  { %v10218_v41 = vmul.f32 %v13351_v29, %v10207_v34 }
 0xdfa   :  { %v10225_v20 = vmul.f32 %v11308_v55, %v10218_v41 }
 0xdfc   :  { %v10232_v63 = vadd.f32 %v11309_v42, %v10225_v20 }
 0xdfe   :  { %v10233_v37 = vmul.f32 0.5, %v10232_v63 }
 0xe00   :  { %13352 = vtanh.f32 %v10233_v37 }
 0xe0d   :  { %v13353_v27 = vpop.eup %13352 }
 0xe0e   :  { %v10235_v61 = vadd.f32 1.0, %v13353_v27 }
 0xe10   :  { %v10236_v54 = vmul.f32 0.5, %v10235_v61 }
 0xe12   :  { %v10237_v10 = vpack.c.bf16 %v10236_v54, %v10236_v54 }
 0xe14   :  { %11908 = vmatmul.mubr.bf16.vlgmr.msra.gmra.mxu0 %v10237_v10 }
 0xed4   :  { %v10343_v11 = vpop.f32.mrf.mxu0 }
 0xed5   :  { %v10344_v24 = vadd.f32 %v11310_v5, %v10343_v11 }
 0xed6   :  { %v11909_v53 = vpop.f32.mrf.mxu0 }
 0xed7   :  { %v10352_v28 = vsel %vm10351_vm1, %v10344_v24, -inf }
 0xed8   :  { %10353 = vmax.xlane.f32.xlu0 %v10352_v28  ;;  %v10346_v1 = vpop.f32.mrf.mxu0 }
 0xeda   :  { %v11910_v6 = vpop.f32.mrf.mxu0 }
 0xf61   :  { %v10354_v50 = vpop.xlane.xlu0 %10353 }
 0xf62   :  { %v10355_v40 = vsub.f32 %v10352_v28, %v10354_v50 }
 0xf64   :  { %v10356_v30 = vmul.f32 1.442695, %v10355_v40 }
 0xf66   :  { %13354 = vpow2.f32 %v10356_v30 }
 0xf73   :  { %v13355_v31 = vpop.eup %13354 }
 0xf74   :  { %10358 = vadd.xlane.f32.xlu0 %v13355_v31 }
 0xffd   :  { %v10359_v7 = vpop.xlane.xlu0 %10358 }
 0xffe   :  { %13356 = vrcp.f32 %v10359_v7 }
0x100b   :  { %v13357_v2 = vpop.eup %13356 }
0x100c   :  { %v10361_v62 = vmul.f32 %v13357_v2, %v13355_v31 }
0x100e   :  { %10362 = vst [vmem:[#allocation2] sm:$0xff] %v10361_v62 }
0x100f   :  { %13647 = shalt.err (!%p13644_p4)
}
0x1010   :  { %10372 = dma.vmem_to_hbm [thread:$0]  %s10370_s20, 128, %s20035_s23, [#allocation3]  }
0x1011   :  { %13656 = dma.done.wait [#allocation3], 128  }
0x1012   :  { %13657 = vsyncadd [#allocation3], 4294967168 }
0x1013   :  { %10376 = vsyncpa [#allocation3], 1 }

</bundles_post_ra>
